<compile_context>
chip_gen: v5e
topology: v5e:2x2
jax: 0.10.0
libtpu: 0.0.40
codegen_flags: <defaults>
</compile_context>

<pallas_src>
import numpy as np

import jax
import jax.numpy as jnp
from jax.experimental import pallas as pl
from jax.experimental.pallas import tpu as pltpu

# ---------------------------------------------------------------------------
# Model configuration (matches the PyTorch module).
# ---------------------------------------------------------------------------
H_DIM, Z_DIM = 8 * 2 * 2, 4
IMG = 32
ENC_CFG = [(2, 1), (2, 1), (2, 1), (2, 1)]               # (stride, padding)
DEC_CFG = [(2, 1, 0), (2, 1, 0), (2, 1, 1), (2, 1, 1)]   # (stride, pad, out_pad)
N_ENC, N_DEC = len(ENC_CFG), len(DEC_CFG)

VMEM_SPEC = pl.BlockSpec(memory_space=pltpu.MemorySpace.VMEM)


# ---------------------------------------------------------------------------
# The single fused kernel.
#
# Activation layout inside the kernel (per batch element): 2-D matrix X with
#   X[h, w*C + c] = feature at spatial (h, w), channel c   (channels-last).
# ---------------------------------------------------------------------------
def _vae_fused_kernel(*refs):
    it = iter(refs)
    x_ref, eps_ref = next(it), next(it)
    enc = [(next(it), next(it), next(it)) for _ in range(N_ENC)]
    w12_ref, b12_ref, w3_ref, b3_ref = next(it), next(it), next(it), next(it)
    dec = [(next(it), next(it), next(it)) for _ in range(N_DEC)]
    out_ref, mu_ref, lv_ref = next(it), next(it), next(it)

    B = x_ref.shape[0]
    zd = mu_ref.shape[1]

    def conv_block(X, s_ref, g_ref, brow_ref):
        # y = sum_i S_i @ X @ G_i + bias_row  — plain 2-D MXU matmuls only.
        acc = None
        for i in range(s_ref.shape[0]):                      # unrolled kernel rows
            t = jnp.dot(s_ref[i], X, preferred_element_type=jnp.float32)
            r = jnp.dot(t, g_ref[i], preferred_element_type=jnp.float32)
            acc = r if acc is None else acc + r
        return acc + brow_ref[...]

    for b in range(B):                                       # B is small & static
        X = x_ref[b]                                         # (H, W), Cin == 1

        # ----- encoder: 4 x (conv + relu); all spatial handling is in S/G -----
        for s_ref, g_ref, brow_ref in enc:
            X = jnp.maximum(conv_block(X, s_ref, g_ref, brow_ref), 0.0)
        # X: (2, 16) == (h, w*c) -> flattened h_dim = 32 features

        # ----- bottleneck: fc1+fc2 fused into one matmul, reparameterize -----
        stats = b12_ref[...]                                 # (1, 2*Z)
        for h in range(X.shape[0]):
            stats = stats + jnp.dot(X[h:h + 1, :], w12_ref[h],
                                    preferred_element_type=jnp.float32)
        mu = stats[:, :zd]                                   # (1, Z)
        logvar = stats[:, zd:]                               # (1, Z)
        z = mu + jnp.exp(0.5 * logvar) * eps_ref[pl.ds(b, 1), :]
        mu_ref[pl.ds(b, 1), :] = mu
        lv_ref[pl.ds(b, 1), :] = logvar

        # ----- fc3 -> decoder input rows (2, 16), no reshape needed -----
        rows = [jnp.dot(z, w3_ref[h], preferred_element_type=jnp.float32)
                + b3_ref[h] for h in range(w3_ref.shape[0])]
        X = jnp.concatenate(rows, axis=0)                    # (2, 16)

        # ----- decoder: 3 x (convT + relu) + (convT + sigmoid) -----
        for li, (s_ref, g_ref, brow_ref) in enumerate(dec):
            Y = conv_block(X, s_ref, g_ref, brow_ref)
            if li + 1 < N_DEC:
                X = jnp.maximum(Y, 0.0)
            else:
                X = 0.5 * (jnp.tanh(0.5 * Y) + 1.0)          # sigmoid via tanh (EUP)

        out_ref[b] = X                                       # (32, 32), Cout == 1


# ---------------------------------------------------------------------------
# Host-side (one-time) repacking of PyTorch-convention weights into the
# (S_i, G_i, bias_row) form consumed by the kernel.
# ---------------------------------------------------------------------------
def _conv_sg(K, b, H, W, stride, padding):
    """Conv2d weight K:(Cout,Cin,kh,kw), bias b:(Cout,) -> (S, G, brow, OH, OW)."""
    K = np.asarray(K, np.float32)
    b = np.asarray(b, np.float32)
    Cout, Cin, kh, kw = K.shape
    OH = (H + 2 * padding - kh) // stride + 1
    OW = (W + 2 * padding - kw) // stride + 1
    S = np.zeros((kh, OH, H), np.float32)
    G = np.zeros((kh, W * Cin, OW * Cout), np.float32)
    oh = np.arange(OH)
    w = np.arange(W)[:, None]
    ow = np.arange(OW)[None, :]
    for i in range(kh):
        h = stride * oh + i - padding
        ok = (h >= 0) & (h < H)
        S[i, oh[ok], h[ok]] = 1.0
        j = w - stride * ow + padding                        # (W, OW)
        ok_j = (j >= 0) & (j < kw)
        Ki = K[:, :, i, :]                                   # (Cout, Cin, kw)
        Ki = Ki[:, :, np.clip(j, 0, kw - 1)]                 # (Cout, Cin, W, OW)
        Ki = np.where(ok_j[None, None], Ki, 0.0)
        G[i] = np.transpose(Ki, (2, 1, 3, 0)).reshape(W * Cin, OW * Cout)
    brow = np.tile(b, OW)[None, :]                           # (1, OW*Cout)
    return S, G, brow, OH, OW


def _convT_sg(Wt, b, H, W, stride, padding, output_padding):
    """ConvTranspose2d weight Wt:(Cin,Cout,kh,kw), bias b:(Cout,)."""
    Wt = np.asarray(Wt, np.float32)
    b = np.asarray(b, np.float32)
    Cin, Cout, kh, kw = Wt.shape
    OH = (H - 1) * stride - 2 * padding + kh + output_padding
    OW = (W - 1) * stride - 2 * padding + kw + output_padding
    S = np.zeros((kh, OH, H), np.float32)
    G = np.zeros((kh, W * Cin, OW * Cout), np.float32)
    h = np.arange(H)
    w = np.arange(W)[:, None]
    ow = np.arange(OW)[None, :]
    for i in range(kh):
        oh = stride * h + i - padding
        ok = (oh >= 0) & (oh < OH)
        S[i, oh[ok], h[ok]] = 1.0
        j = ow + padding - stride * w                        # (W, OW)
        ok_j = (j >= 0) & (j < kw)
        Wi = Wt[:, :, i, :]                                  # (Cin, Cout, kw)
        Wi = Wi[:, :, np.clip(j, 0, kw - 1)]                 # (Cin, Cout, W, OW)
        Wi = np.where(ok_j[None, None], Wi, 0.0)
        G[i] = np.transpose(Wi, (2, 0, 3, 1)).reshape(W * Cin, OW * Cout)
    brow = np.tile(b, OW)[None, :]
    return S, G, brow, OH, OW


def prepare_params(params):
    """One-time repack of PyTorch-convention parameters for the fused kernel."""
    packed = {"enc": [], "dec": []}
    h, w = IMG, IMG
    for (K, b), (s, p) in zip(params["enc"], ENC_CFG):
        S, G, brow, h, w = _conv_sg(K, b, h, w, s, p)
        packed["enc"].append((jnp.asarray(S), jnp.asarray(G), jnp.asarray(brow)))

    # Encoder output: (h, w) = (2, 2) with 8 channels -> h_dim = 32.
    C_h, HH, WW = 8, 2, 2

    def perm_fc_in(wm):
        # PyTorch Linear weight (z, 32), in-index = c*4 + h*2 + w
        # -> (h, w*C + c, z) to match the kernel's channels-last rows.
        wm = np.asarray(wm, np.float32).reshape(-1, C_h, HH, WW)   # (z, c, h, w)
        return np.transpose(wm, (2, 3, 1, 0)).reshape(HH, WW * C_h, -1)

    w12 = np.concatenate([perm_fc_in(params["fc1"][0]),
                          perm_fc_in(params["fc2"][0])], axis=-1)   # (2, 16, 2Z)
    b12 = np.concatenate([np.asarray(params["fc1"][1], np.float32),
                          np.asarray(params["fc2"][1], np.float32)])[None, :]

    # fc3 (32, 4): out-index = c*4 + h*2 + w (Unflatten to (8,2,2)).
    w3 = np.asarray(params["fc3"][0], np.float32).reshape(C_h, HH, WW, Z_DIM)
    w3 = np.transpose(w3, (1, 3, 2, 0)).reshape(HH, Z_DIM, WW * C_h)  # (h, z, w*C+c)
    b3 = np.asarray(params["fc3"][1], np.float32).reshape(C_h, HH, WW)
    b3 = np.transpose(b3, (1, 2, 0)).reshape(HH, 1, WW * C_h)

    packed["w12"] = jnp.asarray(w12)
    packed["b12"] = jnp.asarray(b12)
    packed["w3"] = jnp.asarray(w3)
    packed["b3"] = jnp.asarray(b3)

    for (Wt, b), (s, p, op) in zip(params["dec"], DEC_CFG):
        S, G, brow, h, w = _convT_sg(Wt, b, h, w, s, p, op)
        packed["dec"].append((jnp.asarray(S), jnp.asarray(G), jnp.asarray(brow)))
    return packed


# ---------------------------------------------------------------------------
# Forward pass: a single pallas_call.
# ---------------------------------------------------------------------------
def vae_forward(packed, x, eps):
    """x: (B, 1, 32, 32) NCHW float32; eps: (B, Z_DIM) float32."""
    B, Cin, H, W = x.shape
    assert Cin == 1 and H == IMG and W == IMG
    x2d = x.reshape(B, H, W)            # Cin == 1 -> metadata-only squeeze

    args = [x2d, eps]
    for trip in packed["enc"]:
        args.extend(trip)
    args.extend([packed["w12"], packed["b12"], packed["w3"], packed["b3"]])
    for trip in packed["dec"]:
        args.extend(trip)

    recon, mu, logvar = pl.pallas_call(
        _vae_fused_kernel,
        out_shape=(jax.ShapeDtypeStruct((B, H, W), jnp.float32),
                   jax.ShapeDtypeStruct((B, Z_DIM), jnp.float32),
                   jax.ShapeDtypeStruct((B, Z_DIM), jnp.float32)),
        in_specs=[VMEM_SPEC] * len(args),
        out_specs=(VMEM_SPEC,) * 3,
    )(*args)
    return recon.reshape(B, 1, H, W), mu, logvar


# ---------------------------------------------------------------------------
# Parameters (PyTorch conventions) and a pure-JAX reference for validation.
# ---------------------------------------------------------------------------
def init_params(key):
    keys = jax.random.split(key, 22)
    w = lambda k, s: 0.1 * jax.random.normal(k, s, dtype=jnp.float32)
    return {
        "enc": [  # Conv2d: weight (Cout, Cin, kh, kw), bias (Cout,)
            (w(keys[0], (16, 1, 3, 3)), w(keys[1], (16,))),
            (w(keys[2], (32, 16, 3, 3)), w(keys[3], (32,))),
            (w(keys[4], (16, 32, 8, 8)), w(keys[5], (16,))),
            (w(keys[6], (8, 16, 2, 2)), w(keys[7], (8,))),
        ],
        "fc1": (w(keys[8], (Z_DIM, H_DIM)), w(keys[9], (Z_DIM,))),    # (out, in)
        "fc2": (w(keys[10], (Z_DIM, H_DIM)), w(keys[11], (Z_DIM,))),
        "fc3": (w(keys[12], (H_DIM, Z_DIM)), w(keys[13], (H_DIM,))),
        "dec": [  # ConvTranspose2d: weight (Cin, Cout, kh, kw), bias (Cout,)
            (w(keys[14], (8, 16, 2, 2)), w(keys[15], (16,))),
            (w(keys[16], (16, 32, 8, 8)), w(keys[17], (32,))),
            (w(keys[18], (32, 16, 3, 3)), w(keys[19], (16,))),
            (w(keys[20], (16, 1, 3, 3)), w(keys[21], (1,))),
        ],
    }


def _ref_conv2d(x, K, b, stride, padding):
    y = jax.lax.conv_general_dilated(
        x, K, window_strides=(stride, stride),
        padding=((padding, padding), (padding, padding)),
        dimension_numbers=("NCHW", "OIHW", "NCHW"),
        precision=jax.lax.Precision.HIGHEST)
    return y + b.reshape(1, -1, 1, 1)


def _ref_convT2d(x, Wt, b, stride, padding, output_padding):
    kh, kw = Wt.shape[2], Wt.shape[3]
    K = jnp.flip(Wt, (2, 3)).transpose(1, 0, 2, 3)           # (Cout, Cin, kh, kw)
    y = jax.lax.conv_general_dilated(
        x, K, window_strides=(1, 1),
        padding=((kh - 1 - padding, kh - 1 - padding + output_padding),
                 (kw - 1 - padding, kw - 1 - padding + output_padding)),
        lhs_dilation=(stride, stride),
        dimension_numbers=("NCHW", "OIHW", "NCHW"),
        precision=jax.lax.Precision.HIGHEST)
    return y + b.reshape(1, -1, 1, 1)


def vae_reference(params, x, eps):
    """Pure-JAX (XLA) forward with PyTorch semantics, used only for validation."""
    hi = jax.lax.Precision.HIGHEST
    h = x
    for (K, b), (s, p) in zip(params["enc"], ENC_CFG):
        h = jax.nn.relu(_ref_conv2d(h, K, b, s, p))
    B = x.shape[0]
    hf = h.reshape(B, -1)                                    # Flatten(1,-1): (c,h,w)
    mu = jnp.dot(hf, params["fc1"][0].T, precision=hi) + params["fc1"][1]
    logvar = jnp.dot(hf, params["fc2"][0].T, precision=hi) + params["fc2"][1]
    z = mu + jnp.exp(0.5 * logvar) * eps
    d = jnp.dot(z, params["fc3"][0].T, precision=hi) + params["fc3"][1]
    d = d.reshape(B, 8, 2, 2)                                # Unflatten(1, (8,2,2))
    for li, ((Wt, b), (s, p, op)) in enumerate(zip(params["dec"], DEC_CFG)):
        d = _ref_convT2d(d, Wt, b, s, p, op)
        d = jax.nn.sigmoid(d) if li == N_DEC - 1 else jax.nn.relu(d)
    return d, mu, logvar


if __name__ == "__main__":
    key = jax.random.PRNGKey(0)
    pkey, xkey, ekey = jax.random.split(key, 3)
    params = init_params(pkey)
    packed = prepare_params(params)      # one-time, host-side weight repacking

    x = jax.random.normal(xkey, (2, 1, IMG, IMG), dtype=jnp.float32)   # NCHW
    eps = jax.random.normal(ekey, (2, Z_DIM), dtype=jnp.float32)       # replaces torch.randn

    recon, mu, logvar = jax.jit(vae_forward)(packed, x, eps)
    jax.block_until_ready((recon, mu, logvar))

    assert recon.shape == (2, 1, IMG, IMG)
    assert mu.shape == (2, Z_DIM) and logvar.shape == (2, Z_DIM)
    assert bool(jnp.all(recon >= 0.0) & jnp.all(recon <= 1.0))

    # Validate the fused kernel against a pure-JAX reference of the module.
    ref_recon, ref_mu, ref_logvar = jax.jit(vae_reference)(params, x, eps)
    assert float(jnp.max(jnp.abs(recon - ref_recon))) < 1e-2
    assert float(jnp.max(jnp.abs(mu - ref_mu))) < 1e-2
    assert float(jnp.max(jnp.abs(logvar - ref_logvar))) < 1e-2

    print("KERNEL_OK")
</pallas_src>

<mosaic_0001>
module attributes {stable_mosaic.version = 11 : i64} {
  func.func @_vae_fused_kernel(%arg0: memref<2x32x32xf32, #tpu.memory_space<vmem>>, %arg1: memref<2x4xf32, #tpu.memory_space<vmem>>, %arg2: memref<3x16x32xf32, #tpu.memory_space<vmem>>, %arg3: memref<3x32x256xf32, #tpu.memory_space<vmem>>, %arg4: memref<1x256xf32, #tpu.memory_space<vmem>>, %arg5: memref<3x8x16xf32, #tpu.memory_space<vmem>>, %arg6: memref<3x256x256xf32, #tpu.memory_space<vmem>>, %arg7: memref<1x256xf32, #tpu.memory_space<vmem>>, %arg8: memref<8x2x8xf32, #tpu.memory_space<vmem>>, %arg9: memref<8x256x32xf32, #tpu.memory_space<vmem>>, %arg10: memref<1x32xf32, #tpu.memory_space<vmem>>, %arg11: memref<2x2x2xf32, #tpu.memory_space<vmem>>, %arg12: memref<2x32x16xf32, #tpu.memory_space<vmem>>, %arg13: memref<1x16xf32, #tpu.memory_space<vmem>>, %arg14: memref<2x16x8xf32, #tpu.memory_space<vmem>>, %arg15: memref<1x8xf32, #tpu.memory_space<vmem>>, %arg16: memref<2x4x16xf32, #tpu.memory_space<vmem>>, %arg17: memref<2x1x16xf32, #tpu.memory_space<vmem>>, %arg18: memref<2x2x2xf32, #tpu.memory_space<vmem>>, %arg19: memref<2x16x32xf32, #tpu.memory_space<vmem>>, %arg20: memref<1x32xf32, #tpu.memory_space<vmem>>, %arg21: memref<8x8x2xf32, #tpu.memory_space<vmem>>, %arg22: memref<8x32x256xf32, #tpu.memory_space<vmem>>, %arg23: memref<1x256xf32, #tpu.memory_space<vmem>>, %arg24: memref<3x16x8xf32, #tpu.memory_space<vmem>>, %arg25: memref<3x256x256xf32, #tpu.memory_space<vmem>>, %arg26: memref<1x256xf32, #tpu.memory_space<vmem>>, %arg27: memref<3x32x16xf32, #tpu.memory_space<vmem>>, %arg28: memref<3x256x32xf32, #tpu.memory_space<vmem>>, %arg29: memref<1x32xf32, #tpu.memory_space<vmem>>, %arg30: memref<2x32x32xf32, #tpu.memory_space<vmem>>, %arg31: memref<2x4xf32, #tpu.memory_space<vmem>>, %arg32: memref<2x4xf32, #tpu.memory_space<vmem>>) attributes {dimension_semantics = [], scalar_prefetch = 0 : i64, scratch_operands = 0 : i64, tpu.core_type = #tpu.core_type<tc>} {
    %c0 = arith.constant 0 : index
    %c0_0 = arith.constant 0 : index
    %c0_1 = arith.constant 0 : index
    %0 = vector.load %arg0[%c0, %c0_0, %c0_1] : memref<2x32x32xf32, #tpu.memory_space<vmem>>, vector<1x32x32xf32>
    %1 = vector.shape_cast %0 : vector<1x32x32xf32> to vector<32x32xf32>
    %c0_2 = arith.constant 0 : index
    %c0_3 = arith.constant 0 : index
    %c0_4 = arith.constant 0 : index
    %2 = vector.load %arg2[%c0_2, %c0_3, %c0_4] : memref<3x16x32xf32, #tpu.memory_space<vmem>>, vector<1x16x32xf32>
    %3 = vector.shape_cast %2 : vector<1x16x32xf32> to vector<16x32xf32>
    %cst = arith.constant dense<0.000000e+00> : vector<16x32xf32>
    %4 = tpu.matmul %3, %1, %cst {dimension_numbers = #tpu.dot_dimension_numbers<[1], [0], [0], [1], [0, 0, 1, 1], [], []>} : vector<16x32xf32>, vector<32x32xf32>, vector<16x32xf32> -> vector<16x32xf32>
    %c0_5 = arith.constant 0 : index
    %c0_6 = arith.constant 0 : index
    %c0_7 = arith.constant 0 : index
    %5 = vector.load %arg3[%c0_5, %c0_6, %c0_7] : memref<3x32x256xf32, #tpu.memory_space<vmem>>, vector<1x32x256xf32>
    %6 = vector.shape_cast %5 : vector<1x32x256xf32> to vector<32x256xf32>
    %cst_8 = arith.constant dense<0.000000e+00> : vector<16x256xf32>
    %7 = tpu.matmul %4, %6, %cst_8 {dimension_numbers = #tpu.dot_dimension_numbers<[1], [0], [0], [1], [0, 0, 1, 1], [], []>} : vector<16x32xf32>, vector<32x256xf32>, vector<16x256xf32> -> vector<16x256xf32>
    %c1 = arith.constant 1 : index
    %c0_9 = arith.constant 0 : index
    %c0_10 = arith.constant 0 : index
    %8 = vector.load %arg2[%c1, %c0_9, %c0_10] : memref<3x16x32xf32, #tpu.memory_space<vmem>>, vector<1x16x32xf32>
    %9 = vector.shape_cast %8 : vector<1x16x32xf32> to vector<16x32xf32>
    %cst_11 = arith.constant dense<0.000000e+00> : vector<16x32xf32>
    %10 = tpu.matmul %9, %1, %cst_11 {dimension_numbers = #tpu.dot_dimension_numbers<[1], [0], [0], [1], [0, 0, 1, 1], [], []>} : vector<16x32xf32>, vector<32x32xf32>, vector<16x32xf32> -> vector<16x32xf32>
    %c1_12 = arith.constant 1 : index
    %c0_13 = arith.constant 0 : index
    %c0_14 = arith.constant 0 : index
    %11 = vector.load %arg3[%c1_12, %c0_13, %c0_14] : memref<3x32x256xf32, #tpu.memory_space<vmem>>, vector<1x32x256xf32>
    %12 = vector.shape_cast %11 : vector<1x32x256xf32> to vector<32x256xf32>
    %cst_15 = arith.constant dense<0.000000e+00> : vector<16x256xf32>
    %13 = tpu.matmul %10, %12, %cst_15 {dimension_numbers = #tpu.dot_dimension_numbers<[1], [0], [0], [1], [0, 0, 1, 1], [], []>} : vector<16x32xf32>, vector<32x256xf32>, vector<16x256xf32> -> vector<16x256xf32>
    %14 = arith.addf %7, %13 : vector<16x256xf32>
    %c2 = arith.constant 2 : index
    %c0_16 = arith.constant 0 : index
    %c0_17 = arith.constant 0 : index
    %15 = vector.load %arg2[%c2, %c0_16, %c0_17] : memref<3x16x32xf32, #tpu.memory_space<vmem>>, vector<1x16x32xf32>
    %16 = vector.shape_cast %15 : vector<1x16x32xf32> to vector<16x32xf32>
    %cst_18 = arith.constant dense<0.000000e+00> : vector<16x32xf32>
    %17 = tpu.matmul %16, %1, %cst_18 {dimension_numbers = #tpu.dot_dimension_numbers<[1], [0], [0], [1], [0, 0, 1, 1], [], []>} : vector<16x32xf32>, vector<32x32xf32>, vector<16x32xf32> -> vector<16x32xf32>
    %c2_19 = arith.constant 2 : index
    %c0_20 = arith.constant 0 : index
    %c0_21 = arith.constant 0 : index
    %18 = vector.load %arg3[%c2_19, %c0_20, %c0_21] : memref<3x32x256xf32, #tpu.memory_space<vmem>>, vector<1x32x256xf32>
    %19 = vector.shape_cast %18 : vector<1x32x256xf32> to vector<32x256xf32>
    %cst_22 = arith.constant dense<0.000000e+00> : vector<16x256xf32>
    %20 = tpu.matmul %17, %19, %cst_22 {dimension_numbers = #tpu.dot_dimension_numbers<[1], [0], [0], [1], [0, 0, 1, 1], [], []>} : vector<16x32xf32>, vector<32x256xf32>, vector<16x256xf32> -> vector<16x256xf32>
    %21 = arith.addf %14, %20 : vector<16x256xf32>
    %c0_23 = arith.constant 0 : index
    %c0_24 = arith.constant 0 : index
    %22 = vector.load %arg4[%c0_23, %c0_24] : memref<1x256xf32, #tpu.memory_space<vmem>>, vector<1x256xf32>
    %23 = vector.broadcast %22 : vector<1x256xf32> to vector<16x256xf32>
    %24 = arith.addf %21, %23 : vector<16x256xf32>
    %cst_25 = arith.constant 0.000000e+00 : f32
    %25 = vector.broadcast %cst_25 : f32 to vector<16x256xf32>
    %26 = arith.maximumf %24, %25 : vector<16x256xf32>
    %c0_26 = arith.constant 0 : index
    %c0_27 = arith.constant 0 : index
    %c0_28 = arith.constant 0 : index
    %27 = vector.load %arg5[%c0_26, %c0_27, %c0_28] : memref<3x8x16xf32, #tpu.memory_space<vmem>>, vector<1x8x16xf32>
    %28 = vector.shape_cast %27 : vector<1x8x16xf32> to vector<8x16xf32>
    %cst_29 = arith.constant dense<0.000000e+00> : vector<8x256xf32>
    %29 = tpu.matmul %28, %26, %cst_29 {dimension_numbers = #tpu.dot_dimension_numbers<[1], [0], [0], [1], [0, 0, 1, 1], [], []>} : vector<8x16xf32>, vector<16x256xf32>, vector<8x256xf32> -> vector<8x256xf32>
    %c0_30 = arith.constant 0 : index
    %c0_31 = arith.constant 0 : index
    %c0_32 = arith.constant 0 : index
    %30 = vector.load %arg6[%c0_30, %c0_31, %c0_32] : memref<3x256x256xf32, #tpu.memory_space<vmem>>, vector<1x256x256xf32>
    %31 = vector.shape_cast %30 : vector<1x256x256xf32> to vector<256x256xf32>
    %cst_33 = arith.constant dense<0.000000e+00> : vector<8x256xf32>
    %32 = tpu.matmul %29, %31, %cst_33 {dimension_numbers = #tpu.dot_dimension_numbers<[1], [0], [0], [1], [0, 0, 1, 1], [], []>} : vector<8x256xf32>, vector<256x256xf32>, vector<8x256xf32> -> vector<8x256xf32>
    %c1_34 = arith.constant 1 : index
    %c0_35 = arith.constant 0 : index
    %c0_36 = arith.constant 0 : index
    %33 = vector.load %arg5[%c1_34, %c0_35, %c0_36] : memref<3x8x16xf32, #tpu.memory_space<vmem>>, vector<1x8x16xf32>
    %34 = vector.shape_cast %33 : vector<1x8x16xf32> to vector<8x16xf32>
    %cst_37 = arith.constant dense<0.000000e+00> : vector<8x256xf32>
    %35 = tpu.matmul %34, %26, %cst_37 {dimension_numbers = #tpu.dot_dimension_numbers<[1], [0], [0], [1], [0, 0, 1, 1], [], []>} : vector<8x16xf32>, vector<16x256xf32>, vector<8x256xf32> -> vector<8x256xf32>
    %c1_38 = arith.constant 1 : index
    %c0_39 = arith.constant 0 : index
    %c0_40 = arith.constant 0 : index
    %36 = vector.load %arg6[%c1_38, %c0_39, %c0_40] : memref<3x256x256xf32, #tpu.memory_space<vmem>>, vector<1x256x256xf32>
    %37 = vector.shape_cast %36 : vector<1x256x256xf32> to vector<256x256xf32>
    %cst_41 = arith.constant dense<0.000000e+00> : vector<8x256xf32>
    %38 = tpu.matmul %35, %37, %cst_41 {dimension_numbers = #tpu.dot_dimension_numbers<[1], [0], [0], [1], [0, 0, 1, 1], [], []>} : vector<8x256xf32>, vector<256x256xf32>, vector<8x256xf32> -> vector<8x256xf32>
    %39 = arith.addf %32, %38 : vector<8x256xf32>
    %c2_42 = arith.constant 2 : index
    %c0_43 = arith.constant 0 : index
    %c0_44 = arith.constant 0 : index
    %40 = vector.load %arg5[%c2_42, %c0_43, %c0_44] : memref<3x8x16xf32, #tpu.memory_space<vmem>>, vector<1x8x16xf32>
    %41 = vector.shape_cast %40 : vector<1x8x16xf32> to vector<8x16xf32>
    %cst_45 = arith.constant dense<0.000000e+00> : vector<8x256xf32>
    %42 = tpu.matmul %41, %26, %cst_45 {dimension_numbers = #tpu.dot_dimension_numbers<[1], [0], [0], [1], [0, 0, 1, 1], [], []>} : vector<8x16xf32>, vector<16x256xf32>, vector<8x256xf32> -> vector<8x256xf32>
    %c2_46 = arith.constant 2 : index
    %c0_47 = arith.constant 0 : index
    %c0_48 = arith.constant 0 : index
    %43 = vector.load %arg6[%c2_46, %c0_47, %c0_48] : memref<3x256x256xf32, #tpu.memory_space<vmem>>, vector<1x256x256xf32>
    %44 = vector.shape_cast %43 : vector<1x256x256xf32> to vector<256x256xf32>
    %cst_49 = arith.constant dense<0.000000e+00> : vector<8x256xf32>
    %45 = tpu.matmul %42, %44, %cst_49 {dimension_numbers = #tpu.dot_dimension_numbers<[1], [0], [0], [1], [0, 0, 1, 1], [], []>} : vector<8x256xf32>, vector<256x256xf32>, vector<8x256xf32> -> vector<8x256xf32>
    %46 = arith.addf %39, %45 : vector<8x256xf32>
    %c0_50 = arith.constant 0 : index
    %c0_51 = arith.constant 0 : index
    %47 = vector.load %arg7[%c0_50, %c0_51] : memref<1x256xf32, #tpu.memory_space<vmem>>, vector<1x256xf32>
    %48 = vector.broadcast %47 : vector<1x256xf32> to vector<8x256xf32>
    %49 = arith.addf %46, %48 : vector<8x256xf32>
    %cst_52 = arith.constant 0.000000e+00 : f32
    %50 = vector.broadcast %cst_52 : f32 to vector<8x256xf32>
    %51 = arith.maximumf %49, %50 : vector<8x256xf32>
    %c0_53 = arith.constant 0 : index
    %c0_54 = arith.constant 0 : index
    %c0_55 = arith.constant 0 : index
    %52 = vector.load %arg8[%c0_53, %c0_54, %c0_55] : memref<8x2x8xf32, #tpu.memory_space<vmem>>, vector<1x2x8xf32>
    %53 = vector.shape_cast %52 : vector<1x2x8xf32> to vector<2x8xf32>
    %cst_56 = arith.constant dense<0.000000e+00> : vector<2x256xf32>
    %54 = tpu.matmul %53, %51, %cst_56 {dimension_numbers = #tpu.dot_dimension_numbers<[1], [0], [0], [1], [0, 0, 1, 1], [], []>} : vector<2x8xf32>, vector<8x256xf32>, vector<2x256xf32> -> vector<2x256xf32>
    %c0_57 = arith.constant 0 : index
    %c0_58 = arith.constant 0 : index
    %c0_59 = arith.constant 0 : index
    %55 = vector.load %arg9[%c0_57, %c0_58, %c0_59] : memref<8x256x32xf32, #tpu.memory_space<vmem>>, vector<1x256x32xf32>
    %56 = vector.shape_cast %55 : vector<1x256x32xf32> to vector<256x32xf32>
    %cst_60 = arith.constant dense<0.000000e+00> : vector<2x32xf32>
    %57 = tpu.matmul %54, %56, %cst_60 {dimension_numbers = #tpu.dot_dimension_numbers<[1], [0], [0], [1], [0, 0, 1, 1], [], []>} : vector<2x256xf32>, vector<256x32xf32>, vector<2x32xf32> -> vector<2x32xf32>
    %c1_61 = arith.constant 1 : index
    %c0_62 = arith.constant 0 : index
    %c0_63 = arith.constant 0 : index
    %58 = vector.load %arg8[%c1_61, %c0_62, %c0_63] : memref<8x2x8xf32, #tpu.memory_space<vmem>>, vector<1x2x8xf32>
    %59 = vector.shape_cast %58 : vector<1x2x8xf32> to vector<2x8xf32>
    %cst_64 = arith.constant dense<0.000000e+00> : vector<2x256xf32>
    %60 = tpu.matmul %59, %51, %cst_64 {dimension_numbers = #tpu.dot_dimension_numbers<[1], [0], [0], [1], [0, 0, 1, 1], [], []>} : vector<2x8xf32>, vector<8x256xf32>, vector<2x256xf32> -> vector<2x256xf32>
    %c1_65 = arith.constant 1 : index
    %c0_66 = arith.constant 0 : index
    %c0_67 = arith.constant 0 : index
    %61 = vector.load %arg9[%c1_65, %c0_66, %c0_67] : memref<8x256x32xf32, #tpu.memory_space<vmem>>, vector<1x256x32xf32>
    %62 = vector.shape_cast %61 : vector<1x256x32xf32> to vector<256x32xf32>
    %cst_68 = arith.constant dense<0.000000e+00> : vector<2x32xf32>
    %63 = tpu.matmul %60, %62, %cst_68 {dimension_numbers = #tpu.dot_dimension_numbers<[1], [0], [0], [1], [0, 0, 1, 1], [], []>} : vector<2x256xf32>, vector<256x32xf32>, vector<2x32xf32> -> vector<2x32xf32>
    %64 = arith.addf %57, %63 : vector<2x32xf32>
    %c2_69 = arith.constant 2 : index
    %c0_70 = arith.constant 0 : index
    %c0_71 = arith.constant 0 : index
    %65 = vector.load %arg8[%c2_69, %c0_70, %c0_71] : memref<8x2x8xf32, #tpu.memory_space<vmem>>, vector<1x2x8xf32>
    %66 = vector.shape_cast %65 : vector<1x2x8xf32> to vector<2x8xf32>
    %cst_72 = arith.constant dense<0.000000e+00> : vector<2x256xf32>
    %67 = tpu.matmul %66, %51, %cst_72 {dimension_numbers = #tpu.dot_dimension_numbers<[1], [0], [0], [1], [0, 0, 1, 1], [], []>} : vector<2x8xf32>, vector<8x256xf32>, vector<2x256xf32> -> vector<2x256xf32>
    %c2_73 = arith.constant 2 : index
    %c0_74 = arith.constant 0 : index
    %c0_75 = arith.constant 0 : index
    %68 = vector.load %arg9[%c2_73, %c0_74, %c0_75] : memref<8x256x32xf32, #tpu.memory_space<vmem>>, vector<1x256x32xf32>
    %69 = vector.shape_cast %68 : vector<1x256x32xf32> to vector<256x32xf32>
    %cst_76 = arith.constant dense<0.000000e+00> : vector<2x32xf32>
    %70 = tpu.matmul %67, %69, %cst_76 {dimension_numbers = #tpu.dot_dimension_numbers<[1], [0], [0], [1], [0, 0, 1, 1], [], []>} : vector<2x256xf32>, vector<256x32xf32>, vector<2x32xf32> -> vector<2x32xf32>
    %71 = arith.addf %64, %70 : vector<2x32xf32>
    %c3 = arith.constant 3 : index
    %c0_77 = arith.constant 0 : index
    %c0_78 = arith.constant 0 : index
    %72 = vector.load %arg8[%c3, %c0_77, %c0_78] : memref<8x2x8xf32, #tpu.memory_space<vmem>>, vector<1x2x8xf32>
    %73 = vector.shape_cast %72 : vector<1x2x8xf32> to vector<2x8xf32>
    %cst_79 = arith.constant dense<0.000000e+00> : vector<2x256xf32>
    %74 = tpu.matmul %73, %51, %cst_79 {dimension_numbers = #tpu.dot_dimension_numbers<[1], [0], [0], [1], [0, 0, 1, 1], [], []>} : vector<2x8xf32>, vector<8x256xf32>, vector<2x256xf32> -> vector<2x256xf32>
    %c3_80 = arith.constant 3 : index
    %c0_81 = arith.constant 0 : index
    %c0_82 = arith.constant 0 : index
    %75 = vector.load %arg9[%c3_80, %c0_81, %c0_82] : memref<8x256x32xf32, #tpu.memory_space<vmem>>, vector<1x256x32xf32>
    %76 = vector.shape_cast %75 : vector<1x256x32xf32> to vector<256x32xf32>
    %cst_83 = arith.constant dense<0.000000e+00> : vector<2x32xf32>
    %77 = tpu.matmul %74, %76, %cst_83 {dimension_numbers = #tpu.dot_dimension_numbers<[1], [0], [0], [1], [0, 0, 1, 1], [], []>} : vector<2x256xf32>, vector<256x32xf32>, vector<2x32xf32> -> vector<2x32xf32>
    %78 = arith.addf %71, %77 : vector<2x32xf32>
    %c4 = arith.constant 4 : index
    %c0_84 = arith.constant 0 : index
    %c0_85 = arith.constant 0 : index
    %79 = vector.load %arg8[%c4, %c0_84, %c0_85] : memref<8x2x8xf32, #tpu.memory_space<vmem>>, vector<1x2x8xf32>
    %80 = vector.shape_cast %79 : vector<1x2x8xf32> to vector<2x8xf32>
    %cst_86 = arith.constant dense<0.000000e+00> : vector<2x256xf32>
    %81 = tpu.matmul %80, %51, %cst_86 {dimension_numbers = #tpu.dot_dimension_numbers<[1], [0], [0], [1], [0, 0, 1, 1], [], []>} : vector<2x8xf32>, vector<8x256xf32>, vector<2x256xf32> -> vector<2x256xf32>
    %c4_87 = arith.constant 4 : index
    %c0_88 = arith.constant 0 : index
    %c0_89 = arith.constant 0 : index
    %82 = vector.load %arg9[%c4_87, %c0_88, %c0_89] : memref<8x256x32xf32, #tpu.memory_space<vmem>>, vector<1x256x32xf32>
    %83 = vector.shape_cast %82 : vector<1x256x32xf32> to vector<256x32xf32>
    %cst_90 = arith.constant dense<0.000000e+00> : vector<2x32xf32>
    %84 = tpu.matmul %81, %83, %cst_90 {dimension_numbers = #tpu.dot_dimension_numbers<[1], [0], [0], [1], [0, 0, 1, 1], [], []>} : vector<2x256xf32>, vector<256x32xf32>, vector<2x32xf32> -> vector<2x32xf32>
    %85 = arith.addf %78, %84 : vector<2x32xf32>
    %c5 = arith.constant 5 : index
    %c0_91 = arith.constant 0 : index
    %c0_92 = arith.constant 0 : index
    %86 = vector.load %arg8[%c5, %c0_91, %c0_92] : memref<8x2x8xf32, #tpu.memory_space<vmem>>, vector<1x2x8xf32>
    %87 = vector.shape_cast %86 : vector<1x2x8xf32> to vector<2x8xf32>
    %cst_93 = arith.constant dense<0.000000e+00> : vector<2x256xf32>
    %88 = tpu.matmul %87, %51, %cst_93 {dimension_numbers = #tpu.dot_dimension_numbers<[1], [0], [0], [1], [0, 0, 1, 1], [], []>} : vector<2x8xf32>, vector<8x256xf32>, vector<2x256xf32> -> vector<2x256xf32>
    %c5_94 = arith.constant 5 : index
    %c0_95 = arith.constant 0 : index
    %c0_96 = arith.constant 0 : index
    %89 = vector.load %arg9[%c5_94, %c0_95, %c0_96] : memref<8x256x32xf32, #tpu.memory_space<vmem>>, vector<1x256x32xf32>
    %90 = vector.shape_cast %89 : vector<1x256x32xf32> to vector<256x32xf32>
    %cst_97 = arith.constant dense<0.000000e+00> : vector<2x32xf32>
    %91 = tpu.matmul %88, %90, %cst_97 {dimension_numbers = #tpu.dot_dimension_numbers<[1], [0], [0], [1], [0, 0, 1, 1], [], []>} : vector<2x256xf32>, vector<256x32xf32>, vector<2x32xf32> -> vector<2x32xf32>
    %92 = arith.addf %85, %91 : vector<2x32xf32>
    %c6 = arith.constant 6 : index
    %c0_98 = arith.constant 0 : index
    %c0_99 = arith.constant 0 : index
    %93 = vector.load %arg8[%c6, %c0_98, %c0_99] : memref<8x2x8xf32, #tpu.memory_space<vmem>>, vector<1x2x8xf32>
    %94 = vector.shape_cast %93 : vector<1x2x8xf32> to vector<2x8xf32>
    %cst_100 = arith.constant dense<0.000000e+00> : vector<2x256xf32>
    %95 = tpu.matmul %94, %51, %cst_100 {dimension_numbers = #tpu.dot_dimension_numbers<[1], [0], [0], [1], [0, 0, 1, 1], [], []>} : vector<2x8xf32>, vector<8x256xf32>, vector<2x256xf32> -> vector<2x256xf32>
    %c6_101 = arith.constant 6 : index
    %c0_102 = arith.constant 0 : index
    %c0_103 = arith.constant 0 : index
    %96 = vector.load %arg9[%c6_101, %c0_102, %c0_103] : memref<8x256x32xf32, #tpu.memory_space<vmem>>, vector<1x256x32xf32>
    %97 = vector.shape_cast %96 : vector<1x256x32xf32> to vector<256x32xf32>
    %cst_104 = arith.constant dense<0.000000e+00> : vector<2x32xf32>
    %98 = tpu.matmul %95, %97, %cst_104 {dimension_numbers = #tpu.dot_dimension_numbers<[1], [0], [0], [1], [0, 0, 1, 1], [], []>} : vector<2x256xf32>, vector<256x32xf32>, vector<2x32xf32> -> vector<2x32xf32>
    %99 = arith.addf %92, %98 : vector<2x32xf32>
    %c7 = arith.constant 7 : index
    %c0_105 = arith.constant 0 : index
    %c0_106 = arith.constant 0 : index
    %100 = vector.load %arg8[%c7, %c0_105, %c0_106] : memref<8x2x8xf32, #tpu.memory_space<vmem>>, vector<1x2x8xf32>
    %101 = vector.shape_cast %100 : vector<1x2x8xf32> to vector<2x8xf32>
    %cst_107 = arith.constant dense<0.000000e+00> : vector<2x256xf32>
    %102 = tpu.matmul %101, %51, %cst_107 {dimension_numbers = #tpu.dot_dimension_numbers<[1], [0], [0], [1], [0, 0, 1, 1], [], []>} : vector<2x8xf32>, vector<8x256xf32>, vector<2x256xf32> -> vector<2x256xf32>
    %c7_108 = arith.constant 7 : index
    %c0_109 = arith.constant 0 : index
    %c0_110 = arith.constant 0 : index
    %103 = vector.load %arg9[%c7_108, %c0_109, %c0_110] : memref<8x256x32xf32, #tpu.memory_space<vmem>>, vector<1x256x32xf32>
    %104 = vector.shape_cast %103 : vector<1x256x32xf32> to vector<256x32xf32>
    %cst_111 = arith.constant dense<0.000000e+00> : vector<2x32xf32>
    %105 = tpu.matmul %102, %104, %cst_111 {dimension_numbers = #tpu.dot_dimension_numbers<[1], [0], [0], [1], [0, 0, 1, 1], [], []>} : vector<2x256xf32>, vector<256x32xf32>, vector<2x32xf32> -> vector<2x32xf32>
    %106 = arith.addf %99, %105 : vector<2x32xf32>
    %c0_112 = arith.constant 0 : index
    %c0_113 = arith.constant 0 : index
    %107 = vector.load %arg10[%c0_112, %c0_113] : memref<1x32xf32, #tpu.memory_space<vmem>>, vector<1x32xf32>
    %108 = vector.broadcast %107 : vector<1x32xf32> to vector<2x32xf32>
    %109 = arith.addf %106, %108 : vector<2x32xf32>
    %cst_114 = arith.constant 0.000000e+00 : f32
    %110 = vector.broadcast %cst_114 : f32 to vector<2x32xf32>
    %111 = arith.maximumf %109, %110 : vector<2x32xf32>
    %c0_115 = arith.constant 0 : index
    %c0_116 = arith.constant 0 : index
    %c0_117 = arith.constant 0 : index
    %112 = vector.load %arg11[%c0_115, %c0_116, %c0_117] : memref<2x2x2xf32, #tpu.memory_space<vmem>>, vector<1x2x2xf32>
    %113 = vector.shape_cast %112 : vector<1x2x2xf32> to vector<2x2xf32>
    %cst_118 = arith.constant dense<0.000000e+00> : vector<2x32xf32>
    %114 = tpu.matmul %113, %111, %cst_118 {dimension_numbers = #tpu.dot_dimension_numbers<[1], [0], [0], [1], [0, 0, 1, 1], [], []>} : vector<2x2xf32>, vector<2x32xf32>, vector<2x32xf32> -> vector<2x32xf32>
    %c0_119 = arith.constant 0 : index
    %c0_120 = arith.constant 0 : index
    %c0_121 = arith.constant 0 : index
    %115 = vector.load %arg12[%c0_119, %c0_120, %c0_121] : memref<2x32x16xf32, #tpu.memory_space<vmem>>, vector<1x32x16xf32>
    %116 = vector.shape_cast %115 : vector<1x32x16xf32> to vector<32x16xf32>
    %cst_122 = arith.constant dense<0.000000e+00> : vector<2x16xf32>
    %117 = tpu.matmul %114, %116, %cst_122 {dimension_numbers = #tpu.dot_dimension_numbers<[1], [0], [0], [1], [0, 0, 1, 1], [], []>} : vector<2x32xf32>, vector<32x16xf32>, vector<2x16xf32> -> vector<2x16xf32>
    %c1_123 = arith.constant 1 : index
    %c0_124 = arith.constant 0 : index
    %c0_125 = arith.constant 0 : index
    %118 = vector.load %arg11[%c1_123, %c0_124, %c0_125] : memref<2x2x2xf32, #tpu.memory_space<vmem>>, vector<1x2x2xf32>
    %119 = vector.shape_cast %118 : vector<1x2x2xf32> to vector<2x2xf32>
    %cst_126 = arith.constant dense<0.000000e+00> : vector<2x32xf32>
    %120 = tpu.matmul %119, %111, %cst_126 {dimension_numbers = #tpu.dot_dimension_numbers<[1], [0], [0], [1], [0, 0, 1, 1], [], []>} : vector<2x2xf32>, vector<2x32xf32>, vector<2x32xf32> -> vector<2x32xf32>
    %c1_127 = arith.constant 1 : index
    %c0_128 = arith.constant 0 : index
    %c0_129 = arith.constant 0 : index
    %121 = vector.load %arg12[%c1_127, %c0_128, %c0_129] : memref<2x32x16xf32, #tpu.memory_space<vmem>>, vector<1x32x16xf32>
    %122 = vector.shape_cast %121 : vector<1x32x16xf32> to vector<32x16xf32>
    %cst_130 = arith.constant dense<0.000000e+00> : vector<2x16xf32>
    %123 = tpu.matmul %120, %122, %cst_130 {dimension_numbers = #tpu.dot_dimension_numbers<[1], [0], [0], [1], [0, 0, 1, 1], [], []>} : vector<2x32xf32>, vector<32x16xf32>, vector<2x16xf32> -> vector<2x16xf32>
    %124 = arith.addf %117, %123 : vector<2x16xf32>
    %c0_131 = arith.constant 0 : index
    %c0_132 = arith.constant 0 : index
    %125 = vector.load %arg13[%c0_131, %c0_132] : memref<1x16xf32, #tpu.memory_space<vmem>>, vector<1x16xf32>
    %126 = vector.broadcast %125 : vector<1x16xf32> to vector<2x16xf32>
    %127 = arith.addf %124, %126 : vector<2x16xf32>
    %cst_133 = arith.constant 0.000000e+00 : f32
    %128 = vector.broadcast %cst_133 : f32 to vector<2x16xf32>
    %129 = arith.maximumf %127, %128 : vector<2x16xf32>
    %c0_134 = arith.constant 0 : index
    %c0_135 = arith.constant 0 : index
    %130 = vector.load %arg15[%c0_134, %c0_135] : memref<1x8xf32, #tpu.memory_space<vmem>>, vector<1x8xf32>
    %131 = vector.extract_strided_slice %129 {offsets = [0, 0], sizes = [1, 16], strides = [1, 1]} : vector<2x16xf32> to vector<1x16xf32>
    %c0_136 = arith.constant 0 : index
    %c0_137 = arith.constant 0 : index
    %c0_138 = arith.constant 0 : index
    %132 = vector.load %arg14[%c0_136, %c0_137, %c0_138] : memref<2x16x8xf32, #tpu.memory_space<vmem>>, vector<1x16x8xf32>
    %133 = vector.shape_cast %132 : vector<1x16x8xf32> to vector<16x8xf32>
    %cst_139 = arith.constant dense<0.000000e+00> : vector<1x8xf32>
    %134 = tpu.matmul %131, %133, %cst_139 {dimension_numbers = #tpu.dot_dimension_numbers<[1], [0], [0], [1], [0, 0, 1, 1], [], []>} : vector<1x16xf32>, vector<16x8xf32>, vector<1x8xf32> -> vector<1x8xf32>
    %135 = arith.addf %130, %134 : vector<1x8xf32>
    %136 = vector.extract_strided_slice %129 {offsets = [1, 0], sizes = [1, 16], strides = [1, 1]} : vector<2x16xf32> to vector<1x16xf32>
    %c1_140 = arith.constant 1 : index
    %c0_141 = arith.constant 0 : index
    %c0_142 = arith.constant 0 : index
    %137 = vector.load %arg14[%c1_140, %c0_141, %c0_142] : memref<2x16x8xf32, #tpu.memory_space<vmem>>, vector<1x16x8xf32>
    %138 = vector.shape_cast %137 : vector<1x16x8xf32> to vector<16x8xf32>
    %cst_143 = arith.constant dense<0.000000e+00> : vector<1x8xf32>
    %139 = tpu.matmul %136, %138, %cst_143 {dimension_numbers = #tpu.dot_dimension_numbers<[1], [0], [0], [1], [0, 0, 1, 1], [], []>} : vector<1x16xf32>, vector<16x8xf32>, vector<1x8xf32> -> vector<1x8xf32>
    %140 = arith.addf %135, %139 : vector<1x8xf32>
    %141 = vector.extract_strided_slice %140 {offsets = [0, 0], sizes = [1, 4], strides = [1, 1]} : vector<1x8xf32> to vector<1x4xf32>
    %142 = vector.extract_strided_slice %140 {offsets = [0, 4], sizes = [1, 4], strides = [1, 1]} : vector<1x8xf32> to vector<1x4xf32>
    %cst_144 = arith.constant 5.000000e-01 : f32
    %143 = vector.broadcast %cst_144 : f32 to vector<1x4xf32>
    %144 = arith.mulf %143, %142 : vector<1x4xf32>
    %145 = math.exp %144 : vector<1x4xf32>
    %c0_145 = arith.constant 0 : index
    %c0_146 = arith.constant 0 : index
    %146 = vector.load %arg1[%c0_145, %c0_146] : memref<2x4xf32, #tpu.memory_space<vmem>>, vector<1x4xf32>
    %147 = arith.mulf %145, %146 : vector<1x4xf32>
    %148 = arith.addf %141, %147 : vector<1x4xf32>
    %c0_147 = arith.constant 0 : index
    %c0_148 = arith.constant 0 : index
    %149 = vector.load %arg31[%c0_147, %c0_148] : memref<2x4xf32, #tpu.memory_space<vmem>>, vector<1x4xf32>
    tpu.vector_store %arg31[%c0_147, %c0_148], %141 {strides = array<i32>} : memref<2x4xf32, #tpu.memory_space<vmem>>, vector<1x4xf32>,
    %c0_149 = arith.constant 0 : index
    %c0_150 = arith.constant 0 : index
    %150 = vector.load %arg32[%c0_149, %c0_150] : memref<2x4xf32, #tpu.memory_space<vmem>>, vector<1x4xf32>
    tpu.vector_store %arg32[%c0_149, %c0_150], %142 {strides = array<i32>} : memref<2x4xf32, #tpu.memory_space<vmem>>, vector<1x4xf32>,
    %c0_151 = arith.constant 0 : index
    %c0_152 = arith.constant 0 : index
    %c0_153 = arith.constant 0 : index
    %151 = vector.load %arg16[%c0_151, %c0_152, %c0_153] : memref<2x4x16xf32, #tpu.memory_space<vmem>>, vector<1x4x16xf32>
    %152 = vector.shape_cast %151 : vector<1x4x16xf32> to vector<4x16xf32>
    %cst_154 = arith.constant dense<0.000000e+00> : vector<1x16xf32>
    %153 = tpu.matmul %148, %152, %cst_154 {dimension_numbers = #tpu.dot_dimension_numbers<[1], [0], [0], [1], [0, 0, 1, 1], [], []>} : vector<1x4xf32>, vector<4x16xf32>, vector<1x16xf32> -> vector<1x16xf32>
    %c0_155 = arith.constant 0 : index
    %c0_156 = arith.constant 0 : index
    %c0_157 = arith.constant 0 : index
    %154 = vector.load %arg17[%c0_155, %c0_156, %c0_157] : memref<2x1x16xf32, #tpu.memory_space<vmem>>, vector<1x1x16xf32>
    %155 = vector.shape_cast %154 : vector<1x1x16xf32> to vector<1x16xf32>
    %156 = arith.addf %153, %155 : vector<1x16xf32>
    %c1_158 = arith.constant 1 : index
    %c0_159 = arith.constant 0 : index
    %c0_160 = arith.constant 0 : index
    %157 = vector.load %arg16[%c1_158, %c0_159, %c0_160] : memref<2x4x16xf32, #tpu.memory_space<vmem>>, vector<1x4x16xf32>
    %158 = vector.shape_cast %157 : vector<1x4x16xf32> to vector<4x16xf32>
    %cst_161 = arith.constant dense<0.000000e+00> : vector<1x16xf32>
    %159 = tpu.matmul %148, %158, %cst_161 {dimension_numbers = #tpu.dot_dimension_numbers<[1], [0], [0], [1], [0, 0, 1, 1], [], []>} : vector<1x4xf32>, vector<4x16xf32>, vector<1x16xf32> -> vector<1x16xf32>
    %c1_162 = arith.constant 1 : index
    %c0_163 = arith.constant 0 : index
    %c0_164 = arith.constant 0 : index
    %160 = vector.load %arg17[%c1_162, %c0_163, %c0_164] : memref<2x1x16xf32, #tpu.memory_space<vmem>>, vector<1x1x16xf32>
    %161 = vector.shape_cast %160 : vector<1x1x16xf32> to vector<1x16xf32>
    %162 = arith.addf %159, %161 : vector<1x16xf32>
    %163 = tpu.concatenate %156, %162 in 0 : vector<1x16xf32>, vector<1x16xf32> -> vector<2x16xf32>
    %c0_165 = arith.constant 0 : index
    %c0_166 = arith.constant 0 : index
    %c0_167 = arith.constant 0 : index
    %164 = vector.load %arg18[%c0_165, %c0_166, %c0_167] : memref<2x2x2xf32, #tpu.memory_space<vmem>>, vector<1x2x2xf32>
    %165 = vector.shape_cast %164 : vector<1x2x2xf32> to vector<2x2xf32>
    %cst_168 = arith.constant dense<0.000000e+00> : vector<2x16xf32>
    %166 = tpu.matmul %165, %163, %cst_168 {dimension_numbers = #tpu.dot_dimension_numbers<[1], [0], [0], [1], [0, 0, 1, 1], [], []>} : vector<2x2xf32>, vector<2x16xf32>, vector<2x16xf32> -> vector<2x16xf32>
    %c0_169 = arith.constant 0 : index
    %c0_170 = arith.constant 0 : index
    %c0_171 = arith.constant 0 : index
    %167 = vector.load %arg19[%c0_169, %c0_170, %c0_171] : memref<2x16x32xf32, #tpu.memory_space<vmem>>, vector<1x16x32xf32>
    %168 = vector.shape_cast %167 : vector<1x16x32xf32> to vector<16x32xf32>
    %cst_172 = arith.constant dense<0.000000e+00> : vector<2x32xf32>
    %169 = tpu.matmul %166, %168, %cst_172 {dimension_numbers = #tpu.dot_dimension_numbers<[1], [0], [0], [1], [0, 0, 1, 1], [], []>} : vector<2x16xf32>, vector<16x32xf32>, vector<2x32xf32> -> vector<2x32xf32>
    %c1_173 = arith.constant 1 : index
    %c0_174 = arith.constant 0 : index
    %c0_175 = arith.constant 0 : index
    %170 = vector.load %arg18[%c1_173, %c0_174, %c0_175] : memref<2x2x2xf32, #tpu.memory_space<vmem>>, vector<1x2x2xf32>
    %171 = vector.shape_cast %170 : vector<1x2x2xf32> to vector<2x2xf32>
    %cst_176 = arith.constant dense<0.000000e+00> : vector<2x16xf32>
    %172 = tpu.matmul %171, %163, %cst_176 {dimension_numbers = #tpu.dot_dimension_numbers<[1], [0], [0], [1], [0, 0, 1, 1], [], []>} : vector<2x2xf32>, vector<2x16xf32>, vector<2x16xf32> -> vector<2x16xf32>
    %c1_177 = arith.constant 1 : index
    %c0_178 = arith.constant 0 : index
    %c0_179 = arith.constant 0 : index
    %173 = vector.load %arg19[%c1_177, %c0_178, %c0_179] : memref<2x16x32xf32, #tpu.memory_space<vmem>>, vector<1x16x32xf32>
    %174 = vector.shape_cast %173 : vector<1x16x32xf32> to vector<16x32xf32>
    %cst_180 = arith.constant dense<0.000000e+00> : vector<2x32xf32>
    %175 = tpu.matmul %172, %174, %cst_180 {dimension_numbers = #tpu.dot_dimension_numbers<[1], [0], [0], [1], [0, 0, 1, 1], [], []>} : vector<2x16xf32>, vector<16x32xf32>, vector<2x32xf32> -> vector<2x32xf32>
    %176 = arith.addf %169, %175 : vector<2x32xf32>
    %c0_181 = arith.constant 0 : index
    %c0_182 = arith.constant 0 : index
    %177 = vector.load %arg20[%c0_181, %c0_182] : memref<1x32xf32, #tpu.memory_space<vmem>>, vector<1x32xf32>
    %178 = vector.broadcast %177 : vector<1x32xf32> to vector<2x32xf32>
    %179 = arith.addf %176, %178 : vector<2x32xf32>
    %cst_183 = arith.constant 0.000000e+00 : f32
    %180 = vector.broadcast %cst_183 : f32 to vector<2x32xf32>
    %181 = arith.maximumf %179, %180 : vector<2x32xf32>
    %c0_184 = arith.constant 0 : index
    %c0_185 = arith.constant 0 : index
    %c0_186 = arith.constant 0 : index
    %182 = vector.load %arg21[%c0_184, %c0_185, %c0_186] : memref<8x8x2xf32, #tpu.memory_space<vmem>>, vector<1x8x2xf32>
    %183 = vector.shape_cast %182 : vector<1x8x2xf32> to vector<8x2xf32>
    %cst_187 = arith.constant dense<0.000000e+00> : vector<8x32xf32>
    %184 = tpu.matmul %183, %181, %cst_187 {dimension_numbers = #tpu.dot_dimension_numbers<[1], [0], [0], [1], [0, 0, 1, 1], [], []>} : vector<8x2xf32>, vector<2x32xf32>, vector<8x32xf32> -> vector<8x32xf32>
    %c0_188 = arith.constant 0 : index
    %c0_189 = arith.constant 0 : index
    %c0_190 = arith.constant 0 : index
    %185 = vector.load %arg22[%c0_188, %c0_189, %c0_190] : memref<8x32x256xf32, #tpu.memory_space<vmem>>, vector<1x32x256xf32>
    %186 = vector.shape_cast %185 : vector<1x32x256xf32> to vector<32x256xf32>
    %cst_191 = arith.constant dense<0.000000e+00> : vector<8x256xf32>
    %187 = tpu.matmul %184, %186, %cst_191 {dimension_numbers = #tpu.dot_dimension_numbers<[1], [0], [0], [1], [0, 0, 1, 1], [], []>} : vector<8x32xf32>, vector<32x256xf32>, vector<8x256xf32> -> vector<8x256xf32>
    %c1_192 = arith.constant 1 : index
    %c0_193 = arith.constant 0 : index
    %c0_194 = arith.constant 0 : index
    %188 = vector.load %arg21[%c1_192, %c0_193, %c0_194] : memref<8x8x2xf32, #tpu.memory_space<vmem>>, vector<1x8x2xf32>
    %189 = vector.shape_cast %188 : vector<1x8x2xf32> to vector<8x2xf32>
    %cst_195 = arith.constant dense<0.000000e+00> : vector<8x32xf32>
    %190 = tpu.matmul %189, %181, %cst_195 {dimension_numbers = #tpu.dot_dimension_numbers<[1], [0], [0], [1], [0, 0, 1, 1], [], []>} : vector<8x2xf32>, vector<2x32xf32>, vector<8x32xf32> -> vector<8x32xf32>
    %c1_196 = arith.constant 1 : index
    %c0_197 = arith.constant 0 : index
    %c0_198 = arith.constant 0 : index
    %191 = vector.load %arg22[%c1_196, %c0_197, %c0_198] : memref<8x32x256xf32, #tpu.memory_space<vmem>>, vector<1x32x256xf32>
    %192 = vector.shape_cast %191 : vector<1x32x256xf32> to vector<32x256xf32>
    %cst_199 = arith.constant dense<0.000000e+00> : vector<8x256xf32>
    %193 = tpu.matmul %190, %192, %cst_199 {dimension_numbers = #tpu.dot_dimension_numbers<[1], [0], [0], [1], [0, 0, 1, 1], [], []>} : vector<8x32xf32>, vector<32x256xf32>, vector<8x256xf32> -> vector<8x256xf32>
    %194 = arith.addf %187, %193 : vector<8x256xf32>
    %c2_200 = arith.constant 2 : index
    %c0_201 = arith.constant 0 : index
    %c0_202 = arith.constant 0 : index
    %195 = vector.load %arg21[%c2_200, %c0_201, %c0_202] : memref<8x8x2xf32, #tpu.memory_space<vmem>>, vector<1x8x2xf32>
    %196 = vector.shape_cast %195 : vector<1x8x2xf32> to vector<8x2xf32>
    %cst_203 = arith.constant dense<0.000000e+00> : vector<8x32xf32>
    %197 = tpu.matmul %196, %181, %cst_203 {dimension_numbers = #tpu.dot_dimension_numbers<[1], [0], [0], [1], [0, 0, 1, 1], [], []>} : vector<8x2xf32>, vector<2x32xf32>, vector<8x32xf32> -> vector<8x32xf32>
    %c2_204 = arith.constant 2 : index
    %c0_205 = arith.constant 0 : index
    %c0_206 = arith.constant 0 : index
    %198 = vector.load %arg22[%c2_204, %c0_205, %c0_206] : memref<8x32x256xf32, #tpu.memory_space<vmem>>, vector<1x32x256xf32>
    %199 = vector.shape_cast %198 : vector<1x32x256xf32> to vector<32x256xf32>
    %cst_207 = arith.constant dense<0.000000e+00> : vector<8x256xf32>
    %200 = tpu.matmul %197, %199, %cst_207 {dimension_numbers = #tpu.dot_dimension_numbers<[1], [0], [0], [1], [0, 0, 1, 1], [], []>} : vector<8x32xf32>, vector<32x256xf32>, vector<8x256xf32> -> vector<8x256xf32>
    %201 = arith.addf %194, %200 : vector<8x256xf32>
    %c3_208 = arith.constant 3 : index
    %c0_209 = arith.constant 0 : index
    %c0_210 = arith.constant 0 : index
    %202 = vector.load %arg21[%c3_208, %c0_209, %c0_210] : memref<8x8x2xf32, #tpu.memory_space<vmem>>, vector<1x8x2xf32>
    %203 = vector.shape_cast %202 : vector<1x8x2xf32> to vector<8x2xf32>
    %cst_211 = arith.constant dense<0.000000e+00> : vector<8x32xf32>
    %204 = tpu.matmul %203, %181, %cst_211 {dimension_numbers = #tpu.dot_dimension_numbers<[1], [0], [0], [1], [0, 0, 1, 1], [], []>} : vector<8x2xf32>, vector<2x32xf32>, vector<8x32xf32> -> vector<8x32xf32>
    %c3_212 = arith.constant 3 : index
    %c0_213 = arith.constant 0 : index
    %c0_214 = arith.constant 0 : index
    %205 = vector.load %arg22[%c3_212, %c0_213, %c0_214] : memref<8x32x256xf32, #tpu.memory_space<vmem>>, vector<1x32x256xf32>
    %206 = vector.shape_cast %205 : vector<1x32x256xf32> to vector<32x256xf32>
    %cst_215 = arith.constant dense<0.000000e+00> : vector<8x256xf32>
    %207 = tpu.matmul %204, %206, %cst_215 {dimension_numbers = #tpu.dot_dimension_numbers<[1], [0], [0], [1], [0, 0, 1, 1], [], []>} : vector<8x32xf32>, vector<32x256xf32>, vector<8x256xf32> -> vector<8x256xf32>
    %208 = arith.addf %201, %207 : vector<8x256xf32>
    %c4_216 = arith.constant 4 : index
    %c0_217 = arith.constant 0 : index
    %c0_218 = arith.constant 0 : index
    %209 = vector.load %arg21[%c4_216, %c0_217, %c0_218] : memref<8x8x2xf32, #tpu.memory_space<vmem>>, vector<1x8x2xf32>
    %210 = vector.shape_cast %209 : vector<1x8x2xf32> to vector<8x2xf32>
    %cst_219 = arith.constant dense<0.000000e+00> : vector<8x32xf32>
    %211 = tpu.matmul %210, %181, %cst_219 {dimension_numbers = #tpu.dot_dimension_numbers<[1], [0], [0], [1], [0, 0, 1, 1], [], []>} : vector<8x2xf32>, vector<2x32xf32>, vector<8x32xf32> -> vector<8x32xf32>
    %c4_220 = arith.constant 4 : index
    %c0_221 = arith.constant 0 : index
    %c0_222 = arith.constant 0 : index
    %212 = vector.load %arg22[%c4_220, %c0_221, %c0_222] : memref<8x32x256xf32, #tpu.memory_space<vmem>>, vector<1x32x256xf32>
    %213 = vector.shape_cast %212 : vector<1x32x256xf32> to vector<32x256xf32>
    %cst_223 = arith.constant dense<0.000000e+00> : vector<8x256xf32>
    %214 = tpu.matmul %211, %213, %cst_223 {dimension_numbers = #tpu.dot_dimension_numbers<[1], [0], [0], [1], [0, 0, 1, 1], [], []>} : vector<8x32xf32>, vector<32x256xf32>, vector<8x256xf32> -> vector<8x256xf32>
    %215 = arith.addf %208, %214 : vector<8x256xf32>
    %c5_224 = arith.constant 5 : index
    %c0_225 = arith.constant 0 : index
    %c0_226 = arith.constant 0 : index
    %216 = vector.load %arg21[%c5_224, %c0_225, %c0_226] : memref<8x8x2xf32, #tpu.memory_space<vmem>>, vector<1x8x2xf32>
    %217 = vector.shape_cast %216 : vector<1x8x2xf32> to vector<8x2xf32>
    %cst_227 = arith.constant dense<0.000000e+00> : vector<8x32xf32>
    %218 = tpu.matmul %217, %181, %cst_227 {dimension_numbers = #tpu.dot_dimension_numbers<[1], [0], [0], [1], [0, 0, 1, 1], [], []>} : vector<8x2xf32>, vector<2x32xf32>, vector<8x32xf32> -> vector<8x32xf32>
    %c5_228 = arith.constant 5 : index
    %c0_229 = arith.constant 0 : index
    %c0_230 = arith.constant 0 : index
    %219 = vector.load %arg22[%c5_228, %c0_229, %c0_230] : memref<8x32x256xf32, #tpu.memory_space<vmem>>, vector<1x32x256xf32>
    %220 = vector.shape_cast %219 : vector<1x32x256xf32> to vector<32x256xf32>
    %cst_231 = arith.constant dense<0.000000e+00> : vector<8x256xf32>
    %221 = tpu.matmul %218, %220, %cst_231 {dimension_numbers = #tpu.dot_dimension_numbers<[1], [0], [0], [1], [0, 0, 1, 1], [], []>} : vector<8x32xf32>, vector<32x256xf32>, vector<8x256xf32> -> vector<8x256xf32>
    %222 = arith.addf %215, %221 : vector<8x256xf32>
    %c6_232 = arith.constant 6 : index
    %c0_233 = arith.constant 0 : index
    %c0_234 = arith.constant 0 : index
    %223 = vector.load %arg21[%c6_232, %c0_233, %c0_234] : memref<8x8x2xf32, #tpu.memory_space<vmem>>, vector<1x8x2xf32>
    %224 = vector.shape_cast %223 : vector<1x8x2xf32> to vector<8x2xf32>
    %cst_235 = arith.constant dense<0.000000e+00> : vector<8x32xf32>
    %225 = tpu.matmul %224, %181, %cst_235 {dimension_numbers = #tpu.dot_dimension_numbers<[1], [0], [0], [1], [0, 0, 1, 1], [], []>} : vector<8x2xf32>, vector<2x32xf32>, vector<8x32xf32> -> vector<8x32xf32>
    %c6_236 = arith.constant 6 : index
    %c0_237 = arith.constant 0 : index
    %c0_238 = arith.constant 0 : index
    %226 = vector.load %arg22[%c6_236, %c0_237, %c0_238] : memref<8x32x256xf32, #tpu.memory_space<vmem>>, vector<1x32x256xf32>
    %227 = vector.shape_cast %226 : vector<1x32x256xf32> to vector<32x256xf32>
    %cst_239 = arith.constant dense<0.000000e+00> : vector<8x256xf32>
    %228 = tpu.matmul %225, %227, %cst_239 {dimension_numbers = #tpu.dot_dimension_numbers<[1], [0], [0], [1], [0, 0, 1, 1], [], []>} : vector<8x32xf32>, vector<32x256xf32>, vector<8x256xf32> -> vector<8x256xf32>
    %229 = arith.addf %222, %228 : vector<8x256xf32>
    %c7_240 = arith.constant 7 : index
    %c0_241 = arith.constant 0 : index
    %c0_242 = arith.constant 0 : index
    %230 = vector.load %arg21[%c7_240, %c0_241, %c0_242] : memref<8x8x2xf32, #tpu.memory_space<vmem>>, vector<1x8x2xf32>
    %231 = vector.shape_cast %230 : vector<1x8x2xf32> to vector<8x2xf32>
    %cst_243 = arith.constant dense<0.000000e+00> : vector<8x32xf32>
    %232 = tpu.matmul %231, %181, %cst_243 {dimension_numbers = #tpu.dot_dimension_numbers<[1], [0], [0], [1], [0, 0, 1, 1], [], []>} : vector<8x2xf32>, vector<2x32xf32>, vector<8x32xf32> -> vector<8x32xf32>
    %c7_244 = arith.constant 7 : index
    %c0_245 = arith.constant 0 : index
    %c0_246 = arith.constant 0 : index
    %233 = vector.load %arg22[%c7_244, %c0_245, %c0_246] : memref<8x32x256xf32, #tpu.memory_space<vmem>>, vector<1x32x256xf32>
    %234 = vector.shape_cast %233 : vector<1x32x256xf32> to vector<32x256xf32>
    %cst_247 = arith.constant dense<0.000000e+00> : vector<8x256xf32>
    %235 = tpu.matmul %232, %234, %cst_247 {dimension_numbers = #tpu.dot_dimension_numbers<[1], [0], [0], [1], [0, 0, 1, 1], [], []>} : vector<8x32xf32>, vector<32x256xf32>, vector<8x256xf32> -> vector<8x256xf32>
    %236 = arith.addf %229, %235 : vector<8x256xf32>
    %c0_248 = arith.constant 0 : index
    %c0_249 = arith.constant 0 : index
    %237 = vector.load %arg23[%c0_248, %c0_249] : memref<1x256xf32, #tpu.memory_space<vmem>>, vector<1x256xf32>
    %238 = vector.broadcast %237 : vector<1x256xf32> to vector<8x256xf32>
    %239 = arith.addf %236, %238 : vector<8x256xf32>
    %cst_250 = arith.constant 0.000000e+00 : f32
    %240 = vector.broadcast %cst_250 : f32 to vector<8x256xf32>
    %241 = arith.maximumf %239, %240 : vector<8x256xf32>
    %c0_251 = arith.constant 0 : index
    %c0_252 = arith.constant 0 : index
    %c0_253 = arith.constant 0 : index
    %242 = vector.load %arg24[%c0_251, %c0_252, %c0_253] : memref<3x16x8xf32, #tpu.memory_space<vmem>>, vector<1x16x8xf32>
    %243 = vector.shape_cast %242 : vector<1x16x8xf32> to vector<16x8xf32>
    %cst_254 = arith.constant dense<0.000000e+00> : vector<16x256xf32>
    %244 = tpu.matmul %243, %241, %cst_254 {dimension_numbers = #tpu.dot_dimension_numbers<[1], [0], [0], [1], [0, 0, 1, 1], [], []>} : vector<16x8xf32>, vector<8x256xf32>, vector<16x256xf32> -> vector<16x256xf32>
    %c0_255 = arith.constant 0 : index
    %c0_256 = arith.constant 0 : index
    %c0_257 = arith.constant 0 : index
    %245 = vector.load %arg25[%c0_255, %c0_256, %c0_257] : memref<3x256x256xf32, #tpu.memory_space<vmem>>, vector<1x256x256xf32>
    %246 = vector.shape_cast %245 : vector<1x256x256xf32> to vector<256x256xf32>
    %cst_258 = arith.constant dense<0.000000e+00> : vector<16x256xf32>
    %247 = tpu.matmul %244, %246, %cst_258 {dimension_numbers = #tpu.dot_dimension_numbers<[1], [0], [0], [1], [0, 0, 1, 1], [], []>} : vector<16x256xf32>, vector<256x256xf32>, vector<16x256xf32> -> vector<16x256xf32>
    %c1_259 = arith.constant 1 : index
    %c0_260 = arith.constant 0 : index
    %c0_261 = arith.constant 0 : index
    %248 = vector.load %arg24[%c1_259, %c0_260, %c0_261] : memref<3x16x8xf32, #tpu.memory_space<vmem>>, vector<1x16x8xf32>
    %249 = vector.shape_cast %248 : vector<1x16x8xf32> to vector<16x8xf32>
    %cst_262 = arith.constant dense<0.000000e+00> : vector<16x256xf32>
    %250 = tpu.matmul %249, %241, %cst_262 {dimension_numbers = #tpu.dot_dimension_numbers<[1], [0], [0], [1], [0, 0, 1, 1], [], []>} : vector<16x8xf32>, vector<8x256xf32>, vector<16x256xf32> -> vector<16x256xf32>
    %c1_263 = arith.constant 1 : index
    %c0_264 = arith.constant 0 : index
    %c0_265 = arith.constant 0 : index
    %251 = vector.load %arg25[%c1_263, %c0_264, %c0_265] : memref<3x256x256xf32, #tpu.memory_space<vmem>>, vector<1x256x256xf32>
    %252 = vector.shape_cast %251 : vector<1x256x256xf32> to vector<256x256xf32>
    %cst_266 = arith.constant dense<0.000000e+00> : vector<16x256xf32>
    %253 = tpu.matmul %250, %252, %cst_266 {dimension_numbers = #tpu.dot_dimension_numbers<[1], [0], [0], [1], [0, 0, 1, 1], [], []>} : vector<16x256xf32>, vector<256x256xf32>, vector<16x256xf32> -> vector<16x256xf32>
    %254 = arith.addf %247, %253 : vector<16x256xf32>
    %c2_267 = arith.constant 2 : index
    %c0_268 = arith.constant 0 : index
    %c0_269 = arith.constant 0 : index
    %255 = vector.load %arg24[%c2_267, %c0_268, %c0_269] : memref<3x16x8xf32, #tpu.memory_space<vmem>>, vector<1x16x8xf32>
    %256 = vector.shape_cast %255 : vector<1x16x8xf32> to vector<16x8xf32>
    %cst_270 = arith.constant dense<0.000000e+00> : vector<16x256xf32>
    %257 = tpu.matmul %256, %241, %cst_270 {dimension_numbers = #tpu.dot_dimension_numbers<[1], [0], [0], [1], [0, 0, 1, 1], [], []>} : vector<16x8xf32>, vector<8x256xf32>, vector<16x256xf32> -> vector<16x256xf32>
    %c2_271 = arith.constant 2 : index
    %c0_272 = arith.constant 0 : index
    %c0_273 = arith.constant 0 : index
    %258 = vector.load %arg25[%c2_271, %c0_272, %c0_273] : memref<3x256x256xf32, #tpu.memory_space<vmem>>, vector<1x256x256xf32>
    %259 = vector.shape_cast %258 : vector<1x256x256xf32> to vector<256x256xf32>
    %cst_274 = arith.constant dense<0.000000e+00> : vector<16x256xf32>
    %260 = tpu.matmul %257, %259, %cst_274 {dimension_numbers = #tpu.dot_dimension_numbers<[1], [0], [0], [1], [0, 0, 1, 1], [], []>} : vector<16x256xf32>, vector<256x256xf32>, vector<16x256xf32> -> vector<16x256xf32>
    %261 = arith.addf %254, %260 : vector<16x256xf32>
    %c0_275 = arith.constant 0 : index
    %c0_276 = arith.constant 0 : index
    %262 = vector.load %arg26[%c0_275, %c0_276] : memref<1x256xf32, #tpu.memory_space<vmem>>, vector<1x256xf32>
    %263 = vector.broadcast %262 : vector<1x256xf32> to vector<16x256xf32>
    %264 = arith.addf %261, %263 : vector<16x256xf32>
    %cst_277 = arith.constant 0.000000e+00 : f32
    %265 = vector.broadcast %cst_277 : f32 to vector<16x256xf32>
    %266 = arith.maximumf %264, %265 : vector<16x256xf32>
    %c0_278 = arith.constant 0 : index
    %c0_279 = arith.constant 0 : index
    %c0_280 = arith.constant 0 : index
    %267 = vector.load %arg27[%c0_278, %c0_279, %c0_280] : memref<3x32x16xf32, #tpu.memory_space<vmem>>, vector<1x32x16xf32>
    %268 = vector.shape_cast %267 : vector<1x32x16xf32> to vector<32x16xf32>
    %cst_281 = arith.constant dense<0.000000e+00> : vector<32x256xf32>
    %269 = tpu.matmul %268, %266, %cst_281 {dimension_numbers = #tpu.dot_dimension_numbers<[1], [0], [0], [1], [0, 0, 1, 1], [], []>} : vector<32x16xf32>, vector<16x256xf32>, vector<32x256xf32> -> vector<32x256xf32>
    %c0_282 = arith.constant 0 : index
    %c0_283 = arith.constant 0 : index
    %c0_284 = arith.constant 0 : index
    %270 = vector.load %arg28[%c0_282, %c0_283, %c0_284] : memref<3x256x32xf32, #tpu.memory_space<vmem>>, vector<1x256x32xf32>
    %271 = vector.shape_cast %270 : vector<1x256x32xf32> to vector<256x32xf32>
    %cst_285 = arith.constant dense<0.000000e+00> : vector<32x32xf32>
    %272 = tpu.matmul %269, %271, %cst_285 {dimension_numbers = #tpu.dot_dimension_numbers<[1], [0], [0], [1], [0, 0, 1, 1], [], []>} : vector<32x256xf32>, vector<256x32xf32>, vector<32x32xf32> -> vector<32x32xf32>
    %c1_286 = arith.constant 1 : index
    %c0_287 = arith.constant 0 : index
    %c0_288 = arith.constant 0 : index
    %273 = vector.load %arg27[%c1_286, %c0_287, %c0_288] : memref<3x32x16xf32, #tpu.memory_space<vmem>>, vector<1x32x16xf32>
    %274 = vector.shape_cast %273 : vector<1x32x16xf32> to vector<32x16xf32>
    %cst_289 = arith.constant dense<0.000000e+00> : vector<32x256xf32>
    %275 = tpu.matmul %274, %266, %cst_289 {dimension_numbers = #tpu.dot_dimension_numbers<[1], [0], [0], [1], [0, 0, 1, 1], [], []>} : vector<32x16xf32>, vector<16x256xf32>, vector<32x256xf32> -> vector<32x256xf32>
    %c1_290 = arith.constant 1 : index
    %c0_291 = arith.constant 0 : index
    %c0_292 = arith.constant 0 : index
    %276 = vector.load %arg28[%c1_290, %c0_291, %c0_292] : memref<3x256x32xf32, #tpu.memory_space<vmem>>, vector<1x256x32xf32>
    %277 = vector.shape_cast %276 : vector<1x256x32xf32> to vector<256x32xf32>
    %cst_293 = arith.constant dense<0.000000e+00> : vector<32x32xf32>
    %278 = tpu.matmul %275, %277, %cst_293 {dimension_numbers = #tpu.dot_dimension_numbers<[1], [0], [0], [1], [0, 0, 1, 1], [], []>} : vector<32x256xf32>, vector<256x32xf32>, vector<32x32xf32> -> vector<32x32xf32>
    %279 = arith.addf %272, %278 : vector<32x32xf32>
    %c2_294 = arith.constant 2 : index
    %c0_295 = arith.constant 0 : index
    %c0_296 = arith.constant 0 : index
    %280 = vector.load %arg27[%c2_294, %c0_295, %c0_296] : memref<3x32x16xf32, #tpu.memory_space<vmem>>, vector<1x32x16xf32>
    %281 = vector.shape_cast %280 : vector<1x32x16xf32> to vector<32x16xf32>
    %cst_297 = arith.constant dense<0.000000e+00> : vector<32x256xf32>
    %282 = tpu.matmul %281, %266, %cst_297 {dimension_numbers = #tpu.dot_dimension_numbers<[1], [0], [0], [1], [0, 0, 1, 1], [], []>} : vector<32x16xf32>, vector<16x256xf32>, vector<32x256xf32> -> vector<32x256xf32>
    %c2_298 = arith.constant 2 : index
    %c0_299 = arith.constant 0 : index
    %c0_300 = arith.constant 0 : index
    %283 = vector.load %arg28[%c2_298, %c0_299, %c0_300] : memref<3x256x32xf32, #tpu.memory_space<vmem>>, vector<1x256x32xf32>
    %284 = vector.shape_cast %283 : vector<1x256x32xf32> to vector<256x32xf32>
    %cst_301 = arith.constant dense<0.000000e+00> : vector<32x32xf32>
    %285 = tpu.matmul %282, %284, %cst_301 {dimension_numbers = #tpu.dot_dimension_numbers<[1], [0], [0], [1], [0, 0, 1, 1], [], []>} : vector<32x256xf32>, vector<256x32xf32>, vector<32x32xf32> -> vector<32x32xf32>
    %286 = arith.addf %279, %285 : vector<32x32xf32>
    %c0_302 = arith.constant 0 : index
    %c0_303 = arith.constant 0 : index
    %287 = vector.load %arg29[%c0_302, %c0_303] : memref<1x32xf32, #tpu.memory_space<vmem>>, vector<1x32xf32>
    %288 = vector.broadcast %287 : vector<1x32xf32> to vector<32x32xf32>
    %289 = arith.addf %286, %288 : vector<32x32xf32>
    %cst_304 = arith.constant 5.000000e-01 : f32
    %290 = vector.broadcast %cst_304 : f32 to vector<32x32xf32>
    %291 = arith.mulf %290, %289 : vector<32x32xf32>
    %292 = math.tanh %291 : vector<32x32xf32>
    %cst_305 = arith.constant 1.000000e+00 : f32
    %293 = vector.broadcast %cst_305 : f32 to vector<32x32xf32>
    %294 = arith.addf %292, %293 : vector<32x32xf32>
    %cst_306 = arith.constant 5.000000e-01 : f32
    %295 = vector.broadcast %cst_306 : f32 to vector<32x32xf32>
    %296 = arith.mulf %295, %294 : vector<32x32xf32>
    %c0_307 = arith.constant 0 : index
    %c0_308 = arith.constant 0 : index
    %c0_309 = arith.constant 0 : index
    %297 = vector.load %arg30[%c0_307, %c0_308, %c0_309] : memref<2x32x32xf32, #tpu.memory_space<vmem>>, vector<1x32x32xf32>
    %298 = vector.shape_cast %297 : vector<1x32x32xf32> to vector<32x32xf32>
    %299 = vector.shape_cast %296 : vector<32x32xf32> to vector<1x32x32xf32>
    tpu.vector_store %arg30[%c0_307, %c0_308, %c0_309], %299 {strides = array<i32>} : memref<2x32x32xf32, #tpu.memory_space<vmem>>, vector<1x32x32xf32>,
    %c1_310 = arith.constant 1 : index
    %c0_311 = arith.constant 0 : index
    %c0_312 = arith.constant 0 : index
    %300 = vector.load %arg0[%c1_310, %c0_311, %c0_312] : memref<2x32x32xf32, #tpu.memory_space<vmem>>, vector<1x32x32xf32>
    %301 = vector.shape_cast %300 : vector<1x32x32xf32> to vector<32x32xf32>
    %c0_313 = arith.constant 0 : index
    %c0_314 = arith.constant 0 : index
    %c0_315 = arith.constant 0 : index
    %302 = vector.load %arg2[%c0_313, %c0_314, %c0_315] : memref<3x16x32xf32, #tpu.memory_space<vmem>>, vector<1x16x32xf32>
    %303 = vector.shape_cast %302 : vector<1x16x32xf32> to vector<16x32xf32>
    %cst_316 = arith.constant dense<0.000000e+00> : vector<16x32xf32>
    %304 = tpu.matmul %303, %301, %cst_316 {dimension_numbers = #tpu.dot_dimension_numbers<[1], [0], [0], [1], [0, 0, 1, 1], [], []>} : vector<16x32xf32>, vector<32x32xf32>, vector<16x32xf32> -> vector<16x32xf32>
    %c0_317 = arith.constant 0 : index
    %c0_318 = arith.constant 0 : index
    %c0_319 = arith.constant 0 : index
    %305 = vector.load %arg3[%c0_317, %c0_318, %c0_319] : memref<3x32x256xf32, #tpu.memory_space<vmem>>, vector<1x32x256xf32>
    %306 = vector.shape_cast %305 : vector<1x32x256xf32> to vector<32x256xf32>
    %cst_320 = arith.constant dense<0.000000e+00> : vector<16x256xf32>
    %307 = tpu.matmul %304, %306, %cst_320 {dimension_numbers = #tpu.dot_dimension_numbers<[1], [0], [0], [1], [0, 0, 1, 1], [], []>} : vector<16x32xf32>, vector<32x256xf32>, vector<16x256xf32> -> vector<16x256xf32>
    %c1_321 = arith.constant 1 : index
    %c0_322 = arith.constant 0 : index
    %c0_323 = arith.constant 0 : index
    %308 = vector.load %arg2[%c1_321, %c0_322, %c0_323] : memref<3x16x32xf32, #tpu.memory_space<vmem>>, vector<1x16x32xf32>
    %309 = vector.shape_cast %308 : vector<1x16x32xf32> to vector<16x32xf32>
    %cst_324 = arith.constant dense<0.000000e+00> : vector<16x32xf32>
    %310 = tpu.matmul %309, %301, %cst_324 {dimension_numbers = #tpu.dot_dimension_numbers<[1], [0], [0], [1], [0, 0, 1, 1], [], []>} : vector<16x32xf32>, vector<32x32xf32>, vector<16x32xf32> -> vector<16x32xf32>
    %c1_325 = arith.constant 1 : index
    %c0_326 = arith.constant 0 : index
    %c0_327 = arith.constant 0 : index
    %311 = vector.load %arg3[%c1_325, %c0_326, %c0_327] : memref<3x32x256xf32, #tpu.memory_space<vmem>>, vector<1x32x256xf32>
    %312 = vector.shape_cast %311 : vector<1x32x256xf32> to vector<32x256xf32>
    %cst_328 = arith.constant dense<0.000000e+00> : vector<16x256xf32>
    %313 = tpu.matmul %310, %312, %cst_328 {dimension_numbers = #tpu.dot_dimension_numbers<[1], [0], [0], [1], [0, 0, 1, 1], [], []>} : vector<16x32xf32>, vector<32x256xf32>, vector<16x256xf32> -> vector<16x256xf32>
    %314 = arith.addf %307, %313 : vector<16x256xf32>
    %c2_329 = arith.constant 2 : index
    %c0_330 = arith.constant 0 : index
    %c0_331 = arith.constant 0 : index
    %315 = vector.load %arg2[%c2_329, %c0_330, %c0_331] : memref<3x16x32xf32, #tpu.memory_space<vmem>>, vector<1x16x32xf32>
    %316 = vector.shape_cast %315 : vector<1x16x32xf32> to vector<16x32xf32>
    %cst_332 = arith.constant dense<0.000000e+00> : vector<16x32xf32>
    %317 = tpu.matmul %316, %301, %cst_332 {dimension_numbers = #tpu.dot_dimension_numbers<[1], [0], [0], [1], [0, 0, 1, 1], [], []>} : vector<16x32xf32>, vector<32x32xf32>, vector<16x32xf32> -> vector<16x32xf32>
    %c2_333 = arith.constant 2 : index
    %c0_334 = arith.constant 0 : index
    %c0_335 = arith.constant 0 : index
    %318 = vector.load %arg3[%c2_333, %c0_334, %c0_335] : memref<3x32x256xf32, #tpu.memory_space<vmem>>, vector<1x32x256xf32>
    %319 = vector.shape_cast %318 : vector<1x32x256xf32> to vector<32x256xf32>
    %cst_336 = arith.constant dense<0.000000e+00> : vector<16x256xf32>
    %320 = tpu.matmul %317, %319, %cst_336 {dimension_numbers = #tpu.dot_dimension_numbers<[1], [0], [0], [1], [0, 0, 1, 1], [], []>} : vector<16x32xf32>, vector<32x256xf32>, vector<16x256xf32> -> vector<16x256xf32>
    %321 = arith.addf %314, %320 : vector<16x256xf32>
    %c0_337 = arith.constant 0 : index
    %c0_338 = arith.constant 0 : index
    %322 = vector.load %arg4[%c0_337, %c0_338] : memref<1x256xf32, #tpu.memory_space<vmem>>, vector<1x256xf32>
    %323 = vector.broadcast %322 : vector<1x256xf32> to vector<16x256xf32>
    %324 = arith.addf %321, %323 : vector<16x256xf32>
    %cst_339 = arith.constant 0.000000e+00 : f32
    %325 = vector.broadcast %cst_339 : f32 to vector<16x256xf32>
    %326 = arith.maximumf %324, %325 : vector<16x256xf32>
    %c0_340 = arith.constant 0 : index
    %c0_341 = arith.constant 0 : index
    %c0_342 = arith.constant 0 : index
    %327 = vector.load %arg5[%c0_340, %c0_341, %c0_342] : memref<3x8x16xf32, #tpu.memory_space<vmem>>, vector<1x8x16xf32>
    %328 = vector.shape_cast %327 : vector<1x8x16xf32> to vector<8x16xf32>
    %cst_343 = arith.constant dense<0.000000e+00> : vector<8x256xf32>
    %329 = tpu.matmul %328, %326, %cst_343 {dimension_numbers = #tpu.dot_dimension_numbers<[1], [0], [0], [1], [0, 0, 1, 1], [], []>} : vector<8x16xf32>, vector<16x256xf32>, vector<8x256xf32> -> vector<8x256xf32>
    %c0_344 = arith.constant 0 : index
    %c0_345 = arith.constant 0 : index
    %c0_346 = arith.constant 0 : index
    %330 = vector.load %arg6[%c0_344, %c0_345, %c0_346] : memref<3x256x256xf32, #tpu.memory_space<vmem>>, vector<1x256x256xf32>
    %331 = vector.shape_cast %330 : vector<1x256x256xf32> to vector<256x256xf32>
    %cst_347 = arith.constant dense<0.000000e+00> : vector<8x256xf32>
    %332 = tpu.matmul %329, %331, %cst_347 {dimension_numbers = #tpu.dot_dimension_numbers<[1], [0], [0], [1], [0, 0, 1, 1], [], []>} : vector<8x256xf32>, vector<256x256xf32>, vector<8x256xf32> -> vector<8x256xf32>
    %c1_348 = arith.constant 1 : index
    %c0_349 = arith.constant 0 : index
    %c0_350 = arith.constant 0 : index
    %333 = vector.load %arg5[%c1_348, %c0_349, %c0_350] : memref<3x8x16xf32, #tpu.memory_space<vmem>>, vector<1x8x16xf32>
    %334 = vector.shape_cast %333 : vector<1x8x16xf32> to vector<8x16xf32>
    %cst_351 = arith.constant dense<0.000000e+00> : vector<8x256xf32>
    %335 = tpu.matmul %334, %326, %cst_351 {dimension_numbers = #tpu.dot_dimension_numbers<[1], [0], [0], [1], [0, 0, 1, 1], [], []>} : vector<8x16xf32>, vector<16x256xf32>, vector<8x256xf32> -> vector<8x256xf32>
    %c1_352 = arith.constant 1 : index
    %c0_353 = arith.constant 0 : index
    %c0_354 = arith.constant 0 : index
    %336 = vector.load %arg6[%c1_352, %c0_353, %c0_354] : memref<3x256x256xf32, #tpu.memory_space<vmem>>, vector<1x256x256xf32>
    %337 = vector.shape_cast %336 : vector<1x256x256xf32> to vector<256x256xf32>
    %cst_355 = arith.constant dense<0.000000e+00> : vector<8x256xf32>
    %338 = tpu.matmul %335, %337, %cst_355 {dimension_numbers = #tpu.dot_dimension_numbers<[1], [0], [0], [1], [0, 0, 1, 1], [], []>} : vector<8x256xf32>, vector<256x256xf32>, vector<8x256xf32> -> vector<8x256xf32>
    %339 = arith.addf %332, %338 : vector<8x256xf32>
    %c2_356 = arith.constant 2 : index
    %c0_357 = arith.constant 0 : index
    %c0_358 = arith.constant 0 : index
    %340 = vector.load %arg5[%c2_356, %c0_357, %c0_358] : memref<3x8x16xf32, #tpu.memory_space<vmem>>, vector<1x8x16xf32>
    %341 = vector.shape_cast %340 : vector<1x8x16xf32> to vector<8x16xf32>
    %cst_359 = arith.constant dense<0.000000e+00> : vector<8x256xf32>
    %342 = tpu.matmul %341, %326, %cst_359 {dimension_numbers = #tpu.dot_dimension_numbers<[1], [0], [0], [1], [0, 0, 1, 1], [], []>} : vector<8x16xf32>, vector<16x256xf32>, vector<8x256xf32> -> vector<8x256xf32>
    %c2_360 = arith.constant 2 : index
    %c0_361 = arith.constant 0 : index
    %c0_362 = arith.constant 0 : index
    %343 = vector.load %arg6[%c2_360, %c0_361, %c0_362] : memref<3x256x256xf32, #tpu.memory_space<vmem>>, vector<1x256x256xf32>
    %344 = vector.shape_cast %343 : vector<1x256x256xf32> to vector<256x256xf32>
    %cst_363 = arith.constant dense<0.000000e+00> : vector<8x256xf32>
    %345 = tpu.matmul %342, %344, %cst_363 {dimension_numbers = #tpu.dot_dimension_numbers<[1], [0], [0], [1], [0, 0, 1, 1], [], []>} : vector<8x256xf32>, vector<256x256xf32>, vector<8x256xf32> -> vector<8x256xf32>
    %346 = arith.addf %339, %345 : vector<8x256xf32>
    %c0_364 = arith.constant 0 : index
    %c0_365 = arith.constant 0 : index
    %347 = vector.load %arg7[%c0_364, %c0_365] : memref<1x256xf32, #tpu.memory_space<vmem>>, vector<1x256xf32>
    %348 = vector.broadcast %347 : vector<1x256xf32> to vector<8x256xf32>
    %349 = arith.addf %346, %348 : vector<8x256xf32>
    %cst_366 = arith.constant 0.000000e+00 : f32
    %350 = vector.broadcast %cst_366 : f32 to vector<8x256xf32>
    %351 = arith.maximumf %349, %350 : vector<8x256xf32>
    %c0_367 = arith.constant 0 : index
    %c0_368 = arith.constant 0 : index
    %c0_369 = arith.constant 0 : index
    %352 = vector.load %arg8[%c0_367, %c0_368, %c0_369] : memref<8x2x8xf32, #tpu.memory_space<vmem>>, vector<1x2x8xf32>
    %353 = vector.shape_cast %352 : vector<1x2x8xf32> to vector<2x8xf32>
    %cst_370 = arith.constant dense<0.000000e+00> : vector<2x256xf32>
    %354 = tpu.matmul %353, %351, %cst_370 {dimension_numbers = #tpu.dot_dimension_numbers<[1], [0], [0], [1], [0, 0, 1, 1], [], []>} : vector<2x8xf32>, vector<8x256xf32>, vector<2x256xf32> -> vector<2x256xf32>
    %c0_371 = arith.constant 0 : index
    %c0_372 = arith.constant 0 : index
    %c0_373 = arith.constant 0 : index
    %355 = vector.load %arg9[%c0_371, %c0_372, %c0_373] : memref<8x256x32xf32, #tpu.memory_space<vmem>>, vector<1x256x32xf32>
    %356 = vector.shape_cast %355 : vector<1x256x32xf32> to vector<256x32xf32>
    %cst_374 = arith.constant dense<0.000000e+00> : vector<2x32xf32>
    %357 = tpu.matmul %354, %356, %cst_374 {dimension_numbers = #tpu.dot_dimension_numbers<[1], [0], [0], [1], [0, 0, 1, 1], [], []>} : vector<2x256xf32>, vector<256x32xf32>, vector<2x32xf32> -> vector<2x32xf32>
    %c1_375 = arith.constant 1 : index
    %c0_376 = arith.constant 0 : index
    %c0_377 = arith.constant 0 : index
    %358 = vector.load %arg8[%c1_375, %c0_376, %c0_377] : memref<8x2x8xf32, #tpu.memory_space<vmem>>, vector<1x2x8xf32>
    %359 = vector.shape_cast %358 : vector<1x2x8xf32> to vector<2x8xf32>
    %cst_378 = arith.constant dense<0.000000e+00> : vector<2x256xf32>
    %360 = tpu.matmul %359, %351, %cst_378 {dimension_numbers = #tpu.dot_dimension_numbers<[1], [0], [0], [1], [0, 0, 1, 1], [], []>} : vector<2x8xf32>, vector<8x256xf32>, vector<2x256xf32> -> vector<2x256xf32>
    %c1_379 = arith.constant 1 : index
    %c0_380 = arith.constant 0 : index
    %c0_381 = arith.constant 0 : index
    %361 = vector.load %arg9[%c1_379, %c0_380, %c0_381] : memref<8x256x32xf32, #tpu.memory_space<vmem>>, vector<1x256x32xf32>
    %362 = vector.shape_cast %361 : vector<1x256x32xf32> to vector<256x32xf32>
    %cst_382 = arith.constant dense<0.000000e+00> : vector<2x32xf32>
    %363 = tpu.matmul %360, %362, %cst_382 {dimension_numbers = #tpu.dot_dimension_numbers<[1], [0], [0], [1], [0, 0, 1, 1], [], []>} : vector<2x256xf32>, vector<256x32xf32>, vector<2x32xf32> -> vector<2x32xf32>
    %364 = arith.addf %357, %363 : vector<2x32xf32>
    %c2_383 = arith.constant 2 : index
    %c0_384 = arith.constant 0 : index
    %c0_385 = arith.constant 0 : index
    %365 = vector.load %arg8[%c2_383, %c0_384, %c0_385] : memref<8x2x8xf32, #tpu.memory_space<vmem>>, vector<1x2x8xf32>
    %366 = vector.shape_cast %365 : vector<1x2x8xf32> to vector<2x8xf32>
    %cst_386 = arith.constant dense<0.000000e+00> : vector<2x256xf32>
    %367 = tpu.matmul %366, %351, %cst_386 {dimension_numbers = #tpu.dot_dimension_numbers<[1], [0], [0], [1], [0, 0, 1, 1], [], []>} : vector<2x8xf32>, vector<8x256xf32>, vector<2x256xf32> -> vector<2x256xf32>
    %c2_387 = arith.constant 2 : index
    %c0_388 = arith.constant 0 : index
    %c0_389 = arith.constant 0 : index
    %368 = vector.load %arg9[%c2_387, %c0_388, %c0_389] : memref<8x256x32xf32, #tpu.memory_space<vmem>>, vector<1x256x32xf32>
    %369 = vector.shape_cast %368 : vector<1x256x32xf32> to vector<256x32xf32>
    %cst_390 = arith.constant dense<0.000000e+00> : vector<2x32xf32>
    %370 = tpu.matmul %367, %369, %cst_390 {dimension_numbers = #tpu.dot_dimension_numbers<[1], [0], [0], [1], [0, 0, 1, 1], [], []>} : vector<2x256xf32>, vector<256x32xf32>, vector<2x32xf32> -> vector<2x32xf32>
    %371 = arith.addf %364, %370 : vector<2x32xf32>
    %c3_391 = arith.constant 3 : index
    %c0_392 = arith.constant 0 : index
    %c0_393 = arith.constant 0 : index
    %372 = vector.load %arg8[%c3_391, %c0_392, %c0_393] : memref<8x2x8xf32, #tpu.memory_space<vmem>>, vector<1x2x8xf32>
    %373 = vector.shape_cast %372 : vector<1x2x8xf32> to vector<2x8xf32>
    %cst_394 = arith.constant dense<0.000000e+00> : vector<2x256xf32>
    %374 = tpu.matmul %373, %351, %cst_394 {dimension_numbers = #tpu.dot_dimension_numbers<[1], [0], [0], [1], [0, 0, 1, 1], [], []>} : vector<2x8xf32>, vector<8x256xf32>, vector<2x256xf32> -> vector<2x256xf32>
    %c3_395 = arith.constant 3 : index
    %c0_396 = arith.constant 0 : index
    %c0_397 = arith.constant 0 : index
    %375 = vector.load %arg9[%c3_395, %c0_396, %c0_397] : memref<8x256x32xf32, #tpu.memory_space<vmem>>, vector<1x256x32xf32>
    %376 = vector.shape_cast %375 : vector<1x256x32xf32> to vector<256x32xf32>
    %cst_398 = arith.constant dense<0.000000e+00> : vector<2x32xf32>
    %377 = tpu.matmul %374, %376, %cst_398 {dimension_numbers = #tpu.dot_dimension_numbers<[1], [0], [0], [1], [0, 0, 1, 1], [], []>} : vector<2x256xf32>, vector<256x32xf32>, vector<2x32xf32> -> vector<2x32xf32>
    %378 = arith.addf %371, %377 : vector<2x32xf32>
    %c4_399 = arith.constant 4 : index
    %c0_400 = arith.constant 0 : index
    %c0_401 = arith.constant 0 : index
    %379 = vector.load %arg8[%c4_399, %c0_400, %c0_401] : memref<8x2x8xf32, #tpu.memory_space<vmem>>, vector<1x2x8xf32>
    %380 = vector.shape_cast %379 : vector<1x2x8xf32> to vector<2x8xf32>
    %cst_402 = arith.constant dense<0.000000e+00> : vector<2x256xf32>
    %381 = tpu.matmul %380, %351, %cst_402 {dimension_numbers = #tpu.dot_dimension_numbers<[1], [0], [0], [1], [0, 0, 1, 1], [], []>} : vector<2x8xf32>, vector<8x256xf32>, vector<2x256xf32> -> vector<2x256xf32>
    %c4_403 = arith.constant 4 : index
    %c0_404 = arith.constant 0 : index
    %c0_405 = arith.constant 0 : index
    %382 = vector.load %arg9[%c4_403, %c0_404, %c0_405] : memref<8x256x32xf32, #tpu.memory_space<vmem>>, vector<1x256x32xf32>
    %383 = vector.shape_cast %382 : vector<1x256x32xf32> to vector<256x32xf32>
    %cst_406 = arith.constant dense<0.000000e+00> : vector<2x32xf32>
    %384 = tpu.matmul %381, %383, %cst_406 {dimension_numbers = #tpu.dot_dimension_numbers<[1], [0], [0], [1], [0, 0, 1, 1], [], []>} : vector<2x256xf32>, vector<256x32xf32>, vector<2x32xf32> -> vector<2x32xf32>
    %385 = arith.addf %378, %384 : vector<2x32xf32>
    %c5_407 = arith.constant 5 : index
    %c0_408 = arith.constant 0 : index
    %c0_409 = arith.constant 0 : index
    %386 = vector.load %arg8[%c5_407, %c0_408, %c0_409] : memref<8x2x8xf32, #tpu.memory_space<vmem>>, vector<1x2x8xf32>
    %387 = vector.shape_cast %386 : vector<1x2x8xf32> to vector<2x8xf32>
    %cst_410 = arith.constant dense<0.000000e+00> : vector<2x256xf32>
    %388 = tpu.matmul %387, %351, %cst_410 {dimension_numbers = #tpu.dot_dimension_numbers<[1], [0], [0], [1], [0, 0, 1, 1], [], []>} : vector<2x8xf32>, vector<8x256xf32>, vector<2x256xf32> -> vector<2x256xf32>
    %c5_411 = arith.constant 5 : index
    %c0_412 = arith.constant 0 : index
    %c0_413 = arith.constant 0 : index
    %389 = vector.load %arg9[%c5_411, %c0_412, %c0_413] : memref<8x256x32xf32, #tpu.memory_space<vmem>>, vector<1x256x32xf32>
    %390 = vector.shape_cast %389 : vector<1x256x32xf32> to vector<256x32xf32>
    %cst_414 = arith.constant dense<0.000000e+00> : vector<2x32xf32>
    %391 = tpu.matmul %388, %390, %cst_414 {dimension_numbers = #tpu.dot_dimension_numbers<[1], [0], [0], [1], [0, 0, 1, 1], [], []>} : vector<2x256xf32>, vector<256x32xf32>, vector<2x32xf32> -> vector<2x32xf32>
    %392 = arith.addf %385, %391 : vector<2x32xf32>
    %c6_415 = arith.constant 6 : index
    %c0_416 = arith.constant 0 : index
    %c0_417 = arith.constant 0 : index
    %393 = vector.load %arg8[%c6_415, %c0_416, %c0_417] : memref<8x2x8xf32, #tpu.memory_space<vmem>>, vector<1x2x8xf32>
    %394 = vector.shape_cast %393 : vector<1x2x8xf32> to vector<2x8xf32>
    %cst_418 = arith.constant dense<0.000000e+00> : vector<2x256xf32>
    %395 = tpu.matmul %394, %351, %cst_418 {dimension_numbers = #tpu.dot_dimension_numbers<[1], [0], [0], [1], [0, 0, 1, 1], [], []>} : vector<2x8xf32>, vector<8x256xf32>, vector<2x256xf32> -> vector<2x256xf32>
    %c6_419 = arith.constant 6 : index
    %c0_420 = arith.constant 0 : index
    %c0_421 = arith.constant 0 : index
    %396 = vector.load %arg9[%c6_419, %c0_420, %c0_421] : memref<8x256x32xf32, #tpu.memory_space<vmem>>, vector<1x256x32xf32>
    %397 = vector.shape_cast %396 : vector<1x256x32xf32> to vector<256x32xf32>
    %cst_422 = arith.constant dense<0.000000e+00> : vector<2x32xf32>
    %398 = tpu.matmul %395, %397, %cst_422 {dimension_numbers = #tpu.dot_dimension_numbers<[1], [0], [0], [1], [0, 0, 1, 1], [], []>} : vector<2x256xf32>, vector<256x32xf32>, vector<2x32xf32> -> vector<2x32xf32>
    %399 = arith.addf %392, %398 : vector<2x32xf32>
    %c7_423 = arith.constant 7 : index
    %c0_424 = arith.constant 0 : index
    %c0_425 = arith.constant 0 : index
    %400 = vector.load %arg8[%c7_423, %c0_424, %c0_425] : memref<8x2x8xf32, #tpu.memory_space<vmem>>, vector<1x2x8xf32>
    %401 = vector.shape_cast %400 : vector<1x2x8xf32> to vector<2x8xf32>
    %cst_426 = arith.constant dense<0.000000e+00> : vector<2x256xf32>
    %402 = tpu.matmul %401, %351, %cst_426 {dimension_numbers = #tpu.dot_dimension_numbers<[1], [0], [0], [1], [0, 0, 1, 1], [], []>} : vector<2x8xf32>, vector<8x256xf32>, vector<2x256xf32> -> vector<2x256xf32>
    %c7_427 = arith.constant 7 : index
    %c0_428 = arith.constant 0 : index
    %c0_429 = arith.constant 0 : index
    %403 = vector.load %arg9[%c7_427, %c0_428, %c0_429] : memref<8x256x32xf32, #tpu.memory_space<vmem>>, vector<1x256x32xf32>
    %404 = vector.shape_cast %403 : vector<1x256x32xf32> to vector<256x32xf32>
    %cst_430 = arith.constant dense<0.000000e+00> : vector<2x32xf32>
    %405 = tpu.matmul %402, %404, %cst_430 {dimension_numbers = #tpu.dot_dimension_numbers<[1], [0], [0], [1], [0, 0, 1, 1], [], []>} : vector<2x256xf32>, vector<256x32xf32>, vector<2x32xf32> -> vector<2x32xf32>
    %406 = arith.addf %399, %405 : vector<2x32xf32>
    %c0_431 = arith.constant 0 : index
    %c0_432 = arith.constant 0 : index
    %407 = vector.load %arg10[%c0_431, %c0_432] : memref<1x32xf32, #tpu.memory_space<vmem>>, vector<1x32xf32>
    %408 = vector.broadcast %407 : vector<1x32xf32> to vector<2x32xf32>
    %409 = arith.addf %406, %408 : vector<2x32xf32>
    %cst_433 = arith.constant 0.000000e+00 : f32
    %410 = vector.broadcast %cst_433 : f32 to vector<2x32xf32>
    %411 = arith.maximumf %409, %410 : vector<2x32xf32>
    %c0_434 = arith.constant 0 : index
    %c0_435 = arith.constant 0 : index
    %c0_436 = arith.constant 0 : index
    %412 = vector.load %arg11[%c0_434, %c0_435, %c0_436] : memref<2x2x2xf32, #tpu.memory_space<vmem>>, vector<1x2x2xf32>
    %413 = vector.shape_cast %412 : vector<1x2x2xf32> to vector<2x2xf32>
    %cst_437 = arith.constant dense<0.000000e+00> : vector<2x32xf32>
    %414 = tpu.matmul %413, %411, %cst_437 {dimension_numbers = #tpu.dot_dimension_numbers<[1], [0], [0], [1], [0, 0, 1, 1], [], []>} : vector<2x2xf32>, vector<2x32xf32>, vector<2x32xf32> -> vector<2x32xf32>
    %c0_438 = arith.constant 0 : index
    %c0_439 = arith.constant 0 : index
    %c0_440 = arith.constant 0 : index
    %415 = vector.load %arg12[%c0_438, %c0_439, %c0_440] : memref<2x32x16xf32, #tpu.memory_space<vmem>>, vector<1x32x16xf32>
    %416 = vector.shape_cast %415 : vector<1x32x16xf32> to vector<32x16xf32>
    %cst_441 = arith.constant dense<0.000000e+00> : vector<2x16xf32>
    %417 = tpu.matmul %414, %416, %cst_441 {dimension_numbers = #tpu.dot_dimension_numbers<[1], [0], [0], [1], [0, 0, 1, 1], [], []>} : vector<2x32xf32>, vector<32x16xf32>, vector<2x16xf32> -> vector<2x16xf32>
    %c1_442 = arith.constant 1 : index
    %c0_443 = arith.constant 0 : index
    %c0_444 = arith.constant 0 : index
    %418 = vector.load %arg11[%c1_442, %c0_443, %c0_444] : memref<2x2x2xf32, #tpu.memory_space<vmem>>, vector<1x2x2xf32>
    %419 = vector.shape_cast %418 : vector<1x2x2xf32> to vector<2x2xf32>
    %cst_445 = arith.constant dense<0.000000e+00> : vector<2x32xf32>
    %420 = tpu.matmul %419, %411, %cst_445 {dimension_numbers = #tpu.dot_dimension_numbers<[1], [0], [0], [1], [0, 0, 1, 1], [], []>} : vector<2x2xf32>, vector<2x32xf32>, vector<2x32xf32> -> vector<2x32xf32>
    %c1_446 = arith.constant 1 : index
    %c0_447 = arith.constant 0 : index
    %c0_448 = arith.constant 0 : index
    %421 = vector.load %arg12[%c1_446, %c0_447, %c0_448] : memref<2x32x16xf32, #tpu.memory_space<vmem>>, vector<1x32x16xf32>
    %422 = vector.shape_cast %421 : vector<1x32x16xf32> to vector<32x16xf32>
    %cst_449 = arith.constant dense<0.000000e+00> : vector<2x16xf32>
    %423 = tpu.matmul %420, %422, %cst_449 {dimension_numbers = #tpu.dot_dimension_numbers<[1], [0], [0], [1], [0, 0, 1, 1], [], []>} : vector<2x32xf32>, vector<32x16xf32>, vector<2x16xf32> -> vector<2x16xf32>
    %424 = arith.addf %417, %423 : vector<2x16xf32>
    %c0_450 = arith.constant 0 : index
    %c0_451 = arith.constant 0 : index
    %425 = vector.load %arg13[%c0_450, %c0_451] : memref<1x16xf32, #tpu.memory_space<vmem>>, vector<1x16xf32>
    %426 = vector.broadcast %425 : vector<1x16xf32> to vector<2x16xf32>
    %427 = arith.addf %424, %426 : vector<2x16xf32>
    %cst_452 = arith.constant 0.000000e+00 : f32
    %428 = vector.broadcast %cst_452 : f32 to vector<2x16xf32>
    %429 = arith.maximumf %427, %428 : vector<2x16xf32>
    %c0_453 = arith.constant 0 : index
    %c0_454 = arith.constant 0 : index
    %430 = vector.load %arg15[%c0_453, %c0_454] : memref<1x8xf32, #tpu.memory_space<vmem>>, vector<1x8xf32>
    %431 = vector.extract_strided_slice %429 {offsets = [0, 0], sizes = [1, 16], strides = [1, 1]} : vector<2x16xf32> to vector<1x16xf32>
    %c0_455 = arith.constant 0 : index
    %c0_456 = arith.constant 0 : index
    %c0_457 = arith.constant 0 : index
    %432 = vector.load %arg14[%c0_455, %c0_456, %c0_457] : memref<2x16x8xf32, #tpu.memory_space<vmem>>, vector<1x16x8xf32>
    %433 = vector.shape_cast %432 : vector<1x16x8xf32> to vector<16x8xf32>
    %cst_458 = arith.constant dense<0.000000e+00> : vector<1x8xf32>
    %434 = tpu.matmul %431, %433, %cst_458 {dimension_numbers = #tpu.dot_dimension_numbers<[1], [0], [0], [1], [0, 0, 1, 1], [], []>} : vector<1x16xf32>, vector<16x8xf32>, vector<1x8xf32> -> vector<1x8xf32>
    %435 = arith.addf %430, %434 : vector<1x8xf32>
    %436 = vector.extract_strided_slice %429 {offsets = [1, 0], sizes = [1, 16], strides = [1, 1]} : vector<2x16xf32> to vector<1x16xf32>
    %c1_459 = arith.constant 1 : index
    %c0_460 = arith.constant 0 : index
    %c0_461 = arith.constant 0 : index
    %437 = vector.load %arg14[%c1_459, %c0_460, %c0_461] : memref<2x16x8xf32, #tpu.memory_space<vmem>>, vector<1x16x8xf32>
    %438 = vector.shape_cast %437 : vector<1x16x8xf32> to vector<16x8xf32>
    %cst_462 = arith.constant dense<0.000000e+00> : vector<1x8xf32>
    %439 = tpu.matmul %436, %438, %cst_462 {dimension_numbers = #tpu.dot_dimension_numbers<[1], [0], [0], [1], [0, 0, 1, 1], [], []>} : vector<1x16xf32>, vector<16x8xf32>, vector<1x8xf32> -> vector<1x8xf32>
    %440 = arith.addf %435, %439 : vector<1x8xf32>
    %441 = vector.extract_strided_slice %440 {offsets = [0, 0], sizes = [1, 4], strides = [1, 1]} : vector<1x8xf32> to vector<1x4xf32>
    %442 = vector.extract_strided_slice %440 {offsets = [0, 4], sizes = [1, 4], strides = [1, 1]} : vector<1x8xf32> to vector<1x4xf32>
    %cst_463 = arith.constant 5.000000e-01 : f32
    %443 = vector.broadcast %cst_463 : f32 to vector<1x4xf32>
    %444 = arith.mulf %443, %442 : vector<1x4xf32>
    %445 = math.exp %444 : vector<1x4xf32>
    %c1_464 = arith.constant 1 : index
    %c0_465 = arith.constant 0 : index
    %446 = vector.load %arg1[%c1_464, %c0_465] : memref<2x4xf32, #tpu.memory_space<vmem>>, vector<1x4xf32>
    %447 = arith.mulf %445, %446 : vector<1x4xf32>
    %448 = arith.addf %441, %447 : vector<1x4xf32>
    %c1_466 = arith.constant 1 : index
    %c0_467 = arith.constant 0 : index
    %449 = vector.load %arg31[%c1_466, %c0_467] : memref<2x4xf32, #tpu.memory_space<vmem>>, vector<1x4xf32>
    tpu.vector_store %arg31[%c1_466, %c0_467], %441 {strides = array<i32>} : memref<2x4xf32, #tpu.memory_space<vmem>>, vector<1x4xf32>,
    %c1_468 = arith.constant 1 : index
    %c0_469 = arith.constant 0 : index
    %450 = vector.load %arg32[%c1_468, %c0_469] : memref<2x4xf32, #tpu.memory_space<vmem>>, vector<1x4xf32>
    tpu.vector_store %arg32[%c1_468, %c0_469], %442 {strides = array<i32>} : memref<2x4xf32, #tpu.memory_space<vmem>>, vector<1x4xf32>,
    %c0_470 = arith.constant 0 : index
    %c0_471 = arith.constant 0 : index
    %c0_472 = arith.constant 0 : index
    %451 = vector.load %arg16[%c0_470, %c0_471, %c0_472] : memref<2x4x16xf32, #tpu.memory_space<vmem>>, vector<1x4x16xf32>
    %452 = vector.shape_cast %451 : vector<1x4x16xf32> to vector<4x16xf32>
    %cst_473 = arith.constant dense<0.000000e+00> : vector<1x16xf32>
    %453 = tpu.matmul %448, %452, %cst_473 {dimension_numbers = #tpu.dot_dimension_numbers<[1], [0], [0], [1], [0, 0, 1, 1], [], []>} : vector<1x4xf32>, vector<4x16xf32>, vector<1x16xf32> -> vector<1x16xf32>
    %c0_474 = arith.constant 0 : index
    %c0_475 = arith.constant 0 : index
    %c0_476 = arith.constant 0 : index
    %454 = vector.load %arg17[%c0_474, %c0_475, %c0_476] : memref<2x1x16xf32, #tpu.memory_space<vmem>>, vector<1x1x16xf32>
    %455 = vector.shape_cast %454 : vector<1x1x16xf32> to vector<1x16xf32>
    %456 = arith.addf %453, %455 : vector<1x16xf32>
    %c1_477 = arith.constant 1 : index
    %c0_478 = arith.constant 0 : index
    %c0_479 = arith.constant 0 : index
    %457 = vector.load %arg16[%c1_477, %c0_478, %c0_479] : memref<2x4x16xf32, #tpu.memory_space<vmem>>, vector<1x4x16xf32>
    %458 = vector.shape_cast %457 : vector<1x4x16xf32> to vector<4x16xf32>
    %cst_480 = arith.constant dense<0.000000e+00> : vector<1x16xf32>
    %459 = tpu.matmul %448, %458, %cst_480 {dimension_numbers = #tpu.dot_dimension_numbers<[1], [0], [0], [1], [0, 0, 1, 1], [], []>} : vector<1x4xf32>, vector<4x16xf32>, vector<1x16xf32> -> vector<1x16xf32>
    %c1_481 = arith.constant 1 : index
    %c0_482 = arith.constant 0 : index
    %c0_483 = arith.constant 0 : index
    %460 = vector.load %arg17[%c1_481, %c0_482, %c0_483] : memref<2x1x16xf32, #tpu.memory_space<vmem>>, vector<1x1x16xf32>
    %461 = vector.shape_cast %460 : vector<1x1x16xf32> to vector<1x16xf32>
    %462 = arith.addf %459, %461 : vector<1x16xf32>
    %463 = tpu.concatenate %456, %462 in 0 : vector<1x16xf32>, vector<1x16xf32> -> vector<2x16xf32>
    %c0_484 = arith.constant 0 : index
    %c0_485 = arith.constant 0 : index
    %c0_486 = arith.constant 0 : index
    %464 = vector.load %arg18[%c0_484, %c0_485, %c0_486] : memref<2x2x2xf32, #tpu.memory_space<vmem>>, vector<1x2x2xf32>
    %465 = vector.shape_cast %464 : vector<1x2x2xf32> to vector<2x2xf32>
    %cst_487 = arith.constant dense<0.000000e+00> : vector<2x16xf32>
    %466 = tpu.matmul %465, %463, %cst_487 {dimension_numbers = #tpu.dot_dimension_numbers<[1], [0], [0], [1], [0, 0, 1, 1], [], []>} : vector<2x2xf32>, vector<2x16xf32>, vector<2x16xf32> -> vector<2x16xf32>
    %c0_488 = arith.constant 0 : index
    %c0_489 = arith.constant 0 : index
    %c0_490 = arith.constant 0 : index
    %467 = vector.load %arg19[%c0_488, %c0_489, %c0_490] : memref<2x16x32xf32, #tpu.memory_space<vmem>>, vector<1x16x32xf32>
    %468 = vector.shape_cast %467 : vector<1x16x32xf32> to vector<16x32xf32>
    %cst_491 = arith.constant dense<0.000000e+00> : vector<2x32xf32>
    %469 = tpu.matmul %466, %468, %cst_491 {dimension_numbers = #tpu.dot_dimension_numbers<[1], [0], [0], [1], [0, 0, 1, 1], [], []>} : vector<2x16xf32>, vector<16x32xf32>, vector<2x32xf32> -> vector<2x32xf32>
    %c1_492 = arith.constant 1 : index
    %c0_493 = arith.constant 0 : index
    %c0_494 = arith.constant 0 : index
    %470 = vector.load %arg18[%c1_492, %c0_493, %c0_494] : memref<2x2x2xf32, #tpu.memory_space<vmem>>, vector<1x2x2xf32>
    %471 = vector.shape_cast %470 : vector<1x2x2xf32> to vector<2x2xf32>
    %cst_495 = arith.constant dense<0.000000e+00> : vector<2x16xf32>
    %472 = tpu.matmul %471, %463, %cst_495 {dimension_numbers = #tpu.dot_dimension_numbers<[1], [0], [0], [1], [0, 0, 1, 1], [], []>} : vector<2x2xf32>, vector<2x16xf32>, vector<2x16xf32> -> vector<2x16xf32>
    %c1_496 = arith.constant 1 : index
    %c0_497 = arith.constant 0 : index
    %c0_498 = arith.constant 0 : index
    %473 = vector.load %arg19[%c1_496, %c0_497, %c0_498] : memref<2x16x32xf32, #tpu.memory_space<vmem>>, vector<1x16x32xf32>
    %474 = vector.shape_cast %473 : vector<1x16x32xf32> to vector<16x32xf32>
    %cst_499 = arith.constant dense<0.000000e+00> : vector<2x32xf32>
    %475 = tpu.matmul %472, %474, %cst_499 {dimension_numbers = #tpu.dot_dimension_numbers<[1], [0], [0], [1], [0, 0, 1, 1], [], []>} : vector<2x16xf32>, vector<16x32xf32>, vector<2x32xf32> -> vector<2x32xf32>
    %476 = arith.addf %469, %475 : vector<2x32xf32>
    %c0_500 = arith.constant 0 : index
    %c0_501 = arith.constant 0 : index
    %477 = vector.load %arg20[%c0_500, %c0_501] : memref<1x32xf32, #tpu.memory_space<vmem>>, vector<1x32xf32>
    %478 = vector.broadcast %477 : vector<1x32xf32> to vector<2x32xf32>
    %479 = arith.addf %476, %478 : vector<2x32xf32>
    %cst_502 = arith.constant 0.000000e+00 : f32
    %480 = vector.broadcast %cst_502 : f32 to vector<2x32xf32>
    %481 = arith.maximumf %479, %480 : vector<2x32xf32>
    %c0_503 = arith.constant 0 : index
    %c0_504 = arith.constant 0 : index
    %c0_505 = arith.constant 0 : index
    %482 = vector.load %arg21[%c0_503, %c0_504, %c0_505] : memref<8x8x2xf32, #tpu.memory_space<vmem>>, vector<1x8x2xf32>
    %483 = vector.shape_cast %482 : vector<1x8x2xf32> to vector<8x2xf32>
    %cst_506 = arith.constant dense<0.000000e+00> : vector<8x32xf32>
    %484 = tpu.matmul %483, %481, %cst_506 {dimension_numbers = #tpu.dot_dimension_numbers<[1], [0], [0], [1], [0, 0, 1, 1], [], []>} : vector<8x2xf32>, vector<2x32xf32>, vector<8x32xf32> -> vector<8x32xf32>
    %c0_507 = arith.constant 0 : index
    %c0_508 = arith.constant 0 : index
    %c0_509 = arith.constant 0 : index
    %485 = vector.load %arg22[%c0_507, %c0_508, %c0_509] : memref<8x32x256xf32, #tpu.memory_space<vmem>>, vector<1x32x256xf32>
    %486 = vector.shape_cast %485 : vector<1x32x256xf32> to vector<32x256xf32>
    %cst_510 = arith.constant dense<0.000000e+00> : vector<8x256xf32>
    %487 = tpu.matmul %484, %486, %cst_510 {dimension_numbers = #tpu.dot_dimension_numbers<[1], [0], [0], [1], [0, 0, 1, 1], [], []>} : vector<8x32xf32>, vector<32x256xf32>, vector<8x256xf32> -> vector<8x256xf32>
    %c1_511 = arith.constant 1 : index
    %c0_512 = arith.constant 0 : index
    %c0_513 = arith.constant 0 : index
    %488 = vector.load %arg21[%c1_511, %c0_512, %c0_513] : memref<8x8x2xf32, #tpu.memory_space<vmem>>, vector<1x8x2xf32>
    %489 = vector.shape_cast %488 : vector<1x8x2xf32> to vector<8x2xf32>
    %cst_514 = arith.constant dense<0.000000e+00> : vector<8x32xf32>
    %490 = tpu.matmul %489, %481, %cst_514 {dimension_numbers = #tpu.dot_dimension_numbers<[1], [0], [0], [1], [0, 0, 1, 1], [], []>} : vector<8x2xf32>, vector<2x32xf32>, vector<8x32xf32> -> vector<8x32xf32>
    %c1_515 = arith.constant 1 : index
    %c0_516 = arith.constant 0 : index
    %c0_517 = arith.constant 0 : index
    %491 = vector.load %arg22[%c1_515, %c0_516, %c0_517] : memref<8x32x256xf32, #tpu.memory_space<vmem>>, vector<1x32x256xf32>
    %492 = vector.shape_cast %491 : vector<1x32x256xf32> to vector<32x256xf32>
    %cst_518 = arith.constant dense<0.000000e+00> : vector<8x256xf32>
    %493 = tpu.matmul %490, %492, %cst_518 {dimension_numbers = #tpu.dot_dimension_numbers<[1], [0], [0], [1], [0, 0, 1, 1], [], []>} : vector<8x32xf32>, vector<32x256xf32>, vector<8x256xf32> -> vector<8x256xf32>
    %494 = arith.addf %487, %493 : vector<8x256xf32>
    %c2_519 = arith.constant 2 : index
    %c0_520 = arith.constant 0 : index
    %c0_521 = arith.constant 0 : index
    %495 = vector.load %arg21[%c2_519, %c0_520, %c0_521] : memref<8x8x2xf32, #tpu.memory_space<vmem>>, vector<1x8x2xf32>
    %496 = vector.shape_cast %495 : vector<1x8x2xf32> to vector<8x2xf32>
    %cst_522 = arith.constant dense<0.000000e+00> : vector<8x32xf32>
    %497 = tpu.matmul %496, %481, %cst_522 {dimension_numbers = #tpu.dot_dimension_numbers<[1], [0], [0], [1], [0, 0, 1, 1], [], []>} : vector<8x2xf32>, vector<2x32xf32>, vector<8x32xf32> -> vector<8x32xf32>
    %c2_523 = arith.constant 2 : index
    %c0_524 = arith.constant 0 : index
    %c0_525 = arith.constant 0 : index
    %498 = vector.load %arg22[%c2_523, %c0_524, %c0_525] : memref<8x32x256xf32, #tpu.memory_space<vmem>>, vector<1x32x256xf32>
    %499 = vector.shape_cast %498 : vector<1x32x256xf32> to vector<32x256xf32>
    %cst_526 = arith.constant dense<0.000000e+00> : vector<8x256xf32>
    %500 = tpu.matmul %497, %499, %cst_526 {dimension_numbers = #tpu.dot_dimension_numbers<[1], [0], [0], [1], [0, 0, 1, 1], [], []>} : vector<8x32xf32>, vector<32x256xf32>, vector<8x256xf32> -> vector<8x256xf32>
    %501 = arith.addf %494, %500 : vector<8x256xf32>
    %c3_527 = arith.constant 3 : index
    %c0_528 = arith.constant 0 : index
    %c0_529 = arith.constant 0 : index
    %502 = vector.load %arg21[%c3_527, %c0_528, %c0_529] : memref<8x8x2xf32, #tpu.memory_space<vmem>>, vector<1x8x2xf32>
    %503 = vector.shape_cast %502 : vector<1x8x2xf32> to vector<8x2xf32>
    %cst_530 = arith.constant dense<0.000000e+00> : vector<8x32xf32>
    %504 = tpu.matmul %503, %481, %cst_530 {dimension_numbers = #tpu.dot_dimension_numbers<[1], [0], [0], [1], [0, 0, 1, 1], [], []>} : vector<8x2xf32>, vector<2x32xf32>, vector<8x32xf32> -> vector<8x32xf32>
    %c3_531 = arith.constant 3 : index
    %c0_532 = arith.constant 0 : index
    %c0_533 = arith.constant 0 : index
    %505 = vector.load %arg22[%c3_531, %c0_532, %c0_533] : memref<8x32x256xf32, #tpu.memory_space<vmem>>, vector<1x32x256xf32>
    %506 = vector.shape_cast %505 : vector<1x32x256xf32> to vector<32x256xf32>
    %cst_534 = arith.constant dense<0.000000e+00> : vector<8x256xf32>
    %507 = tpu.matmul %504, %506, %cst_534 {dimension_numbers = #tpu.dot_dimension_numbers<[1], [0], [0], [1], [0, 0, 1, 1], [], []>} : vector<8x32xf32>, vector<32x256xf32>, vector<8x256xf32> -> vector<8x256xf32>
    %508 = arith.addf %501, %507 : vector<8x256xf32>
    %c4_535 = arith.constant 4 : index
    %c0_536 = arith.constant 0 : index
    %c0_537 = arith.constant 0 : index
    %509 = vector.load %arg21[%c4_535, %c0_536, %c0_537] : memref<8x8x2xf32, #tpu.memory_space<vmem>>, vector<1x8x2xf32>
    %510 = vector.shape_cast %509 : vector<1x8x2xf32> to vector<8x2xf32>
    %cst_538 = arith.constant dense<0.000000e+00> : vector<8x32xf32>
    %511 = tpu.matmul %510, %481, %cst_538 {dimension_numbers = #tpu.dot_dimension_numbers<[1], [0], [0], [1], [0, 0, 1, 1], [], []>} : vector<8x2xf32>, vector<2x32xf32>, vector<8x32xf32> -> vector<8x32xf32>
    %c4_539 = arith.constant 4 : index
    %c0_540 = arith.constant 0 : index
    %c0_541 = arith.constant 0 : index
    %512 = vector.load %arg22[%c4_539, %c0_540, %c0_541] : memref<8x32x256xf32, #tpu.memory_space<vmem>>, vector<1x32x256xf32>
    %513 = vector.shape_cast %512 : vector<1x32x256xf32> to vector<32x256xf32>
    %cst_542 = arith.constant dense<0.000000e+00> : vector<8x256xf32>
    %514 = tpu.matmul %511, %513, %cst_542 {dimension_numbers = #tpu.dot_dimension_numbers<[1], [0], [0], [1], [0, 0, 1, 1], [], []>} : vector<8x32xf32>, vector<32x256xf32>, vector<8x256xf32> -> vector<8x256xf32>
    %515 = arith.addf %508, %514 : vector<8x256xf32>
    %c5_543 = arith.constant 5 : index
    %c0_544 = arith.constant 0 : index
    %c0_545 = arith.constant 0 : index
    %516 = vector.load %arg21[%c5_543, %c0_544, %c0_545] : memref<8x8x2xf32, #tpu.memory_space<vmem>>, vector<1x8x2xf32>
    %517 = vector.shape_cast %516 : vector<1x8x2xf32> to vector<8x2xf32>
    %cst_546 = arith.constant dense<0.000000e+00> : vector<8x32xf32>
    %518 = tpu.matmul %517, %481, %cst_546 {dimension_numbers = #tpu.dot_dimension_numbers<[1], [0], [0], [1], [0, 0, 1, 1], [], []>} : vector<8x2xf32>, vector<2x32xf32>, vector<8x32xf32> -> vector<8x32xf32>
    %c5_547 = arith.constant 5 : index
    %c0_548 = arith.constant 0 : index
    %c0_549 = arith.constant 0 : index
    %519 = vector.load %arg22[%c5_547, %c0_548, %c0_549] : memref<8x32x256xf32, #tpu.memory_space<vmem>>, vector<1x32x256xf32>
    %520 = vector.shape_cast %519 : vector<1x32x256xf32> to vector<32x256xf32>
    %cst_550 = arith.constant dense<0.000000e+00> : vector<8x256xf32>
    %521 = tpu.matmul %518, %520, %cst_550 {dimension_numbers = #tpu.dot_dimension_numbers<[1], [0], [0], [1], [0, 0, 1, 1], [], []>} : vector<8x32xf32>, vector<32x256xf32>, vector<8x256xf32> -> vector<8x256xf32>
    %522 = arith.addf %515, %521 : vector<8x256xf32>
    %c6_551 = arith.constant 6 : index
    %c0_552 = arith.constant 0 : index
    %c0_553 = arith.constant 0 : index
    %523 = vector.load %arg21[%c6_551, %c0_552, %c0_553] : memref<8x8x2xf32, #tpu.memory_space<vmem>>, vector<1x8x2xf32>
    %524 = vector.shape_cast %523 : vector<1x8x2xf32> to vector<8x2xf32>
    %cst_554 = arith.constant dense<0.000000e+00> : vector<8x32xf32>
    %525 = tpu.matmul %524, %481, %cst_554 {dimension_numbers = #tpu.dot_dimension_numbers<[1], [0], [0], [1], [0, 0, 1, 1], [], []>} : vector<8x2xf32>, vector<2x32xf32>, vector<8x32xf32> -> vector<8x32xf32>
    %c6_555 = arith.constant 6 : index
    %c0_556 = arith.constant 0 : index
    %c0_557 = arith.constant 0 : index
    %526 = vector.load %arg22[%c6_555, %c0_556, %c0_557] : memref<8x32x256xf32, #tpu.memory_space<vmem>>, vector<1x32x256xf32>
    %527 = vector.shape_cast %526 : vector<1x32x256xf32> to vector<32x256xf32>
    %cst_558 = arith.constant dense<0.000000e+00> : vector<8x256xf32>
    %528 = tpu.matmul %525, %527, %cst_558 {dimension_numbers = #tpu.dot_dimension_numbers<[1], [0], [0], [1], [0, 0, 1, 1], [], []>} : vector<8x32xf32>, vector<32x256xf32>, vector<8x256xf32> -> vector<8x256xf32>
    %529 = arith.addf %522, %528 : vector<8x256xf32>
    %c7_559 = arith.constant 7 : index
    %c0_560 = arith.constant 0 : index
    %c0_561 = arith.constant 0 : index
    %530 = vector.load %arg21[%c7_559, %c0_560, %c0_561] : memref<8x8x2xf32, #tpu.memory_space<vmem>>, vector<1x8x2xf32>
    %531 = vector.shape_cast %530 : vector<1x8x2xf32> to vector<8x2xf32>
    %cst_562 = arith.constant dense<0.000000e+00> : vector<8x32xf32>
    %532 = tpu.matmul %531, %481, %cst_562 {dimension_numbers = #tpu.dot_dimension_numbers<[1], [0], [0], [1], [0, 0, 1, 1], [], []>} : vector<8x2xf32>, vector<2x32xf32>, vector<8x32xf32> -> vector<8x32xf32>
    %c7_563 = arith.constant 7 : index
    %c0_564 = arith.constant 0 : index
    %c0_565 = arith.constant 0 : index
    %533 = vector.load %arg22[%c7_563, %c0_564, %c0_565] : memref<8x32x256xf32, #tpu.memory_space<vmem>>, vector<1x32x256xf32>
    %534 = vector.shape_cast %533 : vector<1x32x256xf32> to vector<32x256xf32>
    %cst_566 = arith.constant dense<0.000000e+00> : vector<8x256xf32>
    %535 = tpu.matmul %532, %534, %cst_566 {dimension_numbers = #tpu.dot_dimension_numbers<[1], [0], [0], [1], [0, 0, 1, 1], [], []>} : vector<8x32xf32>, vector<32x256xf32>, vector<8x256xf32> -> vector<8x256xf32>
    %536 = arith.addf %529, %535 : vector<8x256xf32>
    %c0_567 = arith.constant 0 : index
    %c0_568 = arith.constant 0 : index
    %537 = vector.load %arg23[%c0_567, %c0_568] : memref<1x256xf32, #tpu.memory_space<vmem>>, vector<1x256xf32>
    %538 = vector.broadcast %537 : vector<1x256xf32> to vector<8x256xf32>
    %539 = arith.addf %536, %538 : vector<8x256xf32>
    %cst_569 = arith.constant 0.000000e+00 : f32
    %540 = vector.broadcast %cst_569 : f32 to vector<8x256xf32>
    %541 = arith.maximumf %539, %540 : vector<8x256xf32>
    %c0_570 = arith.constant 0 : index
    %c0_571 = arith.constant 0 : index
    %c0_572 = arith.constant 0 : index
    %542 = vector.load %arg24[%c0_570, %c0_571, %c0_572] : memref<3x16x8xf32, #tpu.memory_space<vmem>>, vector<1x16x8xf32>
    %543 = vector.shape_cast %542 : vector<1x16x8xf32> to vector<16x8xf32>
    %cst_573 = arith.constant dense<0.000000e+00> : vector<16x256xf32>
    %544 = tpu.matmul %543, %541, %cst_573 {dimension_numbers = #tpu.dot_dimension_numbers<[1], [0], [0], [1], [0, 0, 1, 1], [], []>} : vector<16x8xf32>, vector<8x256xf32>, vector<16x256xf32> -> vector<16x256xf32>
    %c0_574 = arith.constant 0 : index
    %c0_575 = arith.constant 0 : index
    %c0_576 = arith.constant 0 : index
    %545 = vector.load %arg25[%c0_574, %c0_575, %c0_576] : memref<3x256x256xf32, #tpu.memory_space<vmem>>, vector<1x256x256xf32>
    %546 = vector.shape_cast %545 : vector<1x256x256xf32> to vector<256x256xf32>
    %cst_577 = arith.constant dense<0.000000e+00> : vector<16x256xf32>
    %547 = tpu.matmul %544, %546, %cst_577 {dimension_numbers = #tpu.dot_dimension_numbers<[1], [0], [0], [1], [0, 0, 1, 1], [], []>} : vector<16x256xf32>, vector<256x256xf32>, vector<16x256xf32> -> vector<16x256xf32>
    %c1_578 = arith.constant 1 : index
    %c0_579 = arith.constant 0 : index
    %c0_580 = arith.constant 0 : index
    %548 = vector.load %arg24[%c1_578, %c0_579, %c0_580] : memref<3x16x8xf32, #tpu.memory_space<vmem>>, vector<1x16x8xf32>
    %549 = vector.shape_cast %548 : vector<1x16x8xf32> to vector<16x8xf32>
    %cst_581 = arith.constant dense<0.000000e+00> : vector<16x256xf32>
    %550 = tpu.matmul %549, %541, %cst_581 {dimension_numbers = #tpu.dot_dimension_numbers<[1], [0], [0], [1], [0, 0, 1, 1], [], []>} : vector<16x8xf32>, vector<8x256xf32>, vector<16x256xf32> -> vector<16x256xf32>
    %c1_582 = arith.constant 1 : index
    %c0_583 = arith.constant 0 : index
    %c0_584 = arith.constant 0 : index
    %551 = vector.load %arg25[%c1_582, %c0_583, %c0_584] : memref<3x256x256xf32, #tpu.memory_space<vmem>>, vector<1x256x256xf32>
    %552 = vector.shape_cast %551 : vector<1x256x256xf32> to vector<256x256xf32>
    %cst_585 = arith.constant dense<0.000000e+00> : vector<16x256xf32>
    %553 = tpu.matmul %550, %552, %cst_585 {dimension_numbers = #tpu.dot_dimension_numbers<[1], [0], [0], [1], [0, 0, 1, 1], [], []>} : vector<16x256xf32>, vector<256x256xf32>, vector<16x256xf32> -> vector<16x256xf32>
    %554 = arith.addf %547, %553 : vector<16x256xf32>
    %c2_586 = arith.constant 2 : index
    %c0_587 = arith.constant 0 : index
    %c0_588 = arith.constant 0 : index
    %555 = vector.load %arg24[%c2_586, %c0_587, %c0_588] : memref<3x16x8xf32, #tpu.memory_space<vmem>>, vector<1x16x8xf32>
    %556 = vector.shape_cast %555 : vector<1x16x8xf32> to vector<16x8xf32>
    %cst_589 = arith.constant dense<0.000000e+00> : vector<16x256xf32>
    %557 = tpu.matmul %556, %541, %cst_589 {dimension_numbers = #tpu.dot_dimension_numbers<[1], [0], [0], [1], [0, 0, 1, 1], [], []>} : vector<16x8xf32>, vector<8x256xf32>, vector<16x256xf32> -> vector<16x256xf32>
    %c2_590 = arith.constant 2 : index
    %c0_591 = arith.constant 0 : index
    %c0_592 = arith.constant 0 : index
    %558 = vector.load %arg25[%c2_590, %c0_591, %c0_592] : memref<3x256x256xf32, #tpu.memory_space<vmem>>, vector<1x256x256xf32>
    %559 = vector.shape_cast %558 : vector<1x256x256xf32> to vector<256x256xf32>
    %cst_593 = arith.constant dense<0.000000e+00> : vector<16x256xf32>
    %560 = tpu.matmul %557, %559, %cst_593 {dimension_numbers = #tpu.dot_dimension_numbers<[1], [0], [0], [1], [0, 0, 1, 1], [], []>} : vector<16x256xf32>, vector<256x256xf32>, vector<16x256xf32> -> vector<16x256xf32>
    %561 = arith.addf %554, %560 : vector<16x256xf32>
    %c0_594 = arith.constant 0 : index
    %c0_595 = arith.constant 0 : index
    %562 = vector.load %arg26[%c0_594, %c0_595] : memref<1x256xf32, #tpu.memory_space<vmem>>, vector<1x256xf32>
    %563 = vector.broadcast %562 : vector<1x256xf32> to vector<16x256xf32>
    %564 = arith.addf %561, %563 : vector<16x256xf32>
    %cst_596 = arith.constant 0.000000e+00 : f32
    %565 = vector.broadcast %cst_596 : f32 to vector<16x256xf32>
    %566 = arith.maximumf %564, %565 : vector<16x256xf32>
    %c0_597 = arith.constant 0 : index
    %c0_598 = arith.constant 0 : index
    %c0_599 = arith.constant 0 : index
    %567 = vector.load %arg27[%c0_597, %c0_598, %c0_599] : memref<3x32x16xf32, #tpu.memory_space<vmem>>, vector<1x32x16xf32>
    %568 = vector.shape_cast %567 : vector<1x32x16xf32> to vector<32x16xf32>
    %cst_600 = arith.constant dense<0.000000e+00> : vector<32x256xf32>
    %569 = tpu.matmul %568, %566, %cst_600 {dimension_numbers = #tpu.dot_dimension_numbers<[1], [0], [0], [1], [0, 0, 1, 1], [], []>} : vector<32x16xf32>, vector<16x256xf32>, vector<32x256xf32> -> vector<32x256xf32>
    %c0_601 = arith.constant 0 : index
    %c0_602 = arith.constant 0 : index
    %c0_603 = arith.constant 0 : index
    %570 = vector.load %arg28[%c0_601, %c0_602, %c0_603] : memref<3x256x32xf32, #tpu.memory_space<vmem>>, vector<1x256x32xf32>
    %571 = vector.shape_cast %570 : vector<1x256x32xf32> to vector<256x32xf32>
    %cst_604 = arith.constant dense<0.000000e+00> : vector<32x32xf32>
    %572 = tpu.matmul %569, %571, %cst_604 {dimension_numbers = #tpu.dot_dimension_numbers<[1], [0], [0], [1], [0, 0, 1, 1], [], []>} : vector<32x256xf32>, vector<256x32xf32>, vector<32x32xf32> -> vector<32x32xf32>
    %c1_605 = arith.constant 1 : index
    %c0_606 = arith.constant 0 : index
    %c0_607 = arith.constant 0 : index
    %573 = vector.load %arg27[%c1_605, %c0_606, %c0_607] : memref<3x32x16xf32, #tpu.memory_space<vmem>>, vector<1x32x16xf32>
    %574 = vector.shape_cast %573 : vector<1x32x16xf32> to vector<32x16xf32>
    %cst_608 = arith.constant dense<0.000000e+00> : vector<32x256xf32>
    %575 = tpu.matmul %574, %566, %cst_608 {dimension_numbers = #tpu.dot_dimension_numbers<[1], [0], [0], [1], [0, 0, 1, 1], [], []>} : vector<32x16xf32>, vector<16x256xf32>, vector<32x256xf32> -> vector<32x256xf32>
    %c1_609 = arith.constant 1 : index
    %c0_610 = arith.constant 0 : index
    %c0_611 = arith.constant 0 : index
    %576 = vector.load %arg28[%c1_609, %c0_610, %c0_611] : memref<3x256x32xf32, #tpu.memory_space<vmem>>, vector<1x256x32xf32>
    %577 = vector.shape_cast %576 : vector<1x256x32xf32> to vector<256x32xf32>
    %cst_612 = arith.constant dense<0.000000e+00> : vector<32x32xf32>
    %578 = tpu.matmul %575, %577, %cst_612 {dimension_numbers = #tpu.dot_dimension_numbers<[1], [0], [0], [1], [0, 0, 1, 1], [], []>} : vector<32x256xf32>, vector<256x32xf32>, vector<32x32xf32> -> vector<32x32xf32>
    %579 = arith.addf %572, %578 : vector<32x32xf32>
    %c2_613 = arith.constant 2 : index
    %c0_614 = arith.constant 0 : index
    %c0_615 = arith.constant 0 : index
    %580 = vector.load %arg27[%c2_613, %c0_614, %c0_615] : memref<3x32x16xf32, #tpu.memory_space<vmem>>, vector<1x32x16xf32>
    %581 = vector.shape_cast %580 : vector<1x32x16xf32> to vector<32x16xf32>
    %cst_616 = arith.constant dense<0.000000e+00> : vector<32x256xf32>
    %582 = tpu.matmul %581, %566, %cst_616 {dimension_numbers = #tpu.dot_dimension_numbers<[1], [0], [0], [1], [0, 0, 1, 1], [], []>} : vector<32x16xf32>, vector<16x256xf32>, vector<32x256xf32> -> vector<32x256xf32>
    %c2_617 = arith.constant 2 : index
    %c0_618 = arith.constant 0 : index
    %c0_619 = arith.constant 0 : index
    %583 = vector.load %arg28[%c2_617, %c0_618, %c0_619] : memref<3x256x32xf32, #tpu.memory_space<vmem>>, vector<1x256x32xf32>
    %584 = vector.shape_cast %583 : vector<1x256x32xf32> to vector<256x32xf32>
    %cst_620 = arith.constant dense<0.000000e+00> : vector<32x32xf32>
    %585 = tpu.matmul %582, %584, %cst_620 {dimension_numbers = #tpu.dot_dimension_numbers<[1], [0], [0], [1], [0, 0, 1, 1], [], []>} : vector<32x256xf32>, vector<256x32xf32>, vector<32x32xf32> -> vector<32x32xf32>
    %586 = arith.addf %579, %585 : vector<32x32xf32>
    %c0_621 = arith.constant 0 : index
    %c0_622 = arith.constant 0 : index
    %587 = vector.load %arg29[%c0_621, %c0_622] : memref<1x32xf32, #tpu.memory_space<vmem>>, vector<1x32xf32>
    %588 = vector.broadcast %587 : vector<1x32xf32> to vector<32x32xf32>
    %589 = arith.addf %586, %588 : vector<32x32xf32>
    %cst_623 = arith.constant 5.000000e-01 : f32
    %590 = vector.broadcast %cst_623 : f32 to vector<32x32xf32>
    %591 = arith.mulf %590, %589 : vector<32x32xf32>
    %592 = math.tanh %591 : vector<32x32xf32>
    %cst_624 = arith.constant 1.000000e+00 : f32
    %593 = vector.broadcast %cst_624 : f32 to vector<32x32xf32>
    %594 = arith.addf %592, %593 : vector<32x32xf32>
    %cst_625 = arith.constant 5.000000e-01 : f32
    %595 = vector.broadcast %cst_625 : f32 to vector<32x32xf32>
    %596 = arith.mulf %595, %594 : vector<32x32xf32>
    %c1_626 = arith.constant 1 : index
    %c0_627 = arith.constant 0 : index
    %c0_628 = arith.constant 0 : index
    %597 = vector.load %arg30[%c1_626, %c0_627, %c0_628] : memref<2x32x32xf32, #tpu.memory_space<vmem>>, vector<1x32x32xf32>
    %598 = vector.shape_cast %597 : vector<1x32x32xf32> to vector<32x32xf32>
    %599 = vector.shape_cast %596 : vector<32x32xf32> to vector<1x32x32xf32>
    tpu.vector_store %arg30[%c1_626, %c0_627, %c0_628], %599 {strides = array<i32>} : memref<2x32x32xf32, #tpu.memory_space<vmem>>, vector<1x32x32xf32>,
    return
  }
}

</mosaic_0001>

<bundles_post_ra>
// kernel: vae_forward.1
= control target key start
LH: loop header
LB: loop body
LE: loop exit
PB: predicated region body
PF: predicated region fallthrough
CT: control target
= control target key end

     0   :  { %s9699_s6 = smov 1   ;;  %s9700_s10 = smov 2   ;;  %s11906_s0 = inlined_call_operand.smem [shape: u32[33], index: -1, kind: input, shape index: {}] }
   0x1   :  { %s9749_s5 = sld [smem:[%s11906_s0]]   ;;  %s9701_s14 = smov 3  }
   0x2   :  { %s9754_s9 = sld [smem:[%s11906_s0 + %s9699_s6]]   ;;  %s9702_s18 = smov 4  }
   0x3   :  { %s9759_s13 = sld [smem:[%s11906_s0 + %s9700_s10]]   ;;  %s9703_s22 = smov 5  }
   0x4   :  { %s9764_s17 = sld [smem:[%s11906_s0 + %s9701_s14]]   ;;  %s9704_s26 = smov 6  }
   0x5   :  { %s9769_s21 = sld [smem:[%s11906_s0 + %s9702_s18]]   ;;  %s9705_s30 = smov 7  }
   0x6   :  { %s9774_s25 = sld [smem:[%s11906_s0 + %s9703_s22]]   ;;  %s9706_s4 = smov 8  }
   0x7   :  { %s9779_s29 = sld [smem:[%s11906_s0 + %s9704_s26]]   ;;  %s9707_s10 = smov 9  }
   0x8   :  { %11926 = sst [smem:[#allocation12_spill]] %s9754_s9  ;;  %s9708_s15 = smov 10  }
   0x9   :  { %s9784_s3 = sld [smem:[%s11906_s0 + %s9705_s30]]   ;;  %s9709_s20 = smov 11  }
   0xa   :  { %s9789_s8 = sld [smem:[%s11906_s0 + %s9706_s4]]   ;;  %s9710_s26 = smov 12  }
   0xb   :  { %s9794_s14 = sld [smem:[%s11906_s0 + %s9707_s10]]   ;;  %s9711_s1 = smov 13  }
   0xc   :  { %s9799_s19 = sld [smem:[%s11906_s0 + %s9708_s15]]   ;;  %s9712_s7 = smov 14  }
   0xd   :  { %s9804_s24 = sld [smem:[%s11906_s0 + %s9709_s20]]   ;;  %s9713_s15 = smov 15  }
   0xe   :  { %s9809_s30 = sld [smem:[%s11906_s0 + %s9710_s26]]   ;;  %s9714_s22 = smov 16  }
   0xf   :  { %s9814_s6 = sld [smem:[%s11906_s0 + %s9711_s1]]   ;;  %s9715_s28 = smov 17  }
  0x10   :  { %s9819_s12 = sld [smem:[%s11906_s0 + %s9712_s7]]   ;;  %s9716_s7 = smov 18  }
  0x11   :  { %s9824_s20 = sld [smem:[%s11906_s0 + %s9713_s15]]   ;;  %s9717_s15 = smov 19  }
  0x12   :  { %s9829_s27 = sld [smem:[%s11906_s0 + %s9714_s22]]   ;;  %s9718_s22 = smov 20  }
  0x13   :  { %s9834_s4 = sld [smem:[%s11906_s0 + %s9715_s28]]   ;;  %s9719_s28 = smov 21  }
  0x15   :  { %11927 = sst [smem:[#allocation13_spill]] %s9814_s6 }
  0x16   :  { %s9839_s6 = sld [smem:[%s11906_s0 + %s9716_s7]]   ;;  %s9720_s7 = smov 22  }
  0x17   :  { %11928 = sst [smem:[#allocation14_spill]] %s9824_s20 }
  0x18   :  { %11929 = sst [smem:[#allocation15_spill]] %s9829_s27 }
  0x19   :  { %11930 = sst [smem:[#allocation16_spill]] %s9834_s4 }
  0x1a   :  { %s9844_s20 = sld [smem:[%s11906_s0 + %s9717_s15]]   ;;  %s9721_s15 = smov 23  }
  0x1b   :  { %s9849_s27 = sld [smem:[%s11906_s0 + %s9718_s22]]   ;;  %s9722_s22 = smov 24  }
  0x1c   :  { %11931 = sst [smem:[#allocation17_spill]] %s9839_s6 }
  0x1d   :  { %s9854_s4 = sld [smem:[%s11906_s0 + %s9719_s28]]   ;;  %s9723_s28 = smov 25  }
  0x1e   :  { %s9859_s6 = sld [smem:[%s11906_s0 + %s9720_s7]]   ;;  %s9724_s7 = smov 26  }
  0x20   :  { %11932 = sst [smem:[#allocation18_spill]] %s9844_s20 }
  0x21   :  { %11933 = sst [smem:[#allocation19_spill]] %s9849_s27 }
  0x22   :  { %s9864_s20 = sld [smem:[%s11906_s0 + %s9721_s15]]   ;;  %s9725_s15 = smov 27  }
  0x23   :  { %11934 = sst [smem:[#allocation20_spill]] %s9854_s4 }
  0x24   :  { %11935 = sst [smem:[#allocation21_spill]] %s9859_s6 }
  0x25   :  { %s9869_s27 = sld [smem:[%s11906_s0 + %s9722_s22]]   ;;  %s9726_s22 = smov 28  }
  0x26   :  { %s9874_s4 = sld [smem:[%s11906_s0 + %s9723_s28]]   ;;  %s9727_s28 = smov 29  }
  0x27   :  { %s9879_s6 = sld [smem:[%s11906_s0 + %s9724_s7]]   ;;  %s9728_s7 = smov 30  }
  0x28   :  { %11936 = sst [smem:[#allocation22_spill]] %s9864_s20 }
  0x29   :  { %s9884_s20 = sld [smem:[%s11906_s0 + %s9725_s15]]   ;;  %s9729_s15 = smov 31  }
  0x2a   :  { %s9894_s9 = sld [smem:[%s11906_s0 + %s9727_s28]]  }
  0x2b   :  { %11937 = sst [smem:[#allocation23_spill]] %s9869_s27 }
  0x2c   :  { %s9889_s27 = sld [smem:[%s11906_s0 + %s9726_s22]]   ;;  %s9730_s22 = smov 32  }
  0x2d   :  { %11938 = sst [smem:[#allocation24_spill]] %s9879_s6 }
  0x2e   :  { %s9899_s6 = sld [smem:[%s11906_s0 + %s9728_s7]]  }
  0x2f   :  { %11939 = sst [smem:[#allocation25_spill]] %s9884_s20 }
  0x30   :  { %s9904_s20 = sld [smem:[%s11906_s0 + %s9729_s15]]  }
  0x32   :  { %11940 = sst [smem:[#allocation26_spill]] %s9889_s27 }
  0x33   :  { %s9909_s27 = sld [smem:[%s11906_s0 + %s9730_s22]]  }
  0x34   :  { %11941 = sst [smem:[#allocation27_spill]] %s9899_s6 }
  0x35   :  { %71 = vsyncpa [#allocation3], 0 }
  0x36   :  { %72 = vsyncpa [#allocation4], 0 }
  0x37   :  { %73 = vsyncpa [#allocation7], 0  ;;  %s128_s28 = sshll.u32 %s9874_s4, 4  ;;  %s9731_s1 = smov [#allocation2]   ;;  %s129_s28 = int_to_ptr.hbm [resolvable:$true] %s128_s28 }
  0x38   :  { %s130_s2 = sshll.u32 %s9731_s1, 4  ;;  %s9597_s7 = sshra.s32 %s129_s28, 4  ;;  %s131_s2 = int_to_ptr.vmem [resolvable:$true] %s130_s2  ;;  %s9598_s7 = int_to_ptr.hbm [resolvable:$true] %s9597_s7 }
  0x39   :  { %s9599_s10 = scalar_lea.hbm %s9598_s7, 1536  ;;  %s9601_s11 = scalar_lea.hbm %s9874_s4, 1536 }
  0x3a   :  { %p9600_p0 = scmp.ne.s32.totalorder %s9598_s7, %s9599_s10  ;;  %p9602_p1 = scmp.lt.s32.totalorder %s9598_s7, %s9874_s4 }
  0x3b   :  { %p9603_p2 = scmp.lt.s32.totalorder %s9601_s11, %s9599_s10 }
  0x3d   :  { %p9604_p3 = por %p9603_p2, %p9602_p1 }
  0x3f   :  { %p9605_p4 = pnand %p9604_p3, %p9600_p0 }
  0x41   :  { %9608 = shalt.err (!%p9605_p4)
}
  0x42   :  { %s9732_s0 = smov 256   ;;  %s9733_s15 = smov 16  }
  0x43   :  { %136 = dma.hbm_to_vmem [thread:$0]  %s129_s28, 24576, %s131_s2, [#allocation3], %s9732_s0, %s9732_s0, %s9733_s15  }
  0x44   :  { %9693 = dma.done.wait [#allocation3], 24576  }
  0x45   :  { %9694 = vsyncadd [#allocation3], 4294942720  ;;  %v152_v0 = vld [vmem:[%s9749_s5 + $0x18] sm:$0xff]  ;;  %v151_v1 = vld [vmem:[%s9749_s5 + $0x10] sm:$0xff]  ;;  %vm155_vm0 = vcmask 261120   ;;  %vm450_vm1 = vcmask 130048  }
  0x46   :  { %214 = vmatpush.msra.mxu1 %v152_v0  ;;  %174 = vmatpush.msra.mxu0 %v152_v0  ;;  %v150_v2 = vld [vmem:[%s9749_s5 + $0x8] sm:$0xff]  ;;  %v149_v3 = vld [vmem:[%s9749_s5] sm:$0xff]  ;;  %v8219_v4 = vld [vmem:[%s9764_s17 + $0x70] sm:$0xff]  ;;  %vm1031_vm2 = vcmask 64512   ;;  %vm1990_vm3 = vcmask 1041408   ;;  %vm1986_vm4 = vcmask 15360  }
  0x47   :  { %v8209_v5 = vld [vmem:[%s9759_s13 + $0x10] sm:$0xff]  ;;  %v153_v6 = vld [vmem:[%s9759_s13] sm:$0xff]  ;;  %v8220_v7 = vld [vmem:[%s9764_s17 + $0x78] sm:$0xff]  ;;  %252 = vmatpush.msra.mxu2 %v8219_v4  ;;  %s11942_s4 = sld [smem:[#allocation12_spill]]  ;;  %s11924_s22 = smov 4   ;;  %vm2168_vm5 = vcmask 24576  }
  0x48   :  { %215 = vmatpush.msra.mxu1 %v151_v1  ;;  %175 = vmatpush.msra.mxu0 %v151_v1  ;;  %v8217_v8 = vld [vmem:[%s9764_s17 + $0x60] sm:$0xff]  ;;  %v8218_v9 = vld [vmem:[%s9764_s17 + $0x68] sm:$0xff]  ;;  %v8215_v10 = vld [vmem:[%s9764_s17 + $0x50] sm:$0xff]  ;;  %s11943_s16 = sld [smem:[#allocation13_spill]]  ;;  %s11922_s26 = smov 124   ;;  %vm2182_vm6 = vcmask 1043456  }
  0x49   :  { %275 = vmatpush.msra.mxu3 %v8220_v7  ;;  %v8216_v11 = vld [vmem:[%s9764_s17 + $0x58] sm:$0xff]  ;;  %253 = vmatpush.msra.mxu2 %v8217_v8  ;;  %v154_v13 = vld [vmem:[%s9759_s13 + $0x8] sm:$0xff]  ;;  %v8213_v14 = vld [vmem:[%s9764_s17 + $0x40] sm:$0xff]  ;;  %s11944_s18 = sld [smem:[#allocation14_spill]]  ;;  %vm2178_vm7 = vcmask 31744   ;;  %vm2236_vm8 = vcmask 1040384  }
  0x4a   :  { %216 = vmatpush.msra.mxu1 %v150_v2  ;;  %176 = vmatpush.msra.mxu0 %v150_v2  ;;  %v8210_v12 = vld [vmem:[%s9759_s13 + $0x18] sm:$0xff]  ;;  %v8214_v15 = vld [vmem:[%s9764_s17 + $0x48] sm:$0xff]  ;;  %v191_v16 = vld [vmem:[%s9764_s17 + $0x30] sm:$0xff]  ;;  %s11945_s23 = sld [smem:[#allocation15_spill]] }
  0x4b   :  { %276 = vmatpush.msra.mxu3 %v8218_v9  ;;  %254 = vmatpush.msra.mxu2 %v8215_v10  ;;  %v192_v17 = vld [vmem:[%s9764_s17 + $0x38] sm:$0xff]  ;;  %v189_v18 = vld [vmem:[%s9764_s17 + $0x20] sm:$0xff]  ;;  %v190_v19 = vld [vmem:[%s9764_s17 + $0x28] sm:$0xff]  ;;  %s11946_s28 = sld [smem:[#allocation18_spill]] }
  0x4c   :  { %217 = vmatpush.msra.mxu1 %v149_v3  ;;  %177 = vmatpush.msra.mxu0 %v149_v3  ;;  %v187_v20 = vld [vmem:[%s9764_s17 + $0x10] sm:$0xff]  ;;  %v188_v21 = vld [vmem:[%s9764_s17 + $0x18] sm:$0xff]  ;;  %v185_v22 = vld [vmem:[%s9764_s17] sm:$0xff]  ;;  %s11947_s1 = sld [smem:[#allocation16_spill]] }
  0x4d   :  { %8211 = vmatmul.msk.f32.vlgmr.msra.gmra.mxu1 %vm155_vm0, %v8209_v5  ;;  %8207 = vmatmul.msk.f32.vlgmr.msra.gmra.mxu0 %vm155_vm0, %v153_v6  ;;  %v186_v23 = vld [vmem:[%s9764_s17 + $0x8] sm:$0xff]  ;;  %v8229_v28 = vld [vmem:[%s9759_s13 + $0x20] sm:$0xff]  ;;  %v8239_v30 = vld [vmem:[%s9764_s17 + $0xb0] sm:$0xff]  ;;  %s11948_s2 = sld [smem:[#allocation17_spill]] }
  0x4e   :  { %277 = vmatpush.msra.mxu3 %v8216_v11  ;;  %255 = vmatpush.msra.mxu2 %v8213_v14  ;;  %v8230_v29 = vld [vmem:[%s9759_s13 + $0x28] sm:$0xff]  ;;  %v8240_v31 = vld [vmem:[%s9764_s17 + $0xb8] sm:$0xff]  ;;  %v8237_v32 = vld [vmem:[%s9764_s17 + $0xa0] sm:$0xff]  ;;  %s11949_s7 = sld [smem:[#allocation21_spill]] }
  0x4f   :  { %304 = vmatpush.msrb.mxu0 %v191_v16  ;;  %327 = vmatpush.msrb.mxu1 %v192_v17  ;;  %v8238_v33 = vld [vmem:[%s9764_s17 + $0xa8] sm:$0xff]  ;;  %v8235_v34 = vld [vmem:[%s9764_s17 + $0x90] sm:$0xff]  ;;  %v8236_v35 = vld [vmem:[%s9764_s17 + $0x98] sm:$0xff]  ;;  %s11950_s10 = sld [smem:[#allocation19_spill]] }
  0x50   :  { %278 = vmatpush.msra.mxu3 %v8214_v15  ;;  %359 = vmatpush.msrb.mxu2 %v152_v0  ;;  %v8233_v36 = vld [vmem:[%s9764_s17 + $0x80] sm:$0xff]  ;;  %v8234_v37 = vld [vmem:[%s9764_s17 + $0x88] sm:$0xff]  ;;  %v8280_v48 = vld [vmem:[%s9779_s29 + $0x2f0] sm:$0xff]  ;;  %s11951_s11 = sld [smem:[#allocation20_spill]] }
  0x51   :  { %305 = vmatpush.msrb.mxu0 %v189_v18  ;;  %328 = vmatpush.msrb.mxu1 %v190_v19  ;;  %v8278_v49 = vld [vmem:[%s9779_s29 + $0x2e0] sm:$0xff]  ;;  %v8276_v50 = vld [vmem:[%s9779_s29 + $0x2d0] sm:$0xff]  ;;  %s11952_s0 = sld [smem:[#allocation22_spill]] }
  0x52   :  { %360 = vmatpush.msrb.mxu2 %v151_v1  ;;  %397 = vmatpush.msrb.mxu3 %v8239_v30  ;;  %v435_v52 = vld [vmem:[%s9769_s21] sm:$0x3]  ;;  %v8272_v56 = vld [vmem:[%s9779_s29 + $0x2b0] sm:$0xff]  ;;  %v8277_v30 = vld [vmem:[%s9779_s29 + $0x2d8] sm:$0xff]  ;;  %s11953_s15 = sld [smem:[#allocation23_spill]] }
  0x53   :  { %306 = vmatpush.msrb.mxu0 %v187_v20  ;;  %329 = vmatpush.msrb.mxu1 %v188_v21  ;;  %v8274_v53 = vld [vmem:[%s9779_s29 + $0x2c0] sm:$0xff]  ;;  %v438_v59 = vperm.slane %v435_v52, 1  ;;  %v8268_v63 = vld [vmem:[%s9779_s29 + $0x290] sm:$0xff]  ;;  %v437_v6 = vperm.slane %v435_v52, 0  ;;  %v8247_v21 = vld [vmem:[%s9774_s25 + $0x8] sm:$0xff]  ;;  %s11956_s6 = sld [smem:[#allocation25_spill]] }
  0x54   :  { %361 = vmatpush.msrb.mxu2 %v150_v2  ;;  %398 = vmatpush.msrb.mxu3 %v8237_v32  ;;  %v8270_v61 = vld [vmem:[%s9779_s29 + $0x2a0] sm:$0xff]  ;;  %v8264_v9 = vld [vmem:[%s9779_s29 + $0x270] sm:$0xff]  ;;  %v8301_v52 = vld [vmem:[%s9779_s29 + $0x398] sm:$0xff] }
  0x55   :  { %8212 = vmatmul.msk.f32.gmra.mxu1 %vm155_vm0, %v8210_v12  ;;  %8208 = vmatmul.msk.f32.gmra.mxu0 %vm155_vm0, %v154_v13  ;;  %v8312_v12 = vld [vmem:[%s9779_s29 + $0x3f0] sm:$0xff]  ;;  %v8262_v13 = vld [vmem:[%s9779_s29 + $0x260] sm:$0xff] }
  0x56   :  { %307 = vmatpush.msrb.mxu0 %v185_v22  ;;  %330 = vmatpush.msrb.mxu1 %v186_v23  ;;  %v449_v16 = vld [vmem:[%s9774_s25] sm:$0xff]  ;;  %v8260_v19 = vld [vmem:[%s9779_s29 + $0x250] sm:$0xff]  ;;  %v8281_v23 = vld [vmem:[%s9779_s29 + $0x2f8] sm:$0xff] }
  0x57   :  { %362 = vmatpush.msrb.mxu2 %v149_v3  ;;  %399 = vmatpush.msrb.mxu3 %v8235_v34  ;;  %v8266_v3 = vld [vmem:[%s9779_s29 + $0x280] sm:$0xff]  ;;  %v8308_v22 = vld [vmem:[%s9779_s29 + $0x3d0] sm:$0xff]  ;;  %v8275_v34 = vld [vmem:[%s9779_s29 + $0x2c8] sm:$0xff] }
  0x58   :  { %420 = vmatpush.msra.mxu0 %v8240_v31  ;;  %v8310_v18 = vld [vmem:[%s9779_s29 + $0x3e0] sm:$0xff]  ;;  %v8311_v31 = vld [vmem:[%s9779_s29 + $0x3e8] sm:$0xff] }
  0x59   :  { %400 = vmatpush.msrb.mxu3 %v8233_v36  ;;  %v8302_v32 = vld [vmem:[%s9779_s29 + $0x3a0] sm:$0xff]  ;;  %v8309_v36 = vld [vmem:[%s9779_s29 + $0x3d8] sm:$0xff] }
  0x5a   :  { %421 = vmatpush.msra.mxu0 %v8238_v33  ;;  %v8254_v33 = vld [vmem:[%s9779_s29 + $0x220] sm:$0xff] }
  0x5c   :  { %422 = vmatpush.msra.mxu0 %v8236_v35  ;;  %v8300_v35 = vld [vmem:[%s9779_s29 + $0x390] sm:$0xff] }
  0x5e   :  { %423 = vmatpush.msra.mxu0 %v8234_v37  ;;  %v8273_v37 = vld [vmem:[%s9779_s29 + $0x2b8] sm:$0xff] }
  0xca   :  { %v219_v24 = vpop.f32.mrf.mxu1  ;;  %v179_v25 = vpop.f32.mrf.mxu0 }
  0xcb   :  { %8221 = vmatmul.msk.f32.vlgmr.msra.gmra.mxu2 %vm155_vm0, %v219_v24  ;;  %8223 = vmatmul.msk.f32.vlgmr.msra.gmra.mxu3 %vm155_vm0, %v219_v24  ;;  %v8258_v24 = vld [vmem:[%s9779_s29 + $0x240] sm:$0xff] }
  0xcc   :  { %8225 = vmatmul.msk.f32.vlgmr.msrb.gmra.mxu0 %vm155_vm0, %v179_v25  ;;  %8227 = vmatmul.msk.f32.vlgmr.msrb.gmra.mxu1 %vm155_vm0, %v179_v25  ;;  %v8306_v25 = vld [vmem:[%s9779_s29 + $0x3c0] sm:$0xff] }
  0xcd   :  { %668 = vmatpush.msrb.mxu0 %v8280_v48  ;;  %v8303_v48 = vld [vmem:[%s9779_s29 + $0x3a8] sm:$0xff] }
  0xcf   :  { %669 = vmatpush.msrb.mxu0 %v8278_v49  ;;  %v8267_v49 = vld [vmem:[%s9779_s29 + $0x288] sm:$0xff] }
  0xd1   :  { %670 = vmatpush.msrb.mxu0 %v8276_v50  ;;  %v522_v50 = vld [vmem:[%s9779_s29 + $0xe0] sm:$0xff] }
  0xd2   :  { %v222_v26 = vpop.f32.mrf.mxu1  ;;  %v182_v27 = vpop.f32.mrf.mxu0 }
  0xd3   :  { %8222 = vmatmul.msk.f32.gmra.mxu2 %vm155_vm0, %v222_v26  ;;  %8224 = vmatmul.msk.f32.gmra.mxu3 %vm155_vm0, %v222_v26  ;;  %v8279_v26 = vld [vmem:[%s9779_s29 + $0x2e8] sm:$0xff] }
  0xd4   :  { %8226 = vmatmul.msk.f32.gmra.mxu0 %vm155_vm0, %v182_v27  ;;  %8228 = vmatmul.msk.f32.gmra.mxu1 %vm155_vm0, %v182_v27  ;;  %v8313_v27 = vld [vmem:[%s9779_s29 + $0x3f8] sm:$0xff] }
  0xd5   :  { %671 = vmatpush.msrb.mxu0 %v8274_v53  ;;  %v8265_v53 = vld [vmem:[%s9779_s29 + $0x278] sm:$0xff] }
  0xd7   :  { %672 = vmatpush.msrb.mxu0 %v8272_v56  ;;  %v8299_v56 = vld [vmem:[%s9779_s29 + $0x388] sm:$0xff] }
  0xd9   :  { %673 = vmatpush.msrb.mxu0 %v8270_v61  ;;  %v8261_v61 = vld [vmem:[%s9779_s29 + $0x258] sm:$0xff] }
  0xdb   :  { %8231 = vmatmul.msk.f32.vlgmr.msrb.gmra.mxu2 %vm155_vm0, %v8229_v28  ;;  %674 = vmatpush.msrb.mxu0 %v8268_v63  ;;  %v8304_v28 = vld [vmem:[%s9779_s29 + $0x3b0] sm:$0xff]  ;;  %v8286_v63 = vld [vmem:[%s9779_s29 + $0x320] sm:$0xff] }
  0xdd   :  { %675 = vmatpush.msrb.mxu0 %v8266_v3  ;;  %v8284_v3 = vld [vmem:[%s9779_s29 + $0x310] sm:$0xff] }
  0xdf   :  { %676 = vmatpush.msrb.mxu0 %v8264_v9  ;;  %v8291_v9 = vld [vmem:[%s9779_s29 + $0x348] sm:$0xff] }
  0xe1   :  { %677 = vmatpush.msrb.mxu0 %v8262_v13  ;;  %v8289_v13 = vld [vmem:[%s9779_s29 + $0x338] sm:$0xff] }
  0xe3   :  { %8232 = vmatmul.msk.f32.gmra.mxu2 %vm155_vm0, %v8230_v29  ;;  %678 = vmatpush.msrb.mxu0 %v8260_v19  ;;  %v8256_v29 = vld [vmem:[%s9779_s29 + $0x230] sm:$0xff] }
  0xe4   :  { %v508_v19 = vld [vmem:[%s9779_s29 + $0x70] sm:$0xff] }
  0xe5   :  { %679 = vmatpush.msrb.mxu0 %v8258_v24  ;;  %v525_v24 = vld [vmem:[%s9779_s29 + $0xf8] sm:$0xff] }
  0xe7   :  { %680 = vmatpush.msrb.mxu0 %v8256_v29  ;;  %v548_v29 = vld [vmem:[%s9779_s29 + $0x1b0] sm:$0xff] }
  0xe9   :  { %681 = vmatpush.msrb.mxu0 %v8254_v33  ;;  %v546_v33 = vld [vmem:[%s9779_s29 + $0x1a0] sm:$0xff] }
 0x149   :  { %v309_v42 = vpop.f32.mrf.mxu0  ;;  %v332_v45 = vpop.f32.mrf.mxu1 }
 0x14e   :  { %v257_v38 = vpop.f32.mrf.mxu2  ;;  %v280_v43 = vpop.f32.mrf.mxu3 }
 0x14f   :  { %v333_v54 = vadd.f32 %v332_v45, %v280_v43  ;;  %v310_v0 = vadd.f32 %v309_v42, %v257_v38  ;;  %v8252_v38 = vld [vmem:[%s9779_s29 + $0x210] sm:$0xff]  ;;  %v8250_v42 = vld [vmem:[%s9779_s29 + $0x200] sm:$0xff]  ;;  %v8269_v45 = vld [vmem:[%s9779_s29 + $0x298] sm:$0xff] }
 0x150   :  { %v8296_v43 = vld [vmem:[%s9779_s29 + $0x370] sm:$0xff]  ;;  %682 = vmatpush.msrb.mxu0 %v8252_v38  ;;  %v553_v38 = vld [vmem:[%s9779_s29 + $0x1d8] sm:$0xff] }
 0x151   :  { %v312_v44 = vpop.f32.mrf.mxu0  ;;  %v335_v51 = vpop.f32.mrf.mxu1 }
 0x152   :  { %683 = vmatpush.msrb.mxu0 %v8250_v42  ;;  %v515_v42 = vld [vmem:[%s9779_s29 + $0xa8] sm:$0xff] }
 0x156   :  { %v260_v39 = vpop.f32.mrf.mxu2  ;;  %v283_v46 = vpop.f32.mrf.mxu3 }
 0x157   :  { %v336_v57 = vadd.f32 %v335_v51, %v283_v46  ;;  %v313_v4 = vadd.f32 %v312_v44, %v260_v39  ;;  %v8298_v39 = vld [vmem:[%s9779_s29 + $0x380] sm:$0xff]  ;;  %v8305_v44 = vld [vmem:[%s9779_s29 + $0x3b8] sm:$0xff]  ;;  %v524_v46 = vld [vmem:[%s9779_s29 + $0xf0] sm:$0xff] }
 0x158   :  { %v8292_v51 = vld [vmem:[%s9779_s29 + $0x350] sm:$0xff] }
 0x15e   :  { %v364_v40 = vpop.f32.mrf.mxu2 }
 0x15f   :  { %8241 = vmatmul.msk.f32.vlgmr.msrb.gmra.mxu3 %vm155_vm0, %v364_v40  ;;  %8243 = vmatmul.msk.f32.vlgmr.msra.gmra.mxu0 %vm155_vm0, %v364_v40  ;;  %v8307_v40 = vld [vmem:[%s9779_s29 + $0x3c8] sm:$0xff] }
 0x160   :  { %748 = vmatpush.msra.mxu0 %v524_v46  ;;  %v538_v46 = vld [vmem:[%s9779_s29 + $0x160] sm:$0xff] }
 0x162   :  { %749 = vmatpush.msra.mxu0 %v522_v50  ;;  %v545_v50 = vld [vmem:[%s9779_s29 + $0x198] sm:$0xff] }
 0x166   :  { %v367_v41 = vpop.f32.mrf.mxu2 }
 0x167   :  { %8242 = vmatmul.msk.f32.gmra.mxu3 %vm155_vm0, %v367_v41  ;;  %8244 = vmatmul.msk.f32.gmra.mxu0 %vm155_vm0, %v367_v41  ;;  %v8271_v41 = vld [vmem:[%s9779_s29 + $0x2a8] sm:$0xff] }
 0x1dc   :  { %v425_v47 = vpop.f32.mrf.mxu0 }
 0x1dd   :  { %v432_v58 = vadd.f32 %v425_v47, %v333_v54  ;;  %v8294_v47 = vld [vmem:[%s9779_s29 + $0x360] sm:$0xff]  ;;  %v520_v54 = vld [vmem:[%s9779_s29 + $0xd0] sm:$0xff] }
 0x1de   :  { %750 = vmatpush.msra.mxu0 %v520_v54  ;;  %v543_v54 = vld [vmem:[%s9779_s29 + $0x188] sm:$0xff] }
 0x1df   :  { %v442_v1 = vadd.f32 %v438_v59, %v432_v58  ;;  %v518_v58 = vld [vmem:[%s9779_s29 + $0xc0] sm:$0xff] }
 0x1e0   :  { %751 = vmatpush.msra.mxu0 %v518_v58  ;;  %v541_v58 = vld [vmem:[%s9779_s29 + $0x178] sm:$0xff] }
 0x1e1   :  { %v9979_v11 = vmax.f32 %v442_v1, 0.0  ;;  %v8259_v1 = vld [vmem:[%s9779_s29 + $0x248] sm:$0xff] }
 0x1e2   :  { %v402_v55 = vpop.f32.mrf.mxu3 }
 0x1e3   :  { %v431_v5 = vadd.f32 %v402_v55, %v310_v0  ;;  %v8290_v55 = vld [vmem:[%s9779_s29 + $0x340] sm:$0xff]  ;;  %v8295_v0 = vld [vmem:[%s9779_s29 + $0x368] sm:$0xff] }
 0x1e4   :  { %v428_v60 = vpop.f32.mrf.mxu0 }
 0x1e5   :  { %v434_v62 = vadd.f32 %v428_v60, %v336_v57  ;;  %v441_v14 = vadd.f32 %v437_v6, %v431_v5  ;;  %v8263_v57 = vld [vmem:[%s9779_s29 + $0x268] sm:$0xff]  ;;  %v8297_v60 = vld [vmem:[%s9779_s29 + $0x378] sm:$0xff] }
 0x1e6   :  { %v8257_v5 = vld [vmem:[%s9779_s29 + $0x238] sm:$0xff] }
 0x1e7   :  { %v444_v2 = vadd.f32 %v438_v59, %v434_v62  ;;  %v9992_v20 = vmax.f32 %v441_v14, 0.0  ;;  %v8288_v59 = vld [vmem:[%s9779_s29 + $0x330] sm:$0xff]  ;;  %v510_v14 = vld [vmem:[%s9779_s29 + $0x80] sm:$0xff] }
 0x1e8   :  { %v516_v62 = vld [vmem:[%s9779_s29 + $0xb0] sm:$0xff] }
 0x1e9   :  { %v9975_v7 = vmax.f32 %v444_v2, 0.0  ;;  %v514_v2 = vld [vmem:[%s9779_s29 + $0xa0] sm:$0xff]  ;;  %752 = vmatpush.msra.mxu0 %v516_v62  ;;  %v539_v62 = vld [vmem:[%s9779_s29 + $0x168] sm:$0xff] }
 0x1ea   :  { %v405_v8 = vpop.f32.mrf.mxu3 }
 0x1eb   :  { %v433_v10 = vadd.f32 %v405_v8, %v313_v4  ;;  %488 = vmatpush.msra.mxu2 %v9975_v7  ;;  %v8293_v4 = vld [vmem:[%s9779_s29 + $0x358] sm:$0xff]  ;;  %v8282_v8 = vld [vmem:[%s9779_s29 + $0x300] sm:$0xff]  ;;  %753 = vmatpush.msra.mxu0 %v514_v2 }
 0x1ec   :  { %v537_v2 = vld [vmem:[%s9779_s29 + $0x158] sm:$0xff] }
 0x1ed   :  { %v443_v15 = vadd.f32 %v437_v6, %v433_v10  ;;  %489 = vmatpush.msra.mxu2 %v9979_v11  ;;  %v512_v6 = vld [vmem:[%s9779_s29 + $0x90] sm:$0xff] }
 0x1ee   :  { %8246 = vmatmul.msk.f32.vlgmr.msra.gmra.mxu2 %vm450_vm1, %v449_v16  ;;  %v556_v10 = vld [vmem:[%s9779_s29 + $0x1f0] sm:$0xff]  ;;  %754 = vmatpush.msra.mxu0 %v512_v6  ;;  %v499_v6 = vld [vmem:[%s9779_s29 + $0x28] sm:$0xff] }
 0x1ef   :  { %v9986_v17 = vmax.f32 %v443_v15, 0.0  ;;  %688 = vmatpush.msrb.mxu2 %v8312_v12  ;;  %v8255_v12 = vld [vmem:[%s9779_s29 + $0x228] sm:$0xff]  ;;  %v554_v15 = vld [vmem:[%s9779_s29 + $0x1e0] sm:$0xff] }
 0x1f0   :  { %755 = vmatpush.msra.mxu0 %v510_v14  ;;  %v527_v14 = vld [vmem:[%s9779_s29 + $0x108] sm:$0xff] }
 0x1f1   :  { %468 = vmatpush.msra.mxu1 %v9986_v17  ;;  %577 = vmatpush.msra.mxu3 %v9986_v17 }
 0x1f2   :  { %689 = vmatpush.msrb.mxu2 %v8310_v18  ;;  %v8287_v18 = vld [vmem:[%s9779_s29 + $0x328] sm:$0xff]  ;;  %756 = vmatpush.msra.mxu0 %v508_v19 }
 0x1f3   :  { %469 = vmatpush.msra.mxu1 %v9992_v20  ;;  %578 = vmatpush.msra.mxu3 %v9992_v20 }
 0x1f4   :  { %8245 = vmatmul.msk.f32.vlgmr.msra.gmra.mxu1 %vm450_vm1, %v449_v16  ;;  %8248 = vmatmul.msk.f32.vlgmr.msra.gmra.mxu3 %vm450_vm1, %v8247_v21  ;;  %v8253_v16 = vld [vmem:[%s9779_s29 + $0x218] sm:$0xff] }
 0x1f5   :  { %597 = vmatpush.msrb.mxu1 %v9975_v7  ;;  %690 = vmatpush.msrb.mxu2 %v8308_v22  ;;  %v8251_v22 = vld [vmem:[%s9779_s29 + $0x208] sm:$0xff] }
 0x1f6   :  { %708 = vmatpush.msrb.mxu3 %v8281_v23  ;;  %v8285_v23 = vld [vmem:[%s9779_s29 + $0x318] sm:$0xff] }
 0x1f7   :  { %598 = vmatpush.msrb.mxu1 %v9979_v11  ;;  %691 = vmatpush.msrb.mxu2 %v8306_v25  ;;  %v550_v25 = vld [vmem:[%s9779_s29 + $0x1c0] sm:$0xff] }
 0x1f8   :  { %709 = vmatpush.msrb.mxu3 %v8279_v26  ;;  %v506_v26 = vld [vmem:[%s9779_s29 + $0x60] sm:$0xff] }
 0x1f9   :  { %728 = vmatpush.msra.mxu1 %v8313_v27  ;;  %692 = vmatpush.msrb.mxu2 %v8304_v28  ;;  %v8283_v27 = vld [vmem:[%s9779_s29 + $0x308] sm:$0xff] }
 0x1fa   :  { %710 = vmatpush.msrb.mxu3 %v8277_v30  ;;  %v523_v28 = vld [vmem:[%s9779_s29 + $0xe8] sm:$0xff]  ;;  %v557_v30 = vld [vmem:[%s9779_s29 + $0x1f8] sm:$0xff]  ;;  %757 = vmatpush.msra.mxu0 %v506_v26 }
 0x1fb   :  { %729 = vmatpush.msra.mxu1 %v8311_v31  ;;  %693 = vmatpush.msrb.mxu2 %v8302_v32  ;;  %v521_v31 = vld [vmem:[%s9779_s29 + $0xd8] sm:$0xff]  ;;  %v504_v32 = vld [vmem:[%s9779_s29 + $0x50] sm:$0xff] }
 0x1fc   :  { %8249 = vmatmul.msk.f32.vlgmr.msrb.gmra.mxu1 %vm450_vm1, %v8247_v21  ;;  %711 = vmatpush.msrb.mxu3 %v8275_v34  ;;  %v552_v21 = vld [vmem:[%s9779_s29 + $0x1d0] sm:$0xff]  ;;  %v555_v34 = vld [vmem:[%s9779_s29 + $0x1e8] sm:$0xff] }
 0x1fd   :  { %694 = vmatpush.msrb.mxu2 %v8300_v35  ;;  %730 = vmatpush.msra.mxu1 %v8309_v36  ;;  %v519_v35 = vld [vmem:[%s9779_s29 + $0xc8] sm:$0xff]  ;;  %v502_v36 = vld [vmem:[%s9779_s29 + $0x40] sm:$0xff] }
 0x1fe   :  { %712 = vmatpush.msrb.mxu3 %v8273_v37  ;;  %v544_v37 = vld [vmem:[%s9779_s29 + $0x190] sm:$0xff]  ;;  %758 = vmatpush.msra.mxu0 %v504_v32 }
 0x1ff   :  { %695 = vmatpush.msrb.mxu2 %v8298_v39  ;;  %731 = vmatpush.msra.mxu1 %v8307_v40  ;;  %v517_v39 = vld [vmem:[%s9779_s29 + $0xb8] sm:$0xff]  ;;  %v542_v40 = vld [vmem:[%s9779_s29 + $0x180] sm:$0xff]  ;;  %v8375_v32 = vld [vmem:[%s9779_s29 + $0x5d0] sm:$0xff] }
 0x200   :  { %713 = vmatpush.msrb.mxu3 %v8271_v41  ;;  %v551_v41 = vld [vmem:[%s9779_s29 + $0x1c8] sm:$0xff]  ;;  %759 = vmatpush.msra.mxu0 %v502_v36  ;;  %v8335_v36 = vld [vmem:[%s9779_s29 + $0x490] sm:$0xff] }
 0x201   :  { %696 = vmatpush.msrb.mxu2 %v8296_v43  ;;  %732 = vmatpush.msra.mxu1 %v8305_v44  ;;  %v540_v43 = vld [vmem:[%s9779_s29 + $0x170] sm:$0xff]  ;;  %v549_v44 = vld [vmem:[%s9779_s29 + $0x1b8] sm:$0xff] }
 0x202   :  { %714 = vmatpush.msrb.mxu3 %v8269_v45  ;;  %v513_v45 = vld [vmem:[%s9779_s29 + $0x98] sm:$0xff] }
 0x203   :  { %697 = vmatpush.msrb.mxu2 %v8294_v47  ;;  %733 = vmatpush.msra.mxu1 %v8303_v48  ;;  %v547_v47 = vld [vmem:[%s9779_s29 + $0x1a8] sm:$0xff] }
 0x204   :  { %715 = vmatpush.msrb.mxu3 %v8267_v49  ;;  %v511_v48 = vld [vmem:[%s9779_s29 + $0x88] sm:$0xff]  ;;  %v536_v49 = vld [vmem:[%s9779_s29 + $0x150] sm:$0xff] }
 0x205   :  { %698 = vmatpush.msrb.mxu2 %v8292_v51  ;;  %734 = vmatpush.msra.mxu1 %v8301_v52  ;;  %v500_v51 = vld [vmem:[%s9779_s29 + $0x30] sm:$0xff]  ;;  %v534_v52 = vld [vmem:[%s9779_s29 + $0x140] sm:$0xff] }
 0x206   :  { %716 = vmatpush.msrb.mxu3 %v8265_v53  ;;  %v509_v53 = vld [vmem:[%s9779_s29 + $0x78] sm:$0xff]  ;;  %760 = vmatpush.msra.mxu0 %v500_v51 }
 0x207   :  { %699 = vmatpush.msrb.mxu2 %v8290_v55  ;;  %735 = vmatpush.msra.mxu1 %v8299_v56  ;;  %v498_v55 = vld [vmem:[%s9779_s29 + $0x20] sm:$0xff]  ;;  %v532_v56 = vld [vmem:[%s9779_s29 + $0x130] sm:$0xff]  ;;  %v8368_v51 = vld [vmem:[%s9779_s29 + $0x598] sm:$0xff] }
 0x208   :  { %717 = vmatpush.msrb.mxu3 %v8263_v57  ;;  %v507_v57 = vld [vmem:[%s9779_s29 + $0x68] sm:$0xff]  ;;  %761 = vmatpush.msra.mxu0 %v498_v55 }
 0x209   :  { %700 = vmatpush.msrb.mxu2 %v8288_v59  ;;  %736 = vmatpush.msra.mxu1 %v8297_v60  ;;  %v496_v59 = vld [vmem:[%s9779_s29 + $0x10] sm:$0xff]  ;;  %v530_v60 = vld [vmem:[%s9779_s29 + $0x120] sm:$0xff]  ;;  %v8366_v55 = vld [vmem:[%s9779_s29 + $0x588] sm:$0xff] }
 0x20a   :  { %718 = vmatpush.msrb.mxu3 %v8261_v61  ;;  %v505_v61 = vld [vmem:[%s9779_s29 + $0x58] sm:$0xff]  ;;  %762 = vmatpush.msra.mxu0 %v496_v59 }
 0x20b   :  { %701 = vmatpush.msrb.mxu2 %v8286_v63  ;;  %737 = vmatpush.msra.mxu1 %v8295_v0  ;;  %v494_v63 = vld [vmem:[%s9779_s29] sm:$0xff]  ;;  %v528_v0 = vld [vmem:[%s9779_s29 + $0x110] sm:$0xff]  ;;  %v8364_v59 = vld [vmem:[%s9779_s29 + $0x578] sm:$0xff] }
 0x20c   :  { %719 = vmatpush.msrb.mxu3 %v8259_v1  ;;  %v503_v1 = vld [vmem:[%s9779_s29 + $0x48] sm:$0xff]  ;;  %763 = vmatpush.msra.mxu0 %v494_v63 }
 0x20d   :  { %702 = vmatpush.msrb.mxu2 %v8284_v3  ;;  %738 = vmatpush.msra.mxu1 %v8293_v4  ;;  %v526_v3 = vld [vmem:[%s9779_s29 + $0x100] sm:$0xff]  ;;  %v501_v4 = vld [vmem:[%s9779_s29 + $0x38] sm:$0xff]  ;;  %v8362_v63 = vld [vmem:[%s9779_s29 + $0x568] sm:$0xff] }
 0x20e   :  { %720 = vmatpush.msrb.mxu3 %v8257_v5  ;;  %v535_v5 = vld [vmem:[%s9779_s29 + $0x148] sm:$0xff] }
 0x20f   :  { %703 = vmatpush.msrb.mxu2 %v8282_v8  ;;  %739 = vmatpush.msra.mxu1 %v8291_v9  ;;  %v533_v8 = vld [vmem:[%s9779_s29 + $0x138] sm:$0xff] }
 0x210   :  { %721 = vmatpush.msrb.mxu3 %v8255_v12  ;;  %v497_v9 = vld [vmem:[%s9779_s29 + $0x18] sm:$0xff]  ;;  %v495_v12 = vld [vmem:[%s9779_s29 + $0x8] sm:$0xff] }
 0x211   :  { %768 = vmatpush.msra.mxu2 %v556_v10  ;;  %740 = vmatpush.msra.mxu1 %v8289_v13  ;;  %v531_v10 = vld [vmem:[%s9779_s29 + $0x128] sm:$0xff]  ;;  %v529_v13 = vld [vmem:[%s9779_s29 + $0x118] sm:$0xff] }
 0x212   :  { %722 = vmatpush.msrb.mxu3 %v8253_v16  ;;  %v8347_v16 = vld [vmem:[%s9779_s29 + $0x4f0] sm:$0xff] }
 0x213   :  { %769 = vmatpush.msra.mxu2 %v554_v15  ;;  %741 = vmatpush.msra.mxu1 %v8287_v18 }
 0x214   :  { %723 = vmatpush.msrb.mxu3 %v8251_v22  ;;  %v8345_v22 = vld [vmem:[%s9779_s29 + $0x4e0] sm:$0xff] }
 0x215   :  { %770 = vmatpush.msra.mxu2 %v552_v21  ;;  %742 = vmatpush.msra.mxu1 %v8285_v23  ;;  %v8348_v21 = vld [vmem:[%s9779_s29 + $0x4f8] sm:$0xff]  ;;  %v8346_v23 = vld [vmem:[%s9779_s29 + $0x4e8] sm:$0xff] }
 0x216   :  { %788 = vmatpush.msra.mxu3 %v525_v24  ;;  %v8343_v24 = vld [vmem:[%s9779_s29 + $0x4d0] sm:$0xff] }
 0x217   :  { %771 = vmatpush.msra.mxu2 %v550_v25  ;;  %743 = vmatpush.msra.mxu1 %v8283_v27  ;;  %v8341_v25 = vld [vmem:[%s9779_s29 + $0x4c0] sm:$0xff]  ;;  %v8380_v27 = vld [vmem:[%s9779_s29 + $0x5f8] sm:$0xff] }
 0x218   :  { %789 = vmatpush.msra.mxu3 %v523_v28  ;;  %v8377_v28 = vld [vmem:[%s9779_s29 + $0x5e0] sm:$0xff] }
 0x219   :  { %772 = vmatpush.msra.mxu2 %v548_v29  ;;  %808 = vmatpush.msrb.mxu1 %v557_v30  ;;  %v8340_v29 = vld [vmem:[%s9779_s29 + $0x4b8] sm:$0xff]  ;;  %v8378_v30 = vld [vmem:[%s9779_s29 + $0x5e8] sm:$0xff] }
 0x21a   :  { %790 = vmatpush.msra.mxu3 %v521_v31  ;;  %v8337_v31 = vld [vmem:[%s9779_s29 + $0x4a0] sm:$0xff] }
 0x21b   :  { %773 = vmatpush.msra.mxu2 %v546_v33  ;;  %809 = vmatpush.msrb.mxu1 %v555_v34  ;;  %v8338_v33 = vld [vmem:[%s9779_s29 + $0x4a8] sm:$0xff]  ;;  %v8314_v34 = vld [vmem:[%s9774_s25 + $0x10] sm:$0xff] }
 0x21c   :  { %791 = vmatpush.msra.mxu3 %v519_v35  ;;  %v8376_v35 = vld [vmem:[%s9779_s29 + $0x5d8] sm:$0xff] }
 0x21d   :  { %774 = vmatpush.msra.mxu2 %v544_v37  ;;  %810 = vmatpush.msrb.mxu1 %v553_v38  ;;  %v8373_v37 = vld [vmem:[%s9779_s29 + $0x5c0] sm:$0xff]  ;;  %v8336_v38 = vld [vmem:[%s9779_s29 + $0x498] sm:$0xff] }
 0x21e   :  { %792 = vmatpush.msra.mxu3 %v517_v39  ;;  %v8374_v39 = vld [vmem:[%s9779_s29 + $0x5c8] sm:$0xff] }
 0x21f   :  { %775 = vmatpush.msra.mxu2 %v542_v40  ;;  %811 = vmatpush.msrb.mxu1 %v551_v41  ;;  %v8333_v40 = vld [vmem:[%s9779_s29 + $0x480] sm:$0xff]  ;;  %v8371_v41 = vld [vmem:[%s9779_s29 + $0x5b0] sm:$0xff] }
 0x220   :  { %793 = vmatpush.msra.mxu3 %v515_v42  ;;  %v8334_v42 = vld [vmem:[%s9779_s29 + $0x488] sm:$0xff] }
 0x221   :  { %776 = vmatpush.msra.mxu2 %v540_v43  ;;  %812 = vmatpush.msrb.mxu1 %v549_v44  ;;  %v8372_v43 = vld [vmem:[%s9779_s29 + $0x5b8] sm:$0xff]  ;;  %v8331_v44 = vld [vmem:[%s9779_s29 + $0x470] sm:$0xff] }
 0x222   :  { %794 = vmatpush.msra.mxu3 %v513_v45  ;;  %v8369_v45 = vld [vmem:[%s9779_s29 + $0x5a0] sm:$0xff] }
 0x223   :  { %777 = vmatpush.msra.mxu2 %v538_v46  ;;  %813 = vmatpush.msrb.mxu1 %v547_v47  ;;  %v8332_v46 = vld [vmem:[%s9779_s29 + $0x478] sm:$0xff]  ;;  %v8370_v47 = vld [vmem:[%s9779_s29 + $0x5a8] sm:$0xff] }
 0x224   :  { %795 = vmatpush.msra.mxu3 %v511_v48  ;;  %v8329_v48 = vld [vmem:[%s9779_s29 + $0x460] sm:$0xff] }
 0x225   :  { %778 = vmatpush.msra.mxu2 %v536_v49  ;;  %814 = vmatpush.msrb.mxu1 %v545_v50  ;;  %v8367_v49 = vld [vmem:[%s9779_s29 + $0x590] sm:$0xff]  ;;  %v8330_v50 = vld [vmem:[%s9779_s29 + $0x468] sm:$0xff] }
 0x226   :  { %796 = vmatpush.msra.mxu3 %v509_v53  ;;  %v8365_v53 = vld [vmem:[%s9779_s29 + $0x580] sm:$0xff] }
 0x227   :  { %779 = vmatpush.msra.mxu2 %v534_v52  ;;  %815 = vmatpush.msrb.mxu1 %v543_v54  ;;  %v8327_v52 = vld [vmem:[%s9779_s29 + $0x450] sm:$0xff]  ;;  %v8328_v54 = vld [vmem:[%s9779_s29 + $0x458] sm:$0xff] }
 0x228   :  { %797 = vmatpush.msra.mxu3 %v507_v57  ;;  %v8363_v57 = vld [vmem:[%s9779_s29 + $0x570] sm:$0xff] }
 0x229   :  { %780 = vmatpush.msra.mxu2 %v532_v56  ;;  %816 = vmatpush.msrb.mxu1 %v541_v58  ;;  %v8325_v56 = vld [vmem:[%s9779_s29 + $0x440] sm:$0xff]  ;;  %v8326_v58 = vld [vmem:[%s9779_s29 + $0x448] sm:$0xff] }
 0x22a   :  { %798 = vmatpush.msra.mxu3 %v505_v61  ;;  %v8361_v61 = vld [vmem:[%s9779_s29 + $0x560] sm:$0xff] }
 0x22b   :  { %781 = vmatpush.msra.mxu2 %v530_v60  ;;  %817 = vmatpush.msrb.mxu1 %v539_v62  ;;  %v8323_v60 = vld [vmem:[%s9779_s29 + $0x430] sm:$0xff]  ;;  %v8324_v62 = vld [vmem:[%s9779_s29 + $0x438] sm:$0xff] }
 0x22c   :  { %799 = vmatpush.msra.mxu3 %v503_v1  ;;  %v8359_v1 = vld [vmem:[%s9779_s29 + $0x550] sm:$0xff] }
 0x22d   :  { %782 = vmatpush.msra.mxu2 %v528_v0  ;;  %818 = vmatpush.msrb.mxu1 %v537_v2  ;;  %v8321_v0 = vld [vmem:[%s9779_s29 + $0x420] sm:$0xff]  ;;  %v8322_v2 = vld [vmem:[%s9779_s29 + $0x428] sm:$0xff] }
 0x22e   :  { %800 = vmatpush.msra.mxu3 %v501_v4  ;;  %v8319_v4 = vld [vmem:[%s9779_s29 + $0x410] sm:$0xff] }
 0x22f   :  { %783 = vmatpush.msra.mxu2 %v526_v3  ;;  %819 = vmatpush.msrb.mxu1 %v535_v5  ;;  %v8360_v3 = vld [vmem:[%s9779_s29 + $0x558] sm:$0xff]  ;;  %v8357_v5 = vld [vmem:[%s9779_s29 + $0x540] sm:$0xff] }
 0x230   :  { %801 = vmatpush.msra.mxu3 %v499_v6  ;;  %v8320_v6 = vld [vmem:[%s9779_s29 + $0x418] sm:$0xff] }
 0x231   :  { %820 = vmatpush.msrb.mxu1 %v533_v8  ;;  %v8358_v8 = vld [vmem:[%s9779_s29 + $0x548] sm:$0xff] }
 0x232   :  { %802 = vmatpush.msra.mxu3 %v497_v9  ;;  %v8317_v9 = vld [vmem:[%s9779_s29 + $0x400] sm:$0xff] }
 0x233   :  { %821 = vmatpush.msrb.mxu1 %v531_v10  ;;  %v8355_v10 = vld [vmem:[%s9779_s29 + $0x530] sm:$0xff] }
 0x234   :  { %803 = vmatpush.msra.mxu3 %v495_v12  ;;  %v8318_v12 = vld [vmem:[%s9779_s29 + $0x408] sm:$0xff] }
 0x235   :  { %822 = vmatpush.msrb.mxu1 %v529_v13  ;;  %v8356_v13 = vld [vmem:[%s9779_s29 + $0x538] sm:$0xff] }
 0x237   :  { %823 = vmatpush.msrb.mxu1 %v527_v14  ;;  %v8353_v14 = vld [vmem:[%s9779_s29 + $0x520] sm:$0xff] }
 0x271   :  { %v471_v15 = vpop.f32.mrf.mxu1  ;;  %v491_v26 = vpop.f32.mrf.mxu2 }
 0x277   :  { %v580_v18 = vpop.f32.mrf.mxu3 }
 0x278   :  { %684 = vmatmul.f32.vlgmr.msrb.gmra.mxu0 %v580_v18  ;;  %724 = vmatmul.f32.vlgmr.msrb.gmra.mxu3 %v580_v18  ;;  %v8352_v18 = vld [vmem:[%s9779_s29 + $0x518] sm:$0xff] }
 0x279   :  { %847 = vmatpush.msrb.mxu0 %v9986_v17  ;;  %v600_v19 = vpop.f32.mrf.mxu1  ;;  %938 = vmatpush.msrb.mxu3 %v8347_v16  ;;  %v8344_v17 = vld [vmem:[%s9779_s29 + $0x4d8] sm:$0xff]  ;;  %v8351_v16 = vld [vmem:[%s9779_s29 + $0x510] sm:$0xff] }
 0x27a   :  { %704 = vmatmul.f32.vlgmr.msrb.gmra.mxu2 %v600_v19  ;;  %744 = vmatmul.f32.vlgmr.msra.gmra.mxu1 %v600_v19  ;;  %v8349_v19 = vld [vmem:[%s9779_s29 + $0x500] sm:$0xff] }
 0x27b   :  { %848 = vmatpush.msrb.mxu0 %v9992_v20  ;;  %867 = vmatpush.msrb.mxu2 %v9975_v7  ;;  %v8379_v7 = vld [vmem:[%s9779_s29 + $0x5f0] sm:$0xff]  ;;  %v8342_v20 = vld [vmem:[%s9779_s29 + $0x4c8] sm:$0xff] }
 0x27c   :  { %978 = vmatpush.msra.mxu1 %v8348_v21  ;;  %939 = vmatpush.msrb.mxu3 %v8345_v22  ;;  %v8350_v21 = vld [vmem:[%s9779_s29 + $0x508] sm:$0xff] }
 0x27d   :  { %868 = vmatpush.msrb.mxu2 %v9979_v11  ;;  %v8339_v11 = vld [vmem:[%s9779_s29 + $0x4b0] sm:$0xff] }
 0x27e   :  { %979 = vmatpush.msra.mxu1 %v8346_v23  ;;  %940 = vmatpush.msrb.mxu3 %v8343_v24 }
 0x280   :  { %764 = vmatmul.f32.vlgmr.msra.gmra.mxu0 %v471_v15  ;;  %804 = vmatmul.f32.vlgmr.msra.gmra.mxu3 %v471_v15  ;;  %v8354_v15 = vld [vmem:[%s9779_s29 + $0x528] sm:$0xff] }
 0x281   :  { %980 = vmatpush.msra.mxu1 %v8344_v17  ;;  %941 = vmatpush.msrb.mxu3 %v8341_v25 }
 0x282   :  { %784 = vmatmul.f32.vlgmr.msra.gmra.mxu2 %v491_v26  ;;  %824 = vmatmul.f32.vlgmr.msrb.gmra.mxu1 %v491_v26 }
 0x283   :  { %958 = vmatpush.msra.mxu0 %v8379_v7  ;;  %981 = vmatpush.msra.mxu1 %v8342_v20 }
 0x284   :  { %998 = vmatpush.msra.mxu2 %v8380_v27  ;;  %942 = vmatpush.msrb.mxu3 %v8339_v11 }
 0x285   :  { %959 = vmatpush.msra.mxu0 %v8377_v28  ;;  %982 = vmatpush.msra.mxu1 %v8340_v29 }
 0x286   :  { %999 = vmatpush.msra.mxu2 %v8378_v30  ;;  %943 = vmatpush.msrb.mxu3 %v8337_v31  ;;  %v1020_v30 = vld [vmem:[%s9784_s3] sm:$0x3] }
 0x287   :  { %960 = vmatpush.msra.mxu0 %v8375_v32  ;;  %983 = vmatpush.msra.mxu1 %v8338_v33 }
 0x288   :  { %8315 = vmatmul.msk.f32.vlgmr.msrb.gmra.mxu0 %vm450_vm1, %v8314_v34  ;;  %1000 = vmatpush.msra.mxu2 %v8376_v35 }
 0x289   :  { %944 = vmatpush.msrb.mxu3 %v8335_v36  ;;  %961 = vmatpush.msra.mxu0 %v8373_v37  ;;  %v1022_v36 = vperm.slane %v1020_v30, 0 }
 0x28a   :  { %8316 = vmatmul.msk.f32.vlgmr.msrb.gmra.mxu2 %vm450_vm1, %v8314_v34  ;;  %984 = vmatpush.msra.mxu1 %v8336_v38 }
 0x28b   :  { %1001 = vmatpush.msra.mxu2 %v8374_v39  ;;  %945 = vmatpush.msrb.mxu3 %v8333_v40 }
 0x28c   :  { %962 = vmatpush.msra.mxu0 %v8371_v41  ;;  %985 = vmatpush.msra.mxu1 %v8334_v42  ;;  %v1023_v42 = vperm.slane %v1020_v30, 1  ;;  %v1097_v30 = vld [vmem:[%s9794_s14 + $0xb0] sm:$0xff] }
 0x28d   :  { %1002 = vmatpush.msra.mxu2 %v8372_v43  ;;  %946 = vmatpush.msrb.mxu3 %v8331_v44 }
 0x28e   :  { %963 = vmatpush.msra.mxu0 %v8369_v45  ;;  %986 = vmatpush.msra.mxu1 %v8332_v46  ;;  %v1030_v46 = vld [vmem:[%s9789_s8] sm:$0x3] }
 0x28f   :  { %1003 = vmatpush.msra.mxu2 %v8370_v47  ;;  %947 = vmatpush.msrb.mxu3 %v8329_v48  ;;  %v8383_v47 = vld [vmem:[%s9789_s8 + $0x2] sm:$0x3]  ;;  %v8401_v48 = vld [vmem:[%s9794_s14 + $0x178] sm:$0xff] }
 0x290   :  { %964 = vmatpush.msra.mxu0 %v8367_v49  ;;  %987 = vmatpush.msra.mxu1 %v8330_v50  ;;  %v8400_v50 = vld [vmem:[%s9794_s14 + $0x170] sm:$0xff] }
 0x291   :  { %1004 = vmatpush.msra.mxu2 %v8368_v51  ;;  %948 = vmatpush.msrb.mxu3 %v8327_v52  ;;  %v8399_v52 = vld [vmem:[%s9794_s14 + $0x168] sm:$0xff] }
 0x292   :  { %965 = vmatpush.msra.mxu0 %v8365_v53  ;;  %988 = vmatpush.msra.mxu1 %v8328_v54  ;;  %v8398_v54 = vld [vmem:[%s9794_s14 + $0x160] sm:$0xff] }
 0x293   :  { %1005 = vmatpush.msra.mxu2 %v8366_v55  ;;  %949 = vmatpush.msrb.mxu3 %v8325_v56  ;;  %v8417_v55 = vld [vmem:[%s9794_s14 + $0x1f8] sm:$0xff] }
 0x294   :  { %966 = vmatpush.msra.mxu0 %v8363_v57  ;;  %989 = vmatpush.msra.mxu1 %v8326_v58  ;;  %v8397_v56 = vld [vmem:[%s9794_s14 + $0x158] sm:$0xff]  ;;  %v8416_v57 = vld [vmem:[%s9794_s14 + $0x1f0] sm:$0xff] }
 0x295   :  { %1006 = vmatpush.msra.mxu2 %v8364_v59  ;;  %950 = vmatpush.msrb.mxu3 %v8323_v60  ;;  %v1090_v58 = vld [vmem:[%s9794_s14 + $0x78] sm:$0xff]  ;;  %v1089_v60 = vld [vmem:[%s9794_s14 + $0x70] sm:$0xff] }
 0x296   :  { %967 = vmatpush.msra.mxu0 %v8361_v61  ;;  %990 = vmatpush.msra.mxu1 %v8324_v62  ;;  %v1106_v59 = vld [vmem:[%s9794_s14 + $0xf8] sm:$0xff]  ;;  %v8396_v61 = vld [vmem:[%s9794_s14 + $0x150] sm:$0xff] }
 0x297   :  { %1007 = vmatpush.msra.mxu2 %v8362_v63  ;;  %951 = vmatpush.msrb.mxu3 %v8321_v0  ;;  %v1105_v62 = vld [vmem:[%s9794_s14 + $0xf0] sm:$0xff]  ;;  %v8415_v63 = vld [vmem:[%s9794_s14 + $0x1e8] sm:$0xff] }
 0x298   :  { %968 = vmatpush.msra.mxu0 %v8359_v1  ;;  %991 = vmatpush.msra.mxu1 %v8322_v2  ;;  %v1088_v0 = vld [vmem:[%s9794_s14 + $0x68] sm:$0xff] }
 0x299   :  { %1008 = vmatpush.msra.mxu2 %v8360_v3  ;;  %952 = vmatpush.msrb.mxu3 %v8319_v4  ;;  %v8395_v1 = vld [vmem:[%s9794_s14 + $0x148] sm:$0xff]  ;;  %v8414_v3 = vld [vmem:[%s9794_s14 + $0x1e0] sm:$0xff] }
 0x29a   :  { %969 = vmatpush.msra.mxu0 %v8357_v5  ;;  %992 = vmatpush.msra.mxu1 %v8320_v6  ;;  %v1104_v2 = vld [vmem:[%s9794_s14 + $0xe8] sm:$0xff]  ;;  %v1087_v4 = vld [vmem:[%s9794_s14 + $0x60] sm:$0xff] }
 0x29b   :  { %1009 = vmatpush.msra.mxu2 %v8358_v8  ;;  %953 = vmatpush.msrb.mxu3 %v8317_v9  ;;  %v8394_v5 = vld [vmem:[%s9794_s14 + $0x140] sm:$0xff]  ;;  %v8413_v8 = vld [vmem:[%s9794_s14 + $0x1d8] sm:$0xff] }
 0x29c   :  { %970 = vmatpush.msra.mxu0 %v8355_v10  ;;  %993 = vmatpush.msra.mxu1 %v8318_v12  ;;  %v1103_v6 = vld [vmem:[%s9794_s14 + $0xe0] sm:$0xff]  ;;  %v1086_v9 = vld [vmem:[%s9794_s14 + $0x58] sm:$0xff] }
 0x29d   :  { %1010 = vmatpush.msra.mxu2 %v8356_v13  ;;  %v8393_v10 = vld [vmem:[%s9794_s14 + $0x138] sm:$0xff]  ;;  %v8412_v13 = vld [vmem:[%s9794_s14 + $0x1d0] sm:$0xff] }
 0x29e   :  { %971 = vmatpush.msra.mxu0 %v8353_v14  ;;  %v1102_v12 = vld [vmem:[%s9794_s14 + $0xd8] sm:$0xff]  ;;  %v1085_v14 = vld [vmem:[%s9794_s14 + $0x50] sm:$0xff] }
 0x29f   :  { %1011 = vmatpush.msra.mxu2 %v8354_v15  ;;  %v8392_v15 = vld [vmem:[%s9794_s14 + $0x130] sm:$0xff] }
 0x2a0   :  { %972 = vmatpush.msra.mxu0 %v8351_v16  ;;  %v1101_v16 = vld [vmem:[%s9794_s14 + $0xd0] sm:$0xff] }
 0x2a1   :  { %1012 = vmatpush.msra.mxu2 %v8352_v18  ;;  %v8411_v18 = vld [vmem:[%s9794_s14 + $0x1c8] sm:$0xff] }
 0x2a2   :  { %973 = vmatpush.msra.mxu0 %v8349_v19  ;;  %v1084_v19 = vld [vmem:[%s9794_s14 + $0x48] sm:$0xff] }
 0x2a3   :  { %1013 = vmatpush.msra.mxu2 %v8350_v21  ;;  %v8391_v21 = vld [vmem:[%s9794_s14 + $0x128] sm:$0xff] }
 0x2f5   :  { %v685_v22 = vpop.f32.mrf.mxu0 }
 0x2f7   :  { %v745_v20 = vpop.f32.mrf.mxu1 }
 0x2fb   :  { %v725_v7 = vpop.f32.mrf.mxu3 }
 0x2fc   :  { %v746_v33 = vadd.f32 %v745_v20, %v725_v7  ;;  %v1082_v7 = vld [vmem:[%s9794_s14 + $0x38] sm:$0xff] }
 0x2fd   :  { %v705_v23 = vpop.f32.mrf.mxu2  ;;  %v765_v24 = vpop.f32.mrf.mxu0  ;;  %v8389_v20 = vld [vmem:[%s9794_s14 + $0x118] sm:$0xff] }
 0x2fe   :  { %v706_v11 = vadd.f32 %v705_v23, %v685_v22  ;;  %v1100_v22 = vld [vmem:[%s9794_s14 + $0xc8] sm:$0xff]  ;;  %v8410_v23 = vld [vmem:[%s9794_s14 + $0x1c0] sm:$0xff] }
 0x2ff   :  { %v825_v28 = vpop.f32.mrf.mxu1 }
 0x300   :  { %v766_v31 = vadd.f32 %v765_v24, %v706_v11  ;;  %v1083_v24 = vld [vmem:[%s9794_s14 + $0x40] sm:$0xff]  ;;  %v8408_v11 = vld [vmem:[%s9794_s14 + $0x1b0] sm:$0xff] }
 0x303   :  { %v805_v27 = vpop.f32.mrf.mxu3 }
 0x304   :  { %v806_v37 = vadd.f32 %v805_v27, %v746_v33  ;;  %v1098_v27 = vld [vmem:[%s9794_s14 + $0xb8] sm:$0xff]  ;;  %v8387_v33 = vld [vmem:[%s9794_s14 + $0x108] sm:$0xff] }
 0x305   :  { %v785_v17 = vpop.f32.mrf.mxu2  ;;  %v850_v25 = vpop.f32.mrf.mxu0 }
 0x306   :  { %954 = vmatmul.f32.vlgmr.msrb.gmra.mxu3 %v850_v25  ;;  %994 = vmatmul.f32.vlgmr.msra.gmra.mxu1 %v850_v25  ;;  %v786_v34 = vadd.f32 %v785_v17, %v766_v31  ;;  %v826_v43 = vadd.f32 %v825_v28, %v806_v37  ;;  %v8390_v17 = vld [vmem:[%s9794_s14 + $0x120] sm:$0xff]  ;;  %v1081_v28 = vld [vmem:[%s9794_s14 + $0x30] sm:$0xff]  ;;  %v8407_v31 = vld [vmem:[%s9794_s14 + $0x1a8] sm:$0xff] }
 0x307   :  { %v1099_v25 = vld [vmem:[%s9794_s14 + $0xc0] sm:$0xff] }
 0x308   :  { %v8386_v37 = vld [vmem:[%s9794_s14 + $0x100] sm:$0xff] }
 0x30d   :  { %v870_v26 = vpop.f32.mrf.mxu2 }
 0x30e   :  { %974 = vmatmul.f32.vlgmr.msra.gmra.mxu0 %v870_v26  ;;  %1014 = vmatmul.f32.vlgmr.msra.gmra.mxu2 %v870_v26  ;;  %v8409_v26 = vld [vmem:[%s9794_s14 + $0x1b8] sm:$0xff] }
 0x383   :  { %v995_v40 = vpop.f32.mrf.mxu1 }
 0x389   :  { %v955_v29 = vpop.f32.mrf.mxu3 }
 0x38b   :  { %v975_v32 = vpop.f32.mrf.mxu0 }
 0x38c   :  { %v976_v35 = vadd.f32 %v975_v32, %v955_v29  ;;  %v8388_v29 = vld [vmem:[%s9794_s14 + $0x110] sm:$0xff]  ;;  %v1080_v32 = vld [vmem:[%s9794_s14 + $0x28] sm:$0xff] }
 0x38e   :  { %v1018_v38 = vadd.f32 %v976_v35, %v786_v34  ;;  %v1096_v34 = vld [vmem:[%s9794_s14 + $0xa8] sm:$0xff]  ;;  %v8406_v35 = vld [vmem:[%s9794_s14 + $0x1a0] sm:$0xff] }
 0x390   :  { %v1026_v39 = vadd.f32 %v1022_v36, %v1018_v38  ;;  %v1079_v36 = vld [vmem:[%s9794_s14 + $0x20] sm:$0xff] }
 0x391   :  { %v1015_v41 = vpop.f32.mrf.mxu2  ;;  %v1095_v38 = vld [vmem:[%s9794_s14 + $0xa0] sm:$0xff] }
 0x392   :  { %v10189_v44 = vmax.f32 %v1026_v39, 0.0  ;;  %v1016_v45 = vadd.f32 %v1015_v41, %v995_v40  ;;  %v8405_v39 = vld [vmem:[%s9794_s14 + $0x198] sm:$0xff] }
 0x393   :  { %v1078_v40 = vld [vmem:[%s9794_s14 + $0x18] sm:$0xff] }
 0x394   :  { %v1019_v49 = vadd.f32 %v1016_v45, %v826_v43  ;;  %1050 = vmatpush.msra.mxu3 %v10189_v44  ;;  %1127 = vmatpush.msrb.mxu1 %v10189_v44  ;;  %v1094_v41 = vld [vmem:[%s9794_s14 + $0x98] sm:$0xff]  ;;  %v1077_v43 = vld [vmem:[%s9794_s14 + $0x10] sm:$0xff] }
 0x395   :  { %8381 = vmatmul.msk.f32.vlgmr.msra.gmra.mxu3 %vm1031_vm2, %v1030_v46  ;;  %8384 = vmatmul.msk.f32.vlgmr.msrb.gmra.mxu1 %vm1031_vm2, %v8383_v47  ;;  %v1093_v45 = vld [vmem:[%s9794_s14 + $0x90] sm:$0xff] }
 0x396   :  { %v1027_v51 = vadd.f32 %v1023_v42, %v1019_v49  ;;  %1185 = vmatpush.msrb.mxu3 %v8401_v48  ;;  %1225 = vmatpush.msra.mxu1 %v1090_v58  ;;  %v8404_v42 = vld [vmem:[%s9794_s14 + $0x190] sm:$0xff]  ;;  %v1092_v48 = vld [vmem:[%s9794_s14 + $0x88] sm:$0xff]  ;;  %v8402_v49 = vld [vmem:[%s9794_s14 + $0x180] sm:$0xff] }
 0x397   :  { %v8450_v58 = vld [vmem:[%s9794_s14 + $0x2e8] sm:$0xff] }
 0x398   :  { %v10200_v53 = vmax.f32 %v1027_v51, 0.0  ;;  %1186 = vmatpush.msrb.mxu3 %v8400_v50  ;;  %1226 = vmatpush.msra.mxu1 %v1089_v60  ;;  %v1075_v50 = vld [vmem:[%s9794_s14] sm:$0xff] }
 0x399   :  { %v1091_v51 = vld [vmem:[%s9794_s14 + $0x80] sm:$0xff] }
 0x39a   :  { %1187 = vmatpush.msrb.mxu3 %v8399_v52  ;;  %1070 = vmatpush.msrb.mxu0 %v10200_v53  ;;  %v8436_v52 = vld [vmem:[%s9794_s14 + $0x278] sm:$0xff]  ;;  %v8449_v60 = vld [vmem:[%s9794_s14 + $0x2e0] sm:$0xff] }
 0x39b   :  { %1147 = vmatpush.msrb.mxu2 %v10200_v53  ;;  %8382 = vmatmul.msk.f32.vlgmr.msrb.gmra.mxu0 %vm1031_vm2, %v1030_v46  ;;  %v8403_v46 = vld [vmem:[%s9794_s14 + $0x188] sm:$0xff] }
 0x39c   :  { %8385 = vmatmul.msk.f32.vlgmr.msrb.gmra.mxu2 %vm1031_vm2, %v8383_v47  ;;  %1188 = vmatpush.msrb.mxu3 %v8398_v54  ;;  %v1076_v47 = vld [vmem:[%s9794_s14 + $0x8] sm:$0xff]  ;;  %v8452_v54 = vld [vmem:[%s9794_s14 + $0x2f8] sm:$0xff] }
 0x39d   :  { %1205 = vmatpush.msra.mxu0 %v8417_v55  ;;  %1245 = vmatpush.msra.mxu2 %v1106_v59  ;;  %v8435_v55 = vld [vmem:[%s9794_s14 + $0x270] sm:$0xff]  ;;  %v8433_v59 = vld [vmem:[%s9794_s14 + $0x260] sm:$0xff] }
 0x39e   :  { %1189 = vmatpush.msrb.mxu3 %v8397_v56  ;;  %1227 = vmatpush.msra.mxu1 %v1088_v0  ;;  %v8451_v56 = vld [vmem:[%s9794_s14 + $0x2f0] sm:$0xff] }
 0x39f   :  { %1206 = vmatpush.msra.mxu0 %v8416_v57  ;;  %1246 = vmatpush.msra.mxu2 %v1105_v62  ;;  %v8434_v57 = vld [vmem:[%s9794_s14 + $0x268] sm:$0xff]  ;;  %v8448_v62 = vld [vmem:[%s9794_s14 + $0x2d8] sm:$0xff]  ;;  %v8447_v0 = vld [vmem:[%s9794_s14 + $0x2d0] sm:$0xff] }
 0x3a0   :  { %1190 = vmatpush.msrb.mxu3 %v8396_v61  ;;  %1228 = vmatpush.msra.mxu1 %v1087_v4  ;;  %v8432_v61 = vld [vmem:[%s9794_s14 + $0x258] sm:$0xff]  ;;  %v8445_v4 = vld [vmem:[%s9794_s14 + $0x2c0] sm:$0xff] }
 0x3a1   :  { %1207 = vmatpush.msra.mxu0 %v8415_v63  ;;  %1247 = vmatpush.msra.mxu2 %v1104_v2  ;;  %v8431_v63 = vld [vmem:[%s9794_s14 + $0x250] sm:$0xff]  ;;  %v8446_v2 = vld [vmem:[%s9794_s14 + $0x2c8] sm:$0xff] }
 0x3a2   :  { %1191 = vmatpush.msrb.mxu3 %v8395_v1  ;;  %1229 = vmatpush.msra.mxu1 %v1086_v9  ;;  %v8430_v1 = vld [vmem:[%s9794_s14 + $0x248] sm:$0xff]  ;;  %v8443_v9 = vld [vmem:[%s9794_s14 + $0x2b0] sm:$0xff] }
 0x3a3   :  { %1208 = vmatpush.msra.mxu0 %v8414_v3  ;;  %1248 = vmatpush.msra.mxu2 %v1103_v6  ;;  %v8429_v3 = vld [vmem:[%s9794_s14 + $0x240] sm:$0xff]  ;;  %v8444_v6 = vld [vmem:[%s9794_s14 + $0x2b8] sm:$0xff] }
 0x3a4   :  { %1192 = vmatpush.msrb.mxu3 %v8394_v5  ;;  %1230 = vmatpush.msra.mxu1 %v1085_v14  ;;  %v8428_v5 = vld [vmem:[%s9794_s14 + $0x238] sm:$0xff]  ;;  %v8441_v14 = vld [vmem:[%s9794_s14 + $0x2a0] sm:$0xff] }
 0x3a5   :  { %1209 = vmatpush.msra.mxu0 %v8413_v8  ;;  %1249 = vmatpush.msra.mxu2 %v1102_v12  ;;  %v8427_v8 = vld [vmem:[%s9794_s14 + $0x230] sm:$0xff]  ;;  %v8442_v12 = vld [vmem:[%s9794_s14 + $0x2a8] sm:$0xff] }
 0x3a6   :  { %1193 = vmatpush.msrb.mxu3 %v8393_v10  ;;  %1231 = vmatpush.msra.mxu1 %v1084_v19  ;;  %v8426_v10 = vld [vmem:[%s9794_s14 + $0x228] sm:$0xff]  ;;  %v8439_v19 = vld [vmem:[%s9794_s14 + $0x290] sm:$0xff] }
 0x3a7   :  { %1210 = vmatpush.msra.mxu0 %v8412_v13  ;;  %1250 = vmatpush.msra.mxu2 %v1101_v16  ;;  %v8425_v13 = vld [vmem:[%s9794_s14 + $0x220] sm:$0xff]  ;;  %v8440_v16 = vld [vmem:[%s9794_s14 + $0x298] sm:$0xff] }
 0x3a8   :  { %1194 = vmatpush.msrb.mxu3 %v8392_v15  ;;  %1232 = vmatpush.msra.mxu1 %v1083_v24  ;;  %v8424_v15 = vld [vmem:[%s9794_s14 + $0x218] sm:$0xff]  ;;  %v8437_v24 = vld [vmem:[%s9794_s14 + $0x280] sm:$0xff] }
 0x3a9   :  { %1211 = vmatpush.msra.mxu0 %v8411_v18  ;;  %1251 = vmatpush.msra.mxu2 %v1100_v22  ;;  %v8423_v18 = vld [vmem:[%s9794_s14 + $0x210] sm:$0xff]  ;;  %v8438_v22 = vld [vmem:[%s9794_s14 + $0x288] sm:$0xff] }
 0x3aa   :  { %1195 = vmatpush.msrb.mxu3 %v8391_v21  ;;  %1233 = vmatpush.msra.mxu1 %v1082_v7  ;;  %v8422_v21 = vld [vmem:[%s9794_s14 + $0x208] sm:$0xff]  ;;  %v8418_v7 = vld [vmem:[%s9789_s8 + $0x4] sm:$0x3] }
 0x3ab   :  { %1212 = vmatpush.msra.mxu0 %v8410_v23  ;;  %1252 = vmatpush.msra.mxu2 %v1099_v25  ;;  %v8421_v23 = vld [vmem:[%s9794_s14 + $0x200] sm:$0xff] }
 0x3ac   :  { %1196 = vmatpush.msrb.mxu3 %v8390_v17  ;;  %1234 = vmatpush.msra.mxu1 %v1081_v28 }
 0x3ad   :  { %1213 = vmatpush.msra.mxu0 %v8409_v26  ;;  %1253 = vmatpush.msra.mxu2 %v1098_v27  ;;  %v8470_v27 = vld [vmem:[%s9794_s14 + $0x370] sm:$0xff] }
 0x3ae   :  { %1197 = vmatpush.msrb.mxu3 %v8389_v20  ;;  %1235 = vmatpush.msra.mxu1 %v1080_v32  ;;  %v8471_v20 = vld [vmem:[%s9794_s14 + $0x378] sm:$0xff]  ;;  %v8466_v32 = vld [vmem:[%s9794_s14 + $0x350] sm:$0xff] }
 0x3af   :  { %1214 = vmatpush.msra.mxu0 %v8408_v11  ;;  %1254 = vmatpush.msra.mxu2 %v1097_v30  ;;  %v8469_v11 = vld [vmem:[%s9794_s14 + $0x368] sm:$0xff]  ;;  %v8453_v30 = vld [vmem:[%s9789_s8 + $0x6] sm:$0x3] }
 0x3b0   :  { %1198 = vmatpush.msrb.mxu3 %v8388_v29  ;;  %1236 = vmatpush.msra.mxu1 %v1079_v36  ;;  %v8468_v29 = vld [vmem:[%s9794_s14 + $0x360] sm:$0xff]  ;;  %v8486_v36 = vld [vmem:[%s9794_s14 + $0x3f0] sm:$0xff] }
 0x3b1   :  { %1215 = vmatpush.msra.mxu0 %v8407_v31  ;;  %1255 = vmatpush.msra.mxu2 %v1096_v34  ;;  %v8467_v31 = vld [vmem:[%s9794_s14 + $0x358] sm:$0xff] }
 0x3b2   :  { %1199 = vmatpush.msrb.mxu3 %v8387_v33  ;;  %1237 = vmatpush.msra.mxu1 %v1078_v40  ;;  %v8465_v33 = vld [vmem:[%s9794_s14 + $0x348] sm:$0xff]  ;;  %v8487_v34 = vld [vmem:[%s9794_s14 + $0x3f8] sm:$0xff]  ;;  %v8484_v40 = vld [vmem:[%s9794_s14 + $0x3e0] sm:$0xff] }
 0x3b3   :  { %1216 = vmatpush.msra.mxu0 %v8406_v35  ;;  %1256 = vmatpush.msra.mxu2 %v1095_v38  ;;  %v8464_v35 = vld [vmem:[%s9794_s14 + $0x340] sm:$0xff]  ;;  %v8485_v38 = vld [vmem:[%s9794_s14 + $0x3e8] sm:$0xff] }
 0x3b4   :  { %1200 = vmatpush.msrb.mxu3 %v8386_v37  ;;  %1238 = vmatpush.msra.mxu1 %v1077_v43  ;;  %v8463_v37 = vld [vmem:[%s9794_s14 + $0x338] sm:$0xff]  ;;  %v8460_v43 = vld [vmem:[%s9794_s14 + $0x320] sm:$0xff] }
 0x3b5   :  { %1217 = vmatpush.msra.mxu0 %v8405_v39  ;;  %1257 = vmatpush.msra.mxu2 %v1094_v41  ;;  %v8462_v39 = vld [vmem:[%s9794_s14 + $0x330] sm:$0xff]  ;;  %v8461_v41 = vld [vmem:[%s9794_s14 + $0x328] sm:$0xff] }
 0x3b6   :  { %1285 = vmatpush.msra.mxu3 %v10189_v44  ;;  %1239 = vmatpush.msra.mxu1 %v1076_v47  ;;  %v8481_v47 = vld [vmem:[%s9794_s14 + $0x3c8] sm:$0xff] }
 0x3b7   :  { %1218 = vmatpush.msra.mxu0 %v8404_v42  ;;  %1258 = vmatpush.msra.mxu2 %v1093_v45  ;;  %v8483_v42 = vld [vmem:[%s9794_s14 + $0x3d8] sm:$0xff]  ;;  %v8482_v45 = vld [vmem:[%s9794_s14 + $0x3d0] sm:$0xff] }
 0x3b8   :  { %1240 = vmatpush.msra.mxu1 %v1075_v50  ;;  %v8457_v50 = vld [vmem:[%s9794_s14 + $0x308] sm:$0xff] }
 0x3b9   :  { %1219 = vmatpush.msra.mxu0 %v8403_v46  ;;  %1259 = vmatpush.msra.mxu2 %v1092_v48  ;;  %v8459_v46 = vld [vmem:[%s9794_s14 + $0x318] sm:$0xff]  ;;  %v8458_v48 = vld [vmem:[%s9794_s14 + $0x310] sm:$0xff] }
 0x3ba   :  { %1343 = vmatpush.msrb.mxu1 %v8436_v52  ;;  %v8456_v52 = vld [vmem:[%s9794_s14 + $0x300] sm:$0xff] }
 0x3bb   :  { %1220 = vmatpush.msra.mxu0 %v8402_v49  ;;  %1260 = vmatpush.msra.mxu2 %v1091_v51  ;;  %v8480_v49 = vld [vmem:[%s9794_s14 + $0x3c0] sm:$0xff]  ;;  %v8479_v51 = vld [vmem:[%s9794_s14 + $0x3b8] sm:$0xff] }
 0x3bc   :  { %1344 = vmatpush.msrb.mxu1 %v8435_v55  ;;  %v8477_v55 = vld [vmem:[%s9794_s14 + $0x3a8] sm:$0xff] }
 0x3bd   :  { %1305 = vmatpush.msrb.mxu0 %v10200_v53  ;;  %1363 = vmatpush.msrb.mxu2 %v8452_v54  ;;  %v8478_v54 = vld [vmem:[%s9794_s14 + $0x3b0] sm:$0xff] }
 0x3be   :  { %1345 = vmatpush.msrb.mxu1 %v8434_v57  ;;  %v8475_v57 = vld [vmem:[%s9794_s14 + $0x398] sm:$0xff] }
 0x3bf   :  { %1364 = vmatpush.msrb.mxu2 %v8451_v56  ;;  %v8476_v56 = vld [vmem:[%s9794_s14 + $0x3a0] sm:$0xff] }
 0x3c0   :  { %1346 = vmatpush.msrb.mxu1 %v8433_v59  ;;  %v8473_v59 = vld [vmem:[%s9794_s14 + $0x388] sm:$0xff] }
 0x3c1   :  { %1365 = vmatpush.msrb.mxu2 %v8450_v58  ;;  %v8474_v58 = vld [vmem:[%s9794_s14 + $0x390] sm:$0xff] }
 0x3c2   :  { %1347 = vmatpush.msrb.mxu1 %v8432_v61 }
 0x3c3   :  { %1366 = vmatpush.msrb.mxu2 %v8449_v60  ;;  %v8472_v60 = vld [vmem:[%s9794_s14 + $0x380] sm:$0xff] }
 0x3c4   :  { %1348 = vmatpush.msrb.mxu1 %v8431_v63  ;;  %v8506_v63 = vld [vmem:[%s9794_s14 + $0x478] sm:$0xff] }
 0x3c5   :  { %1367 = vmatpush.msrb.mxu2 %v8448_v62 }
 0x3c6   :  { %1349 = vmatpush.msrb.mxu1 %v8430_v1  ;;  %v8505_v1 = vld [vmem:[%s9794_s14 + $0x470] sm:$0xff] }
 0x3c7   :  { %1368 = vmatpush.msrb.mxu2 %v8447_v0 }
 0x3c8   :  { %1350 = vmatpush.msrb.mxu1 %v8429_v3  ;;  %v8503_v3 = vld [vmem:[%s9794_s14 + $0x460] sm:$0xff] }
 0x3c9   :  { %1369 = vmatpush.msrb.mxu2 %v8446_v2  ;;  %v8504_v2 = vld [vmem:[%s9794_s14 + $0x468] sm:$0xff] }
 0x3ca   :  { %1351 = vmatpush.msrb.mxu1 %v8428_v5 }
 0x3cb   :  { %1370 = vmatpush.msrb.mxu2 %v8445_v4  ;;  %v8522_v4 = vld [vmem:[%s9794_s14 + $0x4f8] sm:$0xff] }
 0x3cc   :  { %1352 = vmatpush.msrb.mxu1 %v8427_v8  ;;  %v8541_v8 = vld [vmem:[%s9794_s14 + $0x578] sm:$0xff] }
 0x3cd   :  { %1371 = vmatpush.msrb.mxu2 %v8444_v6  ;;  %v8502_v6 = vld [vmem:[%s9794_s14 + $0x458] sm:$0xff] }
 0x3ce   :  { %1353 = vmatpush.msrb.mxu1 %v8426_v10  ;;  %v8521_v10 = vld [vmem:[%s9794_s14 + $0x4f0] sm:$0xff] }
 0x3cf   :  { %1372 = vmatpush.msrb.mxu2 %v8443_v9 }
 0x3d0   :  { %1354 = vmatpush.msrb.mxu1 %v8425_v13  ;;  %v8540_v13 = vld [vmem:[%s9794_s14 + $0x570] sm:$0xff] }
 0x3d1   :  { %1373 = vmatpush.msrb.mxu2 %v8442_v12  ;;  %v8501_v12 = vld [vmem:[%s9794_s14 + $0x450] sm:$0xff] }
 0x3d2   :  { %1355 = vmatpush.msrb.mxu1 %v8424_v15  ;;  %v8488_v15 = vld [vmem:[%s9789_s8 + $0x8] sm:$0x3] }
 0x3d3   :  { %1374 = vmatpush.msrb.mxu2 %v8441_v14  ;;  %v8520_v14 = vld [vmem:[%s9794_s14 + $0x4e8] sm:$0xff] }
 0x3d4   :  { %1356 = vmatpush.msrb.mxu1 %v8423_v18  ;;  %v8539_v18 = vld [vmem:[%s9794_s14 + $0x568] sm:$0xff] }
 0x3d5   :  { %1375 = vmatpush.msrb.mxu2 %v8440_v16  ;;  %v8500_v16 = vld [vmem:[%s9794_s14 + $0x448] sm:$0xff] }
 0x3d6   :  { %1357 = vmatpush.msrb.mxu1 %v8422_v21  ;;  %v8499_v21 = vld [vmem:[%s9794_s14 + $0x440] sm:$0xff] }
 0x3d7   :  { %1376 = vmatpush.msrb.mxu2 %v8439_v19  ;;  %v8519_v19 = vld [vmem:[%s9794_s14 + $0x4e0] sm:$0xff] }
 0x3d8   :  { %1358 = vmatpush.msrb.mxu1 %v8421_v23 }
 0x3d9   :  { %1377 = vmatpush.msrb.mxu2 %v8438_v22  ;;  %v8518_v22 = vld [vmem:[%s9794_s14 + $0x4d8] sm:$0xff] }
 0x3db   :  { %1378 = vmatpush.msrb.mxu2 %v8437_v24  ;;  %v8538_v24 = vld [vmem:[%s9794_s14 + $0x560] sm:$0xff] }
 0x412   :  { %v1129_v17 = vpop.f32.mrf.mxu1 }
 0x413   :  { %1201 = vmatmul.f32.vlgmr.msrb.gmra.mxu3 %v1129_v17  ;;  %v8557_v17 = vld [vmem:[%s9794_s14 + $0x5f8] sm:$0xff] }
 0x414   :  { %1404 = vmatpush.msrb.mxu3 %v10189_v44 }
 0x418   :  { %v1052_v25 = vpop.f32.mrf.mxu3  ;;  %v1072_v26 = vpop.f32.mrf.mxu0 }
 0x419   :  { %1241 = vmatmul.f32.vlgmr.msra.gmra.mxu1 %v1052_v25  ;;  %1261 = vmatmul.f32.vlgmr.msra.gmra.mxu2 %v1072_v26  ;;  %v8498_v25 = vld [vmem:[%s9794_s14 + $0x438] sm:$0xff]  ;;  %v8517_v26 = vld [vmem:[%s9794_s14 + $0x4d0] sm:$0xff] }
 0x41a   :  { %1523 = vmatpush.msra.mxu1 %v10189_v44  ;;  %1543 = vmatpush.msra.mxu2 %v10200_v53 }
 0x41b   :  { %8419 = vmatmul.msk.f32.vlgmr.msra.gmra.mxu3 %vm1031_vm2, %v8418_v7 }
 0x41c   :  { %1462 = vmatpush.msra.mxu3 %v8471_v20  ;;  %v8556_v20 = vld [vmem:[%s9794_s14 + $0x5f0] sm:$0xff] }
 0x41e   :  { %1463 = vmatpush.msra.mxu3 %v8470_v27  ;;  %v8537_v27 = vld [vmem:[%s9794_s14 + $0x558] sm:$0xff] }
 0x41f   :  { %v1149_v28 = vpop.f32.mrf.mxu2 }
 0x420   :  { %1221 = vmatmul.f32.vlgmr.msra.gmra.mxu0 %v1149_v28  ;;  %1464 = vmatpush.msra.mxu3 %v8469_v11  ;;  %v8497_v11 = vld [vmem:[%s9794_s14 + $0x430] sm:$0xff]  ;;  %v8516_v28 = vld [vmem:[%s9794_s14 + $0x4c8] sm:$0xff] }
 0x421   :  { %1424 = vmatpush.msra.mxu0 %v10200_v53 }
 0x422   :  { %1465 = vmatpush.msra.mxu3 %v8468_v29  ;;  %v8555_v29 = vld [vmem:[%s9794_s14 + $0x5e8] sm:$0xff] }
 0x423   :  { %8454 = vmatmul.msk.f32.vlgmr.msrb.gmra.mxu3 %vm1031_vm2, %v8453_v30 }
 0x424   :  { %1466 = vmatpush.msra.mxu3 %v8467_v31  ;;  %v8496_v31 = vld [vmem:[%s9794_s14 + $0x428] sm:$0xff] }
 0x426   :  { %1467 = vmatpush.msra.mxu3 %v8466_v32  ;;  %v8515_v32 = vld [vmem:[%s9794_s14 + $0x4c0] sm:$0xff] }
 0x428   :  { %8420 = vmatmul.msk.f32.vlgmr.msrb.gmra.mxu0 %vm1031_vm2, %v8418_v7  ;;  %1468 = vmatpush.msra.mxu3 %v8465_v33  ;;  %v8523_v7 = vld [vmem:[%s9789_s8 + $0xa] sm:$0x3]  ;;  %v8554_v33 = vld [vmem:[%s9794_s14 + $0x5e0] sm:$0xff] }
 0x429   :  { %1482 = vmatpush.msrb.mxu0 %v8487_v34  ;;  %v8535_v34 = vld [vmem:[%s9794_s14 + $0x548] sm:$0xff] }
 0x42a   :  { %1469 = vmatpush.msra.mxu3 %v8464_v35  ;;  %v8495_v35 = vld [vmem:[%s9794_s14 + $0x420] sm:$0xff] }
 0x42b   :  { %1483 = vmatpush.msrb.mxu0 %v8486_v36  ;;  %v8514_v36 = vld [vmem:[%s9794_s14 + $0x4b8] sm:$0xff] }
 0x42c   :  { %1470 = vmatpush.msra.mxu3 %v8463_v37  ;;  %v8553_v37 = vld [vmem:[%s9794_s14 + $0x5d8] sm:$0xff] }
 0x42d   :  { %1484 = vmatpush.msrb.mxu0 %v8485_v38  ;;  %v8534_v38 = vld [vmem:[%s9794_s14 + $0x540] sm:$0xff] }
 0x42e   :  { %1471 = vmatpush.msra.mxu3 %v8462_v39  ;;  %v8494_v39 = vld [vmem:[%s9794_s14 + $0x418] sm:$0xff] }
 0x42f   :  { %1485 = vmatpush.msrb.mxu0 %v8484_v40  ;;  %v8513_v40 = vld [vmem:[%s9794_s14 + $0x4b0] sm:$0xff] }
 0x430   :  { %8455 = vmatmul.msk.f32.vlgmr.msra.gmra.mxu0 %vm1031_vm2, %v8453_v30  ;;  %1472 = vmatpush.msra.mxu3 %v8461_v41  ;;  %v8536_v30 = vld [vmem:[%s9794_s14 + $0x550] sm:$0xff] }
 0x431   :  { %1486 = vmatpush.msrb.mxu0 %v8483_v42  ;;  %v8552_v41 = vld [vmem:[%s9794_s14 + $0x5d0] sm:$0xff]  ;;  %v8533_v42 = vld [vmem:[%s9794_s14 + $0x538] sm:$0xff] }
 0x432   :  { %1473 = vmatpush.msra.mxu3 %v8460_v43  ;;  %v8493_v43 = vld [vmem:[%s9794_s14 + $0x410] sm:$0xff] }
 0x433   :  { %1487 = vmatpush.msrb.mxu0 %v8482_v45  ;;  %v8512_v45 = vld [vmem:[%s9794_s14 + $0x4a8] sm:$0xff] }
 0x434   :  { %1474 = vmatpush.msra.mxu3 %v8459_v46  ;;  %v8551_v46 = vld [vmem:[%s9794_s14 + $0x5c8] sm:$0xff] }
 0x435   :  { %1488 = vmatpush.msrb.mxu0 %v8481_v47  ;;  %v8532_v47 = vld [vmem:[%s9794_s14 + $0x530] sm:$0xff] }
 0x436   :  { %1475 = vmatpush.msra.mxu3 %v8458_v48  ;;  %v8492_v48 = vld [vmem:[%s9794_s14 + $0x408] sm:$0xff] }
 0x437   :  { %1489 = vmatpush.msrb.mxu0 %v8480_v49  ;;  %v8511_v49 = vld [vmem:[%s9794_s14 + $0x4a0] sm:$0xff] }
 0x438   :  { %1476 = vmatpush.msra.mxu3 %v8457_v50  ;;  %v8531_v50 = vld [vmem:[%s9794_s14 + $0x528] sm:$0xff] }
 0x439   :  { %1490 = vmatpush.msrb.mxu0 %v8479_v51  ;;  %v8550_v51 = vld [vmem:[%s9794_s14 + $0x5c0] sm:$0xff] }
 0x43a   :  { %1477 = vmatpush.msra.mxu3 %v8456_v52  ;;  %v8491_v52 = vld [vmem:[%s9794_s14 + $0x400] sm:$0xff] }
 0x43b   :  { %1491 = vmatpush.msrb.mxu0 %v8478_v54  ;;  %v8510_v54 = vld [vmem:[%s9794_s14 + $0x498] sm:$0xff] }
 0x43c   :  { %1642 = vmatpush.msrb.mxu3 %v10189_v44 }
 0x43d   :  { %1492 = vmatpush.msrb.mxu0 %v8477_v55  ;;  %v8530_v55 = vld [vmem:[%s9794_s14 + $0x520] sm:$0xff] }
 0x43f   :  { %1493 = vmatpush.msrb.mxu0 %v8476_v56  ;;  %v8549_v56 = vld [vmem:[%s9794_s14 + $0x5b8] sm:$0xff] }
 0x441   :  { %1494 = vmatpush.msrb.mxu0 %v8475_v57  ;;  %v8509_v57 = vld [vmem:[%s9794_s14 + $0x490] sm:$0xff] }
 0x443   :  { %1495 = vmatpush.msrb.mxu0 %v8474_v58  ;;  %v8529_v58 = vld [vmem:[%s9794_s14 + $0x518] sm:$0xff] }
 0x445   :  { %1496 = vmatpush.msrb.mxu0 %v8473_v59  ;;  %v8548_v59 = vld [vmem:[%s9794_s14 + $0x5b0] sm:$0xff] }
 0x447   :  { %1497 = vmatpush.msrb.mxu0 %v8472_v60  ;;  %v8508_v60 = vld [vmem:[%s9794_s14 + $0x488] sm:$0xff] }
 0x449   :  { %1662 = vmatpush.msra.mxu0 %v10200_v53 }
 0x496   :  { %v10345_v61 = vpop.f32.mrf.mxu3 }
 0x49d   :  { %v10347_v62 = vpop.f32.mrf.mxu0 }
 0x49e   :  { %v1287_v0 = vpop.f32.mrf.mxu3 }
 0x49f   :  { %1359 = vmatmul.f32.vlgmr.msrb.gmra.mxu1 %v1287_v0  ;;  %v8547_v0 = vld [vmem:[%s9794_s14 + $0x5a8] sm:$0xff] }
 0x4a0   :  { %1581 = vmatpush.msrb.mxu1 %v8506_v63  ;;  %v8528_v63 = vld [vmem:[%s9794_s14 + $0x510] sm:$0xff] }
 0x4a2   :  { %1582 = vmatpush.msrb.mxu1 %v8505_v1  ;;  %v8507_v1 = vld [vmem:[%s9794_s14 + $0x480] sm:$0xff] }
 0x4a4   :  { %1583 = vmatpush.msrb.mxu1 %v8504_v2  ;;  %v8527_v2 = vld [vmem:[%s9794_s14 + $0x508] sm:$0xff] }
 0x4a5   :  { %v1307_v5 = vpop.f32.mrf.mxu0 }
 0x4a6   :  { %1379 = vmatmul.f32.vlgmr.msrb.gmra.mxu2 %v1307_v5  ;;  %1584 = vmatpush.msrb.mxu1 %v8503_v3  ;;  %v1406_v9 = vpop.f32.mrf.mxu3  ;;  %v8546_v3 = vld [vmem:[%s9794_s14 + $0x5a0] sm:$0xff]  ;;  %v8545_v5 = vld [vmem:[%s9794_s14 + $0x598] sm:$0xff] }
 0x4a7   :  { %1601 = vmatpush.msrb.mxu2 %v8522_v4  ;;  %1478 = vmatmul.f32.vlgmr.msra.gmra.mxu3 %v1406_v9  ;;  %v8526_v4 = vld [vmem:[%s9794_s14 + $0x500] sm:$0xff] }
 0x4a8   :  { %1585 = vmatpush.msrb.mxu1 %v8502_v6  ;;  %1700 = vmatpush.msra.mxu3 %v8541_v8  ;;  %v8544_v6 = vld [vmem:[%s9794_s14 + $0x590] sm:$0xff]  ;;  %v8543_v8 = vld [vmem:[%s9794_s14 + $0x588] sm:$0xff]  ;;  %v8542_v9 = vld [vmem:[%s9794_s14 + $0x580] sm:$0xff] }
 0x4a9   :  { %1602 = vmatpush.msrb.mxu2 %v8521_v10  ;;  %8489 = vmatmul.msk.f32.vlgmr.msra.gmra.mxu1 %vm1031_vm2, %v8488_v15  ;;  %v10423_v10 = vpop.f32.mrf.mxu1 }
 0x4aa   :  { %1586 = vmatpush.msrb.mxu1 %v8501_v12  ;;  %1701 = vmatpush.msra.mxu3 %v8540_v13  ;;  %v10427_v13 = vpop.f32.mrf.mxu2 }
 0x4ab   :  { %1603 = vmatpush.msrb.mxu2 %v8520_v14  ;;  %v8576_v14 = vld [vmem:[%s9794_s14 + $0x678] sm:$0xff] }
 0x4ac   :  { %1587 = vmatpush.msrb.mxu1 %v8500_v16  ;;  %1702 = vmatpush.msra.mxu3 %v8539_v18  ;;  %v8574_v18 = vld [vmem:[%s9794_s14 + $0x668] sm:$0xff] }
 0x4ad   :  { %1604 = vmatpush.msrb.mxu2 %v8519_v19  ;;  %v1426_v23 = vpop.f32.mrf.mxu0  ;;  %v8573_v19 = vld [vmem:[%s9794_s14 + $0x660] sm:$0xff] }
 0x4ae   :  { %1498 = vmatmul.f32.vlgmr.msrb.gmra.mxu0 %v1426_v23  ;;  %8490 = vmatmul.msk.f32.vlgmr.msra.gmra.mxu2 %vm1031_vm2, %v8488_v15  ;;  %v8575_v15 = vld [vmem:[%s9794_s14 + $0x670] sm:$0xff] }
 0x4af   :  { %1588 = vmatpush.msrb.mxu1 %v8499_v21  ;;  %1605 = vmatpush.msrb.mxu2 %v8518_v22  ;;  %v8572_v21 = vld [vmem:[%s9794_s14 + $0x658] sm:$0xff]  ;;  %v8558_v22 = vld [vmem:[%s9789_s8 + $0xc] sm:$0x3]  ;;  %v8571_v23 = vld [vmem:[%s9794_s14 + $0x650] sm:$0xff] }
 0x4b0   :  { %1703 = vmatpush.msra.mxu3 %v8538_v24  ;;  %1720 = vmatpush.msrb.mxu0 %v8557_v17  ;;  %v8592_v24 = vld [vmem:[%s9794_s14 + $0x6f8] sm:$0xff] }
 0x4b1   :  { %1589 = vmatpush.msrb.mxu1 %v8498_v25  ;;  %1606 = vmatpush.msrb.mxu2 %v8517_v26  ;;  %v8570_v25 = vld [vmem:[%s9794_s14 + $0x648] sm:$0xff]  ;;  %v8591_v26 = vld [vmem:[%s9794_s14 + $0x6f0] sm:$0xff] }
 0x4b2   :  { %8524 = vmatmul.msk.f32.vlgmr.msrb.gmra.mxu3 %vm1031_vm2, %v8523_v7  ;;  %1721 = vmatpush.msrb.mxu0 %v8556_v20  ;;  %v8569_v20 = vld [vmem:[%s9794_s14 + $0x640] sm:$0xff] }
 0x4b3   :  { %1704 = vmatpush.msra.mxu3 %v8537_v27  ;;  %1590 = vmatpush.msrb.mxu1 %v8497_v11  ;;  %v8611_v27 = vld [vmem:[%s9794_s14 + $0x778] sm:$0xff]  ;;  %v8590_v11 = vld [vmem:[%s9794_s14 + $0x6e8] sm:$0xff] }
 0x4b4   :  { %1607 = vmatpush.msrb.mxu2 %v8516_v28  ;;  %1722 = vmatpush.msrb.mxu0 %v8555_v29  ;;  %v8610_v29 = vld [vmem:[%s9794_s14 + $0x770] sm:$0xff] }
 0x4b5   :  { %1705 = vmatpush.msra.mxu3 %v8536_v30  ;;  %1591 = vmatpush.msrb.mxu1 %v8496_v31  ;;  %v8589_v30 = vld [vmem:[%s9794_s14 + $0x6e0] sm:$0xff]  ;;  %v8609_v31 = vld [vmem:[%s9794_s14 + $0x768] sm:$0xff] }
 0x4b6   :  { %1608 = vmatpush.msrb.mxu2 %v8515_v32  ;;  %1723 = vmatpush.msrb.mxu0 %v8554_v33  ;;  %v8588_v32 = vld [vmem:[%s9794_s14 + $0x6d8] sm:$0xff]  ;;  %v8608_v33 = vld [vmem:[%s9794_s14 + $0x760] sm:$0xff] }
 0x4b7   :  { %1706 = vmatpush.msra.mxu3 %v8535_v34  ;;  %1592 = vmatpush.msrb.mxu1 %v8495_v35  ;;  %v8627_v34 = vld [vmem:[%s9794_s14 + $0x7f8] sm:$0xff] }
 0x4b8   :  { %1609 = vmatpush.msrb.mxu2 %v8514_v36  ;;  %1724 = vmatpush.msrb.mxu0 %v8553_v37  ;;  %v8593_v36 = vld [vmem:[%s9789_s8 + $0xe] sm:$0x3]  ;;  %v8587_v37 = vld [vmem:[%s9794_s14 + $0x6d0] sm:$0xff] }
 0x4b9   :  { %1707 = vmatpush.msra.mxu3 %v8534_v38  ;;  %1593 = vmatpush.msrb.mxu1 %v8494_v39  ;;  %v8607_v38 = vld [vmem:[%s9794_s14 + $0x758] sm:$0xff]  ;;  %v8626_v39 = vld [vmem:[%s9794_s14 + $0x7f0] sm:$0xff] }
 0x4ba   :  { %1610 = vmatpush.msrb.mxu2 %v8513_v40  ;;  %1725 = vmatpush.msrb.mxu0 %v8552_v41  ;;  %v8586_v40 = vld [vmem:[%s9794_s14 + $0x6c8] sm:$0xff]  ;;  %v8606_v41 = vld [vmem:[%s9794_s14 + $0x750] sm:$0xff] }
 0x4bb   :  { %1708 = vmatpush.msra.mxu3 %v8533_v42  ;;  %1594 = vmatpush.msrb.mxu1 %v8493_v43  ;;  %v8625_v42 = vld [vmem:[%s9794_s14 + $0x7e8] sm:$0xff]  ;;  %v8585_v43 = vld [vmem:[%s9794_s14 + $0x6c0] sm:$0xff] }
 0x4bc   :  { %1611 = vmatpush.msrb.mxu2 %v8512_v45  ;;  %1726 = vmatpush.msrb.mxu0 %v8551_v46  ;;  %v8605_v45 = vld [vmem:[%s9794_s14 + $0x748] sm:$0xff]  ;;  %v8624_v46 = vld [vmem:[%s9794_s14 + $0x7e0] sm:$0xff] }
 0x4bd   :  { %1709 = vmatpush.msra.mxu3 %v8532_v47  ;;  %1595 = vmatpush.msrb.mxu1 %v8492_v48  ;;  %v8584_v47 = vld [vmem:[%s9794_s14 + $0x6b8] sm:$0xff]  ;;  %v8604_v48 = vld [vmem:[%s9794_s14 + $0x740] sm:$0xff] }
 0x4be   :  { %1612 = vmatpush.msrb.mxu2 %v8511_v49  ;;  %8525 = vmatmul.msk.f32.vlgmr.msra.gmra.mxu0 %vm1031_vm2, %v8523_v7  ;;  %v8623_v49 = vld [vmem:[%s9794_s14 + $0x7d8] sm:$0xff] }
 0x4bf   :  { %1710 = vmatpush.msra.mxu3 %v8531_v50  ;;  %1727 = vmatpush.msrb.mxu0 %v8550_v51  ;;  %v8583_v50 = vld [vmem:[%s9794_s14 + $0x6b0] sm:$0xff]  ;;  %v8603_v51 = vld [vmem:[%s9794_s14 + $0x738] sm:$0xff] }
 0x4c0   :  { %1596 = vmatpush.msrb.mxu1 %v8491_v52  ;;  %1613 = vmatpush.msrb.mxu2 %v8510_v54  ;;  %v8622_v52 = vld [vmem:[%s9794_s14 + $0x7d0] sm:$0xff]  ;;  %v8582_v54 = vld [vmem:[%s9794_s14 + $0x6a8] sm:$0xff] }
 0x4c1   :  { %1711 = vmatpush.msra.mxu3 %v8530_v55  ;;  %1728 = vmatpush.msrb.mxu0 %v8549_v56  ;;  %v8602_v55 = vld [vmem:[%s9794_s14 + $0x730] sm:$0xff]  ;;  %v8621_v56 = vld [vmem:[%s9794_s14 + $0x7c8] sm:$0xff] }
 0x4c2   :  { %1761 = vmatpush.msra.mxu1 %v10189_v44  ;;  %1614 = vmatpush.msrb.mxu2 %v8509_v57  ;;  %v8568_v57 = vld [vmem:[%s9794_s14 + $0x638] sm:$0xff] }
 0x4c3   :  { %1712 = vmatpush.msra.mxu3 %v8529_v58  ;;  %1729 = vmatpush.msrb.mxu0 %v8548_v59  ;;  %v8581_v58 = vld [vmem:[%s9794_s14 + $0x6a0] sm:$0xff]  ;;  %v8601_v59 = vld [vmem:[%s9794_s14 + $0x728] sm:$0xff] }
 0x4c4   :  { %1615 = vmatpush.msrb.mxu2 %v8508_v60  ;;  %v8620_v60 = vld [vmem:[%s9794_s14 + $0x7c0] sm:$0xff] }
 0x4c5   :  { %1713 = vmatpush.msra.mxu3 %v8528_v63  ;;  %1730 = vmatpush.msrb.mxu0 %v8547_v0  ;;  %v8567_v63 = vld [vmem:[%s9794_s14 + $0x630] sm:$0xff]  ;;  %v8580_v0 = vld [vmem:[%s9794_s14 + $0x698] sm:$0xff] }
 0x4c6   :  { %1616 = vmatpush.msrb.mxu2 %v8507_v1  ;;  %v8600_v1 = vld [vmem:[%s9794_s14 + $0x720] sm:$0xff] }
 0x4c7   :  { %1714 = vmatpush.msra.mxu3 %v8527_v2  ;;  %1731 = vmatpush.msrb.mxu0 %v8546_v3  ;;  %v8619_v2 = vld [vmem:[%s9794_s14 + $0x7b8] sm:$0xff]  ;;  %v8566_v3 = vld [vmem:[%s9794_s14 + $0x628] sm:$0xff] }
 0x4c8   :  { %1781 = vmatpush.msra.mxu2 %v10200_v53 }
 0x4c9   :  { %1715 = vmatpush.msra.mxu3 %v8526_v4  ;;  %1732 = vmatpush.msrb.mxu0 %v8545_v5  ;;  %v8579_v4 = vld [vmem:[%s9794_s14 + $0x690] sm:$0xff]  ;;  %v8599_v5 = vld [vmem:[%s9794_s14 + $0x718] sm:$0xff] }
 0x4cb   :  { %1880 = vmatpush.msrb.mxu3 %v10189_v44  ;;  %1733 = vmatpush.msrb.mxu0 %v8544_v6  ;;  %v8618_v6 = vld [vmem:[%s9794_s14 + $0x7b0] sm:$0xff] }
 0x4cd   :  { %1734 = vmatpush.msrb.mxu0 %v8543_v8  ;;  %v8565_v8 = vld [vmem:[%s9794_s14 + $0x620] sm:$0xff] }
 0x4cf   :  { %1735 = vmatpush.msrb.mxu0 %v8542_v9  ;;  %v8578_v9 = vld [vmem:[%s9794_s14 + $0x688] sm:$0xff] }
 0x4d1   :  { %1900 = vmatpush.msra.mxu0 %v10200_v53 }
 0x51c   :  { %v10425_v12 = vpop.f32.mrf.mxu1 }
 0x526   :  { %v1525_v44 = vpop.f32.mrf.mxu1 }
 0x527   :  { %1597 = vmatmul.f32.vlgmr.msrb.gmra.mxu1 %v1525_v44  ;;  %v8617_v44 = vld [vmem:[%s9794_s14 + $0x7a8] sm:$0xff] }
 0x528   :  { %1819 = vmatpush.msrb.mxu1 %v8576_v14  ;;  %v8598_v14 = vld [vmem:[%s9794_s14 + $0x710] sm:$0xff] }
 0x529   :  { %v10431_v16 = vpop.f32.mrf.mxu2 }
 0x52a   :  { %1820 = vmatpush.msrb.mxu1 %v8575_v15  ;;  %v10434_v53 = vpop.f32.mrf.mxu3  ;;  %v8564_v15 = vld [vmem:[%s9794_s14 + $0x618] sm:$0xff] }
 0x52b   :  { %v10444_v7 = vpop.f32.mrf.mxu0 }
 0x52c   :  { %1821 = vmatpush.msrb.mxu1 %v8574_v18  ;;  %v8577_v18 = vld [vmem:[%s9794_s14 + $0x680] sm:$0xff] }
 0x52e   :  { %1822 = vmatpush.msrb.mxu1 %v8573_v19  ;;  %v8597_v19 = vld [vmem:[%s9794_s14 + $0x708] sm:$0xff] }
 0x52f   :  { %8559 = vmatmul.msk.f32.vlgmr.msra.gmra.mxu1 %vm1031_vm2, %v8558_v22 }
 0x530   :  { %1823 = vmatpush.msrb.mxu1 %v8572_v21  ;;  %v8616_v21 = vld [vmem:[%s9794_s14 + $0x7a0] sm:$0xff] }
 0x531   :  { %v1545_v17 = vpop.f32.mrf.mxu2 }
 0x532   :  { %1617 = vmatmul.f32.vlgmr.msrb.gmra.mxu2 %v1545_v17  ;;  %1824 = vmatpush.msrb.mxu1 %v8571_v23  ;;  %v8596_v23 = vld [vmem:[%s9794_s14 + $0x700] sm:$0xff]  ;;  %v8562_v17 = vld [vmem:[%s9794_s14 + $0x608] sm:$0xff] }
 0x533   :  { %1839 = vmatpush.msrb.mxu2 %v8592_v24  ;;  %v8615_v24 = vld [vmem:[%s9794_s14 + $0x798] sm:$0xff] }
 0x534   :  { %1825 = vmatpush.msrb.mxu1 %v8570_v25  ;;  %v8614_v25 = vld [vmem:[%s9794_s14 + $0x790] sm:$0xff] }
 0x535   :  { %v1644_v28 = vpop.f32.mrf.mxu3  ;;  %1840 = vmatpush.msrb.mxu2 %v8591_v26  ;;  %v8561_v26 = vld [vmem:[%s9794_s14 + $0x600] sm:$0xff] }
 0x536   :  { %1716 = vmatmul.f32.vlgmr.msra.gmra.mxu3 %v1644_v28  ;;  %1826 = vmatpush.msrb.mxu1 %v8569_v20 }
 0x537   :  { %1938 = vmatpush.msra.mxu3 %v8611_v27  ;;  %1841 = vmatpush.msrb.mxu2 %v8590_v11  ;;  %v8613_v27 = vld [vmem:[%s9794_s14 + $0x788] sm:$0xff]  ;;  %v8612_v11 = vld [vmem:[%s9794_s14 + $0x780] sm:$0xff] }
 0x538   :  { %1827 = vmatpush.msrb.mxu1 %v8568_v57  ;;  %v2014_v57 = vld [vmem:[%s9809_s30] sm:$0xff] }
 0x539   :  { %1939 = vmatpush.msra.mxu3 %v8610_v29  ;;  %1842 = vmatpush.msrb.mxu2 %v8589_v30 }
 0x53a   :  { %8560 = vmatmul.msk.f32.vlgmr.msra.gmra.mxu2 %vm1031_vm2, %v8558_v22  ;;  %1828 = vmatpush.msrb.mxu1 %v8567_v63  ;;  %v8563_v22 = vld [vmem:[%s9794_s14 + $0x610] sm:$0xff] }
 0x53b   :  { %v1664_v35 = vpop.f32.mrf.mxu0  ;;  %1940 = vmatpush.msra.mxu3 %v8609_v31  ;;  %1843 = vmatpush.msrb.mxu2 %v8588_v32 }
 0x53c   :  { %1736 = vmatmul.f32.vlgmr.msrb.gmra.mxu0 %v1664_v35  ;;  %1829 = vmatpush.msrb.mxu1 %v8566_v3  ;;  %v1223_v35 = vadd.f32 %v10347_v62, %v10345_v61  ;;  %v8641_v3 = vld [vmem:[%s9819_s12 + $0x18] sm:$0xff] }
 0x53d   :  { %1941 = vmatpush.msra.mxu3 %v8608_v33  ;;  %1958 = vmatpush.msrb.mxu0 %v8627_v34 }
 0x53e   :  { %8594 = vmatmul.msk.f32.vlgmr.msrb.gmra.mxu3 %vm1031_vm2, %v8593_v36  ;;  %1844 = vmatpush.msrb.mxu2 %v8587_v37  ;;  %v1381_v37 = vadd.f32 %v10431_v16, %v10425_v12 }
 0x53f   :  { %1942 = vmatpush.msra.mxu3 %v8607_v38  ;;  %1959 = vmatpush.msrb.mxu0 %v8626_v39 }
 0x540   :  { %1845 = vmatpush.msrb.mxu2 %v8586_v40  ;;  %1830 = vmatpush.msrb.mxu1 %v8565_v8  ;;  %v1500_v40 = vadd.f32 %v10444_v7, %v10434_v53 }
 0x541   :  { %1943 = vmatpush.msra.mxu3 %v8606_v41  ;;  %1960 = vmatpush.msrb.mxu0 %v8625_v42 }
 0x542   :  { %1846 = vmatpush.msrb.mxu2 %v8585_v43  ;;  %1831 = vmatpush.msrb.mxu1 %v8564_v15 }
 0x543   :  { %1944 = vmatpush.msra.mxu3 %v8605_v45  ;;  %1961 = vmatpush.msrb.mxu0 %v8624_v46 }
 0x544   :  { %8595 = vmatmul.msk.f32.vlgmr.msra.gmra.mxu0 %vm1031_vm2, %v8593_v36  ;;  %1847 = vmatpush.msrb.mxu2 %v8584_v47  ;;  %v1243_v36 = vadd.f32 %v10423_v10, %v1223_v35  ;;  %v2177_v35 = vld [vmem:[%s11947_s1] sm:$0x1] }
 0x545   :  { %1945 = vmatpush.msra.mxu3 %v8604_v48  ;;  %1962 = vmatpush.msrb.mxu0 %v8623_v49  ;;  %v9569_v48 = vld [vmem:[%s9799_s19] ss:$0 sm:$0xff] }
 0x546   :  { %1848 = vmatpush.msrb.mxu2 %v8583_v50  ;;  %1832 = vmatpush.msrb.mxu1 %v8563_v22  ;;  %v1263_v38 = vadd.f32 %v10427_v13, %v1243_v36  ;;  %v1985_v50 = vld [vmem:[%s9804_s24] sm:$0x3] }
 0x547   :  { %1946 = vmatpush.msra.mxu3 %v8603_v51  ;;  %1963 = vmatpush.msrb.mxu0 %v8622_v52  ;;  %v8630_v51 = vld [vmem:[%s9804_s24 + $0x2] sm:$0x3]  ;;  %v2017_v52 = vld [vmem:[%s9809_s30 + $0x18] sm:$0xff] }
 0x548   :  { %1849 = vmatpush.msrb.mxu2 %v8582_v54  ;;  %1833 = vmatpush.msrb.mxu1 %v8562_v17  ;;  %v1383_v39 = vadd.f32 %v1381_v37, %v1263_v38  ;;  %v2016_v54 = vld [vmem:[%s9809_s30 + $0x10] sm:$0xff] }
 0x549   :  { %1947 = vmatpush.msra.mxu3 %v8602_v55  ;;  %1964 = vmatpush.msrb.mxu0 %v8621_v56  ;;  %v2015_v55 = vld [vmem:[%s9809_s30 + $0x8] sm:$0xff]  ;;  %v8636_v56 = vld [vmem:[%s9809_s30 + $0x38] sm:$0xff] }
 0x54a   :  { %1850 = vmatpush.msrb.mxu2 %v8581_v58  ;;  %1834 = vmatpush.msrb.mxu1 %v8561_v26  ;;  %v1502_v42 = vadd.f32 %v1500_v40, %v1383_v39  ;;  %v8635_v58 = vld [vmem:[%s9809_s30 + $0x30] sm:$0xff] }
 0x54b   :  { %1948 = vmatpush.msra.mxu3 %v8601_v59  ;;  %1965 = vmatpush.msrb.mxu0 %v8620_v60  ;;  %v8634_v59 = vld [vmem:[%s9809_s30 + $0x28] sm:$0xff]  ;;  %v8633_v60 = vld [vmem:[%s9809_s30 + $0x20] sm:$0xff] }
 0x54c   :  { %1851 = vmatpush.msrb.mxu2 %v8580_v0 }
 0x54d   :  { %1949 = vmatpush.msra.mxu3 %v8600_v1  ;;  %1966 = vmatpush.msrb.mxu0 %v8619_v2  ;;  %v2102_v1 = vld [vmem:[%s9819_s12 + $0x8] sm:$0xff]  ;;  %v2101_v2 = vld [vmem:[%s9819_s12] sm:$0xff] }
 0x54e   :  { %1852 = vmatpush.msrb.mxu2 %v8579_v4  ;;  %v8640_v4 = vld [vmem:[%s9819_s12 + $0x10] sm:$0xff] }
 0x54f   :  { %1950 = vmatpush.msra.mxu3 %v8599_v5  ;;  %1967 = vmatpush.msrb.mxu0 %v8618_v6  ;;  %v2157_v5 = vld [vmem:[%s11942_s4] sm:$0x1] }
 0x550   :  { %1853 = vmatpush.msrb.mxu2 %v8578_v9  ;;  %2159 = vrot.lane.b32.xlu0 %v2157_v5, %s11924_s22  ;;  %v9570_v6 = vld [vmem:[%s11943_s16] ss:$0 sm:$0xff]  ;;  %v8685_v5 = vld [vmem:[%s11949_s7 + $0xb8] sm:$0xff]  ;;  %s11955_s22 = sld [smem:[#allocation26_spill]] }
 0x551   :  { %1951 = vmatpush.msra.mxu3 %v8598_v14  ;;  %1968 = vmatpush.msrb.mxu0 %v8617_v44 }
 0x552   :  { %1854 = vmatpush.msrb.mxu2 %v8577_v18 }
 0x553   :  { %1952 = vmatpush.msra.mxu3 %v8597_v19  ;;  %1969 = vmatpush.msrb.mxu0 %v8616_v21  ;;  %v2100_v19 = vld [vmem:[%s11944_s18] sm:$0x1] }
 0x555   :  { %1953 = vmatpush.msra.mxu3 %v8596_v23  ;;  %1970 = vmatpush.msrb.mxu0 %v8615_v24 }
 0x557   :  { %1971 = vmatpush.msrb.mxu0 %v8614_v25  ;;  %2120 = vmatpush.msrb.mxu3 %v2102_v1  ;;  %v2377_v1 = vld [vmem:[%s11949_s7 + $0x18] sm:$0xff] }
 0x559   :  { %1972 = vmatpush.msrb.mxu0 %v8613_v27  ;;  %2121 = vmatpush.msrb.mxu3 %v2101_v2  ;;  %v2374_v2 = vld [vmem:[%s11949_s7] sm:$0xff] }
 0x55b   :  { %1973 = vmatpush.msrb.mxu0 %v8612_v11 }
 0x55d   :  { %2147 = vmatpush.msra.mxu0 %v8641_v3  ;;  %v2375_v3 = vld [vmem:[%s11949_s7 + $0x8] sm:$0xff] }
 0x55f   :  { %2148 = vmatpush.msra.mxu0 %v8640_v4  ;;  %v8664_v4 = vld [vmem:[%s11949_s7 + $0x48] sm:$0xff] }
 0x5a4   :  { %v1598_v20 = vpop.f32.mrf.mxu1 }
 0x5ac   :  { %v1763_v28 = vpop.f32.mrf.mxu1 }
 0x5ad   :  { %1835 = vmatmul.f32.vlgmr.msrb.gmra.mxu1 %v1763_v28 }
 0x5b5   :  { %v1618_v29 = vpop.f32.mrf.mxu2 }
 0x5b6   :  { %v1619_v41 = vadd.f32 %v1618_v29, %v1598_v20  ;;  %v2176_v29 = vld [vmem:[%s11945_s23] sm:$0xf] }
 0x5b8   :  { %v1621_v43 = vadd.f32 %v1619_v41, %v1502_v42  ;;  %v2238_v41 = vld [vmem:[%s11948_s2] sm:$0x3]  ;;  %v8651_v42 = vld [vmem:[%s11948_s2 + $0x2] sm:$0x3] }
 0x5b9   :  { %v1717_v30 = vpop.f32.mrf.mxu3  ;;  %v1737_v31 = vpop.f32.mrf.mxu0 }
 0x5ba   :  { %v1738_v45 = vadd.f32 %v1737_v31, %v1717_v30  ;;  %v8645_v30 = vld [vmem:[%s11945_s23 + $0x4] sm:$0xf] }
 0x5bc   :  { %v1740_v62 = vadd.f32 %v1738_v45, %v1621_v43  ;;  %v2265_v45 = vld [vmem:[%s11946_s28] sm:$0xff] }
 0x5bd   :  { %v1783_v32 = vpop.f32.mrf.mxu2 }
 0x5be   :  { %1855 = vmatmul.f32.vlgmr.msrb.gmra.mxu2 %v1783_v32 }
 0x5c1   :  { %v1882_v33 = vpop.f32.mrf.mxu3  ;;  %v1902_v34 = vpop.f32.mrf.mxu0 }
 0x5c2   :  { %1954 = vmatmul.f32.vlgmr.msra.gmra.mxu3 %v1882_v33  ;;  %1974 = vmatmul.f32.vlgmr.msrb.gmra.mxu0 %v1902_v34  ;;  %v2160_v20 = vpop.permute.xlu0 %2159  ;;  %v2266_v33 = vld [vmem:[%s11946_s28 + $0x8] sm:$0xff]  ;;  %v8646_v34 = vld [vmem:[%s11947_s1 + $0x1] sm:$0x1] }
 0x62a   :  { %v1836_v46 = vpop.f32.mrf.mxu1 }
 0x63f   :  { %v1975_v47 = vpop.f32.mrf.mxu0 }
 0x641   :  { %v1856_v61 = vpop.f32.mrf.mxu2 }
 0x642   :  { %v1857_v10 = vadd.f32 %v1856_v61, %v1836_v46  ;;  %v8655_v46 = vld [vmem:[%s11946_s28 + $0x18] sm:$0xff]  ;;  %v8654_v61 = vld [vmem:[%s11946_s28 + $0x10] sm:$0xff] }
 0x644   :  { %v1859_v12 = vadd.f32 %v1857_v10, %v1740_v62 }
 0x645   :  { %v1955_v16 = vpop.f32.mrf.mxu3 }
 0x646   :  { %v1976_v13 = vadd.f32 %v1975_v47, %v1955_v16  ;;  %v8669_v47 = vld [vmem:[%s11949_s7 + $0x70] sm:$0xff] }
 0x647   :  { %v8665_v16 = vld [vmem:[%s11949_s7 + $0x50] sm:$0xff] }
 0x648   :  { %v1978_v49 = vadd.f32 %v1976_v13, %v1859_v12  ;;  %v8667_v12 = vld [vmem:[%s11949_s7 + $0x60] sm:$0xff] }
 0x649   :  { %v8663_v13 = vld [vmem:[%s11949_s7 + $0x40] sm:$0xff] }
 0x64a   :  { %v1983_v53 = vadd.f32 %v9569_v48, %v1978_v49  ;;  %v8670_v48 = vld [vmem:[%s11949_s7 + $0x78] sm:$0xff]  ;;  %v8668_v49 = vld [vmem:[%s11949_s7 + $0x68] sm:$0xff] }
 0x64c   :  { %v1984_v7 = vmax.f32 %v1983_v53, 0.0  ;;  %v8666_v53 = vld [vmem:[%s11949_s7 + $0x58] sm:$0xff] }
 0x64e   :  { %8628 = vmatpush.msk.msra.mxu1 %vm1990_vm3, %v1984_v7  ;;  %8631 = vmatpush.msk.msra.mxu2 %vm1990_vm3, %v1984_v7 }
 0x64f   :  { %8629 = vmatmul.msk.f32.vlgmr.msra.gmra.mxu1 %vm1986_vm4, %v1985_v50  ;;  %8632 = vmatmul.msk.f32.vlgmr.msra.gmra.mxu2 %vm1986_vm4, %v8630_v51  ;;  %v9571_v50 = vld [vmem:[%s11950_s10] ss:$0 sm:$0xff] }
 0x650   :  { %2086 = vmatpush.msrb.mxu2 %v2017_v52  ;;  %2063 = vmatpush.msrb.mxu1 %v8636_v56  ;;  %v2347_v56 = vld [vmem:[%s11951_s11] sm:$0xff] }
 0x652   :  { %2087 = vmatpush.msrb.mxu2 %v2016_v54  ;;  %2064 = vmatpush.msrb.mxu1 %v8635_v58  ;;  %v2380_v58 = vld [vmem:[%s11949_s7 + $0x30] sm:$0xff] }
 0x654   :  { %2088 = vmatpush.msrb.mxu2 %v2015_v55  ;;  %2065 = vmatpush.msrb.mxu1 %v8634_v59  ;;  %v2381_v59 = vld [vmem:[%s11949_s7 + $0x38] sm:$0xff] }
 0x656   :  { %2089 = vmatpush.msrb.mxu2 %v2014_v57  ;;  %2066 = vmatpush.msrb.mxu1 %v8633_v60  ;;  %v8660_v57 = vld [vmem:[%s11951_s11 + $0x8] sm:$0xff]  ;;  %v2378_v60 = vld [vmem:[%s11949_s7 + $0x20] sm:$0xff] }
 0x658   :  { %8643 = vmatpush.msk.msra.mxu1 %vm2182_vm6, %v2176_v29  ;;  %8647 = vmatpush.msk.msra.mxu2 %vm2182_vm6, %v8645_v30  ;;  %v8711_v29 = vld [vmem:[%s11949_s7 + $0x138] sm:$0xff]  ;;  %v8709_v30 = vld [vmem:[%s11949_s7 + $0x128] sm:$0xff] }
 0x6cc   :  { %v2011_v63 = vpop.f32.mrf.mxu1 }
 0x6cd   :  { %8638 = vmatmul.msk.f32.vlgmr.msrb.gmra.mxu2 %vm155_vm0, %v2011_v63  ;;  %v2379_v63 = vld [vmem:[%s11949_s7 + $0x28] sm:$0xff] }
 0x6ce   :  { %2335 = vmatpush.msrb.mxu2 %v2266_v33  ;;  %v8710_v33 = vld [vmem:[%s11949_s7 + $0x130] sm:$0xff] }
 0x6d0   :  { %2336 = vmatpush.msrb.mxu2 %v2265_v45  ;;  %v8722_v45 = vld [vmem:[%s11949_s7 + $0x168] sm:$0xff] }
 0x6d2   :  { %v2040_v0 = vpop.f32.mrf.mxu2 }
 0x6d3   :  { %8637 = vmatmul.msk.f32.vlgmr.msrb.gmra.mxu1 %vm155_vm0, %v2040_v0  ;;  %v2376_v0 = vld [vmem:[%s11949_s7 + $0x10] sm:$0xff] }
 0x6d4   :  { %2312 = vmatpush.msrb.mxu1 %v8655_v46  ;;  %v8720_v46 = vld [vmem:[%s11949_s7 + $0x158] sm:$0xff] }
 0x6d6   :  { %2313 = vmatpush.msrb.mxu1 %v8654_v61  ;;  %v8718_v61 = vld [vmem:[%s11949_s7 + $0x148] sm:$0xff] }
 0x750   :  { %v2068_v8 = vpop.f32.mrf.mxu1  ;;  %v2091_v9 = vpop.f32.mrf.mxu2 }
 0x751   :  { %v2092_v14 = vadd.f32 %v2091_v9, %v2068_v8  ;;  %v8681_v8 = vld [vmem:[%s11949_s7 + $0x98] sm:$0xff]  ;;  %v8679_v9 = vld [vmem:[%s11949_s7 + $0x88] sm:$0xff] }
 0x753   :  { %v2098_v44 = vadd.f32 %v9570_v6, %v2092_v14  ;;  %v8683_v6 = vld [vmem:[%s11949_s7 + $0xa8] sm:$0xff]  ;;  %v8684_v14 = vld [vmem:[%s11949_s7 + $0xb0] sm:$0xff] }
 0x755   :  { %v2099_v15 = vmax.f32 %v2098_v44, 0.0  ;;  %v8682_v44 = vld [vmem:[%s11949_s7 + $0xa0] sm:$0xff] }
 0x757   :  { %v2130_v18 = vrot.slane %v2099_v15, 1  ;;  %8639 = vmatmul.msk.f32.vlgmr.msrb.gmra.mxu3 %vm450_vm1, %v2099_v15  ;;  %v8680_v15 = vld [vmem:[%s11949_s7 + $0x90] sm:$0xff] }
 0x759   :  { %8642 = vmatmul.msk.f32.vlgmr.msra.gmra.mxu0 %vm450_vm1, %v2130_v18 }
 0x7d6   :  { %v2150_v23 = vpop.f32.mrf.mxu0 }
 0x7da   :  { %v2123_v21 = vpop.f32.mrf.mxu3 }
 0x7db   :  { %v2126_v22 = vadd.f32 %v2123_v21, %v2100_v19  ;;  %v8675_v21 = vld [vmem:[%s11951_s11 + $0x10] sm:$0xff] }
 0x7dd   :  { %v2153_v24 = vadd.f32 %v2150_v23, %v2126_v22  ;;  %v8688_v22 = vld [vmem:[%s11951_s11 + $0x18] sm:$0xff]  ;;  %v8678_v23 = vld [vmem:[%s11949_s7 + $0x80] sm:$0xff] }
 0x7df   :  { %v2171_v17 = vperm.slane %v2153_v24, 0  ;;  %v2154_v25 = vmul.f32 0.5, %v2153_v24  ;;  %2169 = vst.msk [vmem:[#allocation6] sm:$0x1] %vm2168_vm5, %v2153_v24 }
 0x7e1   :  { %2172 = vrot.lane.b32.xlu2 %v2171_v17, %s11922_s26  ;;  %v2155_v26 = vmul.f32 1.442695, %v2154_v25  ;;  %v8698_v17 = vld [vmem:[%s11949_s7 + $0xf8] sm:$0xff]  ;;  %v8695_v25 = vld [vmem:[%s11949_s7 + $0xe0] sm:$0xff] }
 0x7e3   :  { %9577 = vpow2.f32 %v2155_v26  ;;  %v8696_v26 = vld [vmem:[%s11949_s7 + $0xe8] sm:$0xff] }
 0x7e9   :  { %v9578_v27 = vpop.eup %9577 }
 0x7ea   :  { %v2162_v11 = vmul.f32 %v9578_v27, %v2160_v20  ;;  %v8693_v20 = vld [vmem:[%s11949_s7 + $0xd0] sm:$0xff]  ;;  %v8694_v27 = vld [vmem:[%s11949_s7 + $0xd8] sm:$0xff] }
 0x7ec   :  { %2164 = vrot.lane.b32.xlu0 %v2162_v11, %s11922_s26  ;;  %v8691_v11 = vld [vmem:[%s11949_s7 + $0xc0] sm:$0xff]  ;;  %s11954_s26 = sld [smem:[#allocation24_spill]] }
 0x83b   :  { %v2173_v28 = vpop.permute.xlu2 %2172 }
 0x83c   :  { %2175 = vst.msk [vmem:[#allocation8] sm:$0x1] %vm2168_vm5, %v2173_v28  ;;  %v8692_v28 = vld [vmem:[%s11949_s7 + $0xc8] sm:$0xff] }
 0x85e   :  { %v2165_v31 = vpop.permute.xlu0 %2164 }
 0x85f   :  { %v2167_v32 = vadd.f32 %v2165_v31, %v2153_v24  ;;  %v8697_v24 = vld [vmem:[%s11949_s7 + $0xf0] sm:$0xff]  ;;  %v8707_v31 = vld [vmem:[%s11949_s7 + $0x118] sm:$0xff] }
 0x861   :  { %8644 = vmatmul.msk.f32.vlgmr.msra.gmra.mxu1 %vm2178_vm7, %v2167_v32  ;;  %8648 = vmatmul.msk.f32.vlgmr.msra.gmra.mxu2 %vm2178_vm7, %v2167_v32  ;;  %v8705_v32 = vld [vmem:[%s11949_s7 + $0x108] sm:$0xff] }
 0x862   :  { %2431 = vmatpush.msra.mxu1 %v8669_v47  ;;  %2451 = vmatpush.msra.mxu2 %v8670_v48  ;;  %v8719_v47 = vld [vmem:[%s11949_s7 + $0x150] sm:$0xff] }
 0x864   :  { %2432 = vmatpush.msra.mxu1 %v8667_v12  ;;  %2452 = vmatpush.msra.mxu2 %v8668_v49  ;;  %v8717_v12 = vld [vmem:[%s11949_s7 + $0x140] sm:$0xff] }
 0x866   :  { %2433 = vmatpush.msra.mxu1 %v8665_v16  ;;  %2453 = vmatpush.msra.mxu2 %v8666_v53 }
 0x868   :  { %2434 = vmatpush.msra.mxu1 %v8663_v13  ;;  %2454 = vmatpush.msra.mxu2 %v8664_v4  ;;  %v8745_v4 = vld [vmem:[%s11949_s7 + $0x1d0] sm:$0xff] }
 0x8de   :  { %v2203_v36 = vpop.f32.mrf.mxu1 }
 0x8df   :  { %v2204_v39 = vadd.f32 %v2203_v36, %v2177_v35  ;;  %v8706_v35 = vld [vmem:[%s11949_s7 + $0x110] sm:$0xff] }
 0x8e4   :  { %v2230_v37 = vpop.f32.mrf.mxu2 }
 0x8e5   :  { %v2231_v38 = vadd.f32 %v8646_v34, %v2230_v37  ;;  %v8708_v34 = vld [vmem:[%s11949_s7 + $0x120] sm:$0xff] }
 0x8e7   :  { %v2234_v40 = vrot.slane %v2231_v38, 7 }
 0x8e9   :  { %v2237_v43 = vsel %vm2236_vm8, %v2204_v39, %v2234_v40  ;;  %v8701_v40 = vld [vmem:[%s11951_s11 + $0x20] sm:$0xff] }
 0x8ea   :  { %8649 = vmatpush.msk.msra.mxu3 %vm1990_vm3, %v2237_v43  ;;  %8652 = vmatpush.msk.msrb.mxu0 %vm1990_vm3, %v2237_v43  ;;  %v8724_v43 = vld [vmem:[%s11949_s7 + $0x178] sm:$0xff] }
 0x8eb   :  { %8650 = vmatmul.msk.f32.vlgmr.msra.gmra.mxu3 %vm1986_vm4, %v2238_v41  ;;  %8653 = vmatmul.msk.f32.vlgmr.msrb.gmra.mxu0 %vm1986_vm4, %v8651_v42  ;;  %v8714_v41 = vld [vmem:[%s11951_s11 + $0x28] sm:$0xff]  ;;  %v8704_v42 = vld [vmem:[%s11949_s7 + $0x100] sm:$0xff] }
 0x968   :  { %v2289_v62 = vpop.f32.mrf.mxu0 }
 0x969   :  { %8656 = vmatmul.msk.f32.vlgmr.msrb.gmra.mxu1 %vm450_vm1, %v2289_v62  ;;  %v8723_v62 = vld [vmem:[%s11949_s7 + $0x170] sm:$0xff] }
 0x96e   :  { %v2262_v10 = vpop.f32.mrf.mxu3 }
 0x96f   :  { %8657 = vmatmul.msk.f32.vlgmr.msrb.gmra.mxu2 %vm450_vm1, %v2262_v10  ;;  %v8721_v10 = vld [vmem:[%s11949_s7 + $0x160] sm:$0xff] }
 0x970   :  { %2551 = vmatpush.msrb.mxu2 %v8684_v14 }
 0x972   :  { %2552 = vmatpush.msrb.mxu2 %v8682_v44 }
 0x974   :  { %2553 = vmatpush.msrb.mxu2 %v8680_v15 }
 0x976   :  { %2554 = vmatpush.msrb.mxu2 %v8678_v23 }
 0x9e6   :  { %v2315_v7 = vpop.f32.mrf.mxu1 }
 0x9f2   :  { %v2338_v51 = vpop.f32.mrf.mxu2 }
 0x9f3   :  { %v2339_v52 = vadd.f32 %v2338_v51, %v2315_v7 }
 0x9f5   :  { %v2345_v54 = vadd.f32 %v9571_v50, %v2339_v52  ;;  %v8727_v50 = vld [vmem:[%s11951_s11 + $0x30] sm:$0xff]  ;;  %v8740_v52 = vld [vmem:[%s11951_s11 + $0x38] sm:$0xff] }
 0x9f7   :  { %v10573_v55 = vmax.f32 %v2345_v54, 0.0  ;;  %v8736_v54 = vld [vmem:[%s11949_s7 + $0x1b0] sm:$0xff] }
 0x9f9   :  { %8658 = vmatpush.msk.msrb.mxu3 %vm1990_vm3, %v10573_v55  ;;  %8661 = vmatpush.msk.msra.mxu0 %vm1990_vm3, %v10573_v55 }
 0x9fa   :  { %8676 = vmatpush.msk.msrb.mxu1 %vm1990_vm3, %v10573_v55  ;;  %8659 = vmatmul.msk.f32.vlgmr.msrb.gmra.mxu3 %vm1986_vm4, %v2347_v56  ;;  %v8737_v56 = vld [vmem:[%s11949_s7 + $0x1b8] sm:$0xff] }
 0x9fb   :  { %8662 = vmatmul.msk.f32.vlgmr.msra.gmra.mxu0 %vm1986_vm4, %v8660_v57  ;;  %2474 = vmatpush.msra.mxu3 %v2380_v58  ;;  %v8734_v57 = vld [vmem:[%s11949_s7 + $0x1a0] sm:$0xff]  ;;  %v8732_v58 = vld [vmem:[%s11949_s7 + $0x190] sm:$0xff] }
 0x9fc   :  { %2494 = vmatpush.msrb.mxu0 %v2381_v59  ;;  %v8733_v59 = vld [vmem:[%s11949_s7 + $0x198] sm:$0xff] }
 0x9fd   :  { %2475 = vmatpush.msra.mxu3 %v2378_v60  ;;  %v8730_v60 = vld [vmem:[%s11949_s7 + $0x180] sm:$0xff] }
 0x9fe   :  { %2495 = vmatpush.msrb.mxu0 %v2379_v63  ;;  %v8731_v63 = vld [vmem:[%s11949_s7 + $0x188] sm:$0xff] }
 0x9ff   :  { %2476 = vmatpush.msra.mxu3 %v2376_v0  ;;  %v8749_v0 = vld [vmem:[%s11949_s7 + $0x1f0] sm:$0xff] }
 0xa00   :  { %2496 = vmatpush.msrb.mxu0 %v2377_v1  ;;  %v8750_v1 = vld [vmem:[%s11949_s7 + $0x1f8] sm:$0xff] }
 0xa01   :  { %2477 = vmatpush.msra.mxu3 %v2374_v2  ;;  %v8747_v2 = vld [vmem:[%s11949_s7 + $0x1e0] sm:$0xff] }
 0xa02   :  { %2497 = vmatpush.msrb.mxu0 %v2375_v3  ;;  %v8748_v3 = vld [vmem:[%s11949_s7 + $0x1e8] sm:$0xff] }
 0xa03   :  { %2571 = vmatpush.msrb.mxu3 %v8685_v5  ;;  %v8746_v5 = vld [vmem:[%s11949_s7 + $0x1d8] sm:$0xff] }
 0xa04   :  { %8689 = vmatpush.msk.msra.mxu0 %vm1990_vm3, %v10573_v55 }
 0xa05   :  { %2572 = vmatpush.msrb.mxu3 %v8683_v6  ;;  %v8743_v6 = vld [vmem:[%s11949_s7 + $0x1c0] sm:$0xff] }
 0xa07   :  { %2573 = vmatpush.msrb.mxu3 %v8681_v8  ;;  %v8744_v8 = vld [vmem:[%s11949_s7 + $0x1c8] sm:$0xff] }
 0xa09   :  { %2574 = vmatpush.msrb.mxu3 %v8679_v9 }
 0xa78   :  { %v2404_v18 = vpop.f32.mrf.mxu0 }
 0xa79   :  { %8671 = vmatmul.msk.f32.vlgmr.msra.gmra.mxu1 %vm155_vm0, %v2404_v18  ;;  %8672 = vmatmul.msk.f32.vlgmr.msra.gmra.mxu2 %vm155_vm0, %v2404_v18 }
 0xa7a   :  { %2630 = vmatpush.msra.mxu1 %v8697_v24  ;;  %2650 = vmatpush.msra.mxu2 %v8698_v17 }
 0xa7c   :  { %2631 = vmatpush.msra.mxu1 %v8695_v25  ;;  %2651 = vmatpush.msra.mxu2 %v8696_v26  ;;  %v2976_v26 = vld [vmem:[%s11952_s0] sm:$0x3] }
 0xa7d   :  { %v2371_v19 = vpop.f32.mrf.mxu3 }
 0xa7e   :  { %8673 = vmatmul.msk.f32.vlgmr.msra.gmra.mxu3 %vm155_vm0, %v2371_v19  ;;  %8674 = vmatmul.msk.f32.vlgmr.msrb.gmra.mxu0 %vm155_vm0, %v2371_v19 }
 0xa7f   :  { %8702 = vmatpush.msk.msra.mxu3 %vm1990_vm3, %v10573_v55  ;;  %2632 = vmatpush.msra.mxu1 %v8693_v20 }
 0xa80   :  { %2652 = vmatpush.msra.mxu2 %v8694_v27  ;;  %2709 = vmatpush.msrb.mxu0 %v8710_v33 }
 0xa81   :  { %8677 = vmatmul.msk.f32.vlgmr.msrb.gmra.mxu1 %vm1986_vm4, %v8675_v21 }
 0xa82   :  { %2633 = vmatpush.msra.mxu1 %v8691_v11  ;;  %2653 = vmatpush.msra.mxu2 %v8692_v28 }
 0xa83   :  { %2710 = vmatpush.msrb.mxu0 %v8708_v34 }
 0xa84   :  { %2729 = vmatpush.msrb.mxu1 %v8711_v29 }
 0xa85   :  { %2711 = vmatpush.msrb.mxu0 %v8706_v35 }
 0xa86   :  { %8690 = vmatmul.msk.f32.vlgmr.msra.gmra.mxu0 %vm1986_vm4, %v8688_v22  ;;  %2730 = vmatpush.msrb.mxu1 %v8709_v30 }
 0xa87   :  { %2712 = vmatpush.msrb.mxu0 %v8704_v42 }
 0xa88   :  { %2731 = vmatpush.msrb.mxu1 %v8707_v31  ;;  %v2978_v31 = vperm.slane %v2976_v26, 0 }
 0xa89   :  { %2808 = vmatpush.msra.mxu0 %v8724_v43  ;;  %v3190_v43 = vld [vmem:[#allocation2 + $0x2f0] sm:$0xff] }
 0xa8a   :  { %2732 = vmatpush.msrb.mxu1 %v8705_v32 }
 0xa8b   :  { %2809 = vmatpush.msra.mxu0 %v8722_v45  ;;  %v3191_v45 = vld [vmem:[#allocation2 + $0x2f8] sm:$0xff] }
 0xa8d   :  { %2810 = vmatpush.msra.mxu0 %v8720_v46 }
 0xa8f   :  { %2811 = vmatpush.msra.mxu0 %v8718_v61  ;;  %v3188_v61 = vld [vmem:[#allocation2 + $0x2e0] sm:$0xff] }
 0xaf6   :  { %v10629_v36 = vpop.f32.mrf.mxu1 }
 0xafb   :  { %v10631_v37 = vpop.f32.mrf.mxu0 }
 0xafc   :  { %v2456_v16 = vpop.f32.mrf.mxu2 }
 0xafd   :  { %v2500_v17 = vadd.f32 %v10631_v37, %v2456_v16  ;;  %v2979_v37 = vperm.slane %v2976_v26, 1  ;;  %v3222_v16 = vld [vmem:[#allocation2 + $0x3f0] sm:$0xff] }
 0xafe   :  { %v2524_v38 = vpop.f32.mrf.mxu1  ;;  %v3166_v26 = vld [vmem:[#allocation2 + $0x230] sm:$0xff] }
 0xaff   :  { %8686 = vmatmul.msk.f32.vlgmr.msrb.gmra.mxu2 %vm155_vm0, %v2524_v38  ;;  %8687 = vmatmul.msk.f32.vlgmr.msrb.gmra.mxu3 %vm155_vm0, %v2524_v38 }
 0xb00   :  { %8715 = vmatpush.msk.msrb.mxu2 %vm1990_vm3, %v10573_v55  ;;  %2788 = vmatpush.msrb.mxu3 %v8723_v62  ;;  %v3189_v62 = vld [vmem:[#allocation2 + $0x2e8] sm:$0xff] }
 0xb01   :  { %v2479_v13 = vpop.f32.mrf.mxu3 }
 0xb02   :  { %2789 = vmatpush.msrb.mxu3 %v8721_v10  ;;  %v2480_v21 = vadd.f32 %v2479_v13, %v10629_v36  ;;  %v8758_v13 = vld [vmem:[%s11953_s15 + $0x18] sm:$0xff] }
 0xb03   :  { %v2603_v39 = vpop.f32.mrf.mxu0 }
 0xb04   :  { %8699 = vmatmul.msk.f32.vlgmr.msra.gmra.mxu1 %vm155_vm0, %v2603_v39  ;;  %2790 = vmatpush.msrb.mxu3 %v8719_v47 }
 0xb05   :  { %8728 = vmatpush.msk.msra.mxu1 %vm1990_vm3, %v10573_v55 }
 0xb06   :  { %2791 = vmatpush.msrb.mxu3 %v8717_v12  ;;  %v3186_v12 = vld [vmem:[#allocation2 + $0x2d0] sm:$0xff] }
 0xb07   :  { %8700 = vmatmul.msk.f32.vlgmr.msra.gmra.mxu2 %vm155_vm0, %v2603_v39  ;;  %8703 = vmatmul.msk.f32.vlgmr.msra.gmra.mxu3 %vm1986_vm4, %v8701_v40  ;;  %v8757_v40 = vld [vmem:[%s11953_s15 + $0x10] sm:$0xff] }
 0xb08   :  { %2867 = vmatpush.msra.mxu2 %v8736_v54  ;;  %2887 = vmatpush.msra.mxu3 %v8737_v56  ;;  %v3185_v54 = vld [vmem:[#allocation2 + $0x2c8] sm:$0xff] }
 0xb09   :  { %v3221_v56 = vld [vmem:[#allocation2 + $0x3e8] sm:$0xff] }
 0xb0a   :  { %2868 = vmatpush.msra.mxu2 %v8734_v57  ;;  %v3180_v57 = vld [vmem:[#allocation2 + $0x2a0] sm:$0xff] }
 0xb0c   :  { %2869 = vmatpush.msra.mxu2 %v8732_v58  ;;  %v3178_v58 = vld [vmem:[#allocation2 + $0x290] sm:$0xff] }
 0xb0e   :  { %2870 = vmatpush.msra.mxu2 %v8730_v60  ;;  %v3183_v60 = vld [vmem:[#allocation2 + $0x2b8] sm:$0xff] }
 0xb0f   :  { %8716 = vmatmul.msk.f32.vlgmr.msrb.gmra.mxu2 %vm1986_vm4, %v8714_v41  ;;  %v2986_v41 = vld [vmem:[%s11953_s15] sm:$0xff] }
 0xb10   :  { %2966 = vmatpush.msrb.mxu2 %v8750_v1  ;;  %v3212_v1 = vld [vmem:[#allocation2 + $0x3a0] sm:$0xff] }
 0xb12   :  { %2967 = vmatpush.msrb.mxu2 %v8748_v3  ;;  %v3217_v3 = vld [vmem:[#allocation2 + $0x3c8] sm:$0xff] }
 0xb14   :  { %2968 = vmatpush.msrb.mxu2 %v8746_v5  ;;  %v3210_v5 = vld [vmem:[#allocation2 + $0x390] sm:$0xff] }
 0xb16   :  { %2969 = vmatpush.msrb.mxu2 %v8744_v8  ;;  %v3215_v8 = vld [vmem:[#allocation2 + $0x3b8] sm:$0xff] }
 0xb81   :  { %v2635_v9 = vpop.f32.mrf.mxu1 }
 0xb82   :  { %v2556_v48 = vpop.f32.mrf.mxu2  ;;  %v2576_v49 = vpop.f32.mrf.mxu3 }
 0xb83   :  { %v2579_v22 = vadd.f32 %v2556_v48, %v2480_v21  ;;  %v2580_v20 = vadd.f32 %v2576_v49, %v2500_v17  ;;  %v2987_v48 = vld [vmem:[%s11953_s15 + $0x8] sm:$0xff]  ;;  %v3184_v49 = vld [vmem:[#allocation2 + $0x2c0] sm:$0xff]  ;;  %v3175_v21 = vld [vmem:[#allocation2 + $0x278] sm:$0xff] }
 0xb84   :  { %v3173_v17 = vld [vmem:[#allocation2 + $0x268] sm:$0xff] }
 0xb85   :  { %v2658_v23 = vadd.f32 %v2635_v9, %v2579_v22  ;;  %v3172_v9 = vld [vmem:[#allocation2 + $0x260] sm:$0xff]  ;;  %v3211_v22 = vld [vmem:[#allocation2 + $0x398] sm:$0xff] }
 0xb8a   :  { %v10654_v53 = vpop.f32.mrf.mxu2  ;;  %v2682_v7 = vpop.f32.mrf.mxu3 }
 0xb8b   :  { %8712 = vmatmul.msk.f32.vlgmr.msrb.gmra.mxu0 %vm155_vm0, %v2682_v7  ;;  %8713 = vmatmul.msk.f32.vlgmr.msrb.gmra.mxu1 %vm155_vm0, %v2682_v7  ;;  %v2659_v28 = vadd.f32 %v10654_v53, %v2580_v20  ;;  %v3220_v53 = vld [vmem:[#allocation2 + $0x3e0] sm:$0xff]  ;;  %v3187_v7 = vld [vmem:[#allocation2 + $0x2d8] sm:$0xff]  ;;  %v3202_v20 = vld [vmem:[#allocation2 + $0x350] sm:$0xff] }
 0xb8c   :  { %8741 = vmatpush.msk.msrb.mxu0 %vm1990_vm3, %v10573_v55  ;;  %v8735_v55 = vld [vmem:[%s11949_s7 + $0x1a8] sm:$0xff]  ;;  %2946 = vmatpush.msrb.mxu1 %v8749_v0  ;;  %v3176_v0 = vld [vmem:[#allocation2 + $0x280] sm:$0xff] }
 0xb8d   :  { %2888 = vmatpush.msra.mxu3 %v8735_v55  ;;  %v3216_v55 = vld [vmem:[#allocation2 + $0x3c0] sm:$0xff] }
 0xb8e   :  { %2947 = vmatpush.msrb.mxu1 %v8747_v2  ;;  %v3181_v2 = vld [vmem:[#allocation2 + $0x2a8] sm:$0xff] }
 0xb8f   :  { %2889 = vmatpush.msra.mxu3 %v8733_v59  ;;  %v3214_v59 = vld [vmem:[#allocation2 + $0x3b0] sm:$0xff] }
 0xb90   :  { %2948 = vmatpush.msrb.mxu1 %v8745_v4  ;;  %v3174_v4 = vld [vmem:[#allocation2 + $0x270] sm:$0xff] }
 0xb91   :  { %2890 = vmatpush.msra.mxu3 %v8731_v63  ;;  %v3219_v63 = vld [vmem:[#allocation2 + $0x3d8] sm:$0xff] }
 0xb92   :  { %v2761_v51 = vpop.f32.mrf.mxu2  ;;  %2949 = vmatpush.msrb.mxu1 %v8743_v6  ;;  %v3179_v6 = vld [vmem:[#allocation2 + $0x298] sm:$0xff] }
 0xb93   :  { %8725 = vmatmul.msk.f32.vlgmr.msrb.gmra.mxu3 %vm155_vm0, %v2761_v51  ;;  %8726 = vmatmul.msk.f32.vlgmr.msra.gmra.mxu0 %vm155_vm0, %v2761_v51  ;;  %v3182_v51 = vld [vmem:[#allocation2 + $0x2b0] sm:$0xff] }
 0xb94   :  { %8729 = vmatmul.msk.f32.vlgmr.msra.gmra.mxu1 %vm1986_vm4, %v8727_v50  ;;  %v3223_v50 = vld [vmem:[#allocation2 + $0x3f8] sm:$0xff] }
 0xb9b   :  { %8742 = vmatmul.msk.f32.vlgmr.msrb.gmra.mxu0 %vm1986_vm4, %v8740_v52  ;;  %v3218_v52 = vld [vmem:[#allocation2 + $0x3d0] sm:$0xff] }
 0xc08   :  { %v2714_v14 = vpop.f32.mrf.mxu0  ;;  %v2734_v44 = vpop.f32.mrf.mxu1 }
 0xc09   :  { %v2737_v25 = vadd.f32 %v2714_v14, %v2658_v23  ;;  %v2738_v32 = vadd.f32 %v2734_v44, %v2659_v28  ;;  %v3208_v14 = vld [vmem:[#allocation2 + $0x380] sm:$0xff]  ;;  %v3177_v44 = vld [vmem:[#allocation2 + $0x288] sm:$0xff] }
 0xc0a   :  { %v3168_v23 = vld [vmem:[#allocation2 + $0x240] sm:$0xff] }
 0xc0b   :  { %v3164_v28 = vld [vmem:[#allocation2 + $0x220] sm:$0xff] }
 0xc10   :  { %v2813_v15 = vpop.f32.mrf.mxu0 }
 0xc11   :  { %v2840_v18 = vpop.f32.mrf.mxu1  ;;  %v2817_v35 = vadd.f32 %v2813_v15, %v2738_v32  ;;  %v3213_v15 = vld [vmem:[#allocation2 + $0x3a8] sm:$0xff]  ;;  %v3162_v32 = vld [vmem:[#allocation2 + $0x210] sm:$0xff] }
 0xc12   :  { %8738 = vmatmul.msk.f32.vlgmr.msra.gmra.mxu2 %vm155_vm0, %v2840_v18  ;;  %8739 = vmatmul.msk.f32.vlgmr.msra.gmra.mxu3 %vm155_vm0, %v2840_v18  ;;  %v3170_v18 = vld [vmem:[#allocation2 + $0x250] sm:$0xff] }
 0xc16   :  { %v2793_v24 = vpop.f32.mrf.mxu3 }
 0xc17   :  { %v2816_v27 = vadd.f32 %v2793_v24, %v2737_v25  ;;  %v3204_v24 = vld [vmem:[#allocation2 + $0x360] sm:$0xff]  ;;  %v3209_v25 = vld [vmem:[#allocation2 + $0x388] sm:$0xff] }
 0xc18   :  { %v2919_v19 = vpop.f32.mrf.mxu0 }
 0xc19   :  { %8751 = vmatmul.msk.f32.vlgmr.msrb.gmra.mxu1 %vm155_vm0, %v2919_v19 }
 0xc1a   :  { %8752 = vmatmul.msk.f32.vlgmr.msrb.gmra.mxu2 %vm155_vm0, %v2919_v19  ;;  %v3206_v19 = vld [vmem:[#allocation2 + $0x370] sm:$0xff] }
 0xc95   :  { %v2872_v11 = vpop.f32.mrf.mxu2  ;;  %v2892_v34 = vpop.f32.mrf.mxu3 }
 0xc96   :  { %v2895_v29 = vadd.f32 %v2872_v11, %v2816_v27  ;;  %v2951_v30 = vpop.f32.mrf.mxu1  ;;  %v2896_v38 = vadd.f32 %v2892_v34, %v2817_v35  ;;  %v3171_v27 = vld [vmem:[#allocation2 + $0x258] sm:$0xff] }
 0xc97   :  { %v3207_v11 = vld [vmem:[#allocation2 + $0x378] sm:$0xff] }
 0xc98   :  { %v2974_v33 = vadd.f32 %v2951_v30, %v2895_v29  ;;  %v3200_v29 = vld [vmem:[#allocation2 + $0x340] sm:$0xff]  ;;  %v3169_v30 = vld [vmem:[#allocation2 + $0x248] sm:$0xff]  ;;  %v3167_v34 = vld [vmem:[#allocation2 + $0x238] sm:$0xff] }
 0xc99   :  { %v3203_v35 = vld [vmem:[#allocation2 + $0x358] sm:$0xff] }
 0xc9a   :  { %v2982_v36 = vadd.f32 %v2978_v31, %v2974_v33  ;;  %v3205_v31 = vld [vmem:[#allocation2 + $0x368] sm:$0xff]  ;;  %v3198_v33 = vld [vmem:[#allocation2 + $0x330] sm:$0xff] }
 0xc9c   :  { %v10690_v39 = vmax.f32 %v2982_v36, 0.0  ;;  %v3160_v36 = vld [vmem:[#allocation2 + $0x200] sm:$0xff] }
 0xc9d   :  { %v2971_v42 = vpop.f32.mrf.mxu2 }
 0xc9e   :  { %v2975_v46 = vadd.f32 %v2971_v42, %v2896_v38  ;;  %3009 = vmatpush.msrb.mxu3 %v10690_v39  ;;  %3128 = vmatpush.msra.mxu1 %v10690_v39  ;;  %v3196_v38 = vld [vmem:[#allocation2 + $0x320] sm:$0xff]  ;;  %v3201_v42 = vld [vmem:[#allocation2 + $0x348] sm:$0xff] }
 0xc9f   :  { %8759 = vmatmul.msk.f32.vlgmr.msra.gmra.mxu1 %vm1031_vm2, %v8757_v40  ;;  %8753 = vmatmul.msk.f32.vlgmr.msrb.gmra.mxu3 %vm1031_vm2, %v2986_v41 }
 0xca0   :  { %v2983_v10 = vadd.f32 %v2979_v37, %v2975_v46  ;;  %3224 = vmatpush.msra.mxu3 %v3190_v43  ;;  %3270 = vmatpush.msrb.mxu1 %v3191_v45  ;;  %v3070_v37 = vld [vmem:[#allocation2 + $0xf0] sm:$0xff]  ;;  %v3068_v43 = vld [vmem:[#allocation2 + $0xe0] sm:$0xff]  ;;  %v3163_v45 = vld [vmem:[#allocation2 + $0x218] sm:$0xff] }
 0xca1   :  { %v3192_v46 = vld [vmem:[#allocation2 + $0x300] sm:$0xff] }
 0xca2   :  { %v10698_v47 = vmax.f32 %v2983_v10, 0.0  ;;  %3225 = vmatpush.msra.mxu3 %v3188_v61  ;;  %3271 = vmatpush.msrb.mxu1 %v3189_v62  ;;  %v3199_v61 = vld [vmem:[#allocation2 + $0x338] sm:$0xff]  ;;  %v3066_v62 = vld [vmem:[#allocation2 + $0xd0] sm:$0xff] }
 0xca3   :  { %v3102_v10 = vld [vmem:[#allocation2 + $0x1f0] sm:$0xff] }
 0xca4   :  { %3032 = vmatpush.msra.mxu0 %v10698_v47  ;;  %3151 = vmatpush.msra.mxu2 %v10698_v47 }
 0xca5   :  { %8761 = vmatmul.msk.f32.vlgmr.msra.gmra.mxu2 %vm1031_vm2, %v8757_v40  ;;  %8755 = vmatmul.msk.f32.vlgmr.msra.gmra.mxu0 %vm1031_vm2, %v2986_v41  ;;  %v3165_v40 = vld [vmem:[#allocation2 + $0x228] sm:$0xff]  ;;  %v3194_v41 = vld [vmem:[#allocation2 + $0x310] sm:$0xff] }
 0xca6   :  { %3226 = vmatpush.msra.mxu3 %v3186_v12  ;;  %3247 = vmatpush.msrb.mxu0 %v3222_v16  ;;  %v3161_v12 = vld [vmem:[#allocation2 + $0x208] sm:$0xff] }
 0xca7   :  { %8760 = vmatmul.msk.f32.gmra.mxu1 %vm1031_vm2, %v8758_v13  ;;  %8754 = vmatmul.msk.f32.gmra.mxu3 %vm1031_vm2, %v2987_v48  ;;  %v3197_v16 = vld [vmem:[#allocation2 + $0x328] sm:$0xff] }
 0xca8   :  { %3227 = vmatpush.msra.mxu3 %v3184_v49  ;;  %3248 = vmatpush.msrb.mxu0 %v3220_v53  ;;  %v3071_v49 = vld [vmem:[#allocation2 + $0xf8] sm:$0xff] }
 0xca9   :  { %3272 = vmatpush.msrb.mxu1 %v3187_v7  ;;  %3293 = vmatpush.msrb.mxu2 %v3223_v50  ;;  %v3195_v53 = vld [vmem:[#allocation2 + $0x318] sm:$0xff]  ;;  %v3062_v7 = vld [vmem:[#allocation2 + $0xb0] sm:$0xff] }
 0xcaa   :  { %3228 = vmatpush.msra.mxu3 %v3182_v51  ;;  %3249 = vmatpush.msrb.mxu0 %v3218_v52  ;;  %v3098_v50 = vld [vmem:[#allocation2 + $0x1d0] sm:$0xff]  ;;  %v3069_v51 = vld [vmem:[#allocation2 + $0xe8] sm:$0xff] }
 0xcab   :  { %3273 = vmatpush.msrb.mxu1 %v3185_v54  ;;  %3294 = vmatpush.msrb.mxu2 %v3221_v56  ;;  %v3193_v52 = vld [vmem:[#allocation2 + $0x308] sm:$0xff]  ;;  %v3060_v54 = vld [vmem:[#allocation2 + $0xa0] sm:$0xff] }
 0xcac   :  { %3229 = vmatpush.msra.mxu3 %v3180_v57  ;;  %3250 = vmatpush.msrb.mxu0 %v3216_v55  ;;  %v3096_v56 = vld [vmem:[#allocation2 + $0x1c0] sm:$0xff]  ;;  %v3067_v57 = vld [vmem:[#allocation2 + $0xd8] sm:$0xff] }
 0xcad   :  { %8762 = vmatmul.msk.f32.gmra.mxu2 %vm1031_vm2, %v8758_v13  ;;  %8756 = vmatmul.msk.f32.gmra.mxu0 %vm1031_vm2, %v2987_v48  ;;  %v3064_v13 = vld [vmem:[#allocation2 + $0xc0] sm:$0xff]  ;;  %v3103_v55 = vld [vmem:[#allocation2 + $0x1f8] sm:$0xff] }
 0xcae   :  { %3230 = vmatpush.msra.mxu3 %v3178_v58  ;;  %3251 = vmatpush.msrb.mxu0 %v3214_v59  ;;  %v3100_v48 = vld [vmem:[#allocation2 + $0x1e0] sm:$0xff]  ;;  %v3058_v58 = vld [vmem:[#allocation2 + $0x90] sm:$0xff] }
 0xcaf   :  { %3274 = vmatpush.msrb.mxu1 %v3183_v60  ;;  %3295 = vmatpush.msrb.mxu2 %v3219_v63  ;;  %v3094_v59 = vld [vmem:[#allocation2 + $0x1b0] sm:$0xff]  ;;  %v3065_v60 = vld [vmem:[#allocation2 + $0xc8] sm:$0xff]  ;;  %v3056_v63 = vld [vmem:[#allocation2 + $0x80] sm:$0xff] }
 0xcb0   :  { %3231 = vmatpush.msra.mxu3 %v3176_v0  ;;  %3252 = vmatpush.msrb.mxu0 %v3212_v1  ;;  %v3092_v0 = vld [vmem:[#allocation2 + $0x1a0] sm:$0xff]  ;;  %v3063_v1 = vld [vmem:[#allocation2 + $0xb8] sm:$0xff] }
 0xcb1   :  { %3275 = vmatpush.msrb.mxu1 %v3181_v2  ;;  %3296 = vmatpush.msrb.mxu2 %v3217_v3  ;;  %v3054_v2 = vld [vmem:[#allocation2 + $0x70] sm:$0xff] }
 0xcb2   :  { %3232 = vmatpush.msra.mxu3 %v3174_v4  ;;  %3253 = vmatpush.msrb.mxu0 %v3210_v5  ;;  %v3090_v3 = vld [vmem:[#allocation2 + $0x190] sm:$0xff]  ;;  %v3052_v4 = vld [vmem:[#allocation2 + $0x60] sm:$0xff] }
 0xcb3   :  { %3276 = vmatpush.msrb.mxu1 %v3179_v6  ;;  %3297 = vmatpush.msrb.mxu2 %v3215_v8  ;;  %v3088_v5 = vld [vmem:[#allocation2 + $0x180] sm:$0xff]  ;;  %v3050_v6 = vld [vmem:[#allocation2 + $0x50] sm:$0xff] }
 0xcb4   :  { %3233 = vmatpush.msra.mxu3 %v3172_v9  ;;  %3254 = vmatpush.msrb.mxu0 %v3208_v14  ;;  %v3086_v8 = vld [vmem:[#allocation2 + $0x170] sm:$0xff]  ;;  %v3048_v9 = vld [vmem:[#allocation2 + $0x40] sm:$0xff] }
 0xcb5   :  { %3277 = vmatpush.msrb.mxu1 %v3177_v44  ;;  %3298 = vmatpush.msrb.mxu2 %v3213_v15  ;;  %v3046_v14 = vld [vmem:[#allocation2 + $0x30] sm:$0xff]  ;;  %v3044_v44 = vld [vmem:[#allocation2 + $0x20] sm:$0xff] }
 0xcb6   :  { %3234 = vmatpush.msra.mxu3 %v3170_v18  ;;  %3255 = vmatpush.msrb.mxu0 %v3206_v19  ;;  %v3042_v15 = vld [vmem:[#allocation2 + $0x10] sm:$0xff]  ;;  %v3040_v18 = vld [vmem:[#allocation2] sm:$0xff] }
 0xcb7   :  { %3278 = vmatpush.msrb.mxu1 %v3175_v21  ;;  %3299 = vmatpush.msrb.mxu2 %v3211_v22  ;;  %v3084_v19 = vld [vmem:[#allocation2 + $0x160] sm:$0xff]  ;;  %v3061_v21 = vld [vmem:[#allocation2 + $0xa8] sm:$0xff] }
 0xcb8   :  { %3235 = vmatpush.msra.mxu3 %v3168_v23  ;;  %3256 = vmatpush.msrb.mxu0 %v3204_v24  ;;  %v3101_v22 = vld [vmem:[#allocation2 + $0x1e8] sm:$0xff]  ;;  %v3082_v23 = vld [vmem:[#allocation2 + $0x150] sm:$0xff]  ;;  %v3059_v24 = vld [vmem:[#allocation2 + $0x98] sm:$0xff] }
 0xcb9   :  { %3279 = vmatpush.msrb.mxu1 %v3173_v17  ;;  %3300 = vmatpush.msrb.mxu2 %v3209_v25  ;;  %v3099_v17 = vld [vmem:[#allocation2 + $0x1d8] sm:$0xff]  ;;  %v3080_v25 = vld [vmem:[#allocation2 + $0x140] sm:$0xff] }
 0xcba   :  { %3236 = vmatpush.msra.mxu3 %v3166_v26  ;;  %3257 = vmatpush.msrb.mxu0 %v3202_v20  ;;  %v3057_v26 = vld [vmem:[#allocation2 + $0x88] sm:$0xff] }
 0xcbb   :  { %3280 = vmatpush.msrb.mxu1 %v3171_v27  ;;  %3301 = vmatpush.msrb.mxu2 %v3207_v11  ;;  %v3097_v20 = vld [vmem:[#allocation2 + $0x1c8] sm:$0xff]  ;;  %v3078_v27 = vld [vmem:[#allocation2 + $0x130] sm:$0xff]  ;;  %v3055_v11 = vld [vmem:[#allocation2 + $0x78] sm:$0xff] }
 0xcbc   :  { %3237 = vmatpush.msra.mxu3 %v3164_v28  ;;  %3258 = vmatpush.msrb.mxu0 %v3200_v29  ;;  %v3095_v28 = vld [vmem:[#allocation2 + $0x1b8] sm:$0xff]  ;;  %v3076_v29 = vld [vmem:[#allocation2 + $0x120] sm:$0xff] }
 0xcbd   :  { %3281 = vmatpush.msrb.mxu1 %v3169_v30  ;;  %3302 = vmatpush.msrb.mxu2 %v3205_v31  ;;  %v3053_v30 = vld [vmem:[#allocation2 + $0x68] sm:$0xff] }
 0xcbe   :  { %3238 = vmatpush.msra.mxu3 %v3162_v32  ;;  %3259 = vmatpush.msrb.mxu0 %v3198_v33  ;;  %v3093_v31 = vld [vmem:[#allocation2 + $0x1a8] sm:$0xff]  ;;  %v3074_v32 = vld [vmem:[#allocation2 + $0x110] sm:$0xff]  ;;  %v3051_v33 = vld [vmem:[#allocation2 + $0x58] sm:$0xff] }
 0xcbf   :  { %3282 = vmatpush.msrb.mxu1 %v3167_v34  ;;  %3303 = vmatpush.msrb.mxu2 %v3203_v35  ;;  %v3091_v34 = vld [vmem:[#allocation2 + $0x198] sm:$0xff]  ;;  %v3072_v35 = vld [vmem:[#allocation2 + $0x100] sm:$0xff] }
 0xcc0   :  { %3239 = vmatpush.msra.mxu3 %v3160_v36  ;;  %3260 = vmatpush.msrb.mxu0 %v3196_v38  ;;  %v3049_v36 = vld [vmem:[#allocation2 + $0x48] sm:$0xff] }
 0xcc1   :  { %3283 = vmatpush.msrb.mxu1 %v3165_v40  ;;  %3304 = vmatpush.msrb.mxu2 %v3201_v42  ;;  %v3089_v38 = vld [vmem:[#allocation2 + $0x188] sm:$0xff]  ;;  %v3087_v40 = vld [vmem:[#allocation2 + $0x178] sm:$0xff] }
 0xcc2   :  { %3316 = vmatpush.msrb.mxu3 %v3070_v37  ;;  %3261 = vmatpush.msrb.mxu0 %v3194_v41  ;;  %v3047_v37 = vld [vmem:[#allocation2 + $0x38] sm:$0xff]  ;;  %v3045_v41 = vld [vmem:[#allocation2 + $0x28] sm:$0xff] }
 0xcc3   :  { %3284 = vmatpush.msrb.mxu1 %v3163_v45  ;;  %3305 = vmatpush.msrb.mxu2 %v3199_v61  ;;  %v3085_v42 = vld [vmem:[#allocation2 + $0x168] sm:$0xff]  ;;  %v3083_v45 = vld [vmem:[#allocation2 + $0x158] sm:$0xff] }
 0xcc4   :  { %3317 = vmatpush.msrb.mxu3 %v3068_v43  ;;  %3262 = vmatpush.msrb.mxu0 %v3192_v46  ;;  %v3043_v43 = vld [vmem:[#allocation2 + $0x18] sm:$0xff]  ;;  %v3041_v46 = vld [vmem:[#allocation2 + $0x8] sm:$0xff] }
 0xcc5   :  { %3285 = vmatpush.msrb.mxu1 %v3161_v12  ;;  %3306 = vmatpush.msrb.mxu2 %v3197_v16  ;;  %v3081_v61 = vld [vmem:[#allocation2 + $0x148] sm:$0xff]  ;;  %v3075_v12 = vld [vmem:[#allocation2 + $0x118] sm:$0xff] }
 0xcc6   :  { %3318 = vmatpush.msrb.mxu3 %v3066_v62  ;;  %3339 = vmatpush.msra.mxu0 %v3102_v10  ;;  %v3079_v62 = vld [vmem:[#allocation2 + $0x138] sm:$0xff]  ;;  %v3077_v10 = vld [vmem:[#allocation2 + $0x128] sm:$0xff] }
 0xcc7   :  { %3362 = vmatpush.msra.mxu1 %v3071_v49  ;;  %3307 = vmatpush.msrb.mxu2 %v3195_v53  ;;  %v3073_v16 = vld [vmem:[#allocation2 + $0x108] sm:$0xff] }
 0xcc8   :  { %3319 = vmatpush.msrb.mxu3 %v3064_v13  ;;  %3340 = vmatpush.msra.mxu0 %v3100_v48 }
 0xcc9   :  { %3363 = vmatpush.msra.mxu1 %v3069_v51  ;;  %3308 = vmatpush.msrb.mxu2 %v3193_v52 }
 0xcca   :  { %3320 = vmatpush.msrb.mxu3 %v3062_v7  ;;  %3341 = vmatpush.msra.mxu0 %v3098_v50 }
 0xccb   :  { %3364 = vmatpush.msra.mxu1 %v3067_v57  ;;  %3385 = vmatpush.msra.mxu2 %v3103_v55  ;;  %v3491_v57 = vld [vmem:[#allocation2 + $0x4d8] sm:$0xff]  ;;  %v3494_v55 = vld [vmem:[#allocation2 + $0x4f0] sm:$0xff] }
 0xccc   :  { %3321 = vmatpush.msrb.mxu3 %v3060_v54  ;;  %3342 = vmatpush.msra.mxu0 %v3096_v56  ;;  %v8764_v54 = vld [vmem:[%s11953_s15 + $0x28] sm:$0xff] }
 0xccd   :  { %3365 = vmatpush.msra.mxu1 %v3065_v60  ;;  %3386 = vmatpush.msra.mxu2 %v3101_v22  ;;  %v3493_v56 = vld [vmem:[#allocation2 + $0x4e8] sm:$0xff]  ;;  %v3527_v60 = vld [vmem:[#allocation2 + $0x5f8] sm:$0xff]  ;;  %v3484_v22 = vld [vmem:[#allocation2 + $0x4a0] sm:$0xff] }
 0xcce   :  { %3322 = vmatpush.msrb.mxu3 %v3058_v58  ;;  %3343 = vmatpush.msra.mxu0 %v3094_v59  ;;  %v3526_v58 = vld [vmem:[#allocation2 + $0x5f0] sm:$0xff]  ;;  %v3489_v59 = vld [vmem:[#allocation2 + $0x4c8] sm:$0xff] }
 0xccf   :  { %3366 = vmatpush.msra.mxu1 %v3063_v1  ;;  %3387 = vmatpush.msra.mxu2 %v3099_v17  ;;  %v3487_v1 = vld [vmem:[#allocation2 + $0x4b8] sm:$0xff]  ;;  %v3517_v17 = vld [vmem:[#allocation2 + $0x5a8] sm:$0xff] }
 0xcd0   :  { %3323 = vmatpush.msrb.mxu3 %v3056_v63  ;;  %3344 = vmatpush.msra.mxu0 %v3092_v0  ;;  %v3492_v63 = vld [vmem:[#allocation2 + $0x4e0] sm:$0xff] }
 0xcd1   :  { %3367 = vmatpush.msra.mxu1 %v3061_v21  ;;  %3388 = vmatpush.msra.mxu2 %v3097_v20  ;;  %v3524_v0 = vld [vmem:[#allocation2 + $0x5e0] sm:$0xff]  ;;  %v3519_v21 = vld [vmem:[#allocation2 + $0x5b8] sm:$0xff]  ;;  %v3477_v20 = vld [vmem:[#allocation2 + $0x468] sm:$0xff] }
 0xcd2   :  { %3324 = vmatpush.msrb.mxu3 %v3054_v2  ;;  %3345 = vmatpush.msra.mxu0 %v3090_v3  ;;  %v3525_v2 = vld [vmem:[#allocation2 + $0x5e8] sm:$0xff]  ;;  %v3490_v3 = vld [vmem:[#allocation2 + $0x4d0] sm:$0xff] }
 0xcd3   :  { %3368 = vmatpush.msra.mxu1 %v3059_v24  ;;  %3389 = vmatpush.msra.mxu2 %v3095_v28  ;;  %v3479_v24 = vld [vmem:[#allocation2 + $0x478] sm:$0xff]  ;;  %v3512_v28 = vld [vmem:[#allocation2 + $0x580] sm:$0xff] }
 0xcd4   :  { %3325 = vmatpush.msrb.mxu3 %v3052_v4  ;;  %3346 = vmatpush.msra.mxu0 %v3088_v5  ;;  %v3522_v4 = vld [vmem:[#allocation2 + $0x5d0] sm:$0xff]  ;;  %v3485_v5 = vld [vmem:[#allocation2 + $0x4a8] sm:$0xff] }
 0xcd5   :  { %3369 = vmatpush.msra.mxu1 %v3057_v26  ;;  %3390 = vmatpush.msra.mxu2 %v3093_v31  ;;  %v3514_v26 = vld [vmem:[#allocation2 + $0x590] sm:$0xff] }
 0xcd6   :  { %3326 = vmatpush.msrb.mxu3 %v3050_v6  ;;  %3347 = vmatpush.msra.mxu0 %v3086_v8  ;;  %v3523_v6 = vld [vmem:[#allocation2 + $0x5d8] sm:$0xff]  ;;  %v3488_v8 = vld [vmem:[#allocation2 + $0x4c0] sm:$0xff]  ;;  %v3478_v31 = vld [vmem:[#allocation2 + $0x470] sm:$0xff] }
 0xcd7   :  { %3370 = vmatpush.msra.mxu1 %v3055_v11  ;;  %3391 = vmatpush.msra.mxu2 %v3091_v34  ;;  %v3480_v11 = vld [vmem:[#allocation2 + $0x480] sm:$0xff]  ;;  %v3511_v34 = vld [vmem:[#allocation2 + $0x578] sm:$0xff] }
 0xcd8   :  { %3327 = vmatpush.msrb.mxu3 %v3048_v9  ;;  %3348 = vmatpush.msra.mxu0 %v3084_v19  ;;  %v3520_v9 = vld [vmem:[#allocation2 + $0x5c0] sm:$0xff]  ;;  %v3481_v19 = vld [vmem:[#allocation2 + $0x488] sm:$0xff] }
 0xcd9   :  { %3371 = vmatpush.msra.mxu1 %v3053_v30  ;;  %3392 = vmatpush.msra.mxu2 %v3089_v38  ;;  %v3513_v30 = vld [vmem:[#allocation2 + $0x588] sm:$0xff]  ;;  %v3471_v38 = vld [vmem:[#allocation2 + $0x438] sm:$0xff] }
 0xcda   :  { %3328 = vmatpush.msrb.mxu3 %v3046_v14  ;;  %3349 = vmatpush.msra.mxu0 %v3082_v23  ;;  %v3483_v14 = vld [vmem:[#allocation2 + $0x498] sm:$0xff]  ;;  %v3516_v23 = vld [vmem:[#allocation2 + $0x5a0] sm:$0xff] }
 0xcdb   :  { %3372 = vmatpush.msra.mxu1 %v3051_v33  ;;  %3393 = vmatpush.msra.mxu2 %v3087_v40  ;;  %v3473_v33 = vld [vmem:[#allocation2 + $0x448] sm:$0xff]  ;;  %v3474_v40 = vld [vmem:[#allocation2 + $0x450] sm:$0xff] }
 0xcdc   :  { %3329 = vmatpush.msrb.mxu3 %v3044_v44  ;;  %3350 = vmatpush.msra.mxu0 %v3080_v25  ;;  %v3521_v44 = vld [vmem:[#allocation2 + $0x5c8] sm:$0xff]  ;;  %v3482_v25 = vld [vmem:[#allocation2 + $0x490] sm:$0xff] }
 0xcdd   :  { %3373 = vmatpush.msra.mxu1 %v3049_v36  ;;  %3394 = vmatpush.msra.mxu2 %v3085_v42  ;;  %v3508_v36 = vld [vmem:[#allocation2 + $0x560] sm:$0xff]  ;;  %v3469_v42 = vld [vmem:[#allocation2 + $0x428] sm:$0xff] }
 0xcde   :  { %3330 = vmatpush.msrb.mxu3 %v3042_v15  ;;  %3351 = vmatpush.msra.mxu0 %v3078_v27  ;;  %v3486_v15 = vld [vmem:[#allocation2 + $0x4b0] sm:$0xff]  ;;  %v3515_v27 = vld [vmem:[#allocation2 + $0x598] sm:$0xff] }
 0xcdf   :  { %3374 = vmatpush.msra.mxu1 %v3047_v37  ;;  %3395 = vmatpush.msra.mxu2 %v3083_v45  ;;  %v3509_v37 = vld [vmem:[#allocation2 + $0x568] sm:$0xff]  ;;  %v3472_v45 = vld [vmem:[#allocation2 + $0x440] sm:$0xff] }
 0xce0   :  { %3331 = vmatpush.msrb.mxu3 %v3040_v18  ;;  %3352 = vmatpush.msra.mxu0 %v3076_v29  ;;  %v3518_v18 = vld [vmem:[#allocation2 + $0x5b0] sm:$0xff]  ;;  %v3475_v29 = vld [vmem:[#allocation2 + $0x458] sm:$0xff] }
 0xce1   :  { %3375 = vmatpush.msra.mxu1 %v3045_v41  ;;  %3396 = vmatpush.msra.mxu2 %v3081_v61  ;;  %v3506_v41 = vld [vmem:[#allocation2 + $0x550] sm:$0xff]  ;;  %v3467_v61 = vld [vmem:[#allocation2 + $0x418] sm:$0xff] }
 0xce2   :  { %3353 = vmatpush.msra.mxu0 %v3074_v32  ;;  %v3510_v32 = vld [vmem:[#allocation2 + $0x570] sm:$0xff] }
 0xce3   :  { %3376 = vmatpush.msra.mxu1 %v3043_v43  ;;  %3397 = vmatpush.msra.mxu2 %v3079_v62  ;;  %v3507_v43 = vld [vmem:[#allocation2 + $0x558] sm:$0xff]  ;;  %v3505_v62 = vld [vmem:[#allocation2 + $0x548] sm:$0xff] }
 0xce4   :  { %3354 = vmatpush.msra.mxu0 %v3072_v35  ;;  %v3476_v35 = vld [vmem:[#allocation2 + $0x460] sm:$0xff] }
 0xce5   :  { %3377 = vmatpush.msra.mxu1 %v3041_v46  ;;  %3398 = vmatpush.msra.mxu2 %v3077_v10  ;;  %v3504_v46 = vld [vmem:[#allocation2 + $0x540] sm:$0xff] }
 0xce7   :  { %3399 = vmatpush.msra.mxu2 %v3075_v12  ;;  %v3470_v12 = vld [vmem:[#allocation2 + $0x430] sm:$0xff] }
 0xce9   :  { %3400 = vmatpush.msra.mxu2 %v3073_v16  ;;  %v3502_v16 = vld [vmem:[#allocation2 + $0x530] sm:$0xff] }
 0xd1c   :  { %v3130_v13 = vpop.f32.mrf.mxu1 }
 0xd1d   :  { %3240 = vmatmul.f32.vlgmr.msra.gmra.mxu3 %v3130_v13  ;;  %3286 = vmatmul.f32.vlgmr.msrb.gmra.mxu1 %v3130_v13  ;;  %v3465_v13 = vld [vmem:[#allocation2 + $0x408] sm:$0xff] }
 0xd1e   :  { %3432 = vmatpush.msra.mxu3 %v10690_v39  ;;  %v8763_v39 = vld [vmem:[%s11953_s15 + $0x20] sm:$0xff]  ;;  %3528 = vmatpush.msrb.mxu1 %v3494_v55 }
 0xd20   :  { %3529 = vmatpush.msrb.mxu1 %v3492_v63 }
 0xd22   :  { %v3011_v53 = vpop.f32.mrf.mxu3  ;;  %v3034_v51 = vpop.f32.mrf.mxu0  ;;  %3530 = vmatpush.msrb.mxu1 %v3490_v3 }
 0xd24   :  { %v3133_v48 = vpop.f32.mrf.mxu1  ;;  %3531 = vmatpush.msrb.mxu1 %v3488_v8 }
 0xd25   :  { %3243 = vmatmul.f32.gmra.mxu3 %v3133_v48  ;;  %3289 = vmatmul.f32.gmra.mxu1 %v3133_v48  ;;  %v3503_v48 = vld [vmem:[#allocation2 + $0x538] sm:$0xff] }
 0xd26   :  { %3532 = vmatpush.msrb.mxu1 %v3486_v15 }
 0xd28   :  { %v3153_v49 = vpop.f32.mrf.mxu2  ;;  %3533 = vmatpush.msrb.mxu1 %v3484_v22 }
 0xd29   :  { %3263 = vmatmul.f32.vlgmr.msrb.gmra.mxu0 %v3153_v49  ;;  %3309 = vmatmul.f32.vlgmr.msrb.gmra.mxu2 %v3153_v49  ;;  %v3468_v49 = vld [vmem:[#allocation2 + $0x420] sm:$0xff] }
 0xd2a   :  { %3455 = vmatpush.msrb.mxu0 %v10698_v47  ;;  %v3014_v50 = vpop.f32.mrf.mxu3  ;;  %v3037_v52 = vpop.f32.mrf.mxu0  ;;  %v3495_v47 = vld [vmem:[#allocation2 + $0x4f8] sm:$0xff]  ;;  %3551 = vmatpush.msrb.mxu2 %v3526_v58 }
 0xd2b   :  { %3534 = vmatpush.msrb.mxu1 %v3482_v25 }
 0xd2c   :  { %3552 = vmatpush.msrb.mxu2 %v3524_v0 }
 0xd2d   :  { %3332 = vmatmul.f32.vlgmr.msrb.gmra.mxu3 %v3011_v53  ;;  %3378 = vmatmul.f32.vlgmr.msra.gmra.mxu1 %v3011_v53  ;;  %v3500_v53 = vld [vmem:[#allocation2 + $0x520] sm:$0xff] }
 0xd2e   :  { %3574 = vmatpush.msrb.mxu3 %v3495_v47  ;;  %3553 = vmatpush.msrb.mxu2 %v3522_v4  ;;  %v3496_v47 = vld [vmem:[#allocation2 + $0x500] sm:$0xff] }
 0xd2f   :  { %3535 = vmatpush.msrb.mxu1 %v3480_v11 }
 0xd30   :  { %v3156_v7 = vpop.f32.mrf.mxu2  ;;  %3575 = vmatpush.msrb.mxu3 %v3493_v56  ;;  %3554 = vmatpush.msrb.mxu2 %v3520_v9  ;;  %v3497_v56 = vld [vmem:[#allocation2 + $0x508] sm:$0xff] }
 0xd31   :  { %3266 = vmatmul.f32.gmra.mxu0 %v3156_v7  ;;  %3312 = vmatmul.f32.gmra.mxu2 %v3156_v7  ;;  %v3501_v7 = vld [vmem:[#allocation2 + $0x528] sm:$0xff] }
 0xd32   :  { %3576 = vmatpush.msrb.mxu3 %v3491_v57  ;;  %3555 = vmatpush.msrb.mxu2 %v3518_v18 }
 0xd33   :  { %3536 = vmatpush.msrb.mxu1 %v3478_v31 }
 0xd34   :  { %3577 = vmatpush.msrb.mxu3 %v3489_v59  ;;  %3556 = vmatpush.msrb.mxu2 %v3516_v23 }
 0xd35   :  { %3335 = vmatmul.f32.gmra.mxu3 %v3014_v50  ;;  %3381 = vmatmul.f32.gmra.mxu1 %v3014_v50  ;;  %v3466_v50 = vld [vmem:[#allocation2 + $0x410] sm:$0xff] }
 0xd36   :  { %3578 = vmatpush.msrb.mxu3 %v3487_v1  ;;  %3557 = vmatpush.msrb.mxu2 %v3514_v26  ;;  %v3624_v26 = vld [vmem:[%s11954_s26] sm:$0x3] }
 0xd37   :  { %3537 = vmatpush.msrb.mxu1 %v3476_v35 }
 0xd38   :  { %3579 = vmatpush.msrb.mxu3 %v3485_v5  ;;  %3558 = vmatpush.msrb.mxu2 %v3512_v28 }
 0xd39   :  { %3355 = vmatmul.f32.vlgmr.msra.gmra.mxu0 %v3034_v51  ;;  %3401 = vmatmul.f32.vlgmr.msra.gmra.mxu2 %v3034_v51  ;;  %v3498_v51 = vld [vmem:[#allocation2 + $0x510] sm:$0xff] }
 0xd3a   :  { %3597 = vmatpush.msra.mxu0 %v3527_v60  ;;  %3580 = vmatpush.msrb.mxu3 %v3483_v14 }
 0xd3b   :  { %3559 = vmatpush.msrb.mxu2 %v3510_v32  ;;  %3538 = vmatpush.msrb.mxu1 %v3474_v40 }
 0xd3c   :  { %3598 = vmatpush.msra.mxu0 %v3525_v2  ;;  %3581 = vmatpush.msrb.mxu3 %v3481_v19 }
 0xd3d   :  { %8765 = vmatmul.msk.f32.vlgmr.msra.gmra.mxu3 %vm1031_vm2, %v8763_v39  ;;  %3560 = vmatpush.msrb.mxu2 %v3508_v36 }
 0xd3e   :  { %3599 = vmatpush.msra.mxu0 %v3523_v6  ;;  %3582 = vmatpush.msrb.mxu3 %v3479_v24 }
 0xd3f   :  { %3561 = vmatpush.msrb.mxu2 %v3506_v41  ;;  %3539 = vmatpush.msrb.mxu1 %v3472_v45 }
 0xd40   :  { %3600 = vmatpush.msra.mxu0 %v3521_v44  ;;  %3583 = vmatpush.msrb.mxu3 %v3477_v20 }
 0xd41   :  { %3358 = vmatmul.f32.gmra.mxu0 %v3037_v52  ;;  %3404 = vmatmul.f32.gmra.mxu2 %v3037_v52 }
 0xd42   :  { %3601 = vmatpush.msra.mxu0 %v3519_v21  ;;  %3584 = vmatpush.msrb.mxu3 %v3475_v29 }
 0xd43   :  { %3562 = vmatpush.msrb.mxu2 %v3504_v46  ;;  %3540 = vmatpush.msrb.mxu1 %v3470_v12  ;;  %v3626_v12 = vperm.slane %v3624_v26, 0 }
 0xd44   :  { %3602 = vmatpush.msra.mxu0 %v3517_v17  ;;  %3585 = vmatpush.msrb.mxu3 %v3473_v33  ;;  %v3627_v33 = vperm.slane %v3624_v26, 1  ;;  %v8796_v26 = vld [vmem:[%s11955_s22 + $0x138] sm:$0xff] }
 0xd45   :  { %8766 = vmatmul.msk.f32.gmra.mxu3 %vm1031_vm2, %v8764_v54  ;;  %3563 = vmatpush.msrb.mxu2 %v3502_v16 }
 0xd46   :  { %3603 = vmatpush.msra.mxu0 %v3515_v27  ;;  %3586 = vmatpush.msrb.mxu3 %v3471_v38 }
 0xd47   :  { %3541 = vmatpush.msrb.mxu1 %v3468_v49  ;;  %3564 = vmatpush.msrb.mxu2 %v3500_v53  ;;  %v8777_v49 = vld [vmem:[%s11956_s6 + $0x20] sm:$0xff] }
 0xd48   :  { %3604 = vmatpush.msra.mxu0 %v3513_v30  ;;  %3587 = vmatpush.msrb.mxu3 %v3469_v42 }
 0xd49   :  { %8767 = vmatmul.msk.f32.vlgmr.msrb.gmra.mxu0 %vm1031_vm2, %v8763_v39  ;;  %v3499_v39 = vld [vmem:[#allocation2 + $0x518] sm:$0xff]  ;;  %3542 = vmatpush.msrb.mxu1 %v3466_v50 }
 0xd4a   :  { %3605 = vmatpush.msra.mxu0 %v3511_v34  ;;  %3588 = vmatpush.msrb.mxu3 %v3467_v61 }
 0xd4b   :  { %3565 = vmatpush.msrb.mxu2 %v3498_v51  ;;  %v3638_v51 = vld [vmem:[%s11956_s6] sm:$0xff] }
 0xd4c   :  { %3606 = vmatpush.msra.mxu0 %v3509_v37  ;;  %3589 = vmatpush.msrb.mxu3 %v3465_v13 }
 0xd4d   :  { %3566 = vmatpush.msrb.mxu2 %v3496_v47  ;;  %v8804_v47 = vld [vmem:[%s11955_s22 + $0x178] sm:$0xff] }
 0xd4e   :  { %3607 = vmatpush.msra.mxu0 %v3507_v43 }
 0xd50   :  { %3608 = vmatpush.msra.mxu0 %v3505_v62 }
 0xd51   :  { %8768 = vmatmul.msk.f32.gmra.mxu0 %vm1031_vm2, %v8764_v54  ;;  %v3464_v54 = vld [vmem:[#allocation2 + $0x400] sm:$0xff] }
 0xd52   :  { %3609 = vmatpush.msra.mxu0 %v3503_v48  ;;  %3543 = vmatpush.msrb.mxu1 %v3464_v54  ;;  %v8820_v48 = vld [vmem:[%s11955_s22 + $0x1f8] sm:$0xff] }
 0xd54   :  { %3610 = vmatpush.msra.mxu0 %v3501_v7  ;;  %v8819_v7 = vld [vmem:[%s11955_s22 + $0x1f0] sm:$0xff] }
 0xd56   :  { %3611 = vmatpush.msra.mxu0 %v3499_v39 }
 0xd58   :  { %3612 = vmatpush.msra.mxu0 %v3497_v56  ;;  %v8817_v56 = vld [vmem:[%s11955_s22 + $0x1e0] sm:$0xff] }
 0xd9a   :  { %v3287_v4 = vpop.f32.mrf.mxu1 }
 0xda0   :  { %v10718_v10 = vpop.f32.mrf.mxu3 }
 0xda2   :  { %v3290_v6 = vpop.f32.mrf.mxu1 }
 0xda6   :  { %v3264_v52 = vpop.f32.mrf.mxu0 }
 0xda7   :  { %v3265_v11 = vadd.f32 %v3264_v52, %v10718_v10  ;;  %v8818_v52 = vld [vmem:[%s11955_s22 + $0x1e8] sm:$0xff] }
 0xda8   :  { %v3244_v57 = vpop.f32.mrf.mxu3 }
 0xdaa   :  { %v3379_v9 = vpop.f32.mrf.mxu1 }
 0xdac   :  { %v3310_v5 = vpop.f32.mrf.mxu2 }
 0xdad   :  { %v3311_v21 = vadd.f32 %v3310_v5, %v3287_v4  ;;  %v8814_v4 = vld [vmem:[%s11955_s22 + $0x1c8] sm:$0xff] }
 0xdae   :  { %v3267_v55 = vpop.f32.mrf.mxu0  ;;  %v3725_v5 = vld [vmem:[%s11955_s22 + $0x68] sm:$0xff] }
 0xdaf   :  { %v3380_v24 = vadd.f32 %v3379_v9, %v3311_v21  ;;  %v3268_v34 = vadd.f32 %v3267_v55, %v3244_v57  ;;  %v8803_v57 = vld [vmem:[%s11955_s22 + $0x170] sm:$0xff]  ;;  %v8778_v55 = vld [vmem:[%s11956_s6 + $0x28] sm:$0xff]  ;;  %v3723_v21 = vld [vmem:[%s11955_s22 + $0x58] sm:$0xff] }
 0xdb0   :  { %v3333_v58 = vpop.f32.mrf.mxu3  ;;  %v8799_v9 = vld [vmem:[%s11955_s22 + $0x150] sm:$0xff] }
 0xdb1   :  { %v3334_v35 = vadd.f32 %v3333_v58, %v3265_v11  ;;  %v8816_v58 = vld [vmem:[%s11955_s22 + $0x1d8] sm:$0xff] }
 0xdb2   :  { %v3382_v44 = vpop.f32.mrf.mxu1  ;;  %v8780_v11 = vld [vmem:[%s11956_s6 + $0x38] sm:$0xff] }
 0xdb4   :  { %v3313_v8 = vpop.f32.mrf.mxu2 }
 0xdb5   :  { %v3314_v22 = vadd.f32 %v3313_v8, %v3290_v6  ;;  %v8800_v6 = vld [vmem:[%s11955_s22 + $0x158] sm:$0xff]  ;;  %v8813_v8 = vld [vmem:[%s11955_s22 + $0x1c0] sm:$0xff] }
 0xdb6   :  { %v3356_v59 = vpop.f32.mrf.mxu0 }
 0xdb7   :  { %v3383_v20 = vadd.f32 %v3382_v44, %v3314_v22  ;;  %v3357_v40 = vadd.f32 %v3356_v59, %v3334_v35  ;;  %v8802_v59 = vld [vmem:[%s11955_s22 + $0x168] sm:$0xff]  ;;  %v8812_v44 = vld [vmem:[%s11955_s22 + $0x1b8] sm:$0xff]  ;;  %v8797_v22 = vld [vmem:[%s11955_s22 + $0x140] sm:$0xff] }
 0xdb8   :  { %v3336_v60 = vpop.f32.mrf.mxu3  ;;  %v3720_v35 = vld [vmem:[%s11955_s22 + $0x40] sm:$0xff] }
 0xdb9   :  { %v3337_v37 = vadd.f32 %v3336_v60, %v3268_v34  ;;  %v3727_v60 = vld [vmem:[%s11955_s22 + $0x78] sm:$0xff] }
 0xdba   :  { %v3641_v34 = vld [vmem:[%s11956_s6 + $0x18] sm:$0xff] }
 0xdbc   :  { %v3402_v14 = vpop.f32.mrf.mxu2 }
 0xdbd   :  { %v3403_v27 = vadd.f32 %v3402_v14, %v3380_v24  ;;  %v8779_v14 = vld [vmem:[%s11956_s6 + $0x30] sm:$0xff] }
 0xdbe   :  { %v3359_v63 = vpop.f32.mrf.mxu0  ;;  %v3742_v24 = vld [vmem:[%s11955_s22 + $0xf0] sm:$0xff] }
 0xdbf   :  { %v3360_v43 = vadd.f32 %v3359_v63, %v3337_v37  ;;  %v8815_v63 = vld [vmem:[%s11955_s22 + $0x1d0] sm:$0xff]  ;;  %v8792_v37 = vld [vmem:[%s11955_s22 + $0x118] sm:$0xff] }
 0xdc0   :  { %v3434_v0 = vpop.f32.mrf.mxu3 }
 0xdc1   :  { %3590 = vmatmul.f32.vlgmr.msrb.gmra.mxu3 %v3434_v0  ;;  %3544 = vmatmul.f32.vlgmr.msrb.gmra.mxu1 %v3434_v0  ;;  %v3726_v0 = vld [vmem:[%s11955_s22 + $0x70] sm:$0xff] }
 0xdc4   :  { %v3405_v15 = vpop.f32.mrf.mxu2 }
 0xdc5   :  { %v3406_v30 = vadd.f32 %v3405_v15, %v3383_v20  ;;  %v3724_v15 = vld [vmem:[%s11955_s22 + $0x60] sm:$0xff] }
 0xdc6   :  { %v3457_v1 = vpop.f32.mrf.mxu0  ;;  %v8809_v20 = vld [vmem:[%s11955_s22 + $0x1a0] sm:$0xff] }
 0xdc7   :  { %3567 = vmatmul.f32.vlgmr.msrb.gmra.mxu2 %v3457_v1  ;;  %3613 = vmatmul.f32.vlgmr.msra.gmra.mxu0 %v3457_v1  ;;  %v8801_v1 = vld [vmem:[%s11955_s22 + $0x160] sm:$0xff] }
 0xdc8   :  { %v3437_v2 = vpop.f32.mrf.mxu3 }
 0xdc9   :  { %3593 = vmatmul.f32.gmra.mxu3 %v3437_v2  ;;  %3547 = vmatmul.f32.gmra.mxu1 %v3437_v2  ;;  %v3639_v2 = vld [vmem:[%s11956_s6 + $0x8] sm:$0xff] }
 0xdce   :  { %v3460_v3 = vpop.f32.mrf.mxu0 }
 0xdcf   :  { %3570 = vmatmul.f32.gmra.mxu2 %v3460_v3  ;;  %3616 = vmatmul.f32.gmra.mxu0 %v3460_v3  ;;  %v3743_v3 = vld [vmem:[%s11955_s22 + $0xf8] sm:$0xff] }
 0xe3e   :  { %v3545_v23 = vpop.f32.mrf.mxu1 }
 0xe44   :  { %v3591_v18 = vpop.f32.mrf.mxu3  ;;  %v3614_v19 = vpop.f32.mrf.mxu0 }
 0xe45   :  { %v3615_v17 = vadd.f32 %v3614_v19, %v3591_v18  ;;  %v8798_v18 = vld [vmem:[%s11955_s22 + $0x148] sm:$0xff]  ;;  %v8811_v19 = vld [vmem:[%s11955_s22 + $0x1b0] sm:$0xff] }
 0xe46   :  { %v3548_v45 = vpop.f32.mrf.mxu1 }
 0xe47   :  { %v3621_v31 = vadd.f32 %v3615_v17, %v3403_v27  ;;  %v8810_v17 = vld [vmem:[%s11955_s22 + $0x1a8] sm:$0xff]  ;;  %v8795_v27 = vld [vmem:[%s11955_s22 + $0x130] sm:$0xff] }
 0xe49   :  { %v3631_v42 = vadd.f32 %v3627_v33, %v3621_v31  ;;  %v8807_v31 = vld [vmem:[%s11955_s22 + $0x190] sm:$0xff] }
 0xe4a   :  { %v3568_v25 = vpop.f32.mrf.mxu2 }
 0xe4b   :  { %v3569_v36 = vadd.f32 %v3568_v25, %v3545_v23  ;;  %v10726_v13 = vmax.f32 %v3631_v42, 0.0  ;;  %v3640_v23 = vld [vmem:[%s11956_s6 + $0x10] sm:$0xff]  ;;  %v3719_v42 = vld [vmem:[%s11955_s22 + $0x38] sm:$0xff] }
 0xe4c   :  { %v3594_v28 = vpop.f32.mrf.mxu3  ;;  %v3617_v29 = vpop.f32.mrf.mxu0  ;;  %v3722_v25 = vld [vmem:[%s11955_s22 + $0x50] sm:$0xff] }
 0xe4d   :  { %v3618_v32 = vadd.f32 %v3617_v29, %v3594_v28  ;;  %v3620_v61 = vadd.f32 %v3569_v36, %v3357_v40  ;;  %v8808_v28 = vld [vmem:[%s11955_s22 + $0x198] sm:$0xff]  ;;  %v3721_v29 = vld [vmem:[%s11955_s22 + $0x48] sm:$0xff]  ;;  %v8805_v40 = vld [vmem:[%s11955_s22 + $0x180] sm:$0xff] }
 0xe4e   :  { %v8806_v36 = vld [vmem:[%s11955_s22 + $0x188] sm:$0xff] }
 0xe4f   :  { %v3623_v38 = vadd.f32 %v3618_v32, %v3406_v30  ;;  %v3630_v50 = vadd.f32 %v3626_v12, %v3620_v61  ;;  %v8794_v30 = vld [vmem:[%s11955_s22 + $0x128] sm:$0xff]  ;;  %v3738_v61 = vld [vmem:[%s11955_s22 + $0xd0] sm:$0xff] }
 0xe50   :  { %v3741_v32 = vld [vmem:[%s11955_s22 + $0xe8] sm:$0xff] }
 0xe51   :  { %v3633_v41 = vadd.f32 %v3627_v33, %v3623_v38  ;;  %v10741_v54 = vmax.f32 %v3630_v50, 0.0  ;;  %v8793_v33 = vld [vmem:[%s11955_s22 + $0x120] sm:$0xff]  ;;  %v3713_v50 = vld [vmem:[%s11955_s22 + $0x8] sm:$0xff] }
 0xe52   :  { %v3571_v46 = vpop.f32.mrf.mxu2  ;;  %v3740_v38 = vld [vmem:[%s11955_s22 + $0xe0] sm:$0xff] }
 0xe53   :  { %v10722_v62 = vmax.f32 %v3633_v41, 0.0  ;;  %v3572_v10 = vadd.f32 %v3571_v46, %v3548_v45  ;;  %v8791_v41 = vld [vmem:[%s11955_s22 + $0x110] sm:$0xff]  ;;  %v8790_v45 = vld [vmem:[%s11955_s22 + $0x108] sm:$0xff] }
 0xe54   :  { %v3718_v46 = vld [vmem:[%s11955_s22 + $0x30] sm:$0xff] }
 0xe55   :  { %v3622_v16 = vadd.f32 %v3572_v10, %v3360_v43  ;;  %3697 = vmatpush.msra.mxu2 %v10722_v62  ;;  %3804 = vmatpush.msrb.mxu0 %v10722_v62  ;;  %v3739_v43 = vld [vmem:[%s11955_s22 + $0xd8] sm:$0xff]  ;;  %v8789_v10 = vld [vmem:[%s11955_s22 + $0x100] sm:$0xff] }
 0xe57   :  { %v3632_v53 = vadd.f32 %v3626_v12, %v3622_v16  ;;  %3698 = vmatpush.msra.mxu2 %v10726_v13  ;;  %3805 = vmatpush.msrb.mxu0 %v10726_v13  ;;  %v3717_v12 = vld [vmem:[%s11955_s22 + $0x28] sm:$0xff] }
 0xe58   :  { %8785 = vmatmul.msk.f32.vlgmr.msrb.gmra.mxu0 %vm450_vm1, %v8777_v49  ;;  %8773 = vmatmul.msk.f32.vlgmr.msra.gmra.mxu2 %vm450_vm1, %v3638_v51  ;;  %v3737_v16 = vld [vmem:[%s11955_s22 + $0xc8] sm:$0xff] }
 0xe59   :  { %3881 = vmatpush.msrb.mxu2 %v8820_v48  ;;  %v10735_v39 = vmax.f32 %v3632_v53, 0.0  ;;  %3939 = vmatpush.msra.mxu0 %v3743_v3  ;;  %v3736_v48 = vld [vmem:[%s11955_s22 + $0xc0] sm:$0xff]  ;;  %v3714_v53 = vld [vmem:[%s11955_s22 + $0x10] sm:$0xff] }
 0xe5b   :  { %3882 = vmatpush.msrb.mxu2 %v8819_v7  ;;  %3668 = vmatpush.msra.mxu1 %v10735_v39  ;;  %v3734_v7 = vld [vmem:[%s11955_s22 + $0xb0] sm:$0xff] }
 0xe5c   :  { %3775 = vmatpush.msra.mxu3 %v10735_v39  ;;  %3940 = vmatpush.msra.mxu0 %v3742_v24  ;;  %v8823_v24 = vld [vmem:[%s11956_s6 + $0x50] sm:$0xff] }
 0xe5d   :  { %3883 = vmatpush.msrb.mxu2 %v8818_v52  ;;  %3669 = vmatpush.msra.mxu1 %v10741_v54  ;;  %v3732_v52 = vld [vmem:[%s11955_s22 + $0xa0] sm:$0xff] }
 0xe5e   :  { %3776 = vmatpush.msra.mxu3 %v10741_v54  ;;  %8769 = vmatmul.msk.f32.vlgmr.msra.gmra.mxu1 %vm450_vm1, %v3638_v51  ;;  %v3733_v51 = vld [vmem:[%s11955_s22 + $0xa8] sm:$0xff] }
 0xe5f   :  { %8781 = vmatmul.msk.f32.vlgmr.msra.gmra.mxu3 %vm450_vm1, %v8777_v49  ;;  %3852 = vmatpush.msrb.mxu1 %v8804_v47  ;;  %v3715_v49 = vld [vmem:[%s11955_s22 + $0x18] sm:$0xff]  ;;  %v3730_v47 = vld [vmem:[%s11955_s22 + $0x90] sm:$0xff] }
 0xe60   :  { %3884 = vmatpush.msrb.mxu2 %v8817_v56  ;;  %8786 = vmatmul.msk.f32.gmra.mxu0 %vm450_vm1, %v8778_v55  ;;  %v3729_v56 = vld [vmem:[%s11955_s22 + $0x88] sm:$0xff] }
 0xe61   :  { %3853 = vmatpush.msrb.mxu1 %v8803_v57  ;;  %3910 = vmatpush.msrb.mxu3 %v3727_v60  ;;  %v3728_v57 = vld [vmem:[%s11955_s22 + $0x80] sm:$0xff] }
 0xe62   :  { %3885 = vmatpush.msrb.mxu2 %v8816_v58  ;;  %3941 = vmatpush.msra.mxu0 %v3741_v32  ;;  %v8862_v32 = vld [vmem:[%s11955_s22 + $0x2e8] sm:$0xff] }
 0xe63   :  { %3854 = vmatpush.msrb.mxu1 %v8802_v59  ;;  %8774 = vmatmul.msk.f32.gmra.mxu2 %vm450_vm1, %v3639_v2 }
 0xe64   :  { %3886 = vmatpush.msrb.mxu2 %v8815_v63  ;;  %3911 = vmatpush.msrb.mxu3 %v3726_v0  ;;  %v10831_v0 = vld [vmem:[%s9749_s5 + $0x38] sm:$0xff] }
 0xe65   :  { %3855 = vmatpush.msrb.mxu1 %v8801_v1  ;;  %3942 = vmatpush.msra.mxu0 %v3740_v38  ;;  %v8843_v38 = vld [vmem:[%s11955_s22 + $0x250] sm:$0xff] }
 0xe66   :  { %3887 = vmatpush.msrb.mxu2 %v8814_v4  ;;  %3912 = vmatpush.msrb.mxu3 %v3725_v5  ;;  %v10836_v5 = vld [vmem:[%s9749_s5 + $0x30] sm:$0xff] }
 0xe67   :  { %8782 = vmatmul.msk.f32.gmra.mxu3 %vm450_vm1, %v8778_v55  ;;  %3856 = vmatpush.msrb.mxu1 %v8800_v6 }
 0xe68   :  { %3888 = vmatpush.msrb.mxu2 %v8813_v8  ;;  %8770 = vmatmul.msk.f32.gmra.mxu1 %vm450_vm1, %v3639_v2 }
 0xe69   :  { %3857 = vmatpush.msrb.mxu1 %v8799_v9  ;;  %8787 = vmatmul.msk.f32.gmra.mxu0 %vm450_vm1, %v8779_v14 }
 0xe6a   :  { %3889 = vmatpush.msrb.mxu2 %v8812_v44  ;;  %3913 = vmatpush.msrb.mxu3 %v3724_v15  ;;  %v10841_v44 = vld [vmem:[%s9749_s5 + $0x28] sm:$0xff]  ;;  %v8821_v15 = vld [vmem:[%s11956_s6 + $0x40] sm:$0xff] }
 0xe6b   :  { %3858 = vmatpush.msrb.mxu1 %v8798_v18  ;;  %8775 = vmatmul.msk.f32.gmra.mxu2 %vm450_vm1, %v3640_v23 }
 0xe6c   :  { %3890 = vmatpush.msrb.mxu2 %v8811_v19  ;;  %3914 = vmatpush.msrb.mxu3 %v3723_v21 }
 0xe6d   :  { %3859 = vmatpush.msrb.mxu1 %v8797_v22  ;;  %3943 = vmatpush.msra.mxu0 %v3739_v43  ;;  %v10848_v22 = vld [vmem:[%s9749_s5 + $0x20] sm:$0xff]  ;;  %s11957_s5 = smov 4  }
 0xe6e   :  { %3891 = vmatpush.msrb.mxu2 %v8810_v17  ;;  %3915 = vmatpush.msrb.mxu3 %v3722_v25  ;;  %v8824_v17 = vld [vmem:[%s11956_s6 + $0x58] sm:$0xff]  ;;  %v8871_v25 = vld [vmem:[%s9759_s13 + $0x10] sm:$0xff]  ;;  %v8857_v43 = vld [vmem:[%s11955_s22 + $0x2c0] sm:$0xff] }
 0xe6f   :  { %8783 = vmatmul.msk.f32.gmra.mxu3 %vm450_vm1, %v8779_v14  ;;  %3860 = vmatpush.msrb.mxu1 %v8796_v26  ;;  %v8872_v26 = vld [vmem:[%s9759_s13 + $0x18] sm:$0xff] }
 0xe70   :  { %3892 = vmatpush.msrb.mxu2 %v8809_v20  ;;  %8771 = vmatmul.msk.f32.gmra.mxu1 %vm450_vm1, %v3640_v23  ;;  %v8822_v23 = vld [vmem:[%s11956_s6 + $0x48] sm:$0xff]  ;;  %v4171_v20 = vld [vmem:[%s9759_s13] sm:$0xff] }
 0xe71   :  { %3861 = vmatpush.msrb.mxu1 %v8795_v27  ;;  %8788 = vmatmul.msk.f32.gmra.mxu0 %vm450_vm1, %v8780_v11  ;;  %v4172_v27 = vld [vmem:[%s9759_s13 + $0x8] sm:$0xff] }
 0xe72   :  { %3893 = vmatpush.msrb.mxu2 %v8808_v28  ;;  %3916 = vmatpush.msrb.mxu3 %v3721_v29  ;;  %v8864_v28 = vld [vmem:[%s11955_s22 + $0x2f8] sm:$0xff]  ;;  %v8847_v29 = vld [vmem:[%s11955_s22 + $0x270] sm:$0xff] }
 0xe73   :  { %3862 = vmatpush.msrb.mxu1 %v8794_v30  ;;  %8776 = vmatmul.msk.f32.gmra.mxu2 %vm450_vm1, %v3641_v34  ;;  %v8863_v30 = vld [vmem:[%s11955_s22 + $0x2f0] sm:$0xff] }
 0xe74   :  { %3894 = vmatpush.msrb.mxu2 %v8807_v31  ;;  %3917 = vmatpush.msrb.mxu3 %v3720_v35  ;;  %v8846_v31 = vld [vmem:[%s11955_s22 + $0x268] sm:$0xff]  ;;  %v8844_v35 = vld [vmem:[%s11955_s22 + $0x258] sm:$0xff] }
 0xe75   :  { %3863 = vmatpush.msrb.mxu1 %v8793_v33  ;;  %3944 = vmatpush.msra.mxu0 %v3738_v61  ;;  %v8845_v33 = vld [vmem:[%s11955_s22 + $0x260] sm:$0xff]  ;;  %v8839_v61 = vld [vmem:[%s11955_s22 + $0x230] sm:$0xff] }
 0xe76   :  { %3895 = vmatpush.msrb.mxu2 %v8806_v36  ;;  %3918 = vmatpush.msrb.mxu3 %v3719_v42  ;;  %v8860_v36 = vld [vmem:[%s11955_s22 + $0x2d8] sm:$0xff]  ;;  %v8841_v42 = vld [vmem:[%s11955_s22 + $0x240] sm:$0xff] }
 0xe77   :  { %8784 = vmatmul.msk.f32.gmra.mxu3 %vm450_vm1, %v8780_v11  ;;  %3864 = vmatpush.msrb.mxu1 %v8792_v37  ;;  %v8848_v11 = vld [vmem:[%s11955_s22 + $0x278] sm:$0xff]  ;;  %v8859_v37 = vld [vmem:[%s11955_s22 + $0x2d0] sm:$0xff] }
 0xe78   :  { %3896 = vmatpush.msrb.mxu2 %v8805_v40  ;;  %8772 = vmatmul.msk.f32.gmra.mxu1 %vm450_vm1, %v3641_v34  ;;  %v8861_v34 = vld [vmem:[%s11955_s22 + $0x2e0] sm:$0xff]  ;;  %v8842_v40 = vld [vmem:[%s11955_s22 + $0x248] sm:$0xff] }
 0xe79   :  { %3865 = vmatpush.msrb.mxu1 %v8791_v41  ;;  %3919 = vmatpush.msrb.mxu3 %v3718_v46  ;;  %v8858_v41 = vld [vmem:[%s11955_s22 + $0x2c8] sm:$0xff]  ;;  %v8856_v46 = vld [vmem:[%s11955_s22 + $0x2b8] sm:$0xff] }
 0xe7a   :  { %4028 = vmatpush.msra.mxu2 %v10722_v62  ;;  %v3716_v62 = vld [vmem:[%s11955_s22 + $0x20] sm:$0xff]  ;;  %3945 = vmatpush.msra.mxu0 %v3737_v16  ;;  %v8854_v16 = vld [vmem:[%s11955_s22 + $0x2a8] sm:$0xff] }
 0xe7b   :  { %3866 = vmatpush.msrb.mxu1 %v8790_v45  ;;  %3920 = vmatpush.msrb.mxu3 %v3717_v12  ;;  %v8840_v45 = vld [vmem:[%s11955_s22 + $0x238] sm:$0xff]  ;;  %v8838_v12 = vld [vmem:[%s11955_s22 + $0x228] sm:$0xff] }
 0xe7c   :  { %4029 = vmatpush.msra.mxu2 %v10726_v13  ;;  %v3735_v13 = vld [vmem:[%s11955_s22 + $0xb8] sm:$0xff]  ;;  %3946 = vmatpush.msra.mxu0 %v3736_v48  ;;  %v8853_v48 = vld [vmem:[%s11955_s22 + $0x2a0] sm:$0xff] }
 0xe7d   :  { %3867 = vmatpush.msrb.mxu1 %v8789_v10  ;;  %3921 = vmatpush.msrb.mxu3 %v3716_v62  ;;  %v8855_v10 = vld [vmem:[%s11955_s22 + $0x2b0] sm:$0xff]  ;;  %v8837_v62 = vld [vmem:[%s11955_s22 + $0x220] sm:$0xff] }
 0xe7e   :  { %3947 = vmatpush.msra.mxu0 %v3735_v13  ;;  %v8836_v13 = vld [vmem:[%s11955_s22 + $0x218] sm:$0xff] }
 0xe7f   :  { %3999 = vmatpush.msra.mxu1 %v10735_v39  ;;  %3922 = vmatpush.msrb.mxu3 %v3715_v49  ;;  %v3712_v39 = vld [vmem:[%s11955_s22] sm:$0xff] }
 0xe80   :  { %3948 = vmatpush.msra.mxu0 %v3734_v7  ;;  %v8835_v7 = vld [vmem:[%s11955_s22 + $0x210] sm:$0xff] }
 0xe81   :  { %4000 = vmatpush.msra.mxu1 %v10741_v54  ;;  %3923 = vmatpush.msrb.mxu3 %v3714_v53  ;;  %v3731_v54 = vld [vmem:[%s11955_s22 + $0x98] sm:$0xff] }
 0xe82   :  { %3949 = vmatpush.msra.mxu0 %v3733_v51  ;;  %v8852_v53 = vld [vmem:[%s11955_s22 + $0x298] sm:$0xff]  ;;  %v8834_v51 = vld [vmem:[%s11955_s22 + $0x208] sm:$0xff] }
 0xe83   :  { %3924 = vmatpush.msrb.mxu3 %v3713_v50  ;;  %v8851_v50 = vld [vmem:[%s11955_s22 + $0x290] sm:$0xff] }
 0xe84   :  { %3950 = vmatpush.msra.mxu0 %v3732_v52 }
 0xe85   :  { %3925 = vmatpush.msrb.mxu3 %v3712_v39  ;;  %v8850_v39 = vld [vmem:[%s11955_s22 + $0x288] sm:$0xff] }
 0xe86   :  { %3951 = vmatpush.msra.mxu0 %v3731_v54  ;;  %v8833_v54 = vld [vmem:[%s11955_s22 + $0x200] sm:$0xff] }
 0xe87   :  { %4076 = vmatpush.msra.mxu3 %v8848_v11 }
 0xe88   :  { %3952 = vmatpush.msra.mxu0 %v3730_v47  ;;  %v8849_v47 = vld [vmem:[%s11955_s22 + $0x280] sm:$0xff] }
 0xe89   :  { %4077 = vmatpush.msra.mxu3 %v8847_v29 }
 0xe8a   :  { %3953 = vmatpush.msra.mxu0 %v3729_v56 }
 0xe8b   :  { %4078 = vmatpush.msra.mxu3 %v8846_v31  ;;  %v8891_v31 = vld [vmem:[%s9759_s13 + $0x20] sm:$0xff] }
 0xe8c   :  { %3954 = vmatpush.msra.mxu0 %v3728_v57 }
 0xe8d   :  { %4079 = vmatpush.msra.mxu3 %v8845_v33 }
 0xe8e   :  { %4105 = vmatpush.msrb.mxu0 %v8864_v28 }
 0xe8f   :  { %4080 = vmatpush.msra.mxu3 %v8844_v35 }
 0xe90   :  { %4106 = vmatpush.msrb.mxu0 %v8863_v30 }
 0xe91   :  { %4081 = vmatpush.msra.mxu3 %v8843_v38 }
 0xe92   :  { %4107 = vmatpush.msrb.mxu0 %v8862_v32  ;;  %v8892_v32 = vld [vmem:[%s9759_s13 + $0x28] sm:$0xff]  ;;  %s11958_s13 = smov 124  }
 0xe93   :  { %4082 = vmatpush.msra.mxu3 %v8842_v40 }
 0xe94   :  { %4108 = vmatpush.msrb.mxu0 %v8861_v34 }
 0xe95   :  { %4083 = vmatpush.msra.mxu3 %v8841_v42 }
 0xe96   :  { %4109 = vmatpush.msrb.mxu0 %v8860_v36 }
 0xe97   :  { %4084 = vmatpush.msra.mxu3 %v8840_v45 }
 0xe98   :  { %4110 = vmatpush.msrb.mxu0 %v8859_v37 }
 0xe99   :  { %4085 = vmatpush.msra.mxu3 %v8839_v61 }
 0xe9a   :  { %4111 = vmatpush.msrb.mxu0 %v8858_v41 }
 0xe9b   :  { %4086 = vmatpush.msra.mxu3 %v8838_v12 }
 0xe9c   :  { %4112 = vmatpush.msrb.mxu0 %v8857_v43 }
 0xe9d   :  { %4087 = vmatpush.msra.mxu3 %v8837_v62 }
 0xe9e   :  { %4113 = vmatpush.msrb.mxu0 %v8856_v46 }
 0xe9f   :  { %4088 = vmatpush.msra.mxu3 %v8836_v13 }
 0xea0   :  { %4114 = vmatpush.msrb.mxu0 %v8855_v10 }
 0xea1   :  { %4089 = vmatpush.msra.mxu3 %v8835_v7 }
 0xea2   :  { %4115 = vmatpush.msrb.mxu0 %v8854_v16  ;;  %v9572_v16 = vld [vmem:[%s9894_s9] ss:$0 sm:$0xff] }
 0xea3   :  { %4090 = vmatpush.msra.mxu3 %v8834_v51 }
 0xea4   :  { %4116 = vmatpush.msrb.mxu0 %v8853_v48 }
 0xea5   :  { %4091 = vmatpush.msra.mxu3 %v8833_v54  ;;  %v8902_v54 = vld [vmem:[%s9764_s17 + $0xb8] sm:$0xff] }
 0xea6   :  { %4117 = vmatpush.msrb.mxu0 %v8852_v53 }
 0xea8   :  { %4118 = vmatpush.msrb.mxu0 %v8851_v50 }
 0xeaa   :  { %4119 = vmatpush.msrb.mxu0 %v8850_v39 }
 0xeac   :  { %4120 = vmatpush.msrb.mxu0 %v8849_v47 }
 0xed5   :  { %v3807_v55 = vpop.f32.mrf.mxu0 }
 0xed6   :  { %3897 = vmatmul.f32.vlgmr.msrb.gmra.mxu2 %v3807_v55  ;;  %v8881_v55 = vld [vmem:[%s9764_s17 + $0x70] sm:$0xff] }
 0xed7   :  { %4230 = vmatpush.msrb.mxu2 %v10831_v0 }
 0xed9   :  { %4231 = vmatpush.msrb.mxu2 %v10836_v5 }
 0xedb   :  { %v3671_v58 = vpop.f32.mrf.mxu1  ;;  %v3700_v59 = vpop.f32.mrf.mxu2  ;;  %4232 = vmatpush.msrb.mxu2 %v10841_v44 }
 0xedc   :  { %3926 = vmatmul.f32.vlgmr.msrb.gmra.mxu3 %v3671_v58  ;;  %3955 = vmatmul.f32.vlgmr.msra.gmra.mxu0 %v3700_v59 }
 0xedd   :  { %v3810_v60 = vpop.f32.mrf.mxu0  ;;  %4233 = vmatpush.msrb.mxu2 %v10848_v22  ;;  %4267 = vmatpush.msrb.mxu3 %v8881_v55  ;;  %v8897_v55 = vld [vmem:[%s9764_s17 + $0x90] sm:$0xff] }
 0xede   :  { %3900 = vmatmul.f32.gmra.mxu2 %v3810_v60  ;;  %v8879_v60 = vld [vmem:[%s9764_s17 + $0x60] sm:$0xff] }
 0xedf   :  { %4268 = vmatpush.msrb.mxu3 %v8879_v60 }
 0xee2   :  { %v3778_v63 = vpop.f32.mrf.mxu3 }
 0xee3   :  { %3868 = vmatmul.f32.vlgmr.msrb.gmra.mxu1 %v3778_v63 }
 0xee4   :  { %4191 = vmatpush.msrb.mxu1 %v10831_v0 }
 0xee5   :  { %v3674_v1 = vpop.f32.mrf.mxu1 }
 0xee6   :  { %3929 = vmatmul.f32.gmra.mxu3 %v3674_v1  ;;  %v3813_v2 = vpop.f32.mrf.mxu0  ;;  %v3703_v3 = vpop.f32.mrf.mxu2  ;;  %4192 = vmatpush.msrb.mxu1 %v10836_v5 }
 0xee7   :  { %3903 = vmatmul.f32.gmra.mxu2 %v3813_v2  ;;  %3958 = vmatmul.f32.gmra.mxu0 %v3703_v3  ;;  %v8882_v2 = vld [vmem:[%s9764_s17 + $0x78] sm:$0xff] }
 0xee8   :  { %4193 = vmatpush.msrb.mxu1 %v10841_v44  ;;  %v4209_v3 = vld [vmem:[%s9764_s17 + $0x38] sm:$0xff]  ;;  %4290 = vmatpush.msra.mxu0 %v8882_v2 }
 0xeea   :  { %v3781_v4 = vpop.f32.mrf.mxu3  ;;  %4194 = vmatpush.msrb.mxu1 %v10848_v22 }
 0xeeb   :  { %3871 = vmatmul.f32.gmra.mxu1 %v3781_v4  ;;  %v8880_v4 = vld [vmem:[%s9764_s17 + $0x68] sm:$0xff] }
 0xeec   :  { %4291 = vmatpush.msra.mxu0 %v8880_v4 }
 0xeed   :  { %v3677_v6 = vpop.f32.mrf.mxu1 }
 0xeee   :  { %3932 = vmatmul.f32.gmra.mxu3 %v3677_v6  ;;  %v3816_v8 = vpop.f32.mrf.mxu0  ;;  %v3706_v9 = vpop.f32.mrf.mxu2 }
 0xeef   :  { %3906 = vmatmul.f32.gmra.mxu2 %v3816_v8  ;;  %3961 = vmatmul.f32.gmra.mxu0 %v3706_v9  ;;  %v4207_v8 = vld [vmem:[%s9764_s17 + $0x28] sm:$0xff]  ;;  %v8877_v9 = vld [vmem:[%s9764_s17 + $0x50] sm:$0xff] }
 0xef0   :  { %4269 = vmatpush.msrb.mxu3 %v8877_v9  ;;  %v8895_v9 = vld [vmem:[%s9764_s17 + $0x80] sm:$0xff] }
 0xef2   :  { %v3784_v14 = vpop.f32.mrf.mxu3 }
 0xef3   :  { %3874 = vmatmul.f32.gmra.mxu1 %v3784_v14  ;;  %v8878_v14 = vld [vmem:[%s9764_s17 + $0x58] sm:$0xff] }
 0xef4   :  { %4292 = vmatpush.msra.mxu0 %v8878_v14  ;;  %v8896_v14 = vld [vmem:[%s9764_s17 + $0x88] sm:$0xff] }
 0xef5   :  { %v3680_v18 = vpop.f32.mrf.mxu1 }
 0xef6   :  { %3935 = vmatmul.f32.gmra.mxu3 %v3680_v18  ;;  %v3709_v19 = vpop.f32.mrf.mxu2 }
 0xef7   :  { %8829 = vmatmul.msk.f32.vlgmr.msra.gmra.mxu2 %vm450_vm1, %v8821_v15  ;;  %3964 = vmatmul.f32.gmra.mxu0 %v3709_v19  ;;  %v8875_v19 = vld [vmem:[%s9764_s17 + $0x40] sm:$0xff] }
 0xef8   :  { %4342 = vmatpush.msra.mxu2 %v4209_v3  ;;  %4270 = vmatpush.msrb.mxu3 %v8875_v19  ;;  %v8898_v3 = vld [vmem:[%s9764_s17 + $0x98] sm:$0xff] }
 0xefa   :  { %v3787_v21 = vpop.f32.mrf.mxu3  ;;  %4343 = vmatpush.msra.mxu2 %v4207_v8 }
 0xefb   :  { %3877 = vmatmul.f32.gmra.mxu1 %v3787_v21  ;;  %v8876_v21 = vld [vmem:[%s9764_s17 + $0x48] sm:$0xff] }
 0xefc   :  { %4293 = vmatpush.msra.mxu0 %v8876_v21 }
 0xeff   :  { %8830 = vmatmul.msk.f32.gmra.mxu2 %vm450_vm1, %v8822_v23 }
 0xf03   :  { %8825 = vmatmul.msk.f32.vlgmr.msra.gmra.mxu1 %vm450_vm1, %v8821_v15  ;;  %v4205_v15 = vld [vmem:[%s9764_s17 + $0x18] sm:$0xff] }
 0xf04   :  { %4344 = vmatpush.msra.mxu2 %v4205_v15 }
 0xf07   :  { %8831 = vmatmul.msk.f32.gmra.mxu2 %vm450_vm1, %v8823_v24 }
 0xf0b   :  { %8826 = vmatmul.msk.f32.gmra.mxu1 %vm450_vm1, %v8822_v23  ;;  %v4208_v23 = vld [vmem:[%s9764_s17 + $0x30] sm:$0xff] }
 0xf0c   :  { %4319 = vmatpush.msra.mxu1 %v4208_v23 }
 0xf0f   :  { %8832 = vmatmul.msk.f32.gmra.mxu2 %vm450_vm1, %v8824_v17 }
 0xf13   :  { %8827 = vmatmul.msk.f32.gmra.mxu1 %vm450_vm1, %v8823_v24  ;;  %v4203_v24 = vld [vmem:[%s9764_s17 + $0x8] sm:$0xff] }
 0xf14   :  { %4345 = vmatpush.msra.mxu2 %v4203_v24 }
 0xf17   :  { %8873 = vmatmul.msk.f32.vlgmr.msrb.gmra.mxu2 %vm155_vm0, %v8871_v25 }
 0xf1b   :  { %8828 = vmatmul.msk.f32.gmra.mxu1 %vm450_vm1, %v8824_v17  ;;  %v4206_v17 = vld [vmem:[%s9764_s17 + $0x20] sm:$0xff] }
 0xf1c   :  { %4320 = vmatpush.msra.mxu1 %v4206_v17 }
 0xf1f   :  { %8874 = vmatmul.msk.f32.gmra.mxu2 %vm155_vm0, %v8872_v26  ;;  %v4204_v26 = vld [vmem:[%s9764_s17 + $0x10] sm:$0xff] }
 0xf20   :  { %4321 = vmatpush.msra.mxu1 %v4204_v26 }
 0xf23   :  { %8869 = vmatmul.msk.f32.vlgmr.msrb.gmra.mxu1 %vm155_vm0, %v4171_v20  ;;  %v4202_v20 = vld [vmem:[%s9764_s17] sm:$0xff] }
 0xf24   :  { %4322 = vmatpush.msra.mxu1 %v4202_v20 }
 0xf26   :  { %4433 = vmatpush.msrb.mxu1 %v8902_v54 }
 0xf2b   :  { %8870 = vmatmul.msk.f32.gmra.mxu1 %vm155_vm0, %v4172_v27 }
 0xf59   :  { %v10894_v49 = vpop.f32.mrf.mxu2  ;;  %v3956_v33 = vpop.f32.mrf.mxu0 }
 0xf5f   :  { %v3927_v34 = vpop.f32.mrf.mxu3 }
 0xf60   :  { %v10902_v52 = vpop.f32.mrf.mxu1 }
 0xf61   :  { %v10906_v56 = vpop.f32.mrf.mxu2  ;;  %v3899_v42 = vadd.f32 %v10894_v49, %v10902_v52  ;;  %v8901_v52 = vld [vmem:[%s9764_s17 + $0xb0] sm:$0xff] }
 0xf63   :  { %v3928_v45 = vadd.f32 %v3927_v34, %v3899_v42 }
 0xf64   :  { %v3959_v35 = vpop.f32.mrf.mxu0 }
 0xf65   :  { %v3957_v61 = vadd.f32 %v3956_v33, %v3928_v45  ;;  %v8942_v45 = vld [vmem:[%s9779_s29 + $0x2f0] sm:$0xff] }
 0xf68   :  { %v10908_v57 = vpop.f32.mrf.mxu1 }
 0xf69   :  { %v3930_v36 = vpop.f32.mrf.mxu3  ;;  %v3902_v10 = vadd.f32 %v10906_v56, %v10908_v57  ;;  %v8899_v56 = vld [vmem:[%s9764_s17 + $0xa0] sm:$0xff]  ;;  %v8900_v57 = vld [vmem:[%s9764_s17 + $0xa8] sm:$0xff]  ;;  %s9736_s17 = smov [#allocation6]  }
 0xf6a   :  { %v10911_v58 = vpop.f32.mrf.mxu2  ;;  %4434 = vmatpush.msrb.mxu1 %v8900_v57 }
 0xf6b   :  { %v3931_v13 = vadd.f32 %v3930_v36, %v3902_v10  ;;  %v8936_v10 = vld [vmem:[%s9779_s29 + $0x2c0] sm:$0xff] }
 0xf6c   :  { %v3962_v38 = vpop.f32.mrf.mxu0  ;;  %4435 = vmatpush.msrb.mxu1 %v8898_v3 }
 0xf6d   :  { %v3960_v50 = vadd.f32 %v3959_v35, %v3931_v13 }
 0xf6e   :  { %4436 = vmatpush.msrb.mxu1 %v8896_v14 }
 0xf70   :  { %v10913_v59 = vpop.f32.mrf.mxu1 }
 0xf71   :  { %v3933_v37 = vpop.f32.mrf.mxu3  ;;  %v3905_v51 = vadd.f32 %v10911_v58, %v10913_v59 }
 0xf72   :  { %v10916_v63 = vpop.f32.mrf.mxu2 }
 0xf73   :  { %v3934_v60 = vadd.f32 %v3933_v37, %v3905_v51  ;;  %v8928_v51 = vld [vmem:[%s9779_s29 + $0x280] sm:$0xff] }
 0xf74   :  { %v3965_v40 = vpop.f32.mrf.mxu0 }
 0xf75   :  { %v3963_v15 = vadd.f32 %v3962_v38, %v3934_v60 }
 0xf78   :  { %v10918_v1 = vpop.f32.mrf.mxu1 }
 0xf79   :  { %v3936_v41 = vpop.f32.mrf.mxu3 }
 0xf7a   :  { %v4031_v6 = vpop.f32.mrf.mxu2 }
 0xf7b   :  { %4121 = vmatmul.f32.vlgmr.msrb.gmra.mxu0 %v4031_v6 }
 0xf7c   :  { %4410 = vmatpush.msrb.mxu0 %v8901_v52 }
 0xf7e   :  { %4411 = vmatpush.msrb.mxu0 %v8899_v56 }
 0xf80   :  { %v4002_v18 = vpop.f32.mrf.mxu1  ;;  %4412 = vmatpush.msrb.mxu0 %v8897_v55 }
 0xf81   :  { %4092 = vmatmul.f32.vlgmr.msra.gmra.mxu3 %v4002_v18  ;;  %v3908_v18 = vadd.f32 %v10916_v63, %v10918_v1 }
 0xf82   :  { %v4034_v25 = vpop.f32.mrf.mxu2  ;;  %4373 = vmatpush.msra.mxu3 %v10831_v0  ;;  %4413 = vmatpush.msrb.mxu0 %v8895_v9 }
 0xf83   :  { %4124 = vmatmul.f32.gmra.mxu0 %v4034_v25  ;;  %v3937_v24 = vadd.f32 %v3936_v41, %v3908_v18  ;;  %v8922_v18 = vld [vmem:[%s9779_s29 + $0x250] sm:$0xff] }
 0xf84   :  { %4374 = vmatpush.msra.mxu3 %v10836_v5 }
 0xf86   :  { %4375 = vmatpush.msra.mxu3 %v10841_v44 }
 0xf88   :  { %v4005_v27 = vpop.f32.mrf.mxu1  ;;  %4376 = vmatpush.msra.mxu3 %v10848_v22 }
 0xf89   :  { %4095 = vmatmul.f32.gmra.mxu3 %v4005_v27 }
 0xf8a   :  { %v4037_v11 = vpop.f32.mrf.mxu2 }
 0xf8b   :  { %4127 = vmatmul.f32.gmra.mxu0 %v4037_v11 }
 0xf90   :  { %v4008_v28 = vpop.f32.mrf.mxu1 }
 0xf91   :  { %4098 = vmatmul.f32.gmra.mxu3 %v4008_v28  ;;  %v3966_v28 = vadd.f32 %v3965_v40, %v3937_v24  ;;  %v8909_v24 = vld [vmem:[%s9774_s25 + $0x8] sm:$0xff] }
 0xf92   :  { %v4040_v29 = vpop.f32.mrf.mxu2 }
 0xf93   :  { %4130 = vmatmul.f32.gmra.mxu0 %v4040_v29 }
 0xf98   :  { %v4011_v30 = vpop.f32.mrf.mxu1 }
 0xf99   :  { %4101 = vmatmul.f32.gmra.mxu3 %v4011_v30 }
 0xf9a   :  { %v4235_v0 = vpop.f32.mrf.mxu2 }
 0xf9b   :  { %8885 = vmatmul.msk.f32.vlgmr.msra.gmra.mxu0 %vm155_vm0, %v4235_v0 }
 0xfa0   :  { %v4196_v5 = vpop.f32.mrf.mxu1 }
 0xfa1   :  { %8883 = vmatmul.msk.f32.vlgmr.msrb.gmra.mxu3 %vm155_vm0, %v4235_v0  ;;  %8889 = vmatmul.msk.f32.vlgmr.msra.gmra.mxu2 %vm155_vm0, %v4196_v5 }
 0xfa2   :  { %8887 = vmatmul.msk.f32.vlgmr.msra.gmra.mxu1 %vm155_vm0, %v4196_v5  ;;  %v4238_v44 = vpop.f32.mrf.mxu2 }
 0xfa3   :  { %8886 = vmatmul.msk.f32.gmra.mxu0 %vm155_vm0, %v4238_v44  ;;  %4678 = vmatpush.msra.mxu1 %v8942_v45  ;;  %v8962_v45 = vld [vmem:[%s9779_s29 + $0x390] sm:$0xff] }
 0xfa8   :  { %v4199_v22 = vpop.f32.mrf.mxu1 }
 0xfa9   :  { %8884 = vmatmul.msk.f32.gmra.mxu3 %vm155_vm0, %v4238_v44  ;;  %8890 = vmatmul.msk.f32.gmra.mxu2 %vm155_vm0, %v4199_v22 }
 0xfaa   :  { %8888 = vmatmul.msk.f32.gmra.mxu1 %vm155_vm0, %v4199_v22 }
 0xfb1   :  { %8893 = vmatmul.msk.f32.vlgmr.msra.gmra.mxu3 %vm155_vm0, %v8891_v31 }
 0xfb9   :  { %8894 = vmatmul.msk.f32.gmra.mxu3 %vm155_vm0, %v8892_v32 }
 0xff8   :  { %v4122_v43 = vpop.f32.mrf.mxu0 }
0x1000   :  { %v4125_v48 = vpop.f32.mrf.mxu0 }
0x1004   :  { %v4093_v46 = vpop.f32.mrf.mxu3 }
0x1005   :  { %v4123_v12 = vadd.f32 %v4122_v43, %v4093_v46  ;;  %v8940_v46 = vld [vmem:[%s9779_s29 + $0x2e0] sm:$0xff] }
0x1006   :  { %4679 = vmatpush.msra.mxu1 %v8940_v46  ;;  %v8961_v46 = vld [vmem:[%s9779_s29 + $0x388] sm:$0xff] }
0x1007   :  { %v4134_v62 = vadd.f32 %v4123_v12, %v3957_v61  ;;  %v8938_v61 = vld [vmem:[%s9779_s29 + $0x2d0] sm:$0xff] }
0x1008   :  { %v4128_v4 = vpop.f32.mrf.mxu0  ;;  %4680 = vmatpush.msra.mxu1 %v8938_v61  ;;  %v8927_v61 = vld [vmem:[%s9779_s29 + $0x278] sm:$0xff] }
0x1009   :  { %v4142_v53 = vadd.f32 %v9572_v16, %v4134_v62  ;;  %v8934_v62 = vld [vmem:[%s9779_s29 + $0x2b0] sm:$0xff] }
0x100a   :  { %4681 = vmatpush.msra.mxu1 %v8936_v10  ;;  %v4534_v10 = vld [vmem:[%s9779_s29 + $0xe0] sm:$0xff] }
0x100b   :  { %v4146_v7 = vmul.f32 0.5, %v4142_v53  ;;  %v4448_v53 = vld [vmem:[%s9769_s21] sm:$0x3]  ;;  %s8143_s21 = sshll.u32 %s9736_s17, 4  ;;  %s8144_s21 = int_to_ptr.vmem [resolvable:$true] %s8143_s21 }
0x100c   :  { %v4096_v49 = vpop.f32.mrf.mxu3  ;;  %4682 = vmatpush.msra.mxu1 %v8934_v62  ;;  %v4451_v57 = vperm.slane %v4448_v53, 1  ;;  %v8925_v62 = vld [vmem:[%s9779_s29 + $0x268] sm:$0xff] }
0x100d   :  { %9579 = vtanh.f32 %v4146_v7  ;;  %v4126_v39 = vadd.f32 %v4125_v48, %v4096_v49  ;;  %v8932_v48 = vld [vmem:[%s9779_s29 + $0x2a0] sm:$0xff]  ;;  %v8930_v7 = vld [vmem:[%s9779_s29 + $0x290] sm:$0xff] }
0x100e   :  { %4683 = vmatpush.msra.mxu1 %v8932_v48  ;;  %v4532_v48 = vld [vmem:[%s9779_s29 + $0xd0] sm:$0xff] }
0x100f   :  { %v4135_v47 = vadd.f32 %v4126_v39, %v3960_v50 }
0x1010   :  { %v4131_v27 = vpop.f32.mrf.mxu0  ;;  %4684 = vmatpush.msra.mxu1 %v8930_v7  ;;  %v8923_v7 = vld [vmem:[%s9779_s29 + $0x258] sm:$0xff] }
0x1011   :  { %v4143_v2 = vadd.f32 %v9572_v16, %v4135_v47  ;;  %v4450_v47 = vperm.slane %v4448_v53, 0  ;;  %v8957_v53 = vld [vmem:[%s9779_s29 + $0x368] sm:$0xff] }
0x1012   :  { %4685 = vmatpush.msra.mxu1 %v8928_v51  ;;  %v8955_v51 = vld [vmem:[%s9779_s29 + $0x358] sm:$0xff] }
0x1013   :  { %v9580_v6 = vpop.eup %9579  ;;  %v4147_v58 = vmul.f32 0.5, %v4143_v2  ;;  %v8926_v2 = vld [vmem:[%s9779_s29 + $0x270] sm:$0xff] }
0x1014   :  { %v4154_v59 = vadd.f32 1.0, %v9580_v6  ;;  %v4099_v8 = vpop.f32.mrf.mxu3  ;;  %v8924_v6 = vld [vmem:[%s9779_s29 + $0x260] sm:$0xff]  ;;  %4686 = vmatpush.msra.mxu1 %v8926_v2  ;;  %v8917_v2 = vld [vmem:[%s9779_s29 + $0x228] sm:$0xff] }
0x1015   :  { %9581 = vtanh.f32 %v4147_v58  ;;  %v4129_v19 = vadd.f32 %v4128_v4, %v4099_v8 }
0x1016   :  { %v4158_v21 = vmul.f32 0.5, %v4154_v59  ;;  %4687 = vmatpush.msra.mxu1 %v8924_v6  ;;  %v8949_v6 = vld [vmem:[%s9779_s29 + $0x328] sm:$0xff] }
0x1017   :  { %v4136_v23 = vadd.f32 %v4129_v19, %v3963_v15 }
0x1018   :  { %4162 = vst.msk [vmem:[#allocation5] sm:$0xff] %vm155_vm0, %v4158_v21  ;;  %v4295_v37 = vpop.f32.mrf.mxu0  ;;  %v4462_v21 = vld [vmem:[%s9774_s25] sm:$0xff]  ;;  %4688 = vmatpush.msra.mxu1 %v8922_v18  ;;  %v8913_v18 = vld [vmem:[%s9779_s29 + $0x208] sm:$0xff] }
0x1019   :  { %v4144_v17 = vadd.f32 %v9572_v16, %v4136_v23 }
0x101b   :  { %v9582_v25 = vpop.eup %9581  ;;  %v4148_v26 = vmul.f32 0.5, %v4144_v17  ;;  %v8943_v17 = vld [vmem:[%s9779_s29 + $0x2f8] sm:$0xff] }
0x101c   :  { %v4155_v20 = vadd.f32 1.0, %v9582_v25  ;;  %v4102_v11 = vpop.f32.mrf.mxu3  ;;  %v8975_v25 = vld [vmem:[%s9779_s29 + $0x3f8] sm:$0xff] }
0x101d   :  { %9583 = vtanh.f32 %v4148_v26  ;;  %v4132_v29 = vadd.f32 %v4131_v27, %v4102_v11  ;;  %v8974_v26 = vld [vmem:[%s9779_s29 + $0x3f0] sm:$0xff]  ;;  %v8973_v27 = vld [vmem:[%s9779_s29 + $0x3e8] sm:$0xff]  ;;  %v8920_v11 = vld [vmem:[%s9779_s29 + $0x240] sm:$0xff] }
0x101e   :  { %v4159_v30 = vmul.f32 0.5, %v4155_v20  ;;  %v8941_v20 = vld [vmem:[%s9779_s29 + $0x2e8] sm:$0xff]  ;;  %4689 = vmatpush.msra.mxu1 %v8920_v11  ;;  %v4568_v11 = vld [vmem:[%s9779_s29 + $0x1f0] sm:$0xff] }
0x101f   :  { %v4137_v63 = vadd.f32 %v4132_v29, %v3966_v28  ;;  %v4324_v40 = vpop.f32.mrf.mxu1  ;;  %v8972_v28 = vld [vmem:[%s9779_s29 + $0x3e0] sm:$0xff]  ;;  %v8939_v29 = vld [vmem:[%s9779_s29 + $0x2d8] sm:$0xff] }
0x1020   :  { %4163 = vst.msk [vmem:[#allocation5 + $0x8] sm:$0xff] %vm155_vm0, %v4159_v30  ;;  %v4298_v41 = vpop.f32.mrf.mxu0  ;;  %v8971_v30 = vld [vmem:[%s9779_s29 + $0x3d8] sm:$0xff] }
0x1021   :  { %v4145_v1 = vadd.f32 %v9572_v16, %v4137_v63  ;;  %v8918_v63 = vld [vmem:[%s9779_s29 + $0x230] sm:$0xff] }
0x1022   :  { %4690 = vmatpush.msra.mxu1 %v8918_v63  ;;  %v4566_v63 = vld [vmem:[%s9779_s29 + $0x1e0] sm:$0xff] }
0x1023   :  { %v9584_v0 = vpop.eup %9583  ;;  %v4149_v5 = vmul.f32 0.5, %v4145_v1  ;;  %v8937_v1 = vld [vmem:[%s9779_s29 + $0x2c8] sm:$0xff] }
0x1024   :  { %v4156_v44 = vadd.f32 1.0, %v9584_v0  ;;  %v4272_v22 = vpop.f32.mrf.mxu3  ;;  %v4347_v43 = vpop.f32.mrf.mxu2  ;;  %v8970_v0 = vld [vmem:[%s9779_s29 + $0x3d0] sm:$0xff] }
0x1025   :  { %9585 = vtanh.f32 %v4149_v5  ;;  %v4325_v49 = vadd.f32 %v4324_v40, %v4272_v22  ;;  %v4348_v50 = vadd.f32 %v4347_v43, %v4295_v37  ;;  %v8969_v5 = vld [vmem:[%s9779_s29 + $0x3c8] sm:$0xff]  ;;  %v8916_v22 = vld [vmem:[%s9779_s29 + $0x220] sm:$0xff]  ;;  %v4536_v43 = vld [vmem:[%s9779_s29 + $0xf0] sm:$0xff] }
0x1026   :  { %v4160_v31 = vmul.f32 0.5, %v4156_v44  ;;  %v8935_v44 = vld [vmem:[%s9779_s29 + $0x2b8] sm:$0xff]  ;;  %4691 = vmatpush.msra.mxu1 %v8916_v22  ;;  %v8912_v37 = vld [vmem:[%s9779_s29 + $0x200] sm:$0xff] }
0x1027   :  { %v4327_v42 = vpop.f32.mrf.mxu1  ;;  %v8964_v40 = vld [vmem:[%s9779_s29 + $0x3a0] sm:$0xff]  ;;  %v4565_v22 = vld [vmem:[%s9779_s29 + $0x1d8] sm:$0xff] }
0x1028   :  { %4164 = vst.msk [vmem:[#allocation5 + $0x10] sm:$0xff] %vm155_vm0, %v4160_v31  ;;  %v8968_v31 = vld [vmem:[%s9779_s29 + $0x3c0] sm:$0xff] }
0x102b   :  { %v9586_v32 = vpop.eup %9585 }
0x102c   :  { %v4157_v33 = vadd.f32 1.0, %v9586_v32  ;;  %v4275_v34 = vpop.f32.mrf.mxu3  ;;  %v4350_v13 = vpop.f32.mrf.mxu2  ;;  %v8967_v32 = vld [vmem:[%s9779_s29 + $0x3b8] sm:$0xff] }
0x102d   :  { %v4328_v39 = vadd.f32 %v4327_v42, %v4275_v34  ;;  %v4351_v52 = vadd.f32 %v4350_v13, %v4298_v41  ;;  %v8914_v34 = vld [vmem:[%s9779_s29 + $0x210] sm:$0xff]  ;;  %v8963_v41 = vld [vmem:[%s9779_s29 + $0x398] sm:$0xff]  ;;  %v8929_v42 = vld [vmem:[%s9779_s29 + $0x288] sm:$0xff] }
0x102e   :  { %v4161_v35 = vmul.f32 0.5, %v4157_v33  ;;  %v8933_v33 = vld [vmem:[%s9779_s29 + $0x2a8] sm:$0xff]  ;;  %4692 = vmatpush.msra.mxu1 %v8914_v34  ;;  %v8958_v13 = vld [vmem:[%s9779_s29 + $0x370] sm:$0xff] }
0x102f   :  { %v4527_v34 = vld [vmem:[%s9779_s29 + $0xa8] sm:$0xff] }
0x1030   :  { %4165 = vst.msk [vmem:[#allocation5 + $0x18] sm:$0xff] %vm155_vm0, %v4161_v35  ;;  %v8966_v35 = vld [vmem:[%s9779_s29 + $0x3b0] sm:$0xff]  ;;  %4693 = vmatpush.msra.mxu1 %v8912_v37  ;;  %v4523_v37 = vld [vmem:[%s9779_s29 + $0x88] sm:$0xff] }
0x1034   :  { %v4378_v36 = vpop.f32.mrf.mxu3 }
0x1035   :  { %8903 = vmatmul.msk.f32.vlgmr.msrb.gmra.mxu0 %vm155_vm0, %v4378_v36  ;;  %8905 = vmatmul.msk.f32.vlgmr.msrb.gmra.mxu1 %vm155_vm0, %v4378_v36  ;;  %v8965_v36 = vld [vmem:[%s9779_s29 + $0x3a8] sm:$0xff] }
0x1036   :  { %4758 = vmatpush.msrb.mxu1 %v4536_v43  ;;  %v4552_v43 = vld [vmem:[%s9779_s29 + $0x170] sm:$0xff] }
0x1038   :  { %4759 = vmatpush.msrb.mxu1 %v4534_v10  ;;  %v4550_v10 = vld [vmem:[%s9779_s29 + $0x160] sm:$0xff] }
0x103a   :  { %4760 = vmatpush.msrb.mxu1 %v4532_v48  ;;  %v4548_v48 = vld [vmem:[%s9779_s29 + $0x150] sm:$0xff] }
0x103c   :  { %v4381_v38 = vpop.f32.mrf.mxu3 }
0x103d   :  { %8904 = vmatmul.msk.f32.gmra.mxu0 %vm155_vm0, %v4381_v38  ;;  %8906 = vmatmul.msk.f32.gmra.mxu1 %vm155_vm0, %v4381_v38  ;;  %v8931_v38 = vld [vmem:[%s9779_s29 + $0x298] sm:$0xff] }
0x10b2   :  { %v4415_v12 = vpop.f32.mrf.mxu0  ;;  %v4438_v16 = vpop.f32.mrf.mxu1 }
0x10b3   :  { %v4444_v54 = vadd.f32 %v4415_v12, %v4325_v49  ;;  %v4445_v56 = vadd.f32 %v4438_v16, %v4348_v50  ;;  %v8960_v12 = vld [vmem:[%s9779_s29 + $0x380] sm:$0xff]  ;;  %v8959_v16 = vld [vmem:[%s9779_s29 + $0x378] sm:$0xff] }
0x10b4   :  { %v4530_v49 = vld [vmem:[%s9779_s29 + $0xc0] sm:$0xff] }
0x10b5   :  { %v4454_v58 = vadd.f32 %v4450_v47, %v4444_v54  ;;  %v4455_v9 = vadd.f32 %v4451_v57, %v4445_v56  ;;  %v8956_v50 = vld [vmem:[%s9779_s29 + $0x360] sm:$0xff]  ;;  %v8954_v54 = vld [vmem:[%s9779_s29 + $0x350] sm:$0xff]  ;;  %4761 = vmatpush.msrb.mxu1 %v4530_v49  ;;  %v8919_v56 = vld [vmem:[%s9779_s29 + $0x238] sm:$0xff] }
0x10b6   :  { %v4546_v49 = vld [vmem:[%s9779_s29 + $0x140] sm:$0xff] }
0x10b7   :  { %v10993_v19 = vmax.f32 %v4454_v58, 0.0  ;;  %v10997_v23 = vmax.f32 %v4455_v9, 0.0  ;;  %v8915_v58 = vld [vmem:[%s9779_s29 + $0x218] sm:$0xff] }
0x10b8   :  { %v8947_v9 = vld [vmem:[%s9779_s29 + $0x318] sm:$0xff] }
0x10ba   :  { %v4418_v55 = vpop.f32.mrf.mxu0  ;;  %v4441_v60 = vpop.f32.mrf.mxu1 }
0x10bb   :  { %v4446_v3 = vadd.f32 %v4418_v55, %v4328_v39  ;;  %v4447_v4 = vadd.f32 %v4441_v60, %v4351_v52  ;;  %v8921_v39 = vld [vmem:[%s9779_s29 + $0x248] sm:$0xff]  ;;  %v4528_v52 = vld [vmem:[%s9779_s29 + $0xb0] sm:$0xff]  ;;  %v8952_v55 = vld [vmem:[%s9779_s29 + $0x340] sm:$0xff] }
0x10bc   :  { %4762 = vmatpush.msrb.mxu1 %v4528_v52  ;;  %v8951_v60 = vld [vmem:[%s9779_s29 + $0x338] sm:$0xff] }
0x10bd   :  { %v4456_v59 = vadd.f32 %v4450_v47, %v4446_v3  ;;  %v4457_v8 = vadd.f32 %v4451_v57, %v4447_v4  ;;  %v8953_v47 = vld [vmem:[%s9779_s29 + $0x348] sm:$0xff]  ;;  %v4526_v57 = vld [vmem:[%s9779_s29 + $0xa0] sm:$0xff]  ;;  %v4524_v3 = vld [vmem:[%s9779_s29 + $0x90] sm:$0xff] }
0x10be   :  { %v8950_v4 = vld [vmem:[%s9779_s29 + $0x330] sm:$0xff]  ;;  %4763 = vmatpush.msrb.mxu1 %v4526_v57  ;;  %v4513_v52 = vld [vmem:[%s9779_s29 + $0x38] sm:$0xff]  ;;  %v4551_v57 = vld [vmem:[%s9779_s29 + $0x168] sm:$0xff] }
0x10bf   :  { %v10986_v14 = vmax.f32 %v4456_v59, 0.0  ;;  %v10988_v15 = vmax.f32 %v4457_v8, 0.0  ;;  %v4522_v59 = vld [vmem:[%s9779_s29 + $0x80] sm:$0xff] }
0x10c0   :  { %v8948_v8 = vld [vmem:[%s9779_s29 + $0x320] sm:$0xff]  ;;  %4764 = vmatpush.msrb.mxu1 %v4524_v3 }
0x10c1   :  { %4480 = vmatpush.msrb.mxu2 %v10986_v14  ;;  %4588 = vmatpush.msrb.mxu3 %v10986_v14  ;;  %v4538_v3 = vld [vmem:[%s9779_s29 + $0x100] sm:$0xff] }
0x10c2   :  { %4608 = vmatpush.msra.mxu0 %v10988_v15  ;;  %4765 = vmatpush.msrb.mxu1 %v4522_v59  ;;  %v4543_v59 = vld [vmem:[%s9779_s29 + $0x128] sm:$0xff] }
0x10c3   :  { %4481 = vmatpush.msrb.mxu2 %v10993_v19  ;;  %4589 = vmatpush.msrb.mxu3 %v10993_v19 }
0x10c4   :  { %4609 = vmatpush.msra.mxu0 %v10997_v23  ;;  %8907 = vmatmul.msk.f32.vlgmr.msrb.gmra.mxu2 %vm450_vm1, %v4462_v21 }
0x10c5   :  { %4500 = vmatpush.msra.mxu2 %v10988_v15  ;;  %8910 = vmatmul.msk.f32.vlgmr.msrb.gmra.mxu3 %vm450_vm1, %v8909_v24 }
0x10c6   :  { %8911 = vmatmul.msk.f32.vlgmr.msra.gmra.mxu0 %vm450_vm1, %v8909_v24  ;;  %4718 = vmatpush.msra.mxu3 %v8943_v17  ;;  %v8946_v24 = vld [vmem:[%s9779_s29 + $0x310] sm:$0xff]  ;;  %v4537_v17 = vld [vmem:[%s9779_s29 + $0xf8] sm:$0xff] }
0x10c7   :  { %4501 = vmatpush.msra.mxu2 %v10997_v23  ;;  %4738 = vmatpush.msrb.mxu0 %v8975_v25  ;;  %v8945_v25 = vld [vmem:[%s9779_s29 + $0x308] sm:$0xff] }
0x10c8   :  { %4719 = vmatpush.msra.mxu3 %v8941_v20  ;;  %v8944_v20 = vld [vmem:[%s9779_s29 + $0x300] sm:$0xff] }
0x10c9   :  { %4698 = vmatpush.msrb.mxu2 %v8974_v26  ;;  %4739 = vmatpush.msrb.mxu0 %v8973_v27  ;;  %v4518_v26 = vld [vmem:[%s9779_s29 + $0x60] sm:$0xff]  ;;  %v4535_v27 = vld [vmem:[%s9779_s29 + $0xe8] sm:$0xff] }
0x10ca   :  { %4720 = vmatpush.msra.mxu3 %v8939_v29  ;;  %v4533_v29 = vld [vmem:[%s9779_s29 + $0xd8] sm:$0xff] }
0x10cb   :  { %4699 = vmatpush.msrb.mxu2 %v8972_v28  ;;  %4740 = vmatpush.msrb.mxu0 %v8971_v30  ;;  %v4569_v28 = vld [vmem:[%s9779_s29 + $0x1f8] sm:$0xff]  ;;  %v4516_v30 = vld [vmem:[%s9779_s29 + $0x50] sm:$0xff] }
0x10cc   :  { %8908 = vmatmul.msk.f32.vlgmr.msra.gmra.mxu2 %vm450_vm1, %v4462_v21  ;;  %4721 = vmatpush.msra.mxu3 %v8937_v1  ;;  %v4520_v21 = vld [vmem:[%s9779_s29 + $0x70] sm:$0xff]  ;;  %v4567_v1 = vld [vmem:[%s9779_s29 + $0x1e8] sm:$0xff] }
0x10cd   :  { %4700 = vmatpush.msrb.mxu2 %v8970_v0  ;;  %4741 = vmatpush.msrb.mxu0 %v8969_v5  ;;  %v4531_v0 = vld [vmem:[%s9779_s29 + $0xc8] sm:$0xff]  ;;  %v4514_v5 = vld [vmem:[%s9779_s29 + $0x40] sm:$0xff] }
0x10ce   :  { %4722 = vmatpush.msra.mxu3 %v8935_v44  ;;  %4766 = vmatpush.msrb.mxu1 %v4520_v21  ;;  %v4564_v44 = vld [vmem:[%s9779_s29 + $0x1d0] sm:$0xff]  ;;  %v9010_v21 = vld [vmem:[%s9779_s29 + $0x4f8] sm:$0xff] }
0x10cf   :  { %4701 = vmatpush.msrb.mxu2 %v8968_v31  ;;  %4742 = vmatpush.msrb.mxu0 %v8967_v32  ;;  %v4529_v31 = vld [vmem:[%s9779_s29 + $0xb8] sm:$0xff]  ;;  %v4562_v32 = vld [vmem:[%s9779_s29 + $0x1c0] sm:$0xff] }
0x10d0   :  { %4723 = vmatpush.msra.mxu3 %v8933_v33  ;;  %4767 = vmatpush.msrb.mxu1 %v4518_v26  ;;  %v4563_v33 = vld [vmem:[%s9779_s29 + $0x1c8] sm:$0xff] }
0x10d1   :  { %4702 = vmatpush.msrb.mxu2 %v8966_v35  ;;  %4743 = vmatpush.msrb.mxu0 %v8965_v36  ;;  %v4560_v35 = vld [vmem:[%s9779_s29 + $0x1b0] sm:$0xff]  ;;  %v4525_v36 = vld [vmem:[%s9779_s29 + $0x98] sm:$0xff] }
0x10d2   :  { %4724 = vmatpush.msra.mxu3 %v8931_v38  ;;  %4768 = vmatpush.msrb.mxu1 %v4516_v30  ;;  %v4558_v38 = vld [vmem:[%s9779_s29 + $0x1a0] sm:$0xff]  ;;  %v9004_v30 = vld [vmem:[%s9779_s29 + $0x4c8] sm:$0xff] }
0x10d3   :  { %4703 = vmatpush.msrb.mxu2 %v8964_v40  ;;  %4744 = vmatpush.msrb.mxu0 %v8963_v41  ;;  %v4556_v40 = vld [vmem:[%s9779_s29 + $0x190] sm:$0xff]  ;;  %v4554_v41 = vld [vmem:[%s9779_s29 + $0x180] sm:$0xff] }
0x10d4   :  { %4725 = vmatpush.msra.mxu3 %v8929_v42  ;;  %4769 = vmatpush.msrb.mxu1 %v4514_v5  ;;  %v4512_v42 = vld [vmem:[%s9779_s29 + $0x30] sm:$0xff] }
0x10d5   :  { %4704 = vmatpush.msrb.mxu2 %v8962_v45  ;;  %4745 = vmatpush.msrb.mxu0 %v8961_v46  ;;  %v4521_v45 = vld [vmem:[%s9779_s29 + $0x78] sm:$0xff]  ;;  %v9037_v5 = vld [vmem:[%s9779_s29 + $0x5d0] sm:$0xff] }
0x10d6   :  { %4726 = vmatpush.msra.mxu3 %v8927_v61  ;;  %4770 = vmatpush.msrb.mxu1 %v4512_v42  ;;  %v4561_v46 = vld [vmem:[%s9779_s29 + $0x1b8] sm:$0xff]  ;;  %v4510_v61 = vld [vmem:[%s9779_s29 + $0x20] sm:$0xff] }
0x10d7   :  { %4705 = vmatpush.msrb.mxu2 %v8960_v12  ;;  %4746 = vmatpush.msrb.mxu0 %v8959_v16  ;;  %v4519_v12 = vld [vmem:[%s9779_s29 + $0x68] sm:$0xff]  ;;  %v9034_v42 = vld [vmem:[%s9779_s29 + $0x5b8] sm:$0xff] }
0x10d8   :  { %4727 = vmatpush.msra.mxu3 %v8925_v62  ;;  %4771 = vmatpush.msrb.mxu1 %v4510_v61  ;;  %v4559_v16 = vld [vmem:[%s9779_s29 + $0x1a8] sm:$0xff]  ;;  %v4508_v62 = vld [vmem:[%s9779_s29 + $0x10] sm:$0xff] }
0x10d9   :  { %4706 = vmatpush.msrb.mxu2 %v8958_v13  ;;  %4747 = vmatpush.msrb.mxu0 %v8957_v53  ;;  %v4517_v13 = vld [vmem:[%s9779_s29 + $0x58] sm:$0xff]  ;;  %v9032_v61 = vld [vmem:[%s9779_s29 + $0x5a8] sm:$0xff] }
0x10da   :  { %4728 = vmatpush.msra.mxu3 %v8923_v7  ;;  %v4557_v53 = vld [vmem:[%s9779_s29 + $0x198] sm:$0xff]  ;;  %4772 = vmatpush.msrb.mxu1 %v4508_v62  ;;  %v4506_v7 = vld [vmem:[%s9779_s29] sm:$0xff] }
0x10db   :  { %4707 = vmatpush.msrb.mxu2 %v8956_v50  ;;  %4748 = vmatpush.msrb.mxu0 %v8955_v51  ;;  %v4515_v50 = vld [vmem:[%s9779_s29 + $0x48] sm:$0xff]  ;;  %v9030_v62 = vld [vmem:[%s9779_s29 + $0x598] sm:$0xff] }
0x10dc   :  { %4729 = vmatpush.msra.mxu3 %v8921_v39  ;;  %4773 = vmatpush.msrb.mxu1 %v4506_v7  ;;  %v4555_v51 = vld [vmem:[%s9779_s29 + $0x188] sm:$0xff]  ;;  %v4544_v39 = vld [vmem:[%s9779_s29 + $0x130] sm:$0xff] }
0x10dd   :  { %4708 = vmatpush.msrb.mxu2 %v8954_v54  ;;  %4749 = vmatpush.msrb.mxu0 %v8953_v47  ;;  %v4553_v54 = vld [vmem:[%s9779_s29 + $0x178] sm:$0xff]  ;;  %v4542_v47 = vld [vmem:[%s9779_s29 + $0x120] sm:$0xff]  ;;  %v9028_v7 = vld [vmem:[%s9779_s29 + $0x588] sm:$0xff] }
0x10de   :  { %4730 = vmatpush.msra.mxu3 %v8919_v56  ;;  %v4511_v56 = vld [vmem:[%s9779_s29 + $0x28] sm:$0xff] }
0x10df   :  { %4709 = vmatpush.msrb.mxu2 %v8952_v55  ;;  %4750 = vmatpush.msrb.mxu0 %v8951_v60  ;;  %v4540_v55 = vld [vmem:[%s9779_s29 + $0x110] sm:$0xff]  ;;  %v4509_v60 = vld [vmem:[%s9779_s29 + $0x18] sm:$0xff] }
0x10e0   :  { %4731 = vmatpush.msra.mxu3 %v8917_v2  ;;  %v4549_v2 = vld [vmem:[%s9779_s29 + $0x158] sm:$0xff] }
0x10e1   :  { %4710 = vmatpush.msrb.mxu2 %v8950_v4  ;;  %4751 = vmatpush.msrb.mxu0 %v8949_v6  ;;  %v4507_v4 = vld [vmem:[%s9779_s29 + $0x8] sm:$0xff] }
0x10e2   :  { %4732 = vmatpush.msra.mxu3 %v8915_v58  ;;  %v4547_v6 = vld [vmem:[%s9779_s29 + $0x148] sm:$0xff]  ;;  %v4545_v58 = vld [vmem:[%s9779_s29 + $0x138] sm:$0xff] }
0x10e3   :  { %4711 = vmatpush.msrb.mxu2 %v8948_v8  ;;  %4752 = vmatpush.msrb.mxu0 %v8947_v9  ;;  %v4541_v8 = vld [vmem:[%s9779_s29 + $0x118] sm:$0xff]  ;;  %v4539_v9 = vld [vmem:[%s9779_s29 + $0x108] sm:$0xff] }
0x10e4   :  { %4733 = vmatpush.msra.mxu3 %v8913_v18  ;;  %v9009_v18 = vld [vmem:[%s9779_s29 + $0x4f0] sm:$0xff] }
0x10e5   :  { %4712 = vmatpush.msrb.mxu2 %v8946_v24  ;;  %4753 = vmatpush.msrb.mxu0 %v8945_v25  ;;  %v9008_v25 = vld [vmem:[%s9779_s29 + $0x4e8] sm:$0xff] }
0x10e6   :  { %4798 = vmatpush.msrb.mxu3 %v4537_v17  ;;  %v9007_v17 = vld [vmem:[%s9779_s29 + $0x4e0] sm:$0xff] }
0x10e7   :  { %4713 = vmatpush.msrb.mxu2 %v8944_v20  ;;  %4818 = vmatpush.msra.mxu0 %v4569_v28  ;;  %v9005_v20 = vld [vmem:[%s9779_s29 + $0x4d0] sm:$0xff] }
0x10e8   :  { %4799 = vmatpush.msrb.mxu3 %v4535_v27  ;;  %v9041_v28 = vld [vmem:[%s9779_s29 + $0x5f0] sm:$0xff] }
0x10e9   :  { %4778 = vmatpush.msra.mxu2 %v4568_v11  ;;  %4819 = vmatpush.msra.mxu0 %v4567_v1  ;;  %v9006_v11 = vld [vmem:[%s9779_s29 + $0x4d8] sm:$0xff]  ;;  %v9001_v1 = vld [vmem:[%s9779_s29 + $0x4b0] sm:$0xff] }
0x10ea   :  { %4800 = vmatpush.msrb.mxu3 %v4533_v29  ;;  %v9003_v29 = vld [vmem:[%s9779_s29 + $0x4c0] sm:$0xff] }
0x10eb   :  { %4779 = vmatpush.msra.mxu2 %v4566_v63  ;;  %4820 = vmatpush.msra.mxu0 %v4565_v22  ;;  %v9039_v63 = vld [vmem:[%s9779_s29 + $0x5e0] sm:$0xff]  ;;  %v9000_v22 = vld [vmem:[%s9779_s29 + $0x4a8] sm:$0xff] }
0x10ec   :  { %4801 = vmatpush.msrb.mxu3 %v4531_v0  ;;  %v9002_v0 = vld [vmem:[%s9779_s29 + $0x4b8] sm:$0xff] }
0x10ed   :  { %4780 = vmatpush.msra.mxu2 %v4564_v44  ;;  %4821 = vmatpush.msra.mxu0 %v4563_v33  ;;  %v9042_v33 = vld [vmem:[%s9779_s29 + $0x5f8] sm:$0xff] }
0x10ee   :  { %4802 = vmatpush.msrb.mxu3 %v4529_v31  ;;  %v8998_v31 = vld [vmem:[%s9779_s29 + $0x498] sm:$0xff] }
0x10ef   :  { %4781 = vmatpush.msra.mxu2 %v4562_v32  ;;  %4822 = vmatpush.msra.mxu0 %v4561_v46  ;;  %v8976_v32 = vld [vmem:[%s9774_s25 + $0x10] sm:$0xff]  ;;  %v8992_v46 = vld [vmem:[%s9779_s29 + $0x468] sm:$0xff]  ;;  %s8145_s25 = sshll.u32 %s9904_s20, 4  ;;  %s8146_s25 = int_to_ptr.hbm [resolvable:$true] %s8145_s25 }
0x10f0   :  { %4803 = vmatpush.msrb.mxu3 %v4527_v34  ;;  %v9040_v34 = vld [vmem:[%s9779_s29 + $0x5e8] sm:$0xff] }
0x10f1   :  { %4782 = vmatpush.msra.mxu2 %v4560_v35  ;;  %4823 = vmatpush.msra.mxu0 %v4559_v16  ;;  %v9035_v35 = vld [vmem:[%s9779_s29 + $0x5c0] sm:$0xff]  ;;  %v8990_v16 = vld [vmem:[%s9779_s29 + $0x458] sm:$0xff] }
0x10f2   :  { %4804 = vmatpush.msrb.mxu3 %v4525_v36  ;;  %v8996_v36 = vld [vmem:[%s9779_s29 + $0x488] sm:$0xff] }
0x10f3   :  { %4783 = vmatpush.msra.mxu2 %v4558_v38  ;;  %4824 = vmatpush.msra.mxu0 %v4557_v53  ;;  %v9036_v38 = vld [vmem:[%s9779_s29 + $0x5c8] sm:$0xff] }
0x10f4   :  { %4805 = vmatpush.msrb.mxu3 %v4523_v37  ;;  %v8993_v37 = vld [vmem:[%s9779_s29 + $0x470] sm:$0xff]  ;;  %v8988_v53 = vld [vmem:[%s9779_s29 + $0x448] sm:$0xff] }
0x10f5   :  { %4784 = vmatpush.msra.mxu2 %v4556_v40  ;;  %4825 = vmatpush.msra.mxu0 %v4555_v51  ;;  %v9033_v40 = vld [vmem:[%s9779_s29 + $0x5b0] sm:$0xff]  ;;  %v8986_v51 = vld [vmem:[%s9779_s29 + $0x438] sm:$0xff] }
0x10f6   :  { %4806 = vmatpush.msrb.mxu3 %v4521_v45  ;;  %v9031_v45 = vld [vmem:[%s9779_s29 + $0x5a0] sm:$0xff] }
0x10f7   :  { %4785 = vmatpush.msra.mxu2 %v4554_v41  ;;  %4826 = vmatpush.msra.mxu0 %v4553_v54  ;;  %v8994_v41 = vld [vmem:[%s9779_s29 + $0x478] sm:$0xff]  ;;  %v9023_v54 = vld [vmem:[%s9779_s29 + $0x560] sm:$0xff] }
0x10f8   :  { %4807 = vmatpush.msrb.mxu3 %v4519_v12  ;;  %v9029_v12 = vld [vmem:[%s9779_s29 + $0x590] sm:$0xff] }
0x10f9   :  { %4786 = vmatpush.msra.mxu2 %v4552_v43  ;;  %4827 = vmatpush.msra.mxu0 %v4551_v57  ;;  %v8991_v43 = vld [vmem:[%s9779_s29 + $0x460] sm:$0xff]  ;;  %v8981_v57 = vld [vmem:[%s9779_s29 + $0x410] sm:$0xff] }
0x10fa   :  { %4808 = vmatpush.msrb.mxu3 %v4517_v13  ;;  %v9027_v13 = vld [vmem:[%s9779_s29 + $0x580] sm:$0xff] }
0x10fb   :  { %4787 = vmatpush.msra.mxu2 %v4550_v10  ;;  %4828 = vmatpush.msra.mxu0 %v4549_v2  ;;  %v8989_v10 = vld [vmem:[%s9779_s29 + $0x450] sm:$0xff]  ;;  %v9022_v2 = vld [vmem:[%s9779_s29 + $0x558] sm:$0xff] }
0x10fc   :  { %4809 = vmatpush.msrb.mxu3 %v4515_v50  ;;  %v9025_v50 = vld [vmem:[%s9779_s29 + $0x570] sm:$0xff] }
0x10fd   :  { %4788 = vmatpush.msra.mxu2 %v4548_v48  ;;  %4829 = vmatpush.msra.mxu0 %v4547_v6  ;;  %v8987_v48 = vld [vmem:[%s9779_s29 + $0x440] sm:$0xff]  ;;  %v8980_v6 = vld [vmem:[%s9779_s29 + $0x408] sm:$0xff] }
0x10fe   :  { %4810 = vmatpush.msrb.mxu3 %v4513_v52  ;;  %v8983_v52 = vld [vmem:[%s9779_s29 + $0x420] sm:$0xff] }
0x10ff   :  { %4789 = vmatpush.msra.mxu2 %v4546_v49  ;;  %4830 = vmatpush.msra.mxu0 %v4545_v58  ;;  %v8985_v49 = vld [vmem:[%s9779_s29 + $0x430] sm:$0xff]  ;;  %v9020_v58 = vld [vmem:[%s9779_s29 + $0x548] sm:$0xff] }
0x1100   :  { %4811 = vmatpush.msrb.mxu3 %v4511_v56  ;;  %v9024_v56 = vld [vmem:[%s9779_s29 + $0x568] sm:$0xff] }
0x1101   :  { %4790 = vmatpush.msra.mxu2 %v4544_v39  ;;  %4831 = vmatpush.msra.mxu0 %v4543_v59  ;;  %v9026_v39 = vld [vmem:[%s9779_s29 + $0x578] sm:$0xff]  ;;  %v9017_v59 = vld [vmem:[%s9779_s29 + $0x530] sm:$0xff] }
0x1102   :  { %4812 = vmatpush.msrb.mxu3 %v4509_v60  ;;  %v8982_v60 = vld [vmem:[%s9779_s29 + $0x418] sm:$0xff] }
0x1103   :  { %4791 = vmatpush.msra.mxu2 %v4542_v47  ;;  %4832 = vmatpush.msra.mxu0 %v4541_v8  ;;  %v8984_v47 = vld [vmem:[%s9779_s29 + $0x428] sm:$0xff]  ;;  %v9018_v8 = vld [vmem:[%s9779_s29 + $0x538] sm:$0xff] }
0x1104   :  { %4813 = vmatpush.msrb.mxu3 %v4507_v4  ;;  %v9019_v4 = vld [vmem:[%s9779_s29 + $0x540] sm:$0xff] }
0x1105   :  { %4792 = vmatpush.msra.mxu2 %v4540_v55  ;;  %4833 = vmatpush.msra.mxu0 %v4539_v9  ;;  %v9021_v55 = vld [vmem:[%s9779_s29 + $0x550] sm:$0xff]  ;;  %v9015_v9 = vld [vmem:[%s9779_s29 + $0x520] sm:$0xff] }
0x1107   :  { %4793 = vmatpush.msra.mxu2 %v4538_v3  ;;  %v8979_v3 = vld [vmem:[%s9779_s29 + $0x400] sm:$0xff] }
0x1143   :  { %v4611_v24 = vpop.f32.mrf.mxu0 }
0x1144   :  { %4714 = vmatmul.f32.vlgmr.msrb.gmra.mxu2 %v4611_v24  ;;  %4754 = vmatmul.f32.vlgmr.msrb.gmra.mxu0 %v4611_v24  ;;  %v9014_v24 = vld [vmem:[%s9779_s29 + $0x518] sm:$0xff] }
0x1145   :  { %4946 = vmatpush.msrb.mxu2 %v9009_v18  ;;  %4986 = vmatpush.msrb.mxu0 %v9010_v21  ;;  %v9016_v18 = vld [vmem:[%s9779_s29 + $0x528] sm:$0xff]  ;;  %v9013_v21 = vld [vmem:[%s9779_s29 + $0x510] sm:$0xff] }
0x1147   :  { %v4483_v26 = vpop.f32.mrf.mxu2  ;;  %4947 = vmatpush.msrb.mxu2 %v9007_v17  ;;  %4987 = vmatpush.msrb.mxu0 %v9008_v25  ;;  %v9011_v17 = vld [vmem:[%s9779_s29 + $0x500] sm:$0xff]  ;;  %v9012_v25 = vld [vmem:[%s9779_s29 + $0x508] sm:$0xff] }
0x1148   :  { %v4591_v27 = vpop.f32.mrf.mxu3 }
0x1149   :  { %4694 = vmatmul.f32.vlgmr.msra.gmra.mxu1 %v4591_v27  ;;  %4734 = vmatmul.f32.vlgmr.msra.gmra.mxu3 %v4591_v27 }
0x114a   :  { %4856 = vmatpush.msra.mxu1 %v10986_v14  ;;  %4948 = vmatpush.msrb.mxu2 %v9005_v20  ;;  %v8999_v14 = vld [vmem:[%s9779_s29 + $0x4a0] sm:$0xff] }
0x114b   :  { %4988 = vmatpush.msrb.mxu0 %v9006_v11  ;;  %4966 = vmatpush.msra.mxu3 %v9041_v28 }
0x114c   :  { %4857 = vmatpush.msra.mxu1 %v10993_v19  ;;  %4949 = vmatpush.msrb.mxu2 %v9003_v29  ;;  %v8997_v19 = vld [vmem:[%s9779_s29 + $0x490] sm:$0xff] }
0x114d   :  { %4989 = vmatpush.msrb.mxu0 %v9004_v30  ;;  %4967 = vmatpush.msra.mxu3 %v9039_v63 }
0x114e   :  { %4950 = vmatpush.msrb.mxu2 %v9001_v1 }
0x114f   :  { %v4503_v44 = vpop.f32.mrf.mxu2  ;;  %4990 = vmatpush.msrb.mxu0 %v9002_v0  ;;  %4968 = vmatpush.msra.mxu3 %v9037_v5 }
0x1150   :  { %4794 = vmatmul.f32.vlgmr.msra.gmra.mxu2 %v4503_v44  ;;  %4834 = vmatmul.f32.vlgmr.msra.gmra.mxu0 %v4503_v44 }
0x1151   :  { %4774 = vmatmul.f32.vlgmr.msrb.gmra.mxu1 %v4483_v26  ;;  %4814 = vmatmul.f32.vlgmr.msrb.gmra.mxu3 %v4483_v26 }
0x1152   :  { %4876 = vmatpush.msrb.mxu1 %v10988_v15  ;;  %4951 = vmatpush.msrb.mxu2 %v8999_v14  ;;  %v9038_v15 = vld [vmem:[%s9779_s29 + $0x5d8] sm:$0xff]  ;;  %v5028_v14 = vld [vmem:[%s9784_s3] sm:$0x3] }
0x1153   :  { %4991 = vmatpush.msrb.mxu0 %v9000_v22  ;;  %4969 = vmatpush.msra.mxu3 %v9035_v35 }
0x1154   :  { %4877 = vmatpush.msrb.mxu1 %v10997_v23  ;;  %4952 = vmatpush.msrb.mxu2 %v8997_v19  ;;  %v8995_v23 = vld [vmem:[%s9779_s29 + $0x480] sm:$0xff]  ;;  %s9633_s29 = sshra.s32 %s8146_s25, 4  ;;  %s9634_s29 = int_to_ptr.hbm [resolvable:$true] %s9633_s29 }
0x1155   :  { %4992 = vmatpush.msrb.mxu0 %v8998_v31  ;;  %4970 = vmatpush.msra.mxu3 %v9033_v40  ;;  %s9635_s3 = scalar_lea.hbm %s9634_s29, 2  ;;  %p9638_p6 = scmp.lt.s32.totalorder %s9634_s29, %s9904_s20 }
0x1156   :  { %4953 = vmatpush.msrb.mxu2 %v8995_v23  ;;  %p9636_p5 = scmp.ne.s32.totalorder %s9634_s29, %s9635_s3 }
0x1157   :  { %4993 = vmatpush.msrb.mxu0 %v8996_v36  ;;  %4971 = vmatpush.msra.mxu3 %v9031_v45  ;;  %v9045_v45 = vld [vmem:[%s9789_s8 + $0x2] sm:$0x3] }
0x1158   :  { %4954 = vmatpush.msrb.mxu2 %v8993_v37 }
0x1159   :  { %8977 = vmatmul.msk.f32.vlgmr.msra.gmra.mxu1 %vm450_vm1, %v8976_v32  ;;  %4994 = vmatpush.msrb.mxu0 %v8994_v41 }
0x115a   :  { %5006 = vmatpush.msra.mxu1 %v9042_v33  ;;  %4955 = vmatpush.msrb.mxu2 %v8991_v43  ;;  %v5031_v33 = vperm.slane %v5028_v14, 1  ;;  %v5038_v43 = vld [vmem:[%s9789_s8] sm:$0x3] }
0x115b   :  { %4995 = vmatpush.msrb.mxu0 %v8992_v46  ;;  %4972 = vmatpush.msra.mxu3 %v9029_v12  ;;  %v9079_v46 = vld [vmem:[%s9794_s14 + $0x1f8] sm:$0xff] }
0x115c   :  { %5007 = vmatpush.msra.mxu1 %v9040_v34  ;;  %4956 = vmatpush.msrb.mxu2 %v8989_v10  ;;  %v9078_v10 = vld [vmem:[%s9794_s14 + $0x1f0] sm:$0xff] }
0x115d   :  { %4996 = vmatpush.msrb.mxu0 %v8990_v16  ;;  %4973 = vmatpush.msra.mxu3 %v9027_v13  ;;  %v9077_v16 = vld [vmem:[%s9794_s14 + $0x1e8] sm:$0xff]  ;;  %v9076_v13 = vld [vmem:[%s9794_s14 + $0x1e0] sm:$0xff] }
0x115e   :  { %5008 = vmatpush.msra.mxu1 %v9038_v15  ;;  %4957 = vmatpush.msrb.mxu2 %v8987_v48  ;;  %v9063_v48 = vld [vmem:[%s9794_s14 + $0x178] sm:$0xff] }
0x115f   :  { %4997 = vmatpush.msrb.mxu0 %v8988_v53  ;;  %4974 = vmatpush.msra.mxu3 %v9025_v50  ;;  %v9062_v53 = vld [vmem:[%s9794_s14 + $0x170] sm:$0xff] }
0x1160   :  { %5009 = vmatpush.msra.mxu1 %v9036_v38  ;;  %4958 = vmatpush.msrb.mxu2 %v8985_v49  ;;  %v9075_v49 = vld [vmem:[%s9794_s14 + $0x1d8] sm:$0xff]  ;;  %v5112_v50 = vld [vmem:[%s9794_s14 + $0xf0] sm:$0xff] }
0x1161   :  { %8978 = vmatmul.msk.f32.vlgmr.msrb.gmra.mxu1 %vm450_vm1, %v8976_v32  ;;  %4998 = vmatpush.msrb.mxu0 %v8986_v51  ;;  %v5097_v51 = vld [vmem:[%s9794_s14 + $0x78] sm:$0xff] }
0x1162   :  { %5010 = vmatpush.msra.mxu1 %v9034_v42  ;;  %4959 = vmatpush.msrb.mxu2 %v8983_v52  ;;  %v5030_v42 = vperm.slane %v5028_v14, 0  ;;  %v5096_v52 = vld [vmem:[%s9794_s14 + $0x70] sm:$0xff] }
0x1163   :  { %4975 = vmatpush.msra.mxu3 %v9023_v54  ;;  %4999 = vmatpush.msrb.mxu0 %v8984_v47  ;;  %v9074_v54 = vld [vmem:[%s9794_s14 + $0x1d0] sm:$0xff]  ;;  %v5111_v47 = vld [vmem:[%s9794_s14 + $0xe8] sm:$0xff] }
0x1164   :  { %5011 = vmatpush.msra.mxu1 %v9032_v61  ;;  %4960 = vmatpush.msrb.mxu2 %v8981_v57  ;;  %v5095_v57 = vld [vmem:[%s9794_s14 + $0x68] sm:$0xff]  ;;  %v5088_v14 = vld [vmem:[%s9794_s14 + $0x30] sm:$0xff] }
0x1165   :  { %4976 = vmatpush.msra.mxu3 %v9021_v55  ;;  %5000 = vmatpush.msrb.mxu0 %v8982_v60  ;;  %v9073_v55 = vld [vmem:[%s9794_s14 + $0x1c8] sm:$0xff]  ;;  %v5110_v60 = vld [vmem:[%s9794_s14 + $0xe0] sm:$0xff] }
0x1166   :  { %5012 = vmatpush.msra.mxu1 %v9030_v62  ;;  %4961 = vmatpush.msrb.mxu2 %v8979_v3  ;;  %v5094_v3 = vld [vmem:[%s9794_s14 + $0x60] sm:$0xff] }
0x1167   :  { %4977 = vmatpush.msra.mxu3 %v9019_v4  ;;  %5001 = vmatpush.msrb.mxu0 %v8980_v6  ;;  %v9072_v4 = vld [vmem:[%s9794_s14 + $0x1c0] sm:$0xff]  ;;  %v5109_v6 = vld [vmem:[%s9794_s14 + $0xd8] sm:$0xff] }
0x1168   :  { %5013 = vmatpush.msra.mxu1 %v9028_v7  ;;  %v5113_v7 = vld [vmem:[%s9794_s14 + $0xf8] sm:$0xff] }
0x1169   :  { %4978 = vmatpush.msra.mxu3 %v9017_v59  ;;  %v5093_v59 = vld [vmem:[%s9794_s14 + $0x58] sm:$0xff] }
0x116a   :  { %5014 = vmatpush.msra.mxu1 %v9026_v39  ;;  %v9061_v39 = vld [vmem:[%s9794_s14 + $0x168] sm:$0xff] }
0x116b   :  { %4979 = vmatpush.msra.mxu3 %v9015_v9  ;;  %v5108_v9 = vld [vmem:[%s9794_s14 + $0xd0] sm:$0xff] }
0x116c   :  { %5015 = vmatpush.msra.mxu1 %v9024_v56  ;;  %v9060_v56 = vld [vmem:[%s9794_s14 + $0x160] sm:$0xff] }
0x116d   :  { %4980 = vmatpush.msra.mxu3 %v9013_v21  ;;  %v5092_v21 = vld [vmem:[%s9794_s14 + $0x50] sm:$0xff] }
0x116e   :  { %5016 = vmatpush.msra.mxu1 %v9022_v2  ;;  %v9059_v2 = vld [vmem:[%s9794_s14 + $0x158] sm:$0xff] }
0x116f   :  { %4981 = vmatpush.msra.mxu3 %v9011_v17  ;;  %v5107_v17 = vld [vmem:[%s9794_s14 + $0xc8] sm:$0xff] }
0x1170   :  { %5017 = vmatpush.msra.mxu1 %v9020_v58  ;;  %v9058_v58 = vld [vmem:[%s9794_s14 + $0x150] sm:$0xff] }
0x1172   :  { %5018 = vmatpush.msra.mxu1 %v9018_v8  ;;  %v9071_v8 = vld [vmem:[%s9794_s14 + $0x1b8] sm:$0xff] }
0x1174   :  { %5019 = vmatpush.msra.mxu1 %v9016_v18  ;;  %v9057_v18 = vld [vmem:[%s9794_s14 + $0x148] sm:$0xff] }
0x1176   :  { %5020 = vmatpush.msra.mxu1 %v9014_v24  ;;  %v9070_v24 = vld [vmem:[%s9794_s14 + $0x1b0] sm:$0xff] }
0x1178   :  { %5021 = vmatpush.msra.mxu1 %v9012_v25  ;;  %v9056_v25 = vld [vmem:[%s9794_s14 + $0x140] sm:$0xff] }
0x11c1   :  { %v4755_v29 = vpop.f32.mrf.mxu0 }
0x11c6   :  { %v4695_v26 = vpop.f32.mrf.mxu1 }
0x11c7   :  { %v4715_v30 = vpop.f32.mrf.mxu2 }
0x11c8   :  { %v4716_v34 = vadd.f32 %v4715_v30, %v4695_v26  ;;  %v5091_v26 = vld [vmem:[%s9794_s14 + $0x48] sm:$0xff]  ;;  %v5105_v30 = vld [vmem:[%s9794_s14 + $0xb8] sm:$0xff] }
0x11cc   :  { %v4735_v28 = vpop.f32.mrf.mxu3 }
0x11cd   :  { %v4835_v63 = vpop.f32.mrf.mxu0  ;;  %v4756_v0 = vadd.f32 %v4755_v29, %v4735_v28  ;;  %v5090_v28 = vld [vmem:[%s9794_s14 + $0x40] sm:$0xff] }
0x11ce   :  { %v4775_v20 = vpop.f32.mrf.mxu1  ;;  %v9068_v29 = vld [vmem:[%s9794_s14 + $0x1a0] sm:$0xff] }
0x11cf   :  { %v4776_v23 = vadd.f32 %v4775_v20, %v4716_v34  ;;  %v9069_v20 = vld [vmem:[%s9794_s14 + $0x1a8] sm:$0xff]  ;;  %v5102_v34 = vld [vmem:[%s9794_s14 + $0xa0] sm:$0xff] }
0x11d3   :  { %v4795_v44 = vpop.f32.mrf.mxu2 }
0x11d4   :  { %v4815_v1 = vpop.f32.mrf.mxu3  ;;  %v4796_v37 = vadd.f32 %v4795_v44, %v4776_v23  ;;  %v9053_v44 = vld [vmem:[%s9794_s14 + $0x128] sm:$0xff]  ;;  %v5086_v23 = vld [vmem:[%s9794_s14 + $0x20] sm:$0xff] }
0x11d5   :  { %v4816_v5 = vadd.f32 %v4815_v1, %v4756_v0  ;;  %v5089_v1 = vld [vmem:[%s9794_s14 + $0x38] sm:$0xff] }
0x11d6   :  { %v4859_v27 = vpop.f32.mrf.mxu1  ;;  %v9067_v0 = vld [vmem:[%s9794_s14 + $0x198] sm:$0xff] }
0x11d7   :  { %4962 = vmatmul.f32.vlgmr.msrb.gmra.mxu2 %v4859_v27  ;;  %5002 = vmatmul.f32.vlgmr.msrb.gmra.mxu0 %v4859_v27  ;;  %v4836_v31 = vadd.f32 %v4835_v63, %v4816_v5  ;;  %v5106_v27 = vld [vmem:[%s9794_s14 + $0xc0] sm:$0xff]  ;;  %v9054_v63 = vld [vmem:[%s9794_s14 + $0x130] sm:$0xff] }
0x11d8   :  { %v5104_v5 = vld [vmem:[%s9794_s14 + $0xb0] sm:$0xff] }
0x11de   :  { %v4879_v11 = vpop.f32.mrf.mxu1 }
0x11df   :  { %4982 = vmatmul.f32.vlgmr.msra.gmra.mxu3 %v4879_v11  ;;  %5022 = vmatmul.f32.vlgmr.msra.gmra.mxu1 %v4879_v11  ;;  %v9055_v11 = vld [vmem:[%s9794_s14 + $0x138] sm:$0xff] }
0x1254   :  { %v5003_v22 = vpop.f32.mrf.mxu0 }
0x125a   :  { %v4963_v36 = vpop.f32.mrf.mxu2 }
0x125c   :  { %v5023_v19 = vpop.f32.mrf.mxu1 }
0x125d   :  { %v5024_v32 = vadd.f32 %v5023_v19, %v5003_v22  ;;  %v9066_v22 = vld [vmem:[%s9794_s14 + $0x190] sm:$0xff]  ;;  %v5103_v19 = vld [vmem:[%s9794_s14 + $0xa8] sm:$0xff] }
0x125f   :  { %v5027_v15 = vadd.f32 %v5024_v32, %v4836_v31  ;;  %v9052_v31 = vld [vmem:[%s9794_s14 + $0x120] sm:$0xff]  ;;  %v5087_v32 = vld [vmem:[%s9794_s14 + $0x28] sm:$0xff] }
0x1261   :  { %v5035_v35 = vadd.f32 %v5031_v33, %v5027_v15  ;;  %v9065_v33 = vld [vmem:[%s9794_s14 + $0x188] sm:$0xff]  ;;  %v9051_v15 = vld [vmem:[%s9794_s14 + $0x118] sm:$0xff] }
0x1262   :  { %v4983_v38 = vpop.f32.mrf.mxu3 }
0x1263   :  { %v11198_v40 = vmax.f32 %v5035_v35, 0.0  ;;  %v4984_v41 = vadd.f32 %v4983_v38, %v4963_v36  ;;  %v9064_v35 = vld [vmem:[%s9794_s14 + $0x180] sm:$0xff]  ;;  %v5101_v36 = vld [vmem:[%s9794_s14 + $0x98] sm:$0xff]  ;;  %v9050_v38 = vld [vmem:[%s9794_s14 + $0x110] sm:$0xff] }
0x1265   :  { %v5026_v61 = vadd.f32 %v4984_v41, %v4796_v37  ;;  %5077 = vmatpush.msrb.mxu3 %v11198_v40  ;;  %5153 = vmatpush.msrb.mxu1 %v11198_v40  ;;  %v5100_v37 = vld [vmem:[%s9794_s14 + $0x90] sm:$0xff]  ;;  %v5085_v41 = vld [vmem:[%s9794_s14 + $0x18] sm:$0xff] }
0x1266   :  { %9044 = vmatmul.msk.f32.vlgmr.msrb.gmra.mxu3 %vm1031_vm2, %v5038_v43  ;;  %9047 = vmatmul.msk.f32.vlgmr.msrb.gmra.mxu1 %vm1031_vm2, %v9045_v45 }
0x1267   :  { %v5034_v12 = vadd.f32 %v5030_v42, %v5026_v61  ;;  %5210 = vmatpush.msra.mxu3 %v9079_v46  ;;  %5250 = vmatpush.msra.mxu1 %v5113_v7  ;;  %v9049_v42 = vld [vmem:[%s9794_s14 + $0x108] sm:$0xff]  ;;  %v9048_v46 = vld [vmem:[%s9794_s14 + $0x100] sm:$0xff]  ;;  %v9097_v7 = vld [vmem:[%s9794_s14 + $0x270] sm:$0xff] }
0x1268   :  { %v5098_v61 = vld [vmem:[%s9794_s14 + $0x80] sm:$0xff] }
0x1269   :  { %v11209_v62 = vmax.f32 %v5034_v12, 0.0  ;;  %5211 = vmatpush.msra.mxu3 %v9078_v10  ;;  %5251 = vmatpush.msra.mxu1 %v5112_v50  ;;  %v9114_v10 = vld [vmem:[%s9794_s14 + $0x2f8] sm:$0xff]  ;;  %v5083_v12 = vld [vmem:[%s9794_s14 + $0x8] sm:$0xff] }
0x126a   :  { %v9096_v50 = vld [vmem:[%s9794_s14 + $0x268] sm:$0xff] }
0x126b   :  { %5212 = vmatpush.msra.mxu3 %v9077_v16  ;;  %5057 = vmatpush.msra.mxu2 %v11209_v62  ;;  %v9113_v16 = vld [vmem:[%s9794_s14 + $0x2f0] sm:$0xff] }
0x126c   :  { %5133 = vmatpush.msra.mxu0 %v11209_v62  ;;  %9043 = vmatmul.msk.f32.vlgmr.msra.gmra.mxu2 %vm1031_vm2, %v5038_v43  ;;  %v5099_v43 = vld [vmem:[%s9794_s14 + $0x88] sm:$0xff] }
0x126d   :  { %9046 = vmatmul.msk.f32.vlgmr.msra.gmra.mxu0 %vm1031_vm2, %v9045_v45  ;;  %5190 = vmatpush.msrb.mxu2 %v9063_v48  ;;  %v5084_v45 = vld [vmem:[%s9794_s14 + $0x10] sm:$0xff]  ;;  %v5082_v48 = vld [vmem:[%s9794_s14] sm:$0xff] }
0x126e   :  { %5213 = vmatpush.msra.mxu3 %v9076_v13  ;;  %5230 = vmatpush.msrb.mxu0 %v5097_v51  ;;  %v9098_v13 = vld [vmem:[%s9794_s14 + $0x278] sm:$0xff] }
0x126f   :  { %5191 = vmatpush.msrb.mxu2 %v9062_v53  ;;  %5252 = vmatpush.msra.mxu1 %v5111_v47  ;;  %v9112_v53 = vld [vmem:[%s9794_s14 + $0x2e8] sm:$0xff]  ;;  %v9110_v51 = vld [vmem:[%s9794_s14 + $0x2d8] sm:$0xff] }
0x1270   :  { %5214 = vmatpush.msra.mxu3 %v9075_v49  ;;  %5231 = vmatpush.msrb.mxu0 %v5096_v52  ;;  %v9111_v49 = vld [vmem:[%s9794_s14 + $0x2e0] sm:$0xff]  ;;  %v9109_v52 = vld [vmem:[%s9794_s14 + $0x2d0] sm:$0xff]  ;;  %v9108_v47 = vld [vmem:[%s9794_s14 + $0x2c8] sm:$0xff] }
0x1271   :  { %5192 = vmatpush.msrb.mxu2 %v9061_v39  ;;  %5253 = vmatpush.msra.mxu1 %v5110_v60  ;;  %v9095_v39 = vld [vmem:[%s9794_s14 + $0x260] sm:$0xff]  ;;  %v9106_v60 = vld [vmem:[%s9794_s14 + $0x2b8] sm:$0xff] }
0x1272   :  { %5215 = vmatpush.msra.mxu3 %v9074_v54  ;;  %5232 = vmatpush.msrb.mxu0 %v5095_v57  ;;  %v9094_v54 = vld [vmem:[%s9794_s14 + $0x258] sm:$0xff]  ;;  %v9107_v57 = vld [vmem:[%s9794_s14 + $0x2c0] sm:$0xff] }
0x1273   :  { %5193 = vmatpush.msrb.mxu2 %v9060_v56  ;;  %5254 = vmatpush.msra.mxu1 %v5109_v6  ;;  %v9093_v56 = vld [vmem:[%s9794_s14 + $0x250] sm:$0xff]  ;;  %v9104_v6 = vld [vmem:[%s9794_s14 + $0x2a8] sm:$0xff] }
0x1274   :  { %5216 = vmatpush.msra.mxu3 %v9073_v55  ;;  %5233 = vmatpush.msrb.mxu0 %v5094_v3  ;;  %v9092_v55 = vld [vmem:[%s9794_s14 + $0x248] sm:$0xff]  ;;  %v9105_v3 = vld [vmem:[%s9794_s14 + $0x2b0] sm:$0xff] }
0x1275   :  { %5194 = vmatpush.msrb.mxu2 %v9059_v2  ;;  %5255 = vmatpush.msra.mxu1 %v5108_v9  ;;  %v9091_v2 = vld [vmem:[%s9794_s14 + $0x240] sm:$0xff]  ;;  %v9088_v9 = vld [vmem:[%s9794_s14 + $0x228] sm:$0xff] }
0x1276   :  { %5217 = vmatpush.msra.mxu3 %v9072_v4  ;;  %5234 = vmatpush.msrb.mxu0 %v5093_v59  ;;  %v9090_v4 = vld [vmem:[%s9794_s14 + $0x238] sm:$0xff]  ;;  %v9089_v59 = vld [vmem:[%s9794_s14 + $0x230] sm:$0xff] }
0x1277   :  { %5195 = vmatpush.msrb.mxu2 %v9058_v58  ;;  %5256 = vmatpush.msra.mxu1 %v5107_v17  ;;  %v9103_v58 = vld [vmem:[%s9794_s14 + $0x2a0] sm:$0xff]  ;;  %v9086_v17 = vld [vmem:[%s9794_s14 + $0x218] sm:$0xff] }
0x1278   :  { %5218 = vmatpush.msra.mxu3 %v9071_v8  ;;  %5235 = vmatpush.msrb.mxu0 %v5092_v21  ;;  %v9102_v8 = vld [vmem:[%s9794_s14 + $0x298] sm:$0xff]  ;;  %v9087_v21 = vld [vmem:[%s9794_s14 + $0x220] sm:$0xff] }
0x1279   :  { %5196 = vmatpush.msrb.mxu2 %v9057_v18  ;;  %5257 = vmatpush.msra.mxu1 %v5106_v27  ;;  %v9101_v18 = vld [vmem:[%s9794_s14 + $0x290] sm:$0xff]  ;;  %v9083_v27 = vld [vmem:[%s9794_s14 + $0x200] sm:$0xff] }
0x127a   :  { %5219 = vmatpush.msra.mxu3 %v9070_v24  ;;  %5236 = vmatpush.msrb.mxu0 %v5091_v26  ;;  %v9100_v24 = vld [vmem:[%s9794_s14 + $0x288] sm:$0xff]  ;;  %v9085_v26 = vld [vmem:[%s9794_s14 + $0x210] sm:$0xff] }
0x127b   :  { %5197 = vmatpush.msrb.mxu2 %v9056_v25  ;;  %5258 = vmatpush.msra.mxu1 %v5105_v30  ;;  %v9099_v25 = vld [vmem:[%s9794_s14 + $0x280] sm:$0xff] }
0x127c   :  { %5220 = vmatpush.msra.mxu3 %v9069_v20  ;;  %5237 = vmatpush.msrb.mxu0 %v5090_v28  ;;  %v9084_v20 = vld [vmem:[%s9794_s14 + $0x208] sm:$0xff] }
0x127d   :  { %5198 = vmatpush.msrb.mxu2 %v9055_v11  ;;  %5259 = vmatpush.msra.mxu1 %v5104_v5 }
0x127e   :  { %5221 = vmatpush.msra.mxu3 %v9068_v29  ;;  %5238 = vmatpush.msrb.mxu0 %v5089_v1  ;;  %v9080_v29 = vld [vmem:[%s9789_s8 + $0x4] sm:$0x3]  ;;  %v9148_v1 = vld [vmem:[%s9794_s14 + $0x3f0] sm:$0xff] }
0x127f   :  { %5199 = vmatpush.msrb.mxu2 %v9054_v63  ;;  %5260 = vmatpush.msra.mxu1 %v5103_v19  ;;  %v9149_v63 = vld [vmem:[%s9794_s14 + $0x3f8] sm:$0xff] }
0x1280   :  { %5222 = vmatpush.msra.mxu3 %v9067_v0  ;;  %5239 = vmatpush.msrb.mxu0 %v5088_v14  ;;  %v9147_v0 = vld [vmem:[%s9794_s14 + $0x3e8] sm:$0xff]  ;;  %v9133_v14 = vld [vmem:[%s9794_s14 + $0x378] sm:$0xff] }
0x1281   :  { %5200 = vmatpush.msrb.mxu2 %v9053_v44  ;;  %5261 = vmatpush.msra.mxu1 %v5102_v34  ;;  %v9146_v44 = vld [vmem:[%s9794_s14 + $0x3e0] sm:$0xff]  ;;  %v9145_v19 = vld [vmem:[%s9794_s14 + $0x3d8] sm:$0xff]  ;;  %v9143_v34 = vld [vmem:[%s9794_s14 + $0x3c8] sm:$0xff] }
0x1282   :  { %5223 = vmatpush.msra.mxu3 %v9066_v22  ;;  %5240 = vmatpush.msrb.mxu0 %v5087_v32  ;;  %v9115_v22 = vld [vmem:[%s9789_s8 + $0x6] sm:$0x3]  ;;  %v9144_v32 = vld [vmem:[%s9794_s14 + $0x3d0] sm:$0xff] }
0x1283   :  { %5201 = vmatpush.msrb.mxu2 %v9052_v31  ;;  %5262 = vmatpush.msra.mxu1 %v5101_v36  ;;  %v9132_v31 = vld [vmem:[%s9794_s14 + $0x370] sm:$0xff]  ;;  %v9141_v36 = vld [vmem:[%s9794_s14 + $0x3b8] sm:$0xff] }
0x1284   :  { %5224 = vmatpush.msra.mxu3 %v9065_v33  ;;  %5241 = vmatpush.msrb.mxu0 %v5086_v23  ;;  %v9131_v33 = vld [vmem:[%s9794_s14 + $0x368] sm:$0xff]  ;;  %v9142_v23 = vld [vmem:[%s9794_s14 + $0x3c0] sm:$0xff] }
0x1285   :  { %5202 = vmatpush.msrb.mxu2 %v9051_v15  ;;  %5263 = vmatpush.msra.mxu1 %v5100_v37  ;;  %v9130_v15 = vld [vmem:[%s9794_s14 + $0x360] sm:$0xff]  ;;  %v9140_v37 = vld [vmem:[%s9794_s14 + $0x3b0] sm:$0xff] }
0x1286   :  { %5225 = vmatpush.msra.mxu3 %v9064_v35  ;;  %5242 = vmatpush.msrb.mxu0 %v5085_v41  ;;  %v9129_v35 = vld [vmem:[%s9794_s14 + $0x358] sm:$0xff]  ;;  %v9127_v41 = vld [vmem:[%s9794_s14 + $0x348] sm:$0xff] }
0x1287   :  { %5203 = vmatpush.msrb.mxu2 %v9050_v38  ;;  %5264 = vmatpush.msra.mxu1 %v5099_v43  ;;  %v9128_v38 = vld [vmem:[%s9794_s14 + $0x350] sm:$0xff]  ;;  %v9126_v43 = vld [vmem:[%s9794_s14 + $0x340] sm:$0xff] }
0x1288   :  { %5309 = vmatpush.msrb.mxu3 %v11198_v40  ;;  %5243 = vmatpush.msrb.mxu0 %v5084_v45  ;;  %v9138_v45 = vld [vmem:[%s9794_s14 + $0x3a0] sm:$0xff] }
0x1289   :  { %5204 = vmatpush.msrb.mxu2 %v9049_v42  ;;  %5265 = vmatpush.msra.mxu1 %v5098_v61  ;;  %v9139_v42 = vld [vmem:[%s9794_s14 + $0x3a8] sm:$0xff]  ;;  %v9137_v61 = vld [vmem:[%s9794_s14 + $0x398] sm:$0xff] }
0x128a   :  { %5244 = vmatpush.msrb.mxu0 %v5083_v12  ;;  %v9136_v12 = vld [vmem:[%s9794_s14 + $0x390] sm:$0xff] }
0x128b   :  { %5205 = vmatpush.msrb.mxu2 %v9048_v46  ;;  %5366 = vmatpush.msrb.mxu1 %v9114_v10  ;;  %v9125_v46 = vld [vmem:[%s9794_s14 + $0x338] sm:$0xff]  ;;  %v9124_v10 = vld [vmem:[%s9794_s14 + $0x330] sm:$0xff] }
0x128c   :  { %5245 = vmatpush.msrb.mxu0 %v5082_v48  ;;  %v9135_v48 = vld [vmem:[%s9794_s14 + $0x388] sm:$0xff] }
0x128d   :  { %5289 = vmatpush.msra.mxu2 %v11209_v62  ;;  %5367 = vmatpush.msrb.mxu1 %v9113_v16  ;;  %v9123_v16 = vld [vmem:[%s9794_s14 + $0x328] sm:$0xff] }
0x128e   :  { %5346 = vmatpush.msra.mxu0 %v9098_v13  ;;  %v9122_v13 = vld [vmem:[%s9794_s14 + $0x320] sm:$0xff] }
0x128f   :  { %5368 = vmatpush.msrb.mxu1 %v9112_v53  ;;  %v9134_v53 = vld [vmem:[%s9794_s14 + $0x380] sm:$0xff] }
0x1290   :  { %5347 = vmatpush.msra.mxu0 %v9097_v7  ;;  %v9121_v7 = vld [vmem:[%s9794_s14 + $0x318] sm:$0xff] }
0x1291   :  { %5369 = vmatpush.msrb.mxu1 %v9111_v49  ;;  %v9120_v49 = vld [vmem:[%s9794_s14 + $0x310] sm:$0xff] }
0x1292   :  { %5348 = vmatpush.msra.mxu0 %v9096_v50  ;;  %v9119_v50 = vld [vmem:[%s9794_s14 + $0x308] sm:$0xff] }
0x1293   :  { %5370 = vmatpush.msrb.mxu1 %v9110_v51  ;;  %v9118_v51 = vld [vmem:[%s9794_s14 + $0x300] sm:$0xff] }
0x1294   :  { %5349 = vmatpush.msra.mxu0 %v9095_v39 }
0x1295   :  { %5371 = vmatpush.msrb.mxu1 %v9109_v52 }
0x1296   :  { %5350 = vmatpush.msra.mxu0 %v9094_v54  ;;  %v9184_v54 = vld [vmem:[%s9794_s14 + $0x4f8] sm:$0xff] }
0x1297   :  { %5372 = vmatpush.msrb.mxu1 %v9108_v47 }
0x1298   :  { %5351 = vmatpush.msra.mxu0 %v9093_v56  ;;  %v9183_v56 = vld [vmem:[%s9794_s14 + $0x4f0] sm:$0xff] }
0x1299   :  { %5373 = vmatpush.msrb.mxu1 %v9107_v57  ;;  %v9182_v57 = vld [vmem:[%s9794_s14 + $0x4e8] sm:$0xff] }
0x129a   :  { %5352 = vmatpush.msra.mxu0 %v9092_v55  ;;  %v9181_v55 = vld [vmem:[%s9794_s14 + $0x4e0] sm:$0xff] }
0x129b   :  { %5374 = vmatpush.msrb.mxu1 %v9106_v60  ;;  %v9168_v60 = vld [vmem:[%s9794_s14 + $0x478] sm:$0xff] }
0x129c   :  { %5353 = vmatpush.msra.mxu0 %v9091_v2 }
0x129d   :  { %5375 = vmatpush.msrb.mxu1 %v9105_v3  ;;  %v9180_v3 = vld [vmem:[%s9794_s14 + $0x4d8] sm:$0xff] }
0x129e   :  { %5354 = vmatpush.msra.mxu0 %v9090_v4  ;;  %v9219_v4 = vld [vmem:[%s9794_s14 + $0x5f8] sm:$0xff] }
0x129f   :  { %5376 = vmatpush.msrb.mxu1 %v9104_v6 }
0x12a0   :  { %5355 = vmatpush.msra.mxu0 %v9089_v59  ;;  %v9150_v59 = vld [vmem:[%s9789_s8 + $0x8] sm:$0x3] }
0x12a1   :  { %5377 = vmatpush.msrb.mxu1 %v9103_v58  ;;  %v9167_v58 = vld [vmem:[%s9794_s14 + $0x470] sm:$0xff] }
0x12a2   :  { %5356 = vmatpush.msra.mxu0 %v9088_v9  ;;  %v9218_v9 = vld [vmem:[%s9794_s14 + $0x5f0] sm:$0xff] }
0x12a3   :  { %5378 = vmatpush.msrb.mxu1 %v9102_v8  ;;  %v9179_v8 = vld [vmem:[%s9794_s14 + $0x4d0] sm:$0xff] }
0x12a4   :  { %5357 = vmatpush.msra.mxu0 %v9087_v21  ;;  %v9178_v21 = vld [vmem:[%s9794_s14 + $0x4c8] sm:$0xff] }
0x12a5   :  { %5379 = vmatpush.msrb.mxu1 %v9101_v18  ;;  %v9166_v18 = vld [vmem:[%s9794_s14 + $0x468] sm:$0xff] }
0x12a6   :  { %5358 = vmatpush.msra.mxu0 %v9086_v17  ;;  %v9165_v17 = vld [vmem:[%s9794_s14 + $0x460] sm:$0xff] }
0x12a7   :  { %5380 = vmatpush.msrb.mxu1 %v9100_v24  ;;  %v9217_v24 = vld [vmem:[%s9794_s14 + $0x5e8] sm:$0xff] }
0x12a8   :  { %5359 = vmatpush.msra.mxu0 %v9085_v26  ;;  %v9177_v26 = vld [vmem:[%s9794_s14 + $0x4c0] sm:$0xff] }
0x12a9   :  { %5381 = vmatpush.msrb.mxu1 %v9099_v25  ;;  %v9164_v25 = vld [vmem:[%s9794_s14 + $0x458] sm:$0xff] }
0x12aa   :  { %5360 = vmatpush.msra.mxu0 %v9084_v20 }
0x12ac   :  { %5361 = vmatpush.msra.mxu0 %v9083_v27  ;;  %v9203_v27 = vld [vmem:[%s9794_s14 + $0x578] sm:$0xff] }
0x12e3   :  { %v5155_v11 = vpop.f32.mrf.mxu1 }
0x12e4   :  { %5226 = vmatmul.f32.vlgmr.msra.gmra.mxu3 %v5155_v11  ;;  %v9216_v11 = vld [vmem:[%s9794_s14 + $0x5e0] sm:$0xff] }
0x12e5   :  { %5426 = vmatpush.msra.mxu3 %v11198_v40 }
0x12e9   :  { %v5079_v28 = vpop.f32.mrf.mxu3 }
0x12ea   :  { %v5135_v30 = vpop.f32.mrf.mxu0  ;;  %5266 = vmatmul.f32.vlgmr.msra.gmra.mxu1 %v5079_v28  ;;  %v9163_v28 = vld [vmem:[%s9794_s14 + $0x450] sm:$0xff] }
0x12eb   :  { %5206 = vmatmul.f32.vlgmr.msrb.gmra.mxu2 %v5135_v30  ;;  %5543 = vmatpush.msra.mxu1 %v11198_v40  ;;  %v9202_v30 = vld [vmem:[%s9794_s14 + $0x570] sm:$0xff] }
0x12ec   :  { %5406 = vmatpush.msrb.mxu2 %v11209_v62  ;;  %9082 = vmatmul.msk.f32.vlgmr.msrb.gmra.mxu3 %vm1031_vm2, %v9080_v29 }
0x12ed   :  { %5483 = vmatpush.msrb.mxu3 %v9149_v63  ;;  %v9215_v63 = vld [vmem:[%s9794_s14 + $0x5d8] sm:$0xff] }
0x12ef   :  { %5484 = vmatpush.msrb.mxu3 %v9148_v1  ;;  %v5059_v5 = vpop.f32.mrf.mxu2  ;;  %v9162_v1 = vld [vmem:[%s9794_s14 + $0x448] sm:$0xff] }
0x12f0   :  { %5246 = vmatmul.f32.vlgmr.msrb.gmra.mxu0 %v5059_v5  ;;  %v9201_v5 = vld [vmem:[%s9794_s14 + $0x568] sm:$0xff] }
0x12f1   :  { %5485 = vmatpush.msrb.mxu3 %v9147_v0  ;;  %5523 = vmatpush.msrb.mxu0 %v11209_v62  ;;  %v9175_v0 = vld [vmem:[%s9794_s14 + $0x4b0] sm:$0xff] }
0x12f3   :  { %9081 = vmatmul.msk.f32.vlgmr.msra.gmra.mxu2 %vm1031_vm2, %v9080_v29  ;;  %5486 = vmatpush.msrb.mxu3 %v9146_v44  ;;  %v9176_v29 = vld [vmem:[%s9794_s14 + $0x4b8] sm:$0xff]  ;;  %v9214_v44 = vld [vmem:[%s9794_s14 + $0x5d0] sm:$0xff] }
0x12f4   :  { %5463 = vmatpush.msra.mxu2 %v9133_v14  ;;  %9117 = vmatmul.msk.f32.vlgmr.msra.gmra.mxu3 %vm1031_vm2, %v9115_v22  ;;  %v9161_v14 = vld [vmem:[%s9794_s14 + $0x440] sm:$0xff] }
0x12f5   :  { %5487 = vmatpush.msrb.mxu3 %v9145_v19  ;;  %v9200_v19 = vld [vmem:[%s9794_s14 + $0x560] sm:$0xff] }
0x12f6   :  { %5464 = vmatpush.msra.mxu2 %v9132_v31  ;;  %v9213_v31 = vld [vmem:[%s9794_s14 + $0x5c8] sm:$0xff] }
0x12f7   :  { %5488 = vmatpush.msrb.mxu3 %v9144_v32  ;;  %v9160_v32 = vld [vmem:[%s9794_s14 + $0x438] sm:$0xff] }
0x12f8   :  { %5465 = vmatpush.msra.mxu2 %v9131_v33  ;;  %v9173_v33 = vld [vmem:[%s9794_s14 + $0x4a0] sm:$0xff] }
0x12f9   :  { %5489 = vmatpush.msrb.mxu3 %v9143_v34  ;;  %v9185_v34 = vld [vmem:[%s9789_s8 + $0xa] sm:$0x3] }
0x12fa   :  { %5466 = vmatpush.msra.mxu2 %v9130_v15  ;;  %v9199_v15 = vld [vmem:[%s9794_s14 + $0x558] sm:$0xff] }
0x12fb   :  { %9116 = vmatmul.msk.f32.vlgmr.msrb.gmra.mxu2 %vm1031_vm2, %v9115_v22  ;;  %5490 = vmatpush.msrb.mxu3 %v9142_v23  ;;  %v9174_v22 = vld [vmem:[%s9794_s14 + $0x4a8] sm:$0xff]  ;;  %v9212_v23 = vld [vmem:[%s9794_s14 + $0x5c0] sm:$0xff] }
0x12fc   :  { %5467 = vmatpush.msra.mxu2 %v9129_v35  ;;  %v9159_v35 = vld [vmem:[%s9794_s14 + $0x430] sm:$0xff] }
0x12fd   :  { %5491 = vmatpush.msrb.mxu3 %v9141_v36  ;;  %v9172_v36 = vld [vmem:[%s9794_s14 + $0x498] sm:$0xff] }
0x12fe   :  { %5468 = vmatpush.msra.mxu2 %v9128_v38  ;;  %v9198_v38 = vld [vmem:[%s9794_s14 + $0x550] sm:$0xff] }
0x12ff   :  { %5492 = vmatpush.msrb.mxu3 %v9140_v37  ;;  %v9211_v37 = vld [vmem:[%s9794_s14 + $0x5b8] sm:$0xff] }
0x1300   :  { %5469 = vmatpush.msra.mxu2 %v9127_v41  ;;  %v9158_v41 = vld [vmem:[%s9794_s14 + $0x428] sm:$0xff] }
0x1301   :  { %5493 = vmatpush.msrb.mxu3 %v9139_v42  ;;  %v9171_v42 = vld [vmem:[%s9794_s14 + $0x490] sm:$0xff] }
0x1302   :  { %5470 = vmatpush.msra.mxu2 %v9126_v43  ;;  %v9197_v43 = vld [vmem:[%s9794_s14 + $0x548] sm:$0xff] }
0x1303   :  { %5494 = vmatpush.msrb.mxu3 %v9138_v45  ;;  %v9210_v45 = vld [vmem:[%s9794_s14 + $0x5b0] sm:$0xff] }
0x1304   :  { %5471 = vmatpush.msra.mxu2 %v9125_v46  ;;  %v9157_v46 = vld [vmem:[%s9794_s14 + $0x420] sm:$0xff] }
0x1305   :  { %5495 = vmatpush.msrb.mxu3 %v9137_v61  ;;  %v9170_v61 = vld [vmem:[%s9794_s14 + $0x488] sm:$0xff] }
0x1306   :  { %5472 = vmatpush.msra.mxu2 %v9124_v10  ;;  %v9196_v10 = vld [vmem:[%s9794_s14 + $0x540] sm:$0xff] }
0x1307   :  { %5496 = vmatpush.msrb.mxu3 %v9136_v12  ;;  %v9209_v12 = vld [vmem:[%s9794_s14 + $0x5a8] sm:$0xff] }
0x1308   :  { %5473 = vmatpush.msra.mxu2 %v9123_v16  ;;  %v9156_v16 = vld [vmem:[%s9794_s14 + $0x418] sm:$0xff] }
0x1309   :  { %5497 = vmatpush.msrb.mxu3 %v9135_v48  ;;  %v9169_v48 = vld [vmem:[%s9794_s14 + $0x480] sm:$0xff] }
0x130a   :  { %5474 = vmatpush.msra.mxu2 %v9122_v13  ;;  %v9195_v13 = vld [vmem:[%s9794_s14 + $0x538] sm:$0xff] }
0x130b   :  { %5498 = vmatpush.msrb.mxu3 %v9134_v53  ;;  %v9208_v53 = vld [vmem:[%s9794_s14 + $0x5a0] sm:$0xff] }
0x130c   :  { %5475 = vmatpush.msra.mxu2 %v9121_v7  ;;  %v9155_v7 = vld [vmem:[%s9794_s14 + $0x410] sm:$0xff] }
0x130d   :  { %5660 = vmatpush.msra.mxu3 %v11198_v40 }
0x130e   :  { %5476 = vmatpush.msra.mxu2 %v9120_v49  ;;  %v9194_v49 = vld [vmem:[%s9794_s14 + $0x530] sm:$0xff] }
0x1310   :  { %5477 = vmatpush.msra.mxu2 %v9119_v50  ;;  %v9207_v50 = vld [vmem:[%s9794_s14 + $0x598] sm:$0xff] }
0x1312   :  { %5478 = vmatpush.msra.mxu2 %v9118_v51  ;;  %v9154_v51 = vld [vmem:[%s9794_s14 + $0x408] sm:$0xff] }
0x1314   :  { %5640 = vmatpush.msrb.mxu2 %v11209_v62 }
0x1367   :  { %v11354_v39 = vpop.f32.mrf.mxu3 }
0x136e   :  { %v11356_v52 = vpop.f32.mrf.mxu2 }
0x136f   :  { %v5311_v47 = vpop.f32.mrf.mxu3 }
0x1370   :  { %5382 = vmatmul.f32.vlgmr.msrb.gmra.mxu1 %v5311_v47  ;;  %v9206_v47 = vld [vmem:[%s9794_s14 + $0x590] sm:$0xff] }
0x1371   :  { %5600 = vmatpush.msrb.mxu1 %v9184_v54  ;;  %v9193_v54 = vld [vmem:[%s9794_s14 + $0x528] sm:$0xff] }
0x1373   :  { %5601 = vmatpush.msrb.mxu1 %v9183_v56  ;;  %v9153_v56 = vld [vmem:[%s9794_s14 + $0x400] sm:$0xff] }
0x1375   :  { %5602 = vmatpush.msrb.mxu1 %v9182_v57  ;;  %v9192_v57 = vld [vmem:[%s9794_s14 + $0x520] sm:$0xff] }
0x1376   :  { %v5291_v2 = vpop.f32.mrf.mxu2 }
0x1377   :  { %5362 = vmatmul.f32.vlgmr.msra.gmra.mxu0 %v5291_v2  ;;  %5603 = vmatpush.msrb.mxu1 %v9181_v55  ;;  %v5428_v6 = vpop.f32.mrf.mxu3  ;;  %v9205_v55 = vld [vmem:[%s9794_s14 + $0x588] sm:$0xff]  ;;  %v9204_v2 = vld [vmem:[%s9794_s14 + $0x580] sm:$0xff] }
0x1378   :  { %5580 = vmatpush.msra.mxu0 %v9168_v60  ;;  %5499 = vmatmul.f32.vlgmr.msrb.gmra.mxu3 %v5428_v6  ;;  %v9191_v60 = vld [vmem:[%s9794_s14 + $0x518] sm:$0xff]  ;;  %v9188_v6 = vld [vmem:[%s9794_s14 + $0x500] sm:$0xff] }
0x1379   :  { %5604 = vmatpush.msrb.mxu1 %v9180_v3  ;;  %5717 = vmatpush.msrb.mxu3 %v9219_v4  ;;  %v9190_v3 = vld [vmem:[%s9794_s14 + $0x510] sm:$0xff]  ;;  %v9189_v4 = vld [vmem:[%s9794_s14 + $0x508] sm:$0xff] }
0x137a   :  { %5581 = vmatpush.msra.mxu0 %v9167_v58  ;;  %9152 = vmatmul.msk.f32.vlgmr.msra.gmra.mxu1 %vm1031_vm2, %v9150_v59  ;;  %v11432_v58 = vpop.f32.mrf.mxu1 }
0x137b   :  { %5605 = vmatpush.msrb.mxu1 %v9179_v8  ;;  %5718 = vmatpush.msrb.mxu3 %v9218_v9 }
0x137c   :  { %5582 = vmatpush.msra.mxu0 %v9166_v18 }
0x137d   :  { %5606 = vmatpush.msrb.mxu1 %v9178_v21  ;;  %5719 = vmatpush.msrb.mxu3 %v9217_v24  ;;  %v9253_v21 = vld [vmem:[%s9794_s14 + $0x6f0] sm:$0xff]  ;;  %v9252_v24 = vld [vmem:[%s9794_s14 + $0x6e8] sm:$0xff] }
0x137e   :  { %5583 = vmatpush.msra.mxu0 %v9165_v17  ;;  %v5408_v20 = vpop.f32.mrf.mxu2 }
0x137f   :  { %5479 = vmatmul.f32.vlgmr.msra.gmra.mxu2 %v5408_v20  ;;  %9151 = vmatmul.msk.f32.vlgmr.msrb.gmra.mxu0 %vm1031_vm2, %v9150_v59  ;;  %v11434_v59 = vpop.f32.mrf.mxu0  ;;  %v9237_v20 = vld [vmem:[%s9794_s14 + $0x670] sm:$0xff] }
0x1380   :  { %5584 = vmatpush.msra.mxu0 %v9164_v25  ;;  %5607 = vmatpush.msrb.mxu1 %v9177_v26  ;;  %v9251_v25 = vld [vmem:[%s9794_s14 + $0x6e0] sm:$0xff]  ;;  %v9220_v26 = vld [vmem:[%s9789_s8 + $0xc] sm:$0x3] }
0x1381   :  { %5697 = vmatpush.msra.mxu2 %v9203_v27  ;;  %5720 = vmatpush.msrb.mxu3 %v9216_v11  ;;  %v9250_v27 = vld [vmem:[%s9794_s14 + $0x6d8] sm:$0xff]  ;;  %v9236_v11 = vld [vmem:[%s9794_s14 + $0x668] sm:$0xff] }
0x1382   :  { %5585 = vmatpush.msra.mxu0 %v9163_v28  ;;  %5608 = vmatpush.msrb.mxu1 %v9176_v29  ;;  %v9249_v28 = vld [vmem:[%s9794_s14 + $0x6d0] sm:$0xff]  ;;  %v9235_v29 = vld [vmem:[%s9794_s14 + $0x660] sm:$0xff] }
0x1383   :  { %5698 = vmatpush.msra.mxu2 %v9202_v30  ;;  %5721 = vmatpush.msrb.mxu3 %v9215_v63 }
0x1384   :  { %5586 = vmatpush.msra.mxu0 %v9162_v1  ;;  %5609 = vmatpush.msrb.mxu1 %v9175_v0  ;;  %v9248_v1 = vld [vmem:[%s9794_s14 + $0x6c8] sm:$0xff]  ;;  %v9234_v0 = vld [vmem:[%s9794_s14 + $0x658] sm:$0xff] }
0x1385   :  { %5699 = vmatpush.msra.mxu2 %v9201_v5  ;;  %5722 = vmatpush.msrb.mxu3 %v9214_v44  ;;  %v9247_v5 = vld [vmem:[%s9794_s14 + $0x6c0] sm:$0xff]  ;;  %v9233_v44 = vld [vmem:[%s9794_s14 + $0x650] sm:$0xff] }
0x1386   :  { %5587 = vmatpush.msra.mxu0 %v9161_v14  ;;  %5610 = vmatpush.msrb.mxu1 %v9174_v22  ;;  %v9246_v14 = vld [vmem:[%s9794_s14 + $0x6b8] sm:$0xff]  ;;  %v9232_v22 = vld [vmem:[%s9794_s14 + $0x648] sm:$0xff] }
0x1387   :  { %5700 = vmatpush.msra.mxu2 %v9200_v19  ;;  %5723 = vmatpush.msrb.mxu3 %v9213_v31  ;;  %v9245_v19 = vld [vmem:[%s9794_s14 + $0x6b0] sm:$0xff]  ;;  %v9231_v31 = vld [vmem:[%s9794_s14 + $0x640] sm:$0xff] }
0x1388   :  { %5588 = vmatpush.msra.mxu0 %v9160_v32  ;;  %5611 = vmatpush.msrb.mxu1 %v9173_v33  ;;  %v9230_v32 = vld [vmem:[%s9794_s14 + $0x638] sm:$0xff]  ;;  %v9244_v33 = vld [vmem:[%s9794_s14 + $0x6a8] sm:$0xff] }
0x1389   :  { %9186 = vmatmul.msk.f32.vlgmr.msrb.gmra.mxu2 %vm1031_vm2, %v9185_v34  ;;  %9187 = vmatmul.msk.f32.vlgmr.msra.gmra.mxu3 %vm1031_vm2, %v9185_v34 }
0x138a   :  { %5701 = vmatpush.msra.mxu2 %v9199_v15  ;;  %5724 = vmatpush.msrb.mxu3 %v9212_v23  ;;  %v9273_v23 = vld [vmem:[%s9794_s14 + $0x778] sm:$0xff] }
0x138b   :  { %5589 = vmatpush.msra.mxu0 %v9159_v35  ;;  %5612 = vmatpush.msrb.mxu1 %v9172_v36  ;;  %v9289_v35 = vld [vmem:[%s9794_s14 + $0x7f8] sm:$0xff]  ;;  %v9229_v36 = vld [vmem:[%s9794_s14 + $0x630] sm:$0xff] }
0x138c   :  { %5702 = vmatpush.msra.mxu2 %v9198_v38  ;;  %5725 = vmatpush.msrb.mxu3 %v9211_v37  ;;  %v9228_v38 = vld [vmem:[%s9794_s14 + $0x628] sm:$0xff] }
0x138d   :  { %5590 = vmatpush.msra.mxu0 %v9158_v41  ;;  %5613 = vmatpush.msrb.mxu1 %v9171_v42  ;;  %v9255_v37 = vld [vmem:[%s9789_s8 + $0xe] sm:$0x3]  ;;  %v9227_v41 = vld [vmem:[%s9794_s14 + $0x620] sm:$0xff]  ;;  %s9637_s8 = scalar_lea.hbm %s9904_s20, 2 }
0x138e   :  { %5703 = vmatpush.msra.mxu2 %v9197_v43  ;;  %5726 = vmatpush.msrb.mxu3 %v9210_v45  ;;  %v9243_v42 = vld [vmem:[%s9794_s14 + $0x6a0] sm:$0xff]  ;;  %v9272_v43 = vld [vmem:[%s9794_s14 + $0x770] sm:$0xff]  ;;  %p9639_p7 = scmp.lt.s32.totalorder %s9637_s8, %s9635_s3 }
0x138f   :  { %5591 = vmatpush.msra.mxu0 %v9157_v46  ;;  %5614 = vmatpush.msrb.mxu1 %v9170_v61  ;;  %v9288_v45 = vld [vmem:[%s9794_s14 + $0x7f0] sm:$0xff]  ;;  %v9226_v46 = vld [vmem:[%s9794_s14 + $0x618] sm:$0xff] }
0x1390   :  { %5704 = vmatpush.msra.mxu2 %v9196_v10  ;;  %5727 = vmatpush.msrb.mxu3 %v9209_v12  ;;  %v9242_v61 = vld [vmem:[%s9794_s14 + $0x698] sm:$0xff]  ;;  %v9271_v10 = vld [vmem:[%s9794_s14 + $0x768] sm:$0xff]  ;;  %p9640_p8 = por %p9639_p7, %p9638_p6 }
0x1391   :  { %5592 = vmatpush.msra.mxu0 %v9156_v16  ;;  %5615 = vmatpush.msrb.mxu1 %v9169_v48  ;;  %v9287_v12 = vld [vmem:[%s9794_s14 + $0x7e8] sm:$0xff]  ;;  %v9225_v16 = vld [vmem:[%s9794_s14 + $0x610] sm:$0xff] }
0x1392   :  { %5705 = vmatpush.msra.mxu2 %v9195_v13  ;;  %5728 = vmatpush.msrb.mxu3 %v9208_v53  ;;  %v9241_v48 = vld [vmem:[%s9794_s14 + $0x690] sm:$0xff]  ;;  %v9270_v13 = vld [vmem:[%s9794_s14 + $0x760] sm:$0xff]  ;;  %p9641_p9 = pnand %p9640_p8, %p9636_p5 }
0x1393   :  { %5777 = vmatpush.msra.mxu1 %v11198_v40  ;;  %5593 = vmatpush.msra.mxu0 %v9155_v7  ;;  %v9286_v53 = vld [vmem:[%s9794_s14 + $0x7e0] sm:$0xff]  ;;  %v9224_v7 = vld [vmem:[%s9794_s14 + $0x608] sm:$0xff] }
0x1394   :  { %5706 = vmatpush.msra.mxu2 %v9194_v49  ;;  %5729 = vmatpush.msrb.mxu3 %v9207_v50  ;;  %v9240_v49 = vld [vmem:[%s9794_s14 + $0x688] sm:$0xff]  ;;  %v9269_v50 = vld [vmem:[%s9794_s14 + $0x758] sm:$0xff] }
0x1395   :  { %5594 = vmatpush.msra.mxu0 %v9154_v51  ;;  %v9285_v51 = vld [vmem:[%s9794_s14 + $0x7d8] sm:$0xff] }
0x1396   :  { %5707 = vmatpush.msra.mxu2 %v9193_v54  ;;  %5730 = vmatpush.msrb.mxu3 %v9206_v47  ;;  %v9223_v54 = vld [vmem:[%s9794_s14 + $0x600] sm:$0xff] }
0x1397   :  { %5595 = vmatpush.msra.mxu0 %v9153_v56  ;;  %v9239_v47 = vld [vmem:[%s9794_s14 + $0x680] sm:$0xff]  ;;  %v9268_v56 = vld [vmem:[%s9794_s14 + $0x750] sm:$0xff] }
0x1398   :  { %5708 = vmatpush.msra.mxu2 %v9192_v57  ;;  %5731 = vmatpush.msrb.mxu3 %v9205_v55  ;;  %v9284_v57 = vld [vmem:[%s9794_s14 + $0x7d0] sm:$0xff]  ;;  %v9267_v55 = vld [vmem:[%s9794_s14 + $0x748] sm:$0xff] }
0x1399   :  { %5757 = vmatpush.msrb.mxu0 %v11209_v62 }
0x139a   :  { %5709 = vmatpush.msra.mxu2 %v9191_v60  ;;  %5732 = vmatpush.msrb.mxu3 %v9204_v2  ;;  %v9283_v60 = vld [vmem:[%s9794_s14 + $0x7c8] sm:$0xff]  ;;  %v9266_v2 = vld [vmem:[%s9794_s14 + $0x740] sm:$0xff] }
0x139c   :  { %5894 = vmatpush.msra.mxu3 %v11198_v40  ;;  %5710 = vmatpush.msra.mxu2 %v9190_v3  ;;  %v9254_v40 = vld [vmem:[%s9794_s14 + $0x6f8] sm:$0xff]  ;;  %v9282_v3 = vld [vmem:[%s9794_s14 + $0x7c0] sm:$0xff] }
0x139e   :  { %5711 = vmatpush.msra.mxu2 %v9189_v4  ;;  %v9265_v4 = vld [vmem:[%s9794_s14 + $0x738] sm:$0xff] }
0x13a0   :  { %5712 = vmatpush.msra.mxu2 %v9188_v6  ;;  %v9281_v6 = vld [vmem:[%s9794_s14 + $0x7b8] sm:$0xff] }
0x13a2   :  { %5874 = vmatpush.msrb.mxu2 %v11209_v62  ;;  %v9238_v62 = vld [vmem:[%s9794_s14 + $0x678] sm:$0xff] }
0x13ed   :  { %v11436_v8 = vpop.f32.mrf.mxu1 }
0x13f4   :  { %v11438_v9 = vpop.f32.mrf.mxu0 }
0x13f7   :  { %v5545_v18 = vpop.f32.mrf.mxu1 }
0x13f8   :  { %5616 = vmatmul.f32.vlgmr.msrb.gmra.mxu1 %v5545_v18  ;;  %v9280_v18 = vld [vmem:[%s9794_s14 + $0x7b0] sm:$0xff] }
0x13f9   :  { %5834 = vmatpush.msrb.mxu1 %v9254_v40  ;;  %v9264_v40 = vld [vmem:[%s9794_s14 + $0x730] sm:$0xff] }
0x13fb   :  { %5835 = vmatpush.msrb.mxu1 %v9253_v21  ;;  %v11454_v63 = vpop.f32.mrf.mxu3  ;;  %v9263_v21 = vld [vmem:[%s9794_s14 + $0x728] sm:$0xff] }
0x13fc   :  { %v5525_v17 = vpop.f32.mrf.mxu0 }
0x13fd   :  { %5596 = vmatmul.f32.vlgmr.msra.gmra.mxu0 %v5525_v17  ;;  %5836 = vmatpush.msrb.mxu1 %v9252_v24  ;;  %v9279_v24 = vld [vmem:[%s9794_s14 + $0x7a8] sm:$0xff]  ;;  %v9278_v17 = vld [vmem:[%s9794_s14 + $0x7a0] sm:$0xff] }
0x13fe   :  { %5814 = vmatpush.msra.mxu0 %v9238_v62  ;;  %v9262_v62 = vld [vmem:[%s9794_s14 + $0x720] sm:$0xff] }
0x13ff   :  { %5837 = vmatpush.msrb.mxu1 %v9251_v25  ;;  %v9261_v25 = vld [vmem:[%s9794_s14 + $0x718] sm:$0xff] }
0x1400   :  { %9222 = vmatmul.msk.f32.vlgmr.msra.gmra.mxu1 %vm1031_vm2, %v9220_v26  ;;  %5815 = vmatpush.msra.mxu0 %v9237_v20  ;;  %v9260_v20 = vld [vmem:[%s9794_s14 + $0x710] sm:$0xff] }
0x1401   :  { %5838 = vmatpush.msrb.mxu1 %v9250_v27  ;;  %v9276_v27 = vld [vmem:[%s9794_s14 + $0x790] sm:$0xff] }
0x1402   :  { %v11452_v30 = vpop.f32.mrf.mxu2  ;;  %5816 = vmatpush.msra.mxu0 %v9236_v11 }
0x1403   :  { %5839 = vmatpush.msrb.mxu1 %v9249_v28  ;;  %v9259_v28 = vld [vmem:[%s9794_s14 + $0x708] sm:$0xff] }
0x1404   :  { %5817 = vmatpush.msra.mxu0 %v9235_v29  ;;  %v9275_v29 = vld [vmem:[%s9794_s14 + $0x788] sm:$0xff] }
0x1405   :  { %9221 = vmatmul.msk.f32.vlgmr.msrb.gmra.mxu0 %vm1031_vm2, %v9220_v26  ;;  %5840 = vmatpush.msrb.mxu1 %v9248_v1  ;;  %v9277_v26 = vld [vmem:[%s9794_s14 + $0x798] sm:$0xff]  ;;  %v9258_v1 = vld [vmem:[%s9794_s14 + $0x700] sm:$0xff] }
0x1406   :  { %5818 = vmatpush.msra.mxu0 %v9234_v0  ;;  %v9274_v0 = vld [vmem:[%s9794_s14 + $0x780] sm:$0xff] }
0x1407   :  { %5841 = vmatpush.msrb.mxu1 %v9247_v5 }
0x1408   :  { %5819 = vmatpush.msra.mxu0 %v9233_v44 }
0x1409   :  { %5842 = vmatpush.msrb.mxu1 %v9246_v14 }
0x140a   :  { %5820 = vmatpush.msra.mxu0 %v9232_v22 }
0x140b   :  { %5843 = vmatpush.msrb.mxu1 %v9245_v19 }
0x140c   :  { %v5642_v34 = vpop.f32.mrf.mxu2  ;;  %v5662_v15 = vpop.f32.mrf.mxu3  ;;  %5821 = vmatpush.msra.mxu0 %v9231_v31 }
0x140d   :  { %5713 = vmatmul.f32.vlgmr.msra.gmra.mxu2 %v5642_v34  ;;  %5733 = vmatmul.f32.vlgmr.msrb.gmra.mxu3 %v5662_v15  ;;  %v5384_v15 = vadd.f32 %v11436_v8, %v11438_v9 }
0x140e   :  { %5822 = vmatpush.msra.mxu0 %v9230_v32  ;;  %5844 = vmatpush.msrb.mxu1 %v9244_v33  ;;  %v5228_v33 = vadd.f32 %v11354_v39, %v11356_v52 }
0x140f   :  { %5931 = vmatpush.msra.mxu2 %v9273_v23  ;;  %5951 = vmatpush.msrb.mxu3 %v9289_v35  ;;  %v5501_v35 = vadd.f32 %v11454_v63, %v11452_v30  ;;  %v9573_v30 = vld [vmem:[%s9799_s19] ss:$0 sm:$0xff] }
0x1410   :  { %5823 = vmatpush.msra.mxu0 %v9229_v36  ;;  %5845 = vmatpush.msrb.mxu1 %v9243_v42  ;;  %v5248_v34 = vadd.f32 %v11434_v59, %v5228_v33  ;;  %v9308_v33 = vld [vmem:[%s11947_s1 + $0x1] sm:$0x1] }
0x1411   :  { %5932 = vmatpush.msra.mxu2 %v9272_v43  ;;  %5952 = vmatpush.msrb.mxu3 %v9288_v45 }
0x1412   :  { %5824 = vmatpush.msra.mxu0 %v9228_v38  ;;  %5846 = vmatpush.msrb.mxu1 %v9242_v61  ;;  %v5268_v23 = vadd.f32 %v11432_v58, %v5248_v34  ;;  %v6164_v34 = vld [vmem:[%s11947_s1] sm:$0x1] }
0x1413   :  { %5933 = vmatpush.msra.mxu2 %v9271_v10  ;;  %5953 = vmatpush.msrb.mxu3 %v9287_v12  ;;  %v5978_v10 = vld [vmem:[%s9804_s24] sm:$0x3]  ;;  %v9292_v12 = vld [vmem:[%s9804_s24 + $0x2] sm:$0x3] }
0x1414   :  { %5825 = vmatpush.msra.mxu0 %v9227_v41  ;;  %5847 = vmatpush.msrb.mxu1 %v9241_v48  ;;  %v5386_v36 = vadd.f32 %v5384_v15, %v5268_v23  ;;  %v6008_v48 = vld [vmem:[%s9809_s30 + $0x18] sm:$0xff] }
0x1415   :  { %9256 = vmatmul.msk.f32.vlgmr.msrb.gmra.mxu2 %vm1031_vm2, %v9255_v37  ;;  %9257 = vmatmul.msk.f32.vlgmr.msra.gmra.mxu3 %vm1031_vm2, %v9255_v37 }
0x1416   :  { %5826 = vmatpush.msra.mxu0 %v9226_v46  ;;  %5934 = vmatpush.msra.mxu2 %v9270_v13  ;;  %v5503_v42 = vadd.f32 %v5501_v35, %v5386_v36  ;;  %v9297_v13 = vld [vmem:[%s9809_s30 + $0x30] sm:$0xff] }
0x1417   :  { %5954 = vmatpush.msrb.mxu3 %v9286_v53  ;;  %5848 = vmatpush.msrb.mxu1 %v9240_v49  ;;  %v6007_v53 = vld [vmem:[%s9809_s30 + $0x10] sm:$0xff]  ;;  %v6006_v49 = vld [vmem:[%s9809_s30 + $0x8] sm:$0xff] }
0x1418   :  { %5827 = vmatpush.msra.mxu0 %v9225_v16  ;;  %5935 = vmatpush.msra.mxu2 %v9269_v50  ;;  %v9298_v16 = vld [vmem:[%s9809_s30 + $0x38] sm:$0xff]  ;;  %v9295_v50 = vld [vmem:[%s9809_s30 + $0x20] sm:$0xff] }
0x1419   :  { %5955 = vmatpush.msrb.mxu3 %v9285_v51  ;;  %5849 = vmatpush.msrb.mxu1 %v9239_v47  ;;  %v6005_v51 = vld [vmem:[%s9809_s30] sm:$0xff] }
0x141a   :  { %5828 = vmatpush.msra.mxu0 %v9224_v7  ;;  %5936 = vmatpush.msra.mxu2 %v9268_v56  ;;  %v9296_v7 = vld [vmem:[%s9809_s30 + $0x28] sm:$0xff] }
0x141b   :  { %5956 = vmatpush.msrb.mxu3 %v9284_v57  ;;  %v6091_v56 = vld [vmem:[%s9819_s12 + $0x8] sm:$0xff]  ;;  %v6090_v57 = vld [vmem:[%s9819_s12] sm:$0xff] }
0x141c   :  { %5829 = vmatpush.msra.mxu0 %v9223_v54  ;;  %5937 = vmatpush.msra.mxu2 %v9267_v55  ;;  %v9303_v55 = vld [vmem:[%s9819_s12 + $0x18] sm:$0xff] }
0x141d   :  { %5957 = vmatpush.msrb.mxu3 %v9283_v60  ;;  %v9302_v60 = vld [vmem:[%s9819_s12 + $0x10] sm:$0xff] }
0x141e   :  { %5938 = vmatpush.msra.mxu2 %v9266_v2  ;;  %v6145_v2 = vld [vmem:[%s11942_s4 + $0x1] sm:$0x1] }
0x141f   :  { %5958 = vmatpush.msrb.mxu3 %v9282_v3  ;;  %6147 = vrot.lane.b32.xlu1 %v6145_v2, %s11957_s5  ;;  %v9574_v3 = vld [vmem:[%s11943_s16] ss:$0 sm:$0xff]  ;;  %v9345_v2 = vld [vmem:[%s11949_s7 + $0xa8] sm:$0xff] }
0x1420   :  { %5939 = vmatpush.msra.mxu2 %v9265_v4 }
0x1421   :  { %5959 = vmatpush.msrb.mxu3 %v9281_v6 }
0x1422   :  { %5940 = vmatpush.msra.mxu2 %v9264_v40 }
0x1423   :  { %5960 = vmatpush.msrb.mxu3 %v9280_v18 }
0x1424   :  { %5941 = vmatpush.msra.mxu2 %v9263_v21 }
0x1425   :  { %5961 = vmatpush.msrb.mxu3 %v9279_v24 }
0x1426   :  { %5942 = vmatpush.msra.mxu2 %v9262_v62  ;;  %v6089_v62 = vld [vmem:[%s11944_s18] sm:$0x1] }
0x1427   :  { %5962 = vmatpush.msrb.mxu3 %v9278_v17 }
0x1428   :  { %5943 = vmatpush.msra.mxu2 %v9261_v25 }
0x1429   :  { %5963 = vmatpush.msrb.mxu3 %v9277_v26 }
0x142a   :  { %5944 = vmatpush.msra.mxu2 %v9260_v20 }
0x142b   :  { %5964 = vmatpush.msrb.mxu3 %v9276_v27 }
0x142c   :  { %5945 = vmatpush.msra.mxu2 %v9259_v28 }
0x142d   :  { %5965 = vmatpush.msrb.mxu3 %v9275_v29 }
0x142e   :  { %5946 = vmatpush.msra.mxu2 %v9258_v1 }
0x142f   :  { %5966 = vmatpush.msrb.mxu3 %v9274_v0 }
0x1430   :  { %6109 = vmatpush.msrb.mxu2 %v6091_v56  ;;  %v6357_v56 = vld [vmem:[%s11949_s7 + $0x18] sm:$0xff] }
0x1431   :  { %6135 = vmatpush.msra.mxu3 %v9303_v55  ;;  %v6355_v55 = vld [vmem:[%s11949_s7 + $0x8] sm:$0xff] }
0x1432   :  { %6110 = vmatpush.msrb.mxu2 %v6090_v57  ;;  %v6354_v57 = vld [vmem:[%s11949_s7] sm:$0xff] }
0x1433   :  { %6136 = vmatpush.msra.mxu3 %v9302_v60  ;;  %v9347_v60 = vld [vmem:[%s11949_s7 + $0xb8] sm:$0xff] }
0x1475   :  { %v5617_v11 = vpop.f32.mrf.mxu1 }
0x147a   :  { %v5597_v5 = vpop.f32.mrf.mxu0 }
0x147b   :  { %v5618_v38 = vadd.f32 %v5617_v11, %v5597_v5 }
0x147d   :  { %v5779_v44 = vpop.f32.mrf.mxu1  ;;  %v5620_v52 = vadd.f32 %v5618_v38, %v5503_v42 }
0x147e   :  { %5850 = vmatmul.f32.vlgmr.msrb.gmra.mxu1 %v5779_v44  ;;  %v6163_v44 = vld [vmem:[%s11945_s23] sm:$0xf] }
0x1482   :  { %v5759_v14 = vpop.f32.mrf.mxu0 }
0x1483   :  { %5830 = vmatmul.f32.vlgmr.msra.gmra.mxu0 %v5759_v14  ;;  %v9307_v14 = vld [vmem:[%s11945_s23 + $0x4] sm:$0xf] }
0x1490   :  { %v5714_v22 = vpop.f32.mrf.mxu2  ;;  %v5734_v19 = vpop.f32.mrf.mxu3 }
0x1491   :  { %v5735_v39 = vadd.f32 %v5734_v19, %v5714_v22  ;;  %v6148_v29 = vpop.permute.xlu1 %6147 }
0x1493   :  { %v5737_v43 = vadd.f32 %v5735_v39, %v5620_v52  ;;  %v9316_v39 = vld [vmem:[%s11946_s28 + $0x10] sm:$0xff]  ;;  %v6247_v52 = vld [vmem:[%s11946_s28] sm:$0xff] }
0x1498   :  { %v5876_v31 = vpop.f32.mrf.mxu2  ;;  %v5896_v32 = vpop.f32.mrf.mxu3 }
0x1499   :  { %5947 = vmatmul.f32.vlgmr.msra.gmra.mxu2 %v5876_v31  ;;  %5967 = vmatmul.f32.vlgmr.msrb.gmra.mxu3 %v5896_v32  ;;  %v9317_v31 = vld [vmem:[%s11946_s28 + $0x18] sm:$0xff]  ;;  %v6248_v32 = vld [vmem:[%s11946_s28 + $0x8] sm:$0xff] }
0x14fb   :  { %v5851_v41 = vpop.f32.mrf.mxu1 }
0x1500   :  { %v5831_v37 = vpop.f32.mrf.mxu0 }
0x1501   :  { %v5852_v59 = vadd.f32 %v5851_v41, %v5831_v37  ;;  %v6220_v37 = vld [vmem:[%s11948_s2] sm:$0x3]  ;;  %v9313_v41 = vld [vmem:[%s11948_s2 + $0x2] sm:$0x3] }
0x1503   :  { %v5854_v58 = vadd.f32 %v5852_v59, %v5737_v43 }
0x151c   :  { %v5948_v8 = vpop.f32.mrf.mxu2  ;;  %v5968_v9 = vpop.f32.mrf.mxu3 }
0x151d   :  { %v5969_v45 = vadd.f32 %v5968_v9, %v5948_v8  ;;  %v9331_v8 = vld [vmem:[%s11949_s7 + $0x70] sm:$0xff]  ;;  %v9329_v9 = vld [vmem:[%s11949_s7 + $0x60] sm:$0xff] }
0x151f   :  { %v5971_v63 = vadd.f32 %v5969_v45, %v5854_v58  ;;  %v9327_v58 = vld [vmem:[%s11949_s7 + $0x50] sm:$0xff]  ;;  %v9325_v45 = vld [vmem:[%s11949_s7 + $0x40] sm:$0xff] }
0x1521   :  { %v5976_v46 = vadd.f32 %v9573_v30, %v5971_v63  ;;  %v9332_v30 = vld [vmem:[%s11949_s7 + $0x78] sm:$0xff]  ;;  %v9330_v63 = vld [vmem:[%s11949_s7 + $0x68] sm:$0xff] }
0x1523   :  { %v5977_v61 = vmax.f32 %v5976_v46, 0.0  ;;  %v9328_v46 = vld [vmem:[%s11949_s7 + $0x58] sm:$0xff] }
0x1525   :  { %9290 = vmatpush.msk.msrb.mxu0 %vm1990_vm3, %v5977_v61  ;;  %9293 = vmatpush.msk.msra.mxu1 %vm1990_vm3, %v5977_v61  ;;  %v9575_v61 = vld [vmem:[%s11950_s10] ss:$0 sm:$0xff] }
0x1526   :  { %9291 = vmatmul.msk.f32.vlgmr.msrb.gmra.mxu0 %vm1986_vm4, %v5978_v10  ;;  %9294 = vmatmul.msk.f32.vlgmr.msra.gmra.mxu1 %vm1986_vm4, %v9292_v12 }
0x1527   :  { %6052 = vmatpush.msra.mxu0 %v9298_v16  ;;  %6075 = vmatpush.msrb.mxu1 %v6008_v48 }
0x1529   :  { %6053 = vmatpush.msra.mxu0 %v9297_v13  ;;  %6076 = vmatpush.msrb.mxu1 %v6007_v53  ;;  %v6327_v53 = vld [vmem:[%s11951_s11] sm:$0xff] }
0x152b   :  { %6054 = vmatpush.msra.mxu0 %v9296_v7  ;;  %6077 = vmatpush.msrb.mxu1 %v6006_v49  ;;  %v9322_v7 = vld [vmem:[%s11951_s11 + $0x8] sm:$0xff]  ;;  %v6360_v49 = vld [vmem:[%s11949_s7 + $0x30] sm:$0xff] }
0x152d   :  { %6055 = vmatpush.msra.mxu0 %v9295_v50  ;;  %6078 = vmatpush.msrb.mxu1 %v6005_v51  ;;  %v6361_v50 = vld [vmem:[%s11949_s7 + $0x38] sm:$0xff]  ;;  %v6358_v51 = vld [vmem:[%s11949_s7 + $0x20] sm:$0xff] }
0x152f   :  { %9305 = vmatpush.msk.msrb.mxu0 %vm2182_vm6, %v6163_v44  ;;  %9309 = vmatpush.msk.msra.mxu1 %vm2182_vm6, %v9307_v14  ;;  %v9373_v44 = vld [vmem:[%s11949_s7 + $0x138] sm:$0xff]  ;;  %v9371_v14 = vld [vmem:[%s11949_s7 + $0x128] sm:$0xff] }
0x15a3   :  { %v6002_v54 = vpop.f32.mrf.mxu0  ;;  %v6030_v47 = vpop.f32.mrf.mxu1 }
0x15a4   :  { %9299 = vmatmul.msk.f32.vlgmr.msra.gmra.mxu0 %vm155_vm0, %v6030_v47  ;;  %9300 = vmatmul.msk.f32.vlgmr.msrb.gmra.mxu1 %vm155_vm0, %v6002_v54  ;;  %v6359_v54 = vld [vmem:[%s11949_s7 + $0x28] sm:$0xff]  ;;  %v6356_v47 = vld [vmem:[%s11949_s7 + $0x10] sm:$0xff] }
0x15a5   :  { %6292 = vmatpush.msra.mxu0 %v9317_v31  ;;  %6315 = vmatpush.msrb.mxu1 %v6248_v32 }
0x15a7   :  { %6293 = vmatpush.msra.mxu0 %v9316_v39  ;;  %6316 = vmatpush.msrb.mxu1 %v6247_v52  ;;  %v9384_v39 = vld [vmem:[%s11949_s7 + $0x168] sm:$0xff]  ;;  %v9383_v52 = vld [vmem:[%s11949_s7 + $0x160] sm:$0xff] }
0x1621   :  { %v6057_v4 = vpop.f32.mrf.mxu0  ;;  %v6080_v6 = vpop.f32.mrf.mxu1 }
0x1622   :  { %v6081_v40 = vadd.f32 %v6080_v6, %v6057_v4  ;;  %v9326_v4 = vld [vmem:[%s11949_s7 + $0x48] sm:$0xff] }
0x1623   :  { %v9341_v6 = vld [vmem:[%s11949_s7 + $0x88] sm:$0xff] }
0x1624   :  { %v6087_v18 = vadd.f32 %v9574_v3, %v6081_v40  ;;  %v9343_v3 = vld [vmem:[%s11949_s7 + $0x98] sm:$0xff]  ;;  %v9346_v40 = vld [vmem:[%s11949_s7 + $0xb0] sm:$0xff] }
0x1626   :  { %v6088_v21 = vmax.f32 %v6087_v18, 0.0  ;;  %v9344_v18 = vld [vmem:[%s11949_s7 + $0xa0] sm:$0xff] }
0x1628   :  { %v6118_v24 = vrot.slane %v6088_v21, 1  ;;  %9301 = vmatmul.msk.f32.vlgmr.msrb.gmra.mxu2 %vm450_vm1, %v6088_v21  ;;  %v9342_v21 = vld [vmem:[%s11949_s7 + $0x90] sm:$0xff] }
0x162a   :  { %9304 = vmatmul.msk.f32.vlgmr.msra.gmra.mxu3 %vm450_vm1, %v6118_v24 }
0x16ab   :  { %v6112_v17 = vpop.f32.mrf.mxu2 }
0x16ac   :  { %v6115_v25 = vadd.f32 %v6112_v17, %v6089_v62  ;;  %v9350_v17 = vld [vmem:[%s11951_s11 + $0x18] sm:$0xff] }
0x16ad   :  { %v6138_v26 = vpop.f32.mrf.mxu3 }
0x16ae   :  { %v6141_v20 = vadd.f32 %v6138_v26, %v6115_v25  ;;  %v9337_v25 = vld [vmem:[%s11951_s11 + $0x10] sm:$0xff]  ;;  %v9340_v26 = vld [vmem:[%s11949_s7 + $0x80] sm:$0xff] }
0x16b0   :  { %6156 = vst.msk [vmem:[#allocation6 + $0x1] sm:$0x1] %vm2168_vm5, %v6141_v20  ;;  %v6158_v27 = vperm.slane %v6141_v20, 0  ;;  %v6142_v11 = vmul.f32 0.5, %v6141_v20 }
0x16b2   :  { %6159 = vrot.lane.b32.xlu2 %v6158_v27, %s11958_s13  ;;  %v6143_v28 = vmul.f32 1.442695, %v6142_v11  ;;  %v9360_v27 = vld [vmem:[%s11949_s7 + $0xf8] sm:$0xff]  ;;  %v9357_v11 = vld [vmem:[%s11949_s7 + $0xe0] sm:$0xff] }
0x16b4   :  { %9587 = vpow2.f32 %v6143_v28  ;;  %v9358_v28 = vld [vmem:[%s11949_s7 + $0xe8] sm:$0xff] }
0x16ba   :  { %v9588_v1 = vpop.eup %9587 }
0x16bb   :  { %v6150_v0 = vmul.f32 %v9588_v1, %v6148_v29  ;;  %v9355_v29 = vld [vmem:[%s11949_s7 + $0xd0] sm:$0xff]  ;;  %v9356_v1 = vld [vmem:[%s11949_s7 + $0xd8] sm:$0xff] }
0x16bd   :  { %6152 = vrot.lane.b32.xlu1 %v6150_v0, %s11958_s13  ;;  %v9353_v0 = vld [vmem:[%s11949_s7 + $0xc0] sm:$0xff] }
0x170c   :  { %v6160_v5 = vpop.permute.xlu2 %6159 }
0x170d   :  { %6162 = vst.msk [vmem:[#allocation8 + $0x1] sm:$0x1] %vm2168_vm5, %v6160_v5  ;;  %v9354_v5 = vld [vmem:[%s11949_s7 + $0xc8] sm:$0xff] }
0x172f   :  { %v6153_v22 = vpop.permute.xlu1 %6152 }
0x1730   :  { %v6155_v19 = vadd.f32 %v6153_v22, %v6141_v20  ;;  %v9359_v20 = vld [vmem:[%s11949_s7 + $0xf0] sm:$0xff]  ;;  %v9369_v22 = vld [vmem:[%s11949_s7 + $0x118] sm:$0xff] }
0x1732   :  { %9306 = vmatmul.msk.f32.vlgmr.msrb.gmra.mxu0 %vm2178_vm7, %v6155_v19  ;;  %9310 = vmatmul.msk.f32.vlgmr.msra.gmra.mxu1 %vm2178_vm7, %v6155_v19  ;;  %v9367_v19 = vld [vmem:[%s11949_s7 + $0x108] sm:$0xff] }
0x1733   :  { %6409 = vmatpush.msrb.mxu0 %v9331_v8  ;;  %6429 = vmatpush.msra.mxu1 %v9332_v30  ;;  %v9380_v8 = vld [vmem:[%s11949_s7 + $0x148] sm:$0xff] }
0x1735   :  { %6410 = vmatpush.msrb.mxu0 %v9329_v9  ;;  %6430 = vmatpush.msra.mxu1 %v9330_v63  ;;  %v9379_v9 = vld [vmem:[%s11949_s7 + $0x140] sm:$0xff] }
0x1737   :  { %6411 = vmatpush.msrb.mxu0 %v9327_v58  ;;  %6431 = vmatpush.msra.mxu1 %v9328_v46 }
0x1739   :  { %6412 = vmatpush.msrb.mxu0 %v9325_v45  ;;  %6432 = vmatpush.msra.mxu1 %v9326_v4  ;;  %v9406_v4 = vld [vmem:[%s11949_s7 + $0x1c8] sm:$0xff] }
0x17af   :  { %v6188_v15 = vpop.f32.mrf.mxu0  ;;  %v6213_v23 = vpop.f32.mrf.mxu1 }
0x17b0   :  { %v6214_v35 = vadd.f32 %v9308_v33, %v6213_v23  ;;  %v6189_v36 = vadd.f32 %v6188_v15, %v6164_v34  ;;  %v9363_v15 = vld [vmem:[%s11951_s11 + $0x20] sm:$0xff]  ;;  %v9376_v23 = vld [vmem:[%s11951_s11 + $0x28] sm:$0xff] }
0x17b2   :  { %v6217_v38 = vrot.slane %v6214_v35, 7  ;;  %v9372_v35 = vld [vmem:[%s11949_s7 + $0x130] sm:$0xff] }
0x17b4   :  { %v6219_v42 = vsel %vm2236_vm8, %v6189_v36, %v6217_v38  ;;  %v9370_v36 = vld [vmem:[%s11949_s7 + $0x120] sm:$0xff]  ;;  %v9368_v38 = vld [vmem:[%s11949_s7 + $0x110] sm:$0xff] }
0x17b5   :  { %9311 = vmatpush.msk.msra.mxu2 %vm1990_vm3, %v6219_v42  ;;  %9314 = vmatpush.msk.msrb.mxu3 %vm1990_vm3, %v6219_v42  ;;  %v9385_v42 = vld [vmem:[%s11949_s7 + $0x170] sm:$0xff] }
0x17b6   :  { %9312 = vmatmul.msk.f32.vlgmr.msra.gmra.mxu2 %vm1986_vm4, %v6220_v37  ;;  %9315 = vmatmul.msk.f32.vlgmr.msrb.gmra.mxu3 %vm1986_vm4, %v9313_v41  ;;  %v9366_v37 = vld [vmem:[%s11949_s7 + $0x100] sm:$0xff]  ;;  %v9386_v41 = vld [vmem:[%s11949_s7 + $0x178] sm:$0xff] }
0x1839   :  { %v6244_v59 = vpop.f32.mrf.mxu2  ;;  %v6270_v43 = vpop.f32.mrf.mxu3 }
0x183a   :  { %9318 = vmatmul.msk.f32.vlgmr.msra.gmra.mxu0 %vm450_vm1, %v6270_v43  ;;  %9319 = vmatmul.msk.f32.vlgmr.msrb.gmra.mxu1 %vm450_vm1, %v6244_v59  ;;  %v9382_v59 = vld [vmem:[%s11949_s7 + $0x158] sm:$0xff]  ;;  %v9381_v43 = vld [vmem:[%s11949_s7 + $0x150] sm:$0xff] }
0x183b   :  { %6527 = vmatpush.msrb.mxu1 %v9346_v40 }
0x183d   :  { %6528 = vmatpush.msrb.mxu1 %v9344_v18 }
0x183f   :  { %6529 = vmatpush.msrb.mxu1 %v9342_v21 }
0x1841   :  { %6530 = vmatpush.msrb.mxu1 %v9340_v26 }
0x18b7   :  { %v6295_v10 = vpop.f32.mrf.mxu0  ;;  %v6318_v12 = vpop.f32.mrf.mxu1 }
0x18b8   :  { %v6319_v16 = vadd.f32 %v6318_v12, %v6295_v10  ;;  %v9389_v12 = vld [vmem:[%s11951_s11 + $0x30] sm:$0xff] }
0x18ba   :  { %v6325_v48 = vadd.f32 %v9575_v61, %v6319_v16  ;;  %v9402_v16 = vld [vmem:[%s11951_s11 + $0x38] sm:$0xff] }
0x18bc   :  { %v11582_v13 = vmax.f32 %v6325_v48, 0.0  ;;  %v9398_v48 = vld [vmem:[%s11949_s7 + $0x1b0] sm:$0xff] }
0x18be   :  { %9320 = vmatpush.msk.msrb.mxu2 %vm1990_vm3, %v11582_v13  ;;  %9323 = vmatpush.msk.msra.mxu3 %vm1990_vm3, %v11582_v13 }
0x18bf   :  { %9338 = vmatpush.msk.msra.mxu0 %vm1990_vm3, %v11582_v13  ;;  %9321 = vmatmul.msk.f32.vlgmr.msrb.gmra.mxu2 %vm1986_vm4, %v6327_v53  ;;  %v9399_v53 = vld [vmem:[%s11949_s7 + $0x1b8] sm:$0xff] }
0x18c0   :  { %9324 = vmatmul.msk.f32.vlgmr.msra.gmra.mxu3 %vm1986_vm4, %v9322_v7  ;;  %6452 = vmatpush.msra.mxu2 %v6360_v49  ;;  %v9397_v7 = vld [vmem:[%s11949_s7 + $0x1a8] sm:$0xff]  ;;  %v9394_v49 = vld [vmem:[%s11949_s7 + $0x190] sm:$0xff] }
0x18c1   :  { %6472 = vmatpush.msrb.mxu3 %v6361_v50  ;;  %v9395_v50 = vld [vmem:[%s11949_s7 + $0x198] sm:$0xff] }
0x18c2   :  { %6453 = vmatpush.msra.mxu2 %v6358_v51  ;;  %v9392_v51 = vld [vmem:[%s11949_s7 + $0x180] sm:$0xff] }
0x18c3   :  { %6473 = vmatpush.msrb.mxu3 %v6359_v54  ;;  %v9393_v54 = vld [vmem:[%s11949_s7 + $0x188] sm:$0xff] }
0x18c4   :  { %6454 = vmatpush.msra.mxu2 %v6356_v47  ;;  %v9411_v47 = vld [vmem:[%s11949_s7 + $0x1f0] sm:$0xff] }
0x18c5   :  { %6474 = vmatpush.msrb.mxu3 %v6357_v56  ;;  %v9412_v56 = vld [vmem:[%s11949_s7 + $0x1f8] sm:$0xff] }
0x18c6   :  { %6455 = vmatpush.msra.mxu2 %v6354_v57  ;;  %v9409_v57 = vld [vmem:[%s11949_s7 + $0x1e0] sm:$0xff] }
0x18c7   :  { %6475 = vmatpush.msrb.mxu3 %v6355_v55  ;;  %v9410_v55 = vld [vmem:[%s11949_s7 + $0x1e8] sm:$0xff] }
0x18c8   :  { %6547 = vmatpush.msrb.mxu2 %v9347_v60  ;;  %v9407_v60 = vld [vmem:[%s11949_s7 + $0x1d0] sm:$0xff] }
0x18c9   :  { %9351 = vmatpush.msk.msra.mxu3 %vm1990_vm3, %v11582_v13 }
0x18ca   :  { %6548 = vmatpush.msrb.mxu2 %v9345_v2  ;;  %v9408_v2 = vld [vmem:[%s11949_s7 + $0x1d8] sm:$0xff] }
0x18cc   :  { %6549 = vmatpush.msrb.mxu2 %v9343_v3  ;;  %v9405_v3 = vld [vmem:[%s11949_s7 + $0x1c0] sm:$0xff] }
0x18ce   :  { %6550 = vmatpush.msrb.mxu2 %v9341_v6 }
0x1942   :  { %v6351_v24 = vpop.f32.mrf.mxu2 }
0x1943   :  { %v6383_v62 = vpop.f32.mrf.mxu3  ;;  %9335 = vmatmul.msk.f32.vlgmr.msra.gmra.mxu2 %vm155_vm0, %v6351_v24  ;;  %9336 = vmatmul.msk.f32.vlgmr.msrb.gmra.mxu3 %vm155_vm0, %v6351_v24 }
0x1944   :  { %9333 = vmatmul.msk.f32.vlgmr.msrb.gmra.mxu0 %vm155_vm0, %v6383_v62  ;;  %9334 = vmatmul.msk.f32.vlgmr.msra.gmra.mxu1 %vm155_vm0, %v6383_v62 }
0x1945   :  { %9364 = vmatpush.msk.msra.mxu2 %vm1990_vm3, %v11582_v13  ;;  %6604 = vmatpush.msrb.mxu0 %v9359_v20 }
0x1946   :  { %6624 = vmatpush.msra.mxu1 %v9360_v27  ;;  %6681 = vmatpush.msrb.mxu3 %v9372_v35 }
0x1947   :  { %6605 = vmatpush.msrb.mxu0 %v9357_v11 }
0x1948   :  { %6625 = vmatpush.msra.mxu1 %v9358_v28  ;;  %6682 = vmatpush.msrb.mxu3 %v9370_v36 }
0x1949   :  { %6606 = vmatpush.msrb.mxu0 %v9355_v29 }
0x194a   :  { %6626 = vmatpush.msra.mxu1 %v9356_v1  ;;  %6683 = vmatpush.msrb.mxu3 %v9368_v38 }
0x194b   :  { %9352 = vmatmul.msk.f32.vlgmr.msra.gmra.mxu3 %vm1986_vm4, %v9350_v17  ;;  %6607 = vmatpush.msrb.mxu0 %v9353_v0 }
0x194c   :  { %9339 = vmatmul.msk.f32.vlgmr.msra.gmra.mxu0 %vm1986_vm4, %v9337_v25  ;;  %6627 = vmatpush.msra.mxu1 %v9354_v5 }
0x194d   :  { %6701 = vmatpush.msra.mxu0 %v9373_v44  ;;  %6684 = vmatpush.msrb.mxu3 %v9366_v37 }
0x194f   :  { %6702 = vmatpush.msra.mxu0 %v9371_v14  ;;  %6778 = vmatpush.msra.mxu3 %v9386_v41  ;;  %v6942_v14 = vld [vmem:[%s11952_s0] sm:$0x3] }
0x1951   :  { %6703 = vmatpush.msra.mxu0 %v9369_v22  ;;  %6779 = vmatpush.msra.mxu3 %v9384_v39  ;;  %v6952_v39 = vld [vmem:[%s11953_s15] sm:$0xff] }
0x1953   :  { %6704 = vmatpush.msra.mxu0 %v9367_v19  ;;  %6780 = vmatpush.msra.mxu3 %v9382_v59  ;;  %v7186_v59 = vld [vmem:[#allocation2 + $0x3f0] sm:$0xff] }
0x1955   :  { %6781 = vmatpush.msra.mxu3 %v9380_v8  ;;  %v7187_v8 = vld [vmem:[#allocation2 + $0x3f8] sm:$0xff] }
0x19c1   :  { %v11635_v31 = vpop.f32.mrf.mxu0  ;;  %v6434_v58 = vpop.f32.mrf.mxu1 }
0x19c6   :  { %v11637_v32 = vpop.f32.mrf.mxu3  ;;  %v6457_v45 = vpop.f32.mrf.mxu2 }
0x19c7   :  { %v6478_v40 = vadd.f32 %v11637_v32, %v6434_v58  ;;  %v6458_v11 = vadd.f32 %v6457_v45, %v11635_v31  ;;  %v7184_v58 = vld [vmem:[#allocation2 + $0x3e0] sm:$0xff]  ;;  %v7153_v45 = vld [vmem:[#allocation2 + $0x2e8] sm:$0xff] }
0x19c9   :  { %v6501_v33 = vpop.f32.mrf.mxu0 }
0x19ca   :  { %9348 = vmatmul.msk.f32.vlgmr.msrb.gmra.mxu1 %vm155_vm0, %v6501_v33  ;;  %9349 = vmatmul.msk.f32.vlgmr.msrb.gmra.mxu2 %vm155_vm0, %v6501_v33  ;;  %v6944_v33 = vperm.slane %v6942_v14, 0 }
0x19cb   :  { %9377 = vmatpush.msk.msrb.mxu1 %vm1990_vm3, %v11582_v13  ;;  %6758 = vmatpush.msrb.mxu2 %v9385_v42  ;;  %v9419_v42 = vld [vmem:[%s11953_s15 + $0x10] sm:$0xff] }
0x19cd   :  { %6759 = vmatpush.msrb.mxu2 %v9383_v52  ;;  %v7154_v52 = vld [vmem:[#allocation2 + $0x2f0] sm:$0xff] }
0x19ce   :  { %v6578_v34 = vpop.f32.mrf.mxu3 }
0x19cf   :  { %9361 = vmatmul.msk.f32.vlgmr.msrb.gmra.mxu0 %vm155_vm0, %v6578_v34  ;;  %6760 = vmatpush.msrb.mxu2 %v9381_v43  ;;  %v7155_v43 = vld [vmem:[#allocation2 + $0x2f8] sm:$0xff] }
0x19d0   :  { %9390 = vmatpush.msk.msrb.mxu0 %vm1990_vm3, %v11582_v13 }
0x19d1   :  { %6761 = vmatpush.msrb.mxu2 %v9379_v9  ;;  %v7152_v9 = vld [vmem:[#allocation2 + $0x2e0] sm:$0xff] }
0x19d2   :  { %9362 = vmatmul.msk.f32.vlgmr.msra.gmra.mxu1 %vm155_vm0, %v6578_v34  ;;  %9365 = vmatmul.msk.f32.vlgmr.msra.gmra.mxu2 %vm1986_vm4, %v9363_v15  ;;  %v6945_v34 = vperm.slane %v6942_v14, 1  ;;  %v7133_v14 = vld [vmem:[#allocation2 + $0x248] sm:$0xff] }
0x19d3   :  { %6835 = vmatpush.msra.mxu1 %v9398_v48  ;;  %6855 = vmatpush.msra.mxu2 %v9399_v53  ;;  %v7148_v48 = vld [vmem:[#allocation2 + $0x2c0] sm:$0xff] }
0x19d4   :  { %v7180_v53 = vld [vmem:[#allocation2 + $0x3c0] sm:$0xff] }
0x19d5   :  { %6856 = vmatpush.msra.mxu2 %v9397_v7  ;;  %v7181_v7 = vld [vmem:[#allocation2 + $0x3c8] sm:$0xff] }
0x19d7   :  { %6857 = vmatpush.msra.mxu2 %v9395_v50  ;;  %v7178_v50 = vld [vmem:[#allocation2 + $0x3b0] sm:$0xff] }
0x19d9   :  { %6858 = vmatpush.msra.mxu2 %v9393_v54  ;;  %v7179_v54 = vld [vmem:[#allocation2 + $0x3b8] sm:$0xff] }
0x19da   :  { %9378 = vmatmul.msk.f32.vlgmr.msrb.gmra.mxu1 %vm1986_vm4, %v9376_v23 }
0x1a47   :  { %v11663_v30 = vpop.f32.mrf.mxu1 }
0x1a48   :  { %v6555_v29 = vadd.f32 %v11663_v30, %v6458_v11  ;;  %v7185_v30 = vld [vmem:[#allocation2 + $0x3e8] sm:$0xff] }
0x1a49   :  { %v7169_v11 = vld [vmem:[#allocation2 + $0x368] sm:$0xff] }
0x1a4c   :  { %v6609_v6 = vpop.f32.mrf.mxu0 }
0x1a4d   :  { %v6552_v63 = vpop.f32.mrf.mxu2  ;;  %v6632_v1 = vadd.f32 %v6609_v6, %v6555_v29  ;;  %v7140_v6 = vld [vmem:[#allocation2 + $0x280] sm:$0xff]  ;;  %v7166_v29 = vld [vmem:[#allocation2 + $0x350] sm:$0xff] }
0x1a4e   :  { %v6556_v18 = vadd.f32 %v6552_v63, %v6478_v40  ;;  %v7150_v63 = vld [vmem:[#allocation2 + $0x2d0] sm:$0xff]  ;;  %v7172_v40 = vld [vmem:[#allocation2 + $0x380] sm:$0xff] }
0x1a4f   :  { %v6629_v46 = vpop.f32.mrf.mxu1 }
0x1a50   :  { %v6633_v21 = vadd.f32 %v6629_v46, %v6556_v18  ;;  %v7182_v46 = vld [vmem:[#allocation2 + $0x3d0] sm:$0xff]  ;;  %v7141_v18 = vld [vmem:[#allocation2 + $0x288] sm:$0xff] }
0x1a55   :  { %v6655_v61 = vpop.f32.mrf.mxu2 }
0x1a56   :  { %9374 = vmatmul.msk.f32.vlgmr.msrb.gmra.mxu3 %vm155_vm0, %v6655_v61  ;;  %9375 = vmatmul.msk.f32.vlgmr.msra.gmra.mxu0 %vm155_vm0, %v6655_v61  ;;  %v7151_v61 = vld [vmem:[#allocation2 + $0x2d8] sm:$0xff] }
0x1a57   :  { %9403 = vmatpush.msk.msrb.mxu3 %vm1990_vm3, %v11582_v13  ;;  %v6732_v10 = vpop.f32.mrf.mxu1  ;;  %v9396_v13 = vld [vmem:[%s11949_s7 + $0x1a0] sm:$0xff]  ;;  %6912 = vmatpush.msra.mxu0 %v9411_v47 }
0x1a58   :  { %9387 = vmatmul.msk.f32.vlgmr.msrb.gmra.mxu2 %vm155_vm0, %v6732_v10  ;;  %6836 = vmatpush.msra.mxu1 %v9396_v13  ;;  %v7149_v13 = vld [vmem:[#allocation2 + $0x2c8] sm:$0xff]  ;;  %v7144_v47 = vld [vmem:[#allocation2 + $0x2a0] sm:$0xff] }
0x1a59   :  { %6913 = vmatpush.msra.mxu0 %v9409_v57  ;;  %v7145_v57 = vld [vmem:[#allocation2 + $0x2a8] sm:$0xff] }
0x1a5a   :  { %6837 = vmatpush.msra.mxu1 %v9394_v49  ;;  %v7146_v49 = vld [vmem:[#allocation2 + $0x2b0] sm:$0xff] }
0x1a5b   :  { %6914 = vmatpush.msra.mxu0 %v9407_v60  ;;  %v7142_v60 = vld [vmem:[#allocation2 + $0x290] sm:$0xff] }
0x1a5c   :  { %6838 = vmatpush.msra.mxu1 %v9392_v51  ;;  %v7147_v51 = vld [vmem:[#allocation2 + $0x2b8] sm:$0xff] }
0x1a5d   :  { %6915 = vmatpush.msra.mxu0 %v9405_v3  ;;  %v7143_v3 = vld [vmem:[#allocation2 + $0x298] sm:$0xff] }
0x1a5e   :  { %9388 = vmatmul.msk.f32.vlgmr.msra.gmra.mxu3 %vm155_vm0, %v6732_v10  ;;  %9391 = vmatmul.msk.f32.vlgmr.msrb.gmra.mxu0 %vm1986_vm4, %v9389_v12  ;;  %v7183_v10 = vld [vmem:[#allocation2 + $0x3d8] sm:$0xff] }
0x1a5f   :  { %6932 = vmatpush.msrb.mxu1 %v9412_v56  ;;  %v9420_v12 = vld [vmem:[%s11953_s15 + $0x18] sm:$0xff]  ;;  %v7176_v56 = vld [vmem:[#allocation2 + $0x3a0] sm:$0xff] }
0x1a61   :  { %6933 = vmatpush.msrb.mxu1 %v9410_v55  ;;  %v7177_v55 = vld [vmem:[#allocation2 + $0x3a8] sm:$0xff] }
0x1a63   :  { %6934 = vmatpush.msrb.mxu1 %v9408_v2  ;;  %v7174_v2 = vld [vmem:[#allocation2 + $0x390] sm:$0xff] }
0x1a65   :  { %6935 = vmatpush.msrb.mxu1 %v9406_v4  ;;  %v7175_v4 = vld [vmem:[#allocation2 + $0x398] sm:$0xff] }
0x1a66   :  { %9404 = vmatmul.msk.f32.vlgmr.msrb.gmra.mxu3 %vm1986_vm4, %v9402_v16  ;;  %v6953_v16 = vld [vmem:[%s11953_s15 + $0x8] sm:$0xff] }
0x1ad3   :  { %v6706_v24 = vpop.f32.mrf.mxu0 }
0x1ad4   :  { %v6710_v62 = vadd.f32 %v6706_v24, %v6633_v21  ;;  %v7173_v21 = vld [vmem:[#allocation2 + $0x388] sm:$0xff]  ;;  %v7138_v24 = vld [vmem:[#allocation2 + $0x270] sm:$0xff] }
0x1ad9   :  { %v6686_v17 = vpop.f32.mrf.mxu3 }
0x1ada   :  { %v6709_v5 = vadd.f32 %v6686_v17, %v6632_v1  ;;  %v7139_v17 = vld [vmem:[#allocation2 + $0x278] sm:$0xff] }
0x1adb   :  { %v6809_v25 = vpop.f32.mrf.mxu0  ;;  %v6763_v28 = vpop.f32.mrf.mxu2  ;;  %v7135_v1 = vld [vmem:[#allocation2 + $0x258] sm:$0xff] }
0x1adc   :  { %9400 = vmatmul.msk.f32.vlgmr.msra.gmra.mxu1 %vm155_vm0, %v6809_v25  ;;  %9401 = vmatmul.msk.f32.vlgmr.msra.gmra.mxu2 %vm155_vm0, %v6809_v25  ;;  %v6786_v22 = vadd.f32 %v6763_v28, %v6709_v5  ;;  %v7171_v25 = vld [vmem:[#allocation2 + $0x378] sm:$0xff]  ;;  %v7134_v28 = vld [vmem:[#allocation2 + $0x250] sm:$0xff]  ;;  %v7132_v5 = vld [vmem:[#allocation2 + $0x240] sm:$0xff] }
0x1ae1   :  { %v6783_v26 = vpop.f32.mrf.mxu3 }
0x1ae2   :  { %v6787_v20 = vadd.f32 %v6783_v26, %v6710_v62  ;;  %v7170_v62 = vld [vmem:[#allocation2 + $0x370] sm:$0xff]  ;;  %v7136_v26 = vld [vmem:[#allocation2 + $0x260] sm:$0xff] }
0x1ae9   :  { %v6886_v27 = vpop.f32.mrf.mxu3 }
0x1aea   :  { %9413 = vmatmul.msk.f32.vlgmr.msra.gmra.mxu0 %vm155_vm0, %v6886_v27  ;;  %9414 = vmatmul.msk.f32.vlgmr.msrb.gmra.mxu1 %vm155_vm0, %v6886_v27  ;;  %v7137_v27 = vld [vmem:[#allocation2 + $0x268] sm:$0xff] }
0x1b59   :  { %v6840_v0 = vpop.f32.mrf.mxu1 }
0x1b5a   :  { %v6863_v19 = vadd.f32 %v6840_v0, %v6786_v22  ;;  %v7167_v0 = vld [vmem:[#allocation2 + $0x358] sm:$0xff]  ;;  %v7165_v22 = vld [vmem:[#allocation2 + $0x348] sm:$0xff] }
0x1b5f   :  { %v6860_v44 = vpop.f32.mrf.mxu2 }
0x1b60   :  { %v6864_v32 = vadd.f32 %v6860_v44, %v6787_v20  ;;  %v7168_v20 = vld [vmem:[#allocation2 + $0x360] sm:$0xff] }
0x1b61   :  { %v7164_v44 = vld [vmem:[#allocation2 + $0x340] sm:$0xff] }
0x1b67   :  { %v6917_v15 = vpop.f32.mrf.mxu0  ;;  %v6937_v23 = vpop.f32.mrf.mxu1 }
0x1b68   :  { %v6940_v35 = vadd.f32 %v6917_v15, %v6863_v19  ;;  %v6941_v36 = vadd.f32 %v6937_v23, %v6864_v32  ;;  %v7130_v19 = vld [vmem:[#allocation2 + $0x230] sm:$0xff]  ;;  %v7128_v15 = vld [vmem:[#allocation2 + $0x220] sm:$0xff] }
0x1b69   :  { %v7162_v32 = vld [vmem:[#allocation2 + $0x330] sm:$0xff]  ;;  %v7160_v23 = vld [vmem:[#allocation2 + $0x320] sm:$0xff] }
0x1b6a   :  { %v6948_v31 = vadd.f32 %v6944_v33, %v6940_v35  ;;  %v6949_v38 = vadd.f32 %v6945_v34, %v6941_v36  ;;  %v7131_v33 = vld [vmem:[#allocation2 + $0x238] sm:$0xff]  ;;  %v7129_v35 = vld [vmem:[#allocation2 + $0x228] sm:$0xff] }
0x1b6b   :  { %v7163_v34 = vld [vmem:[#allocation2 + $0x338] sm:$0xff]  ;;  %v7161_v36 = vld [vmem:[#allocation2 + $0x328] sm:$0xff] }
0x1b6c   :  { %v11699_v37 = vmax.f32 %v6948_v31, 0.0  ;;  %v11701_v41 = vmax.f32 %v6949_v38, 0.0  ;;  %v7126_v31 = vld [vmem:[#allocation2 + $0x210] sm:$0xff] }
0x1b6d   :  { %v7158_v38 = vld [vmem:[#allocation2 + $0x310] sm:$0xff] }
0x1b6e   :  { %6975 = vmatpush.msrb.mxu2 %v11699_v37  ;;  %6998 = vmatpush.msra.mxu3 %v11701_v41 }
0x1b6f   :  { %7093 = vmatpush.msrb.mxu0 %v11699_v37  ;;  %7116 = vmatpush.msra.mxu1 %v11701_v41 }
0x1b70   :  { %9421 = vmatmul.msk.f32.vlgmr.msrb.gmra.mxu0 %vm1031_vm2, %v9419_v42  ;;  %9423 = vmatmul.msk.f32.vlgmr.msra.gmra.mxu1 %vm1031_vm2, %v9419_v42  ;;  %v7127_v42 = vld [vmem:[#allocation2 + $0x218] sm:$0xff] }
0x1b71   :  { %9415 = vmatmul.msk.f32.vlgmr.msrb.gmra.mxu2 %vm1031_vm2, %v6952_v39  ;;  %9417 = vmatmul.msk.f32.vlgmr.msra.gmra.mxu3 %vm1031_vm2, %v6952_v39  ;;  %v7159_v39 = vld [vmem:[#allocation2 + $0x318] sm:$0xff] }
0x1b72   :  { %7188 = vmatpush.msra.mxu2 %v7154_v52  ;;  %7211 = vmatpush.msrb.mxu3 %v7186_v59  ;;  %v7124_v52 = vld [vmem:[#allocation2 + $0x200] sm:$0xff] }
0x1b73   :  { %7234 = vmatpush.msra.mxu0 %v7155_v43  ;;  %7257 = vmatpush.msrb.mxu1 %v7187_v8  ;;  %v7156_v59 = vld [vmem:[#allocation2 + $0x300] sm:$0xff]  ;;  %v7036_v43 = vld [vmem:[#allocation2 + $0xf0] sm:$0xff] }
0x1b74   :  { %7189 = vmatpush.msra.mxu2 %v7152_v9  ;;  %7212 = vmatpush.msrb.mxu3 %v7184_v58  ;;  %v7068_v8 = vld [vmem:[#allocation2 + $0x1f0] sm:$0xff]  ;;  %v7125_v9 = vld [vmem:[#allocation2 + $0x208] sm:$0xff] }
0x1b75   :  { %7235 = vmatpush.msra.mxu0 %v7153_v45  ;;  %7258 = vmatpush.msrb.mxu1 %v7185_v30  ;;  %v7157_v58 = vld [vmem:[#allocation2 + $0x308] sm:$0xff]  ;;  %v7034_v45 = vld [vmem:[#allocation2 + $0xe0] sm:$0xff] }
0x1b76   :  { %7190 = vmatpush.msra.mxu2 %v7150_v63  ;;  %7213 = vmatpush.msrb.mxu3 %v7182_v46  ;;  %v7066_v30 = vld [vmem:[#allocation2 + $0x1e0] sm:$0xff]  ;;  %v7037_v63 = vld [vmem:[#allocation2 + $0xf8] sm:$0xff] }
0x1b77   :  { %7236 = vmatpush.msra.mxu0 %v7151_v61  ;;  %7259 = vmatpush.msrb.mxu1 %v7183_v10  ;;  %v7069_v46 = vld [vmem:[#allocation2 + $0x1f8] sm:$0xff]  ;;  %v7032_v61 = vld [vmem:[#allocation2 + $0xd0] sm:$0xff] }
0x1b78   :  { %9422 = vmatmul.msk.f32.gmra.mxu0 %vm1031_vm2, %v9420_v12  ;;  %9424 = vmatmul.msk.f32.gmra.mxu1 %vm1031_vm2, %v9420_v12  ;;  %v7064_v10 = vld [vmem:[#allocation2 + $0x1d0] sm:$0xff]  ;;  %v7035_v12 = vld [vmem:[#allocation2 + $0xe8] sm:$0xff] }
0x1b79   :  { %9416 = vmatmul.msk.f32.gmra.mxu2 %vm1031_vm2, %v6953_v16  ;;  %9418 = vmatmul.msk.f32.gmra.mxu3 %vm1031_vm2, %v6953_v16  ;;  %v7067_v16 = vld [vmem:[#allocation2 + $0x1e8] sm:$0xff] }
0x1b7a   :  { %7191 = vmatpush.msra.mxu2 %v7148_v48  ;;  %7214 = vmatpush.msrb.mxu3 %v7180_v53  ;;  %v7030_v48 = vld [vmem:[#allocation2 + $0xc0] sm:$0xff] }
0x1b7b   :  { %7237 = vmatpush.msra.mxu0 %v7149_v13  ;;  %7260 = vmatpush.msrb.mxu1 %v7181_v7  ;;  %v7062_v53 = vld [vmem:[#allocation2 + $0x1c0] sm:$0xff]  ;;  %v7033_v13 = vld [vmem:[#allocation2 + $0xd8] sm:$0xff] }
0x1b7c   :  { %7192 = vmatpush.msra.mxu2 %v7146_v49  ;;  %7215 = vmatpush.msrb.mxu3 %v7178_v50  ;;  %v7065_v7 = vld [vmem:[#allocation2 + $0x1d8] sm:$0xff]  ;;  %v7028_v49 = vld [vmem:[#allocation2 + $0xb0] sm:$0xff] }
0x1b7d   :  { %7238 = vmatpush.msra.mxu0 %v7147_v51  ;;  %7261 = vmatpush.msrb.mxu1 %v7179_v54  ;;  %v7060_v50 = vld [vmem:[#allocation2 + $0x1b0] sm:$0xff]  ;;  %v7031_v51 = vld [vmem:[#allocation2 + $0xc8] sm:$0xff] }
0x1b7e   :  { %7193 = vmatpush.msra.mxu2 %v7144_v47  ;;  %7216 = vmatpush.msrb.mxu3 %v7176_v56  ;;  %v7063_v54 = vld [vmem:[#allocation2 + $0x1c8] sm:$0xff]  ;;  %v7026_v47 = vld [vmem:[#allocation2 + $0xa0] sm:$0xff] }
0x1b7f   :  { %7239 = vmatpush.msra.mxu0 %v7145_v57  ;;  %7262 = vmatpush.msrb.mxu1 %v7177_v55  ;;  %v7058_v56 = vld [vmem:[#allocation2 + $0x1a0] sm:$0xff]  ;;  %v7029_v57 = vld [vmem:[#allocation2 + $0xb8] sm:$0xff] }
0x1b80   :  { %7194 = vmatpush.msra.mxu2 %v7142_v60  ;;  %7217 = vmatpush.msrb.mxu3 %v7174_v2  ;;  %v7061_v55 = vld [vmem:[#allocation2 + $0x1b8] sm:$0xff]  ;;  %v7024_v60 = vld [vmem:[#allocation2 + $0x90] sm:$0xff] }
0x1b81   :  { %7240 = vmatpush.msra.mxu0 %v7143_v3  ;;  %7263 = vmatpush.msrb.mxu1 %v7175_v4  ;;  %v7056_v2 = vld [vmem:[#allocation2 + $0x190] sm:$0xff]  ;;  %v7027_v3 = vld [vmem:[#allocation2 + $0xa8] sm:$0xff] }
0x1b82   :  { %7195 = vmatpush.msra.mxu2 %v7140_v6  ;;  %7218 = vmatpush.msrb.mxu3 %v7172_v40  ;;  %v7059_v4 = vld [vmem:[#allocation2 + $0x1a8] sm:$0xff]  ;;  %v7022_v6 = vld [vmem:[#allocation2 + $0x80] sm:$0xff] }
0x1b83   :  { %7241 = vmatpush.msra.mxu0 %v7141_v18  ;;  %7264 = vmatpush.msrb.mxu1 %v7173_v21  ;;  %v7054_v40 = vld [vmem:[#allocation2 + $0x180] sm:$0xff]  ;;  %v7025_v18 = vld [vmem:[#allocation2 + $0x98] sm:$0xff] }
0x1b84   :  { %7196 = vmatpush.msra.mxu2 %v7138_v24  ;;  %7219 = vmatpush.msrb.mxu3 %v7170_v62  ;;  %v7057_v21 = vld [vmem:[#allocation2 + $0x198] sm:$0xff]  ;;  %v7020_v24 = vld [vmem:[#allocation2 + $0x70] sm:$0xff] }
0x1b85   :  { %7242 = vmatpush.msra.mxu0 %v7139_v17  ;;  %7265 = vmatpush.msrb.mxu1 %v7171_v25  ;;  %v7052_v62 = vld [vmem:[#allocation2 + $0x170] sm:$0xff]  ;;  %v7018_v17 = vld [vmem:[#allocation2 + $0x60] sm:$0xff] }
0x1b86   :  { %7197 = vmatpush.msra.mxu2 %v7136_v26  ;;  %7220 = vmatpush.msrb.mxu3 %v7168_v20  ;;  %v7050_v25 = vld [vmem:[#allocation2 + $0x160] sm:$0xff]  ;;  %v7016_v26 = vld [vmem:[#allocation2 + $0x50] sm:$0xff] }
0x1b87   :  { %7243 = vmatpush.msra.mxu0 %v7137_v27  ;;  %7266 = vmatpush.msrb.mxu1 %v7169_v11  ;;  %v7048_v20 = vld [vmem:[#allocation2 + $0x150] sm:$0xff]  ;;  %v7014_v27 = vld [vmem:[#allocation2 + $0x40] sm:$0xff] }
0x1b88   :  { %7198 = vmatpush.msra.mxu2 %v7134_v28  ;;  %7221 = vmatpush.msrb.mxu3 %v7166_v29  ;;  %v7046_v11 = vld [vmem:[#allocation2 + $0x140] sm:$0xff]  ;;  %v7012_v28 = vld [vmem:[#allocation2 + $0x30] sm:$0xff] }
0x1b89   :  { %7244 = vmatpush.msra.mxu0 %v7135_v1  ;;  %7267 = vmatpush.msrb.mxu1 %v7167_v0  ;;  %v7044_v29 = vld [vmem:[#allocation2 + $0x130] sm:$0xff]  ;;  %v7010_v1 = vld [vmem:[#allocation2 + $0x20] sm:$0xff] }
0x1b8a   :  { %7199 = vmatpush.msra.mxu2 %v7132_v5  ;;  %7222 = vmatpush.msrb.mxu3 %v7164_v44  ;;  %v7042_v0 = vld [vmem:[#allocation2 + $0x120] sm:$0xff]  ;;  %v7008_v5 = vld [vmem:[#allocation2 + $0x10] sm:$0xff] }
0x1b8b   :  { %7245 = vmatpush.msra.mxu0 %v7133_v14  ;;  %7268 = vmatpush.msrb.mxu1 %v7165_v22  ;;  %v7040_v44 = vld [vmem:[#allocation2 + $0x110] sm:$0xff]  ;;  %v7006_v14 = vld [vmem:[#allocation2] sm:$0xff] }
0x1b8c   :  { %7200 = vmatpush.msra.mxu2 %v7130_v19  ;;  %7223 = vmatpush.msrb.mxu3 %v7162_v32  ;;  %v7038_v22 = vld [vmem:[#allocation2 + $0x100] sm:$0xff]  ;;  %v7023_v19 = vld [vmem:[#allocation2 + $0x88] sm:$0xff] }
0x1b8d   :  { %7246 = vmatpush.msra.mxu0 %v7131_v33  ;;  %7269 = vmatpush.msrb.mxu1 %v7163_v34  ;;  %v7055_v32 = vld [vmem:[#allocation2 + $0x188] sm:$0xff]  ;;  %v7021_v33 = vld [vmem:[#allocation2 + $0x78] sm:$0xff] }
0x1b8e   :  { %7201 = vmatpush.msra.mxu2 %v7128_v15  ;;  %7224 = vmatpush.msrb.mxu3 %v7160_v23  ;;  %v7053_v34 = vld [vmem:[#allocation2 + $0x178] sm:$0xff]  ;;  %v7019_v15 = vld [vmem:[#allocation2 + $0x68] sm:$0xff] }
0x1b8f   :  { %7247 = vmatpush.msra.mxu0 %v7129_v35  ;;  %7270 = vmatpush.msrb.mxu1 %v7161_v36  ;;  %v7051_v23 = vld [vmem:[#allocation2 + $0x168] sm:$0xff]  ;;  %v7017_v35 = vld [vmem:[#allocation2 + $0x58] sm:$0xff] }
0x1b90   :  { %7202 = vmatpush.msra.mxu2 %v7126_v31  ;;  %7225 = vmatpush.msrb.mxu3 %v7158_v38  ;;  %v7049_v36 = vld [vmem:[#allocation2 + $0x158] sm:$0xff]  ;;  %v7015_v31 = vld [vmem:[#allocation2 + $0x48] sm:$0xff] }
0x1b91   :  { %7248 = vmatpush.msra.mxu0 %v7127_v42  ;;  %7271 = vmatpush.msrb.mxu1 %v7159_v39  ;;  %v7047_v38 = vld [vmem:[#allocation2 + $0x148] sm:$0xff]  ;;  %v7013_v42 = vld [vmem:[#allocation2 + $0x38] sm:$0xff] }
0x1b92   :  { %7203 = vmatpush.msra.mxu2 %v7124_v52  ;;  %7226 = vmatpush.msrb.mxu3 %v7156_v59  ;;  %v7045_v39 = vld [vmem:[#allocation2 + $0x138] sm:$0xff]  ;;  %v7011_v52 = vld [vmem:[#allocation2 + $0x28] sm:$0xff] }
0x1b93   :  { %7249 = vmatpush.msra.mxu0 %v7125_v9  ;;  %7272 = vmatpush.msrb.mxu1 %v7157_v58  ;;  %v7043_v59 = vld [vmem:[#allocation2 + $0x128] sm:$0xff] }
0x1b94   :  { %7280 = vmatpush.msrb.mxu2 %v7036_v43  ;;  %7303 = vmatpush.msra.mxu3 %v7068_v8  ;;  %v7009_v43 = vld [vmem:[#allocation2 + $0x18] sm:$0xff]  ;;  %v7007_v9 = vld [vmem:[#allocation2 + $0x8] sm:$0xff] }
0x1b95   :  { %7326 = vmatpush.msrb.mxu0 %v7037_v63  ;;  %7349 = vmatpush.msra.mxu1 %v7069_v46  ;;  %v7041_v8 = vld [vmem:[#allocation2 + $0x118] sm:$0xff]  ;;  %v7039_v58 = vld [vmem:[#allocation2 + $0x108] sm:$0xff] }
0x1b96   :  { %7281 = vmatpush.msrb.mxu2 %v7034_v45  ;;  %7304 = vmatpush.msra.mxu3 %v7066_v30 }
0x1b97   :  { %7327 = vmatpush.msrb.mxu0 %v7035_v12  ;;  %7350 = vmatpush.msra.mxu1 %v7067_v16 }
0x1b98   :  { %7282 = vmatpush.msrb.mxu2 %v7032_v61  ;;  %7305 = vmatpush.msra.mxu3 %v7064_v10 }
0x1b99   :  { %7328 = vmatpush.msrb.mxu0 %v7033_v13  ;;  %7351 = vmatpush.msra.mxu1 %v7065_v7  ;;  %v7457_v13 = vld [vmem:[#allocation2 + $0x4f8] sm:$0xff] }
0x1b9a   :  { %7283 = vmatpush.msrb.mxu2 %v7030_v48  ;;  %7306 = vmatpush.msra.mxu3 %v7062_v53  ;;  %v7456_v48 = vld [vmem:[#allocation2 + $0x4f0] sm:$0xff]  ;;  %v7489_v7 = vld [vmem:[#allocation2 + $0x5f8] sm:$0xff] }
0x1b9b   :  { %7329 = vmatpush.msrb.mxu0 %v7031_v51  ;;  %7352 = vmatpush.msra.mxu1 %v7063_v54  ;;  %v7488_v53 = vld [vmem:[#allocation2 + $0x5f0] sm:$0xff]  ;;  %v7455_v51 = vld [vmem:[#allocation2 + $0x4e8] sm:$0xff] }
0x1b9c   :  { %7284 = vmatpush.msrb.mxu2 %v7028_v49  ;;  %7307 = vmatpush.msra.mxu3 %v7060_v50  ;;  %v7454_v49 = vld [vmem:[#allocation2 + $0x4e0] sm:$0xff]  ;;  %v7487_v54 = vld [vmem:[#allocation2 + $0x5e8] sm:$0xff] }
0x1b9d   :  { %7330 = vmatpush.msrb.mxu0 %v7029_v57  ;;  %7353 = vmatpush.msra.mxu1 %v7061_v55  ;;  %v7486_v50 = vld [vmem:[#allocation2 + $0x5e0] sm:$0xff]  ;;  %v7453_v57 = vld [vmem:[#allocation2 + $0x4d8] sm:$0xff] }
0x1b9e   :  { %7285 = vmatpush.msrb.mxu2 %v7026_v47  ;;  %7308 = vmatpush.msra.mxu3 %v7058_v56  ;;  %v7452_v47 = vld [vmem:[#allocation2 + $0x4d0] sm:$0xff]  ;;  %v7485_v55 = vld [vmem:[#allocation2 + $0x5d8] sm:$0xff] }
0x1b9f   :  { %7331 = vmatpush.msrb.mxu0 %v7027_v3  ;;  %7354 = vmatpush.msra.mxu1 %v7059_v4  ;;  %v7484_v56 = vld [vmem:[#allocation2 + $0x5d0] sm:$0xff]  ;;  %v7451_v3 = vld [vmem:[#allocation2 + $0x4c8] sm:$0xff] }
0x1ba0   :  { %7286 = vmatpush.msrb.mxu2 %v7024_v60  ;;  %7309 = vmatpush.msra.mxu3 %v7056_v2  ;;  %v7450_v60 = vld [vmem:[#allocation2 + $0x4c0] sm:$0xff]  ;;  %v7483_v4 = vld [vmem:[#allocation2 + $0x5c8] sm:$0xff] }
0x1ba1   :  { %7332 = vmatpush.msrb.mxu0 %v7025_v18  ;;  %7355 = vmatpush.msra.mxu1 %v7057_v21  ;;  %v7482_v2 = vld [vmem:[#allocation2 + $0x5c0] sm:$0xff]  ;;  %v7449_v18 = vld [vmem:[#allocation2 + $0x4b8] sm:$0xff] }
0x1ba2   :  { %7287 = vmatpush.msrb.mxu2 %v7022_v6  ;;  %7310 = vmatpush.msra.mxu3 %v7054_v40  ;;  %v7448_v6 = vld [vmem:[#allocation2 + $0x4b0] sm:$0xff]  ;;  %v7481_v21 = vld [vmem:[#allocation2 + $0x5b8] sm:$0xff] }
0x1ba3   :  { %7333 = vmatpush.msrb.mxu0 %v7023_v19  ;;  %7356 = vmatpush.msra.mxu1 %v7055_v32  ;;  %v7480_v40 = vld [vmem:[#allocation2 + $0x5b0] sm:$0xff]  ;;  %v7438_v19 = vld [vmem:[#allocation2 + $0x460] sm:$0xff] }
0x1ba4   :  { %7288 = vmatpush.msrb.mxu2 %v7020_v24  ;;  %7311 = vmatpush.msra.mxu3 %v7052_v62  ;;  %v7446_v24 = vld [vmem:[#allocation2 + $0x4a0] sm:$0xff] }
0x1ba5   :  { %7334 = vmatpush.msrb.mxu0 %v7021_v33  ;;  %7357 = vmatpush.msra.mxu1 %v7053_v34  ;;  %v7478_v62 = vld [vmem:[#allocation2 + $0x5a0] sm:$0xff]  ;;  %v7439_v33 = vld [vmem:[#allocation2 + $0x468] sm:$0xff] }
0x1ba6   :  { %7289 = vmatpush.msrb.mxu2 %v7018_v17  ;;  %7312 = vmatpush.msra.mxu3 %v7050_v25  ;;  %v7447_v17 = vld [vmem:[#allocation2 + $0x4a8] sm:$0xff]  ;;  %v7470_v32 = vld [vmem:[#allocation2 + $0x560] sm:$0xff] }
0x1ba7   :  { %7335 = vmatpush.msrb.mxu0 %v7019_v15  ;;  %7358 = vmatpush.msra.mxu1 %v7051_v23  ;;  %v7479_v25 = vld [vmem:[#allocation2 + $0x5a8] sm:$0xff]  ;;  %v7436_v15 = vld [vmem:[#allocation2 + $0x450] sm:$0xff] }
0x1ba8   :  { %7290 = vmatpush.msrb.mxu2 %v7016_v26  ;;  %7313 = vmatpush.msra.mxu3 %v7048_v20  ;;  %v7444_v26 = vld [vmem:[#allocation2 + $0x490] sm:$0xff]  ;;  %v7471_v34 = vld [vmem:[#allocation2 + $0x568] sm:$0xff] }
0x1ba9   :  { %7336 = vmatpush.msrb.mxu0 %v7017_v35  ;;  %7359 = vmatpush.msra.mxu1 %v7049_v36  ;;  %v7476_v20 = vld [vmem:[#allocation2 + $0x590] sm:$0xff]  ;;  %v7437_v35 = vld [vmem:[#allocation2 + $0x458] sm:$0xff] }
0x1baa   :  { %7291 = vmatpush.msrb.mxu2 %v7014_v27  ;;  %7314 = vmatpush.msra.mxu3 %v7046_v11  ;;  %v7445_v27 = vld [vmem:[#allocation2 + $0x498] sm:$0xff]  ;;  %v7468_v23 = vld [vmem:[#allocation2 + $0x550] sm:$0xff] }
0x1bab   :  { %7337 = vmatpush.msrb.mxu0 %v7015_v31  ;;  %7360 = vmatpush.msra.mxu1 %v7047_v38  ;;  %v7477_v11 = vld [vmem:[#allocation2 + $0x598] sm:$0xff]  ;;  %v7434_v31 = vld [vmem:[#allocation2 + $0x440] sm:$0xff] }
0x1bac   :  { %7292 = vmatpush.msrb.mxu2 %v7012_v28  ;;  %7315 = vmatpush.msra.mxu3 %v7044_v29  ;;  %v7442_v28 = vld [vmem:[#allocation2 + $0x480] sm:$0xff]  ;;  %v7469_v36 = vld [vmem:[#allocation2 + $0x558] sm:$0xff] }
0x1bad   :  { %7338 = vmatpush.msrb.mxu0 %v7013_v42  ;;  %7361 = vmatpush.msra.mxu1 %v7045_v39  ;;  %v7474_v29 = vld [vmem:[#allocation2 + $0x580] sm:$0xff]  ;;  %v7435_v42 = vld [vmem:[#allocation2 + $0x448] sm:$0xff] }
0x1bae   :  { %7293 = vmatpush.msrb.mxu2 %v7010_v1  ;;  %7316 = vmatpush.msra.mxu3 %v7042_v0  ;;  %v7443_v1 = vld [vmem:[#allocation2 + $0x488] sm:$0xff]  ;;  %v7466_v38 = vld [vmem:[#allocation2 + $0x540] sm:$0xff] }
0x1baf   :  { %7339 = vmatpush.msrb.mxu0 %v7011_v52  ;;  %7362 = vmatpush.msra.mxu1 %v7043_v59  ;;  %v7475_v0 = vld [vmem:[#allocation2 + $0x588] sm:$0xff]  ;;  %v7432_v52 = vld [vmem:[#allocation2 + $0x430] sm:$0xff] }
0x1bb0   :  { %7294 = vmatpush.msrb.mxu2 %v7008_v5  ;;  %7317 = vmatpush.msra.mxu3 %v7040_v44  ;;  %v7440_v5 = vld [vmem:[#allocation2 + $0x470] sm:$0xff]  ;;  %v7467_v39 = vld [vmem:[#allocation2 + $0x548] sm:$0xff] }
0x1bb1   :  { %7340 = vmatpush.msrb.mxu0 %v7009_v43  ;;  %7363 = vmatpush.msra.mxu1 %v7041_v8  ;;  %v7472_v44 = vld [vmem:[#allocation2 + $0x570] sm:$0xff]  ;;  %v7433_v43 = vld [vmem:[#allocation2 + $0x438] sm:$0xff] }
0x1bb2   :  { %7295 = vmatpush.msrb.mxu2 %v7006_v14  ;;  %7318 = vmatpush.msra.mxu3 %v7038_v22  ;;  %v7441_v14 = vld [vmem:[#allocation2 + $0x478] sm:$0xff]  ;;  %v7464_v59 = vld [vmem:[#allocation2 + $0x530] sm:$0xff] }
0x1bb3   :  { %7341 = vmatpush.msrb.mxu0 %v7007_v9  ;;  %7364 = vmatpush.msra.mxu1 %v7039_v58  ;;  %v7473_v22 = vld [vmem:[#allocation2 + $0x578] sm:$0xff]  ;;  %v7430_v9 = vld [vmem:[#allocation2 + $0x420] sm:$0xff] }
0x1bb4   :  { %v7465_v8 = vld [vmem:[#allocation2 + $0x538] sm:$0xff]  ;;  %v7462_v58 = vld [vmem:[#allocation2 + $0x520] sm:$0xff] }
0x1bed   :  { %v7095_v45 = vpop.f32.mrf.mxu0  ;;  %v7118_v30 = vpop.f32.mrf.mxu1 }
0x1bee   :  { %7204 = vmatmul.f32.vlgmr.msra.gmra.mxu2 %v7095_v45  ;;  %7227 = vmatmul.f32.vlgmr.msrb.gmra.mxu3 %v7118_v30 }
0x1bef   :  { %7250 = vmatmul.f32.vlgmr.msra.gmra.mxu0 %v7095_v45  ;;  %7273 = vmatmul.f32.vlgmr.msrb.gmra.mxu1 %v7118_v30  ;;  %v7431_v45 = vld [vmem:[#allocation2 + $0x428] sm:$0xff] }
0x1bf0   :  { %7395 = vmatpush.msra.mxu2 %v11699_v37  ;;  %7418 = vmatpush.msrb.mxu3 %v11701_v41  ;;  %v9425_v37 = vld [vmem:[%s11953_s15 + $0x20] sm:$0xff]  ;;  %v9426_v41 = vld [vmem:[%s11953_s15 + $0x28] sm:$0xff] }
0x1bf1   :  { %7490 = vmatpush.msra.mxu0 %v7456_v48  ;;  %7513 = vmatpush.msrb.mxu1 %v7488_v53  ;;  %v7463_v30 = vld [vmem:[#allocation2 + $0x528] sm:$0xff] }
0x1bf2   :  { %v7427_v48 = vld [vmem:[#allocation2 + $0x408] sm:$0xff] }
0x1bf3   :  { %7491 = vmatpush.msra.mxu0 %v7454_v49  ;;  %7514 = vmatpush.msrb.mxu1 %v7486_v50 }
0x1bf4   :  { %v6977_v61 = vpop.f32.mrf.mxu2  ;;  %v7000_v10 = vpop.f32.mrf.mxu3 }
0x1bf5   :  { %v7098_v63 = vpop.f32.mrf.mxu0  ;;  %v7121_v46 = vpop.f32.mrf.mxu1  ;;  %7492 = vmatpush.msra.mxu0 %v7452_v47  ;;  %7515 = vmatpush.msrb.mxu1 %v7484_v56 }
0x1bf6   :  { %7207 = vmatmul.f32.gmra.mxu2 %v7098_v63  ;;  %7230 = vmatmul.f32.gmra.mxu3 %v7121_v46 }
0x1bf7   :  { %7253 = vmatmul.f32.gmra.mxu0 %v7098_v63  ;;  %7276 = vmatmul.f32.gmra.mxu1 %v7121_v46  ;;  %v7428_v63 = vld [vmem:[#allocation2 + $0x410] sm:$0xff] }
0x1bf8   :  { %7493 = vmatpush.msra.mxu0 %v7450_v60  ;;  %7516 = vmatpush.msrb.mxu1 %v7482_v2  ;;  %v7460_v46 = vld [vmem:[#allocation2 + $0x510] sm:$0xff] }
0x1bfa   :  { %7494 = vmatpush.msra.mxu0 %v7448_v6  ;;  %7517 = vmatpush.msrb.mxu1 %v7480_v40 }
0x1bfc   :  { %v6980_v12 = vpop.f32.mrf.mxu2  ;;  %v7003_v16 = vpop.f32.mrf.mxu3  ;;  %7495 = vmatpush.msra.mxu0 %v7446_v24  ;;  %7518 = vmatpush.msrb.mxu1 %v7478_v62 }
0x1bfe   :  { %7296 = vmatmul.f32.vlgmr.msrb.gmra.mxu2 %v6977_v61  ;;  %7319 = vmatmul.f32.vlgmr.msra.gmra.mxu3 %v7000_v10 }
0x1bff   :  { %7342 = vmatmul.f32.vlgmr.msrb.gmra.mxu0 %v6977_v61  ;;  %7365 = vmatmul.f32.vlgmr.msra.gmra.mxu1 %v7000_v10  ;;  %v7429_v61 = vld [vmem:[#allocation2 + $0x418] sm:$0xff] }
0x1c00   :  { %7536 = vmatpush.msrb.mxu2 %v7457_v13  ;;  %7559 = vmatpush.msra.mxu3 %v7489_v7  ;;  %v7461_v10 = vld [vmem:[#allocation2 + $0x518] sm:$0xff]  ;;  %v7459_v13 = vld [vmem:[#allocation2 + $0x508] sm:$0xff] }
0x1c01   :  { %7496 = vmatpush.msra.mxu0 %v7444_v26  ;;  %7519 = vmatpush.msrb.mxu1 %v7476_v20 }
0x1c02   :  { %7537 = vmatpush.msrb.mxu2 %v7455_v51  ;;  %7560 = vmatpush.msra.mxu3 %v7487_v54 }
0x1c03   :  { %7497 = vmatpush.msra.mxu0 %v7442_v28  ;;  %7520 = vmatpush.msrb.mxu1 %v7474_v29  ;;  %v7586_v29 = vld [vmem:[%s11954_s26] sm:$0x3] }
0x1c04   :  { %7538 = vmatpush.msrb.mxu2 %v7453_v57  ;;  %7561 = vmatpush.msra.mxu3 %v7485_v55 }
0x1c05   :  { %7498 = vmatpush.msra.mxu0 %v7440_v5  ;;  %7521 = vmatpush.msrb.mxu1 %v7472_v44 }
0x1c06   :  { %7299 = vmatmul.f32.gmra.mxu2 %v6980_v12  ;;  %7322 = vmatmul.f32.gmra.mxu3 %v7003_v16 }
0x1c07   :  { %7345 = vmatmul.f32.gmra.mxu0 %v6980_v12  ;;  %7368 = vmatmul.f32.gmra.mxu1 %v7003_v16 }
0x1c08   :  { %7539 = vmatpush.msrb.mxu2 %v7451_v3  ;;  %7562 = vmatpush.msra.mxu3 %v7483_v4 }
0x1c09   :  { %7499 = vmatpush.msra.mxu0 %v7438_v19  ;;  %7522 = vmatpush.msrb.mxu1 %v7470_v32  ;;  %v7588_v32 = vperm.slane %v7586_v29, 0 }
0x1c0a   :  { %7540 = vmatpush.msrb.mxu2 %v7449_v18  ;;  %7563 = vmatpush.msra.mxu3 %v7481_v21 }
0x1c0b   :  { %7500 = vmatpush.msra.mxu0 %v7436_v15  ;;  %7523 = vmatpush.msrb.mxu1 %v7468_v23 }
0x1c0c   :  { %7541 = vmatpush.msrb.mxu2 %v7447_v17  ;;  %7564 = vmatpush.msra.mxu3 %v7479_v25 }
0x1c0d   :  { %7501 = vmatpush.msra.mxu0 %v7434_v31  ;;  %7524 = vmatpush.msrb.mxu1 %v7466_v38 }
0x1c0e   :  { %9427 = vmatmul.msk.f32.vlgmr.msra.gmra.mxu2 %vm1031_vm2, %v9425_v37  ;;  %9429 = vmatmul.msk.f32.vlgmr.msrb.gmra.mxu3 %vm1031_vm2, %v9425_v37  ;;  %v7426_v37 = vld [vmem:[#allocation2 + $0x400] sm:$0xff] }
0x1c0f   :  { %7542 = vmatpush.msrb.mxu2 %v7445_v27  ;;  %7565 = vmatpush.msra.mxu3 %v7477_v11 }
0x1c10   :  { %7502 = vmatpush.msra.mxu0 %v7432_v52  ;;  %7525 = vmatpush.msrb.mxu1 %v7464_v59 }
0x1c11   :  { %7543 = vmatpush.msrb.mxu2 %v7443_v1  ;;  %7566 = vmatpush.msra.mxu3 %v7475_v0 }
0x1c12   :  { %7503 = vmatpush.msra.mxu0 %v7430_v9  ;;  %7526 = vmatpush.msrb.mxu1 %v7462_v58  ;;  %v7589_v9 = vperm.slane %v7586_v29, 1  ;;  %v9474_v29 = vld [vmem:[%s11955_s22 + $0x1b8] sm:$0xff] }
0x1c13   :  { %7544 = vmatpush.msrb.mxu2 %v7441_v14  ;;  %7567 = vmatpush.msra.mxu3 %v7473_v22 }
0x1c14   :  { %7504 = vmatpush.msra.mxu0 %v7428_v63  ;;  %7527 = vmatpush.msrb.mxu1 %v7460_v46  ;;  %v7600_v46 = vld [vmem:[%s11956_s6] sm:$0xff] }
0x1c15   :  { %7545 = vmatpush.msrb.mxu2 %v7439_v33  ;;  %7568 = vmatpush.msra.mxu3 %v7471_v34 }
0x1c16   :  { %9428 = vmatmul.msk.f32.gmra.mxu2 %vm1031_vm2, %v9426_v41  ;;  %9430 = vmatmul.msk.f32.gmra.mxu3 %vm1031_vm2, %v9426_v41  ;;  %v7458_v41 = vld [vmem:[#allocation2 + $0x500] sm:$0xff] }
0x1c17   :  { %7546 = vmatpush.msrb.mxu2 %v7437_v35  ;;  %7569 = vmatpush.msra.mxu3 %v7469_v36 }
0x1c18   :  { %7505 = vmatpush.msra.mxu0 %v7426_v37  ;;  %7528 = vmatpush.msrb.mxu1 %v7458_v41  ;;  %v9464_v37 = vld [vmem:[%s11955_s22 + $0x168] sm:$0xff] }
0x1c19   :  { %7547 = vmatpush.msrb.mxu2 %v7435_v42  ;;  %7570 = vmatpush.msra.mxu3 %v7467_v39 }
0x1c1b   :  { %7548 = vmatpush.msrb.mxu2 %v7433_v43  ;;  %7571 = vmatpush.msra.mxu3 %v7465_v8 }
0x1c1d   :  { %7549 = vmatpush.msrb.mxu2 %v7431_v45  ;;  %7572 = vmatpush.msra.mxu3 %v7463_v30  ;;  %v9466_v45 = vld [vmem:[%s11955_s22 + $0x178] sm:$0xff]  ;;  %v9439_v30 = vld [vmem:[%s11956_s6 + $0x20] sm:$0xff] }
0x1c1f   :  { %7550 = vmatpush.msrb.mxu2 %v7429_v61  ;;  %7573 = vmatpush.msra.mxu3 %v7461_v10  ;;  %v9465_v61 = vld [vmem:[%s11955_s22 + $0x170] sm:$0xff] }
0x1c21   :  { %7551 = vmatpush.msrb.mxu2 %v7427_v48  ;;  %7574 = vmatpush.msra.mxu3 %v7459_v13  ;;  %v9463_v48 = vld [vmem:[%s11955_s22 + $0x160] sm:$0xff]  ;;  %v9440_v13 = vld [vmem:[%s11956_s6 + $0x28] sm:$0xff] }
0x1c6c   :  { %v7251_v18 = vpop.f32.mrf.mxu0  ;;  %v7274_v21 = vpop.f32.mrf.mxu1 }
0x1c6d   :  { %v7275_v5 = vadd.f32 %v7274_v21, %v7251_v18  ;;  %v9477_v18 = vld [vmem:[%s11955_s22 + $0x1d0] sm:$0xff] }
0x1c6e   :  { %v7602_v21 = vld [vmem:[%s11956_s6 + $0x10] sm:$0xff] }
0x1c71   :  { %v7205_v12 = vpop.f32.mrf.mxu2  ;;  %v7228_v16 = vpop.f32.mrf.mxu3 }
0x1c72   :  { %v7229_v53 = vadd.f32 %v7228_v16, %v7205_v12 }
0x1c74   :  { %v7254_v24 = vpop.f32.mrf.mxu0  ;;  %v7277_v62 = vpop.f32.mrf.mxu1 }
0x1c75   :  { %v7278_v33 = vadd.f32 %v7277_v62, %v7254_v24  ;;  %v9457_v24 = vld [vmem:[%s11955_s22 + $0x130] sm:$0xff]  ;;  %v7687_v62 = vld [vmem:[%s11955_s22 + $0x68] sm:$0xff] }
0x1c79   :  { %v7208_v7 = vpop.f32.mrf.mxu2  ;;  %v7231_v49 = vpop.f32.mrf.mxu3 }
0x1c7a   :  { %v7232_v50 = vadd.f32 %v7231_v49, %v7208_v7  ;;  %v9462_v7 = vld [vmem:[%s11955_s22 + $0x158] sm:$0xff]  ;;  %v9481_v49 = vld [vmem:[%s11955_s22 + $0x1f0] sm:$0xff] }
0x1c7c   :  { %v7343_v17 = vpop.f32.mrf.mxu0  ;;  %v7366_v25 = vpop.f32.mrf.mxu1 }
0x1c7d   :  { %v7344_v34 = vadd.f32 %v7343_v17, %v7275_v5  ;;  %v9476_v17 = vld [vmem:[%s11955_s22 + $0x1c8] sm:$0xff]  ;;  %v9473_v5 = vld [vmem:[%s11955_s22 + $0x1b0] sm:$0xff] }
0x1c7f   :  { %v7367_v38 = vadd.f32 %v7366_v25, %v7344_v34  ;;  %v7703_v25 = vld [vmem:[%s11955_s22 + $0xe8] sm:$0xff]  ;;  %v7684_v34 = vld [vmem:[%s11955_s22 + $0x50] sm:$0xff] }
0x1c81   :  { %v7297_v51 = vpop.f32.mrf.mxu2  ;;  %v7320_v54 = vpop.f32.mrf.mxu3 }
0x1c82   :  { %v7298_v47 = vadd.f32 %v7297_v51, %v7229_v53  ;;  %v9482_v53 = vld [vmem:[%s11955_s22 + $0x1f8] sm:$0xff]  ;;  %v9461_v51 = vld [vmem:[%s11955_s22 + $0x150] sm:$0xff] }
0x1c84   :  { %v7321_v56 = vadd.f32 %v7320_v54, %v7298_v47  ;;  %v7346_v26 = vpop.f32.mrf.mxu0  ;;  %v7369_v20 = vpop.f32.mrf.mxu1  ;;  %v9480_v54 = vld [vmem:[%s11955_s22 + $0x1e8] sm:$0xff]  ;;  %v7689_v47 = vld [vmem:[%s11955_s22 + $0x78] sm:$0xff] }
0x1c85   :  { %v7347_v23 = vadd.f32 %v7346_v26, %v7278_v33  ;;  %v9456_v26 = vld [vmem:[%s11955_s22 + $0x128] sm:$0xff] }
0x1c86   :  { %v9452_v33 = vld [vmem:[%s11955_s22 + $0x108] sm:$0xff] }
0x1c87   :  { %v7370_v59 = vadd.f32 %v7369_v20, %v7347_v23  ;;  %v7686_v20 = vld [vmem:[%s11955_s22 + $0x60] sm:$0xff]  ;;  %v7700_v23 = vld [vmem:[%s11955_s22 + $0xd0] sm:$0xff] }
0x1c89   :  { %v7300_v57 = vpop.f32.mrf.mxu2  ;;  %v7323_v55 = vpop.f32.mrf.mxu3 }
0x1c8a   :  { %v7301_v60 = vadd.f32 %v7300_v57, %v7232_v50  ;;  %v7601_v50 = vld [vmem:[%s11956_s6 + $0x8] sm:$0xff] }
0x1c8b   :  { %v9460_v57 = vld [vmem:[%s11955_s22 + $0x148] sm:$0xff] }
0x1c8c   :  { %v7324_v2 = vadd.f32 %v7323_v55, %v7301_v60  ;;  %v7688_v55 = vld [vmem:[%s11955_s22 + $0x70] sm:$0xff]  ;;  %v9479_v60 = vld [vmem:[%s11955_s22 + $0x1e0] sm:$0xff] }
0x1c91   :  { %v7397_v3 = vpop.f32.mrf.mxu2  ;;  %v7420_v4 = vpop.f32.mrf.mxu3 }
0x1c92   :  { %7506 = vmatmul.f32.vlgmr.msra.gmra.mxu0 %v7397_v3  ;;  %7529 = vmatmul.f32.vlgmr.msrb.gmra.mxu1 %v7420_v4 }
0x1c93   :  { %7552 = vmatmul.f32.vlgmr.msrb.gmra.mxu2 %v7397_v3  ;;  %7575 = vmatmul.f32.vlgmr.msra.gmra.mxu3 %v7420_v4  ;;  %v9459_v3 = vld [vmem:[%s11955_s22 + $0x140] sm:$0xff]  ;;  %v9478_v4 = vld [vmem:[%s11955_s22 + $0x1d8] sm:$0xff] }
0x1c99   :  { %v7400_v6 = vpop.f32.mrf.mxu2  ;;  %v7423_v40 = vpop.f32.mrf.mxu3 }
0x1c9a   :  { %7509 = vmatmul.f32.gmra.mxu0 %v7400_v6  ;;  %7532 = vmatmul.f32.gmra.mxu1 %v7423_v40 }
0x1c9b   :  { %7555 = vmatmul.f32.gmra.mxu2 %v7400_v6  ;;  %7578 = vmatmul.f32.gmra.mxu3 %v7423_v40  ;;  %v9441_v6 = vld [vmem:[%s11956_s6 + $0x30] sm:$0xff]  ;;  %v9458_v40 = vld [vmem:[%s11955_s22 + $0x138] sm:$0xff] }
0x1d0f   :  { %v7507_v27 = vpop.f32.mrf.mxu0  ;;  %v7530_v11 = vpop.f32.mrf.mxu1 }
0x1d10   :  { %v7531_v28 = vadd.f32 %v7530_v11, %v7507_v27  ;;  %v9475_v27 = vld [vmem:[%s11955_s22 + $0x1c0] sm:$0xff] }
0x1d11   :  { %v7702_v11 = vld [vmem:[%s11955_s22 + $0xe0] sm:$0xff] }
0x1d12   :  { %v7582_v22 = vadd.f32 %v7531_v28, %v7321_v56  ;;  %v7705_v56 = vld [vmem:[%s11955_s22 + $0xf8] sm:$0xff]  ;;  %v9455_v28 = vld [vmem:[%s11955_s22 + $0x120] sm:$0xff] }
0x1d14   :  { %v7592_v31 = vadd.f32 %v7588_v32, %v7582_v22  ;;  %v7685_v22 = vld [vmem:[%s11955_s22 + $0x58] sm:$0xff] }
0x1d16   :  { %v7553_v1 = vpop.f32.mrf.mxu2  ;;  %v7576_v0 = vpop.f32.mrf.mxu3  ;;  %v11732_v58 = vmax.f32 %v7592_v31, 0.0  ;;  %v7683_v31 = vld [vmem:[%s11955_s22 + $0x48] sm:$0xff] }
0x1d17   :  { %v7510_v44 = vpop.f32.mrf.mxu0  ;;  %v7533_v14 = vpop.f32.mrf.mxu1  ;;  %v7577_v35 = vadd.f32 %v7576_v0, %v7553_v1  ;;  %v9442_v1 = vld [vmem:[%s11956_s6 + $0x38] sm:$0xff] }
0x1d18   :  { %v7534_v19 = vadd.f32 %v7533_v14, %v7510_v44  ;;  %v9454_v0 = vld [vmem:[%s11955_s22 + $0x118] sm:$0xff]  ;;  %v9453_v14 = vld [vmem:[%s11955_s22 + $0x110] sm:$0xff] }
0x1d19   :  { %v7583_v43 = vadd.f32 %v7577_v35, %v7367_v38  ;;  %v7603_v44 = vld [vmem:[%s11956_s6 + $0x18] sm:$0xff]  ;;  %v9451_v35 = vld [vmem:[%s11955_s22 + $0x100] sm:$0xff]  ;;  %v9469_v38 = vld [vmem:[%s11955_s22 + $0x190] sm:$0xff] }
0x1d1a   :  { %v7584_v15 = vadd.f32 %v7534_v19, %v7324_v2  ;;  %v7704_v2 = vld [vmem:[%s11955_s22 + $0xf0] sm:$0xff]  ;;  %v9472_v19 = vld [vmem:[%s11955_s22 + $0x1a8] sm:$0xff] }
0x1d1b   :  { %v7593_v12 = vadd.f32 %v7589_v9, %v7583_v43  ;;  %v7681_v43 = vld [vmem:[%s11955_s22 + $0x38] sm:$0xff] }
0x1d1c   :  { %v7594_v36 = vadd.f32 %v7588_v32, %v7584_v15  ;;  %v7701_v32 = vld [vmem:[%s11955_s22 + $0xd8] sm:$0xff]  ;;  %v9471_v15 = vld [vmem:[%s11955_s22 + $0x1a0] sm:$0xff] }
0x1d1d   :  { %v11747_v41 = vmax.f32 %v7593_v12, 0.0  ;;  %v7676_v12 = vld [vmem:[%s11955_s22 + $0x10] sm:$0xff] }
0x1d1e   :  { %v11728_v42 = vmax.f32 %v7594_v36, 0.0  ;;  %v7556_v39 = vpop.f32.mrf.mxu2  ;;  %v7579_v52 = vpop.f32.mrf.mxu3  ;;  %v9470_v36 = vld [vmem:[%s11955_s22 + $0x198] sm:$0xff] }
0x1d1f   :  { %v7580_v8 = vadd.f32 %v7579_v52, %v7556_v39  ;;  %v7682_v39 = vld [vmem:[%s11955_s22 + $0x40] sm:$0xff]  ;;  %v7699_v52 = vld [vmem:[%s11955_s22 + $0xc8] sm:$0xff] }
0x1d20   :  { %7630 = vmatpush.msrb.mxu0 %v11728_v42  ;;  %7736 = vmatpush.msra.mxu2 %v11728_v42 }
0x1d21   :  { %v7585_v63 = vadd.f32 %v7580_v8, %v7370_v59  ;;  %v9468_v59 = vld [vmem:[%s11955_s22 + $0x188] sm:$0xff]  ;;  %v7698_v8 = vld [vmem:[%s11955_s22 + $0xc0] sm:$0xff] }
0x1d22   :  { %7631 = vmatpush.msrb.mxu0 %v11732_v58  ;;  %7737 = vmatpush.msra.mxu2 %v11732_v58 }
0x1d23   :  { %v7595_v10 = vadd.f32 %v7589_v9, %v7585_v63  ;;  %9443 = vmatmul.msk.f32.vlgmr.msra.gmra.mxu2 %vm450_vm1, %v9439_v30  ;;  %9431 = vmatmul.msk.f32.vlgmr.msrb.gmra.mxu0 %vm450_vm1, %v7600_v46  ;;  %v9467_v9 = vld [vmem:[%s11955_s22 + $0x180] sm:$0xff] }
0x1d24   :  { %7812 = vmatpush.msra.mxu0 %v9466_v45  ;;  %7870 = vmatpush.msrb.mxu2 %v7689_v47  ;;  %v7697_v45 = vld [vmem:[%s11955_s22 + $0xb8] sm:$0xff]  ;;  %v7678_v63 = vld [vmem:[%s11955_s22 + $0x20] sm:$0xff] }
0x1d25   :  { %v11742_v16 = vmax.f32 %v7595_v10, 0.0  ;;  %v7694_v10 = vld [vmem:[%s11955_s22 + $0xa0] sm:$0xff] }
0x1d26   :  { %7813 = vmatpush.msra.mxu0 %v9465_v61  ;;  %7871 = vmatpush.msrb.mxu2 %v7688_v55  ;;  %v7677_v61 = vld [vmem:[%s11955_s22 + $0x18] sm:$0xff] }
0x1d27   :  { %7659 = vmatpush.msra.mxu1 %v11742_v16  ;;  %7765 = vmatpush.msrb.mxu3 %v11742_v16 }
0x1d28   :  { %7814 = vmatpush.msra.mxu0 %v9464_v37  ;;  %7872 = vmatpush.msrb.mxu2 %v7687_v62  ;;  %v7675_v37 = vld [vmem:[%s11955_s22 + $0x8] sm:$0xff]  ;;  %v9485_v62 = vld [vmem:[%s11956_s6 + $0x50] sm:$0xff] }
0x1d29   :  { %7660 = vmatpush.msra.mxu1 %v11747_v41  ;;  %7766 = vmatpush.msrb.mxu3 %v11747_v41 }
0x1d2a   :  { %9447 = vmatmul.msk.f32.vlgmr.msrb.gmra.mxu3 %vm450_vm1, %v9439_v30  ;;  %7815 = vmatpush.msra.mxu0 %v9463_v48  ;;  %v7679_v30 = vld [vmem:[%s11955_s22 + $0x28] sm:$0xff]  ;;  %v7674_v48 = vld [vmem:[%s11955_s22] sm:$0xff] }
0x1d2b   :  { %7841 = vmatpush.msrb.mxu1 %v9482_v53  ;;  %9444 = vmatmul.msk.f32.gmra.mxu2 %vm450_vm1, %v9440_v13  ;;  %v7691_v53 = vld [vmem:[%s11955_s22 + $0x88] sm:$0xff] }
0x1d2c   :  { %7816 = vmatpush.msra.mxu0 %v9462_v7  ;;  %9435 = vmatmul.msk.f32.vlgmr.msra.gmra.mxu1 %vm450_vm1, %v7600_v46  ;;  %v7695_v46 = vld [vmem:[%s11955_s22 + $0xa8] sm:$0xff] }
0x1d2d   :  { %7842 = vmatpush.msrb.mxu1 %v9481_v49  ;;  %9432 = vmatmul.msk.f32.gmra.mxu0 %vm450_vm1, %v7601_v50 }
0x1d2e   :  { %7817 = vmatpush.msra.mxu0 %v9461_v51  ;;  %7899 = vmatpush.msra.mxu3 %v7705_v56 }
0x1d2f   :  { %7843 = vmatpush.msrb.mxu1 %v9480_v54  ;;  %7873 = vmatpush.msrb.mxu2 %v7686_v20  ;;  %v9509_v20 = vld [vmem:[%s11955_s22 + $0x270] sm:$0xff] }
0x1d30   :  { %7818 = vmatpush.msra.mxu0 %v9460_v57  ;;  %7900 = vmatpush.msra.mxu3 %v7704_v2 }
0x1d31   :  { %7844 = vmatpush.msrb.mxu1 %v9479_v60  ;;  %7874 = vmatpush.msrb.mxu2 %v7685_v22  ;;  %v9504_v22 = vld [vmem:[%s11955_s22 + $0x248] sm:$0xff] }
0x1d32   :  { %9448 = vmatmul.msk.f32.gmra.mxu3 %vm450_vm1, %v9440_v13  ;;  %7819 = vmatpush.msra.mxu0 %v9459_v3  ;;  %v7690_v13 = vld [vmem:[%s11955_s22 + $0x80] sm:$0xff] }
0x1d33   :  { %7845 = vmatpush.msrb.mxu1 %v9478_v4  ;;  %9445 = vmatmul.msk.f32.gmra.mxu2 %vm450_vm1, %v9441_v6 }
0x1d34   :  { %7820 = vmatpush.msra.mxu0 %v9458_v40  ;;  %9436 = vmatmul.msk.f32.gmra.mxu1 %vm450_vm1, %v7601_v50 }
0x1d35   :  { %7846 = vmatpush.msrb.mxu1 %v9477_v18  ;;  %9433 = vmatmul.msk.f32.gmra.mxu0 %vm450_vm1, %v7602_v21  ;;  %v9483_v18 = vld [vmem:[%s11956_s6 + $0x40] sm:$0xff] }
0x1d36   :  { %7821 = vmatpush.msra.mxu0 %v9457_v24  ;;  %7901 = vmatpush.msra.mxu3 %v7703_v25  ;;  %v9484_v24 = vld [vmem:[%s11956_s6 + $0x48] sm:$0xff]  ;;  %v9510_v25 = vld [vmem:[%s11955_s22 + $0x278] sm:$0xff] }
0x1d37   :  { %7847 = vmatpush.msrb.mxu1 %v9476_v17  ;;  %7875 = vmatpush.msrb.mxu2 %v7684_v34  ;;  %v9486_v17 = vld [vmem:[%s11956_s6 + $0x58] sm:$0xff] }
0x1d38   :  { %7822 = vmatpush.msra.mxu0 %v9456_v26  ;;  %7902 = vmatpush.msra.mxu3 %v7702_v11  ;;  %v9526_v26 = vld [vmem:[%s11955_s22 + $0x2f8] sm:$0xff]  ;;  %v9508_v11 = vld [vmem:[%s11955_s22 + $0x268] sm:$0xff] }
0x1d39   :  { %7848 = vmatpush.msrb.mxu1 %v9475_v27  ;;  %7876 = vmatpush.msrb.mxu2 %v7683_v31  ;;  %v9525_v27 = vld [vmem:[%s11955_s22 + $0x2f0] sm:$0xff]  ;;  %v9502_v34 = vld [vmem:[%s11955_s22 + $0x238] sm:$0xff]  ;;  %v9516_v31 = vld [vmem:[%s11955_s22 + $0x2a8] sm:$0xff] }
0x1d3a   :  { %9449 = vmatmul.msk.f32.gmra.mxu3 %vm450_vm1, %v9441_v6  ;;  %7823 = vmatpush.msra.mxu0 %v9455_v28  ;;  %v9524_v28 = vld [vmem:[%s11955_s22 + $0x2e8] sm:$0xff] }
0x1d3b   :  { %7849 = vmatpush.msrb.mxu1 %v9474_v29  ;;  %9446 = vmatmul.msk.f32.gmra.mxu2 %vm450_vm1, %v9442_v1  ;;  %v9507_v29 = vld [vmem:[%s11955_s22 + $0x260] sm:$0xff] }
0x1d3c   :  { %7824 = vmatpush.msra.mxu0 %v9454_v0  ;;  %9437 = vmatmul.msk.f32.gmra.mxu1 %vm450_vm1, %v7602_v21  ;;  %v9506_v0 = vld [vmem:[%s11955_s22 + $0x258] sm:$0xff] }
0x1d3d   :  { %7850 = vmatpush.msrb.mxu1 %v9473_v5  ;;  %9434 = vmatmul.msk.f32.gmra.mxu0 %vm450_vm1, %v7603_v44  ;;  %v9522_v5 = vld [vmem:[%s11955_s22 + $0x2d8] sm:$0xff] }
0x1d3e   :  { %7825 = vmatpush.msra.mxu0 %v9453_v14  ;;  %7903 = vmatpush.msra.mxu3 %v7701_v32  ;;  %v9521_v14 = vld [vmem:[%s11955_s22 + $0x2d0] sm:$0xff]  ;;  %v9503_v32 = vld [vmem:[%s11955_s22 + $0x240] sm:$0xff] }
0x1d3f   :  { %7851 = vmatpush.msrb.mxu1 %v9472_v19  ;;  %7877 = vmatpush.msrb.mxu2 %v7682_v39  ;;  %v9520_v19 = vld [vmem:[%s11955_s22 + $0x2c8] sm:$0xff]  ;;  %v9515_v39 = vld [vmem:[%s11955_s22 + $0x2a0] sm:$0xff] }
0x1d40   :  { %7826 = vmatpush.msra.mxu0 %v9452_v33  ;;  %7904 = vmatpush.msra.mxu3 %v7700_v23  ;;  %v9519_v33 = vld [vmem:[%s11955_s22 + $0x2c0] sm:$0xff]  ;;  %v9501_v23 = vld [vmem:[%s11955_s22 + $0x230] sm:$0xff] }
0x1d41   :  { %7852 = vmatpush.msrb.mxu1 %v9471_v15  ;;  %7878 = vmatpush.msrb.mxu2 %v7681_v43  ;;  %v9518_v15 = vld [vmem:[%s11955_s22 + $0x2b8] sm:$0xff] }
0x1d42   :  { %9450 = vmatmul.msk.f32.gmra.mxu3 %vm450_vm1, %v9442_v1  ;;  %7827 = vmatpush.msra.mxu0 %v9451_v35  ;;  %v9523_v1 = vld [vmem:[%s11955_s22 + $0x2e0] sm:$0xff]  ;;  %v9517_v35 = vld [vmem:[%s11955_s22 + $0x2b0] sm:$0xff]  ;;  %v9514_v43 = vld [vmem:[%s11955_s22 + $0x298] sm:$0xff] }
0x1d43   :  { %7853 = vmatpush.msrb.mxu1 %v9470_v36  ;;  %7905 = vmatpush.msra.mxu3 %v7699_v52  ;;  %v9500_v36 = vld [vmem:[%s11955_s22 + $0x228] sm:$0xff] }
0x1d44   :  { %7958 = vmatpush.msrb.mxu0 %v11728_v42  ;;  %9438 = vmatmul.msk.f32.gmra.mxu1 %vm450_vm1, %v7603_v44  ;;  %v7680_v42 = vld [vmem:[%s11955_s22 + $0x30] sm:$0xff] }
0x1d45   :  { %7854 = vmatpush.msrb.mxu1 %v9469_v38  ;;  %7906 = vmatpush.msra.mxu3 %v7698_v8  ;;  %v9505_v44 = vld [vmem:[%s11955_s22 + $0x250] sm:$0xff]  ;;  %v9499_v38 = vld [vmem:[%s11955_s22 + $0x220] sm:$0xff] }
0x1d46   :  { %7959 = vmatpush.msrb.mxu0 %v11732_v58  ;;  %7879 = vmatpush.msrb.mxu2 %v7680_v42  ;;  %v7696_v58 = vld [vmem:[%s11955_s22 + $0xb0] sm:$0xff]  ;;  %v9496_v42 = vld [vmem:[%s11955_s22 + $0x208] sm:$0xff] }
0x1d47   :  { %7855 = vmatpush.msrb.mxu1 %v9468_v59  ;;  %7907 = vmatpush.msra.mxu3 %v7697_v45  ;;  %v9498_v59 = vld [vmem:[%s11955_s22 + $0x218] sm:$0xff]  ;;  %v9497_v8 = vld [vmem:[%s11955_s22 + $0x210] sm:$0xff]  ;;  %v9512_v45 = vld [vmem:[%s11955_s22 + $0x288] sm:$0xff] }
0x1d48   :  { %7880 = vmatpush.msrb.mxu2 %v7679_v30 }
0x1d49   :  { %7856 = vmatpush.msrb.mxu1 %v9467_v9  ;;  %7908 = vmatpush.msra.mxu3 %v7696_v58  ;;  %v9513_v9 = vld [vmem:[%s11955_s22 + $0x290] sm:$0xff]  ;;  %v9495_v58 = vld [vmem:[%s11955_s22 + $0x200] sm:$0xff] }
0x1d4a   :  { %7881 = vmatpush.msrb.mxu2 %v7678_v63  ;;  %v9511_v63 = vld [vmem:[%s11955_s22 + $0x280] sm:$0xff] }
0x1d4b   :  { %7987 = vmatpush.msra.mxu1 %v11742_v16  ;;  %7909 = vmatpush.msra.mxu3 %v7695_v46  ;;  %v7693_v16 = vld [vmem:[%s11955_s22 + $0x98] sm:$0xff] }
0x1d4c   :  { %7882 = vmatpush.msrb.mxu2 %v7677_v61 }
0x1d4d   :  { %7988 = vmatpush.msra.mxu1 %v11747_v41  ;;  %7910 = vmatpush.msra.mxu3 %v7694_v10  ;;  %v7692_v41 = vld [vmem:[%s11955_s22 + $0x90] sm:$0xff] }
0x1d4e   :  { %7883 = vmatpush.msrb.mxu2 %v7676_v12 }
0x1d4f   :  { %7911 = vmatpush.msra.mxu3 %v7693_v16 }
0x1d50   :  { %7884 = vmatpush.msrb.mxu2 %v7675_v37 }
0x1d51   :  { %7912 = vmatpush.msra.mxu3 %v7692_v41 }
0x1d52   :  { %7885 = vmatpush.msrb.mxu2 %v7674_v48 }
0x1d53   :  { %7913 = vmatpush.msra.mxu3 %v7691_v53 }
0x1d54   :  { %8034 = vmatpush.msra.mxu2 %v9510_v25 }
0x1d55   :  { %7914 = vmatpush.msra.mxu3 %v7690_v13 }
0x1d56   :  { %8035 = vmatpush.msra.mxu2 %v9509_v20 }
0x1d57   :  { %8063 = vmatpush.msrb.mxu3 %v9526_v26 }
0x1d58   :  { %8036 = vmatpush.msra.mxu2 %v9508_v11 }
0x1d59   :  { %8064 = vmatpush.msrb.mxu3 %v9525_v27 }
0x1d5a   :  { %8037 = vmatpush.msra.mxu2 %v9507_v29 }
0x1d5b   :  { %8065 = vmatpush.msrb.mxu3 %v9524_v28 }
0x1d5c   :  { %8038 = vmatpush.msra.mxu2 %v9506_v0 }
0x1d5d   :  { %8066 = vmatpush.msrb.mxu3 %v9523_v1 }
0x1d5e   :  { %8039 = vmatpush.msra.mxu2 %v9505_v44 }
0x1d5f   :  { %8067 = vmatpush.msrb.mxu3 %v9522_v5 }
0x1d60   :  { %8040 = vmatpush.msra.mxu2 %v9504_v22 }
0x1d61   :  { %8068 = vmatpush.msrb.mxu3 %v9521_v14 }
0x1d62   :  { %8041 = vmatpush.msra.mxu2 %v9503_v32 }
0x1d63   :  { %8069 = vmatpush.msrb.mxu3 %v9520_v19 }
0x1d64   :  { %8042 = vmatpush.msra.mxu2 %v9502_v34 }
0x1d65   :  { %8070 = vmatpush.msrb.mxu3 %v9519_v33 }
0x1d66   :  { %8043 = vmatpush.msra.mxu2 %v9501_v23 }
0x1d67   :  { %8071 = vmatpush.msrb.mxu3 %v9518_v15 }
0x1d68   :  { %8044 = vmatpush.msra.mxu2 %v9500_v36 }
0x1d69   :  { %8072 = vmatpush.msrb.mxu3 %v9517_v35 }
0x1d6a   :  { %8045 = vmatpush.msra.mxu2 %v9499_v38 }
0x1d6b   :  { %8073 = vmatpush.msrb.mxu3 %v9516_v31 }
0x1d6c   :  { %8046 = vmatpush.msra.mxu2 %v9498_v59 }
0x1d6d   :  { %8074 = vmatpush.msrb.mxu3 %v9515_v39 }
0x1d6e   :  { %8047 = vmatpush.msra.mxu2 %v9497_v8 }
0x1d6f   :  { %8075 = vmatpush.msrb.mxu3 %v9514_v43 }
0x1d70   :  { %8048 = vmatpush.msra.mxu2 %v9496_v42 }
0x1d71   :  { %8076 = vmatpush.msrb.mxu3 %v9513_v9 }
0x1d72   :  { %8049 = vmatpush.msra.mxu2 %v9495_v58 }
0x1d73   :  { %8077 = vmatpush.msrb.mxu3 %v9512_v45 }
0x1d75   :  { %8078 = vmatpush.msrb.mxu3 %v9511_v63 }
0x1da0   :  { %v7633_v7 = vpop.f32.mrf.mxu0 }
0x1da1   :  { %7886 = vmatmul.f32.vlgmr.msrb.gmra.mxu2 %v7633_v7 }
0x1da6   :  { %v7739_v49 = vpop.f32.mrf.mxu2 }
0x1da7   :  { %7828 = vmatmul.f32.vlgmr.msra.gmra.mxu0 %v7739_v49 }
0x1da9   :  { %v7662_v50 = vpop.f32.mrf.mxu1 }
0x1daa   :  { %7915 = vmatmul.f32.vlgmr.msra.gmra.mxu3 %v7662_v50  ;;  %v7636_v51 = vpop.f32.mrf.mxu0 }
0x1dab   :  { %7889 = vmatmul.f32.gmra.mxu2 %v7636_v51 }
0x1dad   :  { %v7768_v54 = vpop.f32.mrf.mxu3 }
0x1dae   :  { %7857 = vmatmul.f32.vlgmr.msrb.gmra.mxu1 %v7768_v54  ;;  %v7742_v47 = vpop.f32.mrf.mxu2 }
0x1daf   :  { %7831 = vmatmul.f32.gmra.mxu0 %v7742_v47 }
0x1db1   :  { %v7665_v56 = vpop.f32.mrf.mxu1 }
0x1db2   :  { %7918 = vmatmul.f32.gmra.mxu3 %v7665_v56  ;;  %v7639_v57 = vpop.f32.mrf.mxu0 }
0x1db3   :  { %7892 = vmatmul.f32.gmra.mxu2 %v7639_v57 }
0x1db5   :  { %v7771_v55 = vpop.f32.mrf.mxu3 }
0x1db6   :  { %7860 = vmatmul.f32.gmra.mxu1 %v7771_v55  ;;  %v7745_v60 = vpop.f32.mrf.mxu2 }
0x1db7   :  { %7834 = vmatmul.f32.gmra.mxu0 %v7745_v60 }
0x1db9   :  { %v7668_v2 = vpop.f32.mrf.mxu1 }
0x1dba   :  { %7921 = vmatmul.f32.gmra.mxu3 %v7668_v2  ;;  %v7642_v3 = vpop.f32.mrf.mxu0 }
0x1dbb   :  { %7895 = vmatmul.f32.gmra.mxu2 %v7642_v3 }
0x1dbd   :  { %v7774_v4 = vpop.f32.mrf.mxu3 }
0x1dbe   :  { %7863 = vmatmul.f32.gmra.mxu1 %v7774_v4  ;;  %v7748_v6 = vpop.f32.mrf.mxu2 }
0x1dbf   :  { %7837 = vmatmul.f32.gmra.mxu0 %v7748_v6 }
0x1dc1   :  { %v7671_v40 = vpop.f32.mrf.mxu1 }
0x1dc2   :  { %7924 = vmatmul.f32.gmra.mxu3 %v7671_v40 }
0x1dc5   :  { %v7777_v21 = vpop.f32.mrf.mxu3 }
0x1dc6   :  { %7866 = vmatmul.f32.gmra.mxu1 %v7777_v21 }
0x1dc7   :  { %9487 = vmatmul.msk.f32.vlgmr.msrb.gmra.mxu0 %vm450_vm1, %v9483_v18 }
0x1dce   :  { %9491 = vmatmul.msk.f32.vlgmr.msra.gmra.mxu1 %vm450_vm1, %v9483_v18 }
0x1dcf   :  { %9488 = vmatmul.msk.f32.gmra.mxu0 %vm450_vm1, %v9484_v24 }
0x1dd6   :  { %9492 = vmatmul.msk.f32.gmra.mxu1 %vm450_vm1, %v9484_v24 }
0x1dd7   :  { %9489 = vmatmul.msk.f32.gmra.mxu0 %vm450_vm1, %v9485_v62 }
0x1dde   :  { %9493 = vmatmul.msk.f32.gmra.mxu1 %vm450_vm1, %v9485_v62 }
0x1ddf   :  { %9490 = vmatmul.msk.f32.gmra.mxu0 %vm450_vm1, %v9486_v17 }
0x1de6   :  { %9494 = vmatmul.msk.f32.gmra.mxu1 %vm450_vm1, %v9486_v17 }
0x1e24   :  { %v7829_v52 = vpop.f32.mrf.mxu0 }
0x1e2b   :  { %v7858_v30 = vpop.f32.mrf.mxu1 }
0x1e2c   :  { %v11880_v46 = vadd.f32 %v7858_v30, %v7829_v52  ;;  %v7832_v61 = vpop.f32.mrf.mxu0 }
0x1e33   :  { %v7861_v10 = vpop.f32.mrf.mxu1 }
0x1e34   :  { %v11882_v12 = vadd.f32 %v7861_v10, %v7832_v61  ;;  %v7835_v16 = vpop.f32.mrf.mxu0 }
0x1e3b   :  { %v7864_v37 = vpop.f32.mrf.mxu1 }
0x1e3c   :  { %v11884_v41 = vadd.f32 %v7864_v37, %v7835_v16  ;;  %v7838_v48 = vpop.f32.mrf.mxu0 }
0x1e43   :  { %v7867_v53 = vpop.f32.mrf.mxu1 }
0x1e44   :  { %v11886_v13 = vadd.f32 %v7867_v53, %v7838_v48  ;;  %v7961_v7 = vpop.f32.mrf.mxu0 }
0x1e45   :  { %8050 = vmatmul.f32.vlgmr.msra.gmra.mxu2 %v7961_v7 }
0x1e4b   :  { %v7990_v49 = vpop.f32.mrf.mxu1 }
0x1e4c   :  { %8079 = vmatmul.f32.vlgmr.msrb.gmra.mxu3 %v7990_v49  ;;  %v7964_v50 = vpop.f32.mrf.mxu0 }
0x1e4d   :  { %8053 = vmatmul.f32.gmra.mxu2 %v7964_v50 }
0x1e53   :  { %v7993_v51 = vpop.f32.mrf.mxu1 }
0x1e54   :  { %8082 = vmatmul.f32.gmra.mxu3 %v7993_v51  ;;  %v7967_v54 = vpop.f32.mrf.mxu0 }
0x1e55   :  { %8056 = vmatmul.f32.gmra.mxu2 %v7967_v54 }
0x1e5b   :  { %v7996_v47 = vpop.f32.mrf.mxu1 }
0x1e5c   :  { %8085 = vmatmul.f32.gmra.mxu3 %v7996_v47  ;;  %v7970_v56 = vpop.f32.mrf.mxu0 }
0x1e5d   :  { %8059 = vmatmul.f32.gmra.mxu2 %v7970_v56 }
0x1e63   :  { %v7999_v57 = vpop.f32.mrf.mxu1 }
0x1e64   :  { %8088 = vmatmul.f32.gmra.mxu3 %v7999_v57 }
0x1e65   :  { %9644 = shalt.err (!%p9641_p9)
}
0x1e66   :  { %8148 = dma.vmem_to_hbm [thread:$0]  %s8144_s21, 32, %s8146_s25, [#allocation7]  }
0x1e67   :  { %s9737_s14 = smov [#allocation8]   ;;  %s8156_s24 = sshll.u32 %s9909_s27, 4  ;;  %s8157_s24 = int_to_ptr.hbm [resolvable:$true] %s8156_s24 }
0x1e68   :  { %s8154_s19 = sshll.u32 %s9737_s14, 4  ;;  %s9657_s30 = sshra.s32 %s8157_s24, 4  ;;  %s8155_s19 = int_to_ptr.vmem [resolvable:$true] %s8154_s19  ;;  %s9658_s30 = int_to_ptr.hbm [resolvable:$true] %s9657_s30 }
0x1e69   :  { %s9659_s6 = scalar_lea.hbm %s9658_s30, 2  ;;  %s9661_s12 = scalar_lea.hbm %s9909_s27, 2 }
0x1e6a   :  { %p9660_p10 = scmp.ne.s32.totalorder %s9658_s30, %s9659_s6  ;;  %p9662_p11 = scmp.lt.s32.totalorder %s9658_s30, %s9909_s27 }
0x1e6b   :  { %p9663_p12 = scmp.lt.s32.totalorder %s9661_s12, %s9659_s6 }
0x1e6d   :  { %p9664_p13 = por %p9663_p12, %p9662_p11 }
0x1e6f   :  { %p9665_p0 = pnand %p9664_p13, %p9660_p10 }
0x1e71   :  { %9668 = shalt.err (!%p9665_p0)
}
0x1e72   :  { %8159 = dma.vmem_to_hbm [thread:$0]  %s8155_s19, 32, %s8157_s24, [#allocation7]   ;;  %v7887_v55 = vpop.f32.mrf.mxu2  ;;  %v7916_v60 = vpop.f32.mrf.mxu3  ;;  %v9576_v26 = vld [vmem:[%s9894_s9] ss:$0 sm:$0xff] }
0x1e73   :  { %v7888_v24 = vadd.f32 %v7887_v55, %v11880_v46  ;;  %s11959_s9 = sld [smem:[#allocation27_spill]]  ;;  %s9738_s20 = smov [#allocation5]  }
0x1e74   :  { %s8129_s27 = sshll.u32 %s9738_s20, 4  ;;  %s8130_s27 = int_to_ptr.vmem [resolvable:$true] %s8129_s27 }
0x1e75   :  { %v7917_v17 = vadd.f32 %v7916_v60, %v7888_v24 }
0x1e79   :  { %s8131_s4 = sshll.u32 %s11959_s9, 4  ;;  %s9685_s22 = scalar_lea.hbm %s11959_s9, 64  ;;  %s8132_s4 = int_to_ptr.hbm [resolvable:$true] %s8131_s4 }
0x1e7a   :  { %v7890_v2 = vpop.f32.mrf.mxu2  ;;  %v7919_v3 = vpop.f32.mrf.mxu3  ;;  %s9681_s16 = sshra.s32 %s8132_s4, 4  ;;  %s9682_s16 = int_to_ptr.hbm [resolvable:$true] %s9681_s16 }
0x1e7b   :  { %v7891_v11 = vadd.f32 %v7890_v2, %v11882_v12  ;;  %s9683_s18 = scalar_lea.hbm %s9682_s16, 64  ;;  %p9686_p2 = scmp.lt.s32.totalorder %s9682_s16, %s11959_s9 }
0x1e7c   :  { %p9684_p1 = scmp.ne.s32.totalorder %s9682_s16, %s9683_s18  ;;  %p9687_p3 = scmp.lt.s32.totalorder %s9685_s22, %s9683_s18 }
0x1e7d   :  { %v7920_v0 = vadd.f32 %v7919_v3, %v7891_v11 }
0x1e7e   :  { %p9688_p4 = por %p9687_p3, %p9686_p2 }
0x1e80   :  { %p9689_p5 = pnand %p9688_p4, %p9684_p1 }
0x1e82   :  { %v7893_v4 = vpop.f32.mrf.mxu2  ;;  %v7922_v6 = vpop.f32.mrf.mxu3 }
0x1e83   :  { %v7894_v22 = vadd.f32 %v7893_v4, %v11884_v41 }
0x1e85   :  { %v7923_v23 = vadd.f32 %v7922_v6, %v7894_v22 }
0x1e8a   :  { %v7896_v40 = vpop.f32.mrf.mxu2  ;;  %v7925_v18 = vpop.f32.mrf.mxu3 }
0x1e8b   :  { %v7897_v38 = vadd.f32 %v7896_v40, %v11886_v13 }
0x1e8d   :  { %v7926_v42 = vadd.f32 %v7925_v18, %v7897_v38 }
0x1ec8   :  { %v8051_v21 = vpop.f32.mrf.mxu2 }
0x1ecf   :  { %v8080_v62 = vpop.f32.mrf.mxu3 }
0x1ed0   :  { %v8081_v25 = vadd.f32 %v8080_v62, %v8051_v21  ;;  %v8054_v20 = vpop.f32.mrf.mxu2 }
0x1ed2   :  { %v8092_v27 = vadd.f32 %v8081_v25, %v7917_v17 }
0x1ed4   :  { %v8100_v28 = vadd.f32 %v9576_v26, %v8092_v27 }
0x1ed6   :  { %v8104_v29 = vmul.f32 0.5, %v8100_v28 }
0x1ed7   :  { %v8083_v1 = vpop.f32.mrf.mxu3 }
0x1ed8   :  { %9589 = vtanh.f32 %v8104_v29  ;;  %v8084_v5 = vadd.f32 %v8083_v1, %v8054_v20  ;;  %v8057_v14 = vpop.f32.mrf.mxu2 }
0x1eda   :  { %v8093_v44 = vadd.f32 %v8084_v5, %v7920_v0 }
0x1edc   :  { %v8101_v19 = vadd.f32 %v9576_v26, %v8093_v44 }
0x1ede   :  { %v9590_v32 = vpop.eup %9589  ;;  %v8105_v33 = vmul.f32 0.5, %v8101_v19 }
0x1edf   :  { %v8112_v34 = vadd.f32 1.0, %v9590_v32  ;;  %v8086_v15 = vpop.f32.mrf.mxu3 }
0x1ee0   :  { %9591 = vtanh.f32 %v8105_v33  ;;  %v8087_v35 = vadd.f32 %v8086_v15, %v8057_v14  ;;  %v8060_v52 = vpop.f32.mrf.mxu2 }
0x1ee1   :  { %v8116_v36 = vmul.f32 0.5, %v8112_v34 }
0x1ee2   :  { %v8094_v31 = vadd.f32 %v8087_v35, %v7923_v23 }
0x1ee3   :  { %8121 = vst.msk [vmem:[#allocation5 + $0x20] sm:$0xff] %vm155_vm0, %v8116_v36 }
0x1ee4   :  { %v8102_v39 = vadd.f32 %v9576_v26, %v8094_v31 }
0x1ee6   :  { %v9592_v59 = vpop.eup %9591  ;;  %v8106_v43 = vmul.f32 0.5, %v8102_v39 }
0x1ee7   :  { %v8113_v8 = vadd.f32 1.0, %v9592_v59  ;;  %v8089_v9 = vpop.f32.mrf.mxu3 }
0x1ee8   :  { %9593 = vtanh.f32 %v8106_v43  ;;  %v8090_v45 = vadd.f32 %v8089_v9, %v8060_v52 }
0x1ee9   :  { %v8117_v30 = vmul.f32 0.5, %v8113_v8 }
0x1eea   :  { %v8095_v58 = vadd.f32 %v8090_v45, %v7926_v42 }
0x1eeb   :  { %8122 = vst.msk [vmem:[#allocation5 + $0x28] sm:$0xff] %vm155_vm0, %v8117_v30 }
0x1eec   :  { %v8103_v63 = vadd.f32 %v9576_v26, %v8095_v58 }
0x1eee   :  { %v9594_v46 = vpop.eup %9593  ;;  %v8107_v61 = vmul.f32 0.5, %v8103_v63 }
0x1eef   :  { %v8114_v10 = vadd.f32 1.0, %v9594_v46 }
0x1ef0   :  { %9595 = vtanh.f32 %v8107_v61 }
0x1ef1   :  { %v8118_v12 = vmul.f32 0.5, %v8114_v10 }
0x1ef3   :  { %8123 = vst.msk [vmem:[#allocation5 + $0x30] sm:$0xff] %vm155_vm0, %v8118_v12 }
0x1ef6   :  { %v9596_v16 = vpop.eup %9595 }
0x1ef7   :  { %v8115_v37 = vadd.f32 1.0, %v9596_v16 }
0x1ef9   :  { %v8119_v41 = vmul.f32 0.5, %v8115_v37 }
0x1efb   :  { %8124 = vst.msk [vmem:[#allocation5 + $0x38] sm:$0xff] %vm155_vm0, %v8119_v41 }
0x1efc   :  { %9692 = shalt.err (!%p9689_p5)
}
0x1efd   :  { %s9739_s23 = smov 128   ;;  %s9740_s26 = smov 8  }
0x1efe   :  { %8137 = dma.vmem_to_hbm [thread:$0]  %s8130_s27, 1024, %s8132_s4, [#allocation4], %s9739_s23, %s9739_s23, %s9740_s26  }
0x1eff   :  { %9695 = dma.done.wait [#allocation4], 1024  }
0x1f00   :  { %9696 = vsyncadd [#allocation4], 4294966272 }
0x1f01   :  { %9697 = dma.done.wait [#allocation7], 64  }
0x1f02   :  { %9698 = vsyncadd [#allocation7], 4294967232 }
0x1f03   :  { %8172 = vsyncpa [#allocation3], 1 }
0x1f04   :  { %8173 = vsyncpa [#allocation4], 1 }
0x1f05   :  { %8174 = vsyncpa [#allocation7], 1 }

</bundles_post_ra>
